<compile_context>
chip_gen: v7x
topology: tpu7x:2x2x1
jax: 0.10.0
libtpu: 0.0.40
codegen_flags: <defaults>
</compile_context>

<pallas_src>
import jax
import jax.numpy as jnp
from jax import lax
from jax.experimental import pallas as pl
from jax.experimental.pallas import tpu as pltpu


# -----------------------------------------------------------------------------
# Fused kernel: 3D-conv-as-one-matmul + bias + ReLU + spatial mean-pool
# -----------------------------------------------------------------------------
def _cnn3d_feat_kernel(p_ref, w_ref, b_ref, pool_ref, out_ref):
    # p_ref    : (N*T*H*W, 27*Cin)  im2col 3D patch matrix (built wrapper-side)
    # w_ref    : (27*Cin, feat)     folded 3x3x3 conv weight (DHWIO fold)
    # b_ref    : (1, feat)          conv bias
    # pool_ref : (N*T, N*T*H*W)     constant block-diag 1/(H*W) mean-pool matrix
    # out_ref  : (N*T, feat)        per-(frame, timestep) features ('x')

    # One fat MXU matmul (M=N*T*H*W, K=27*Cin) replaces 27 tiny serial dots.
    acc = jnp.dot(p_ref[...], w_ref[...],
                  preferred_element_type=jnp.float32)           # (M, feat)
    acc = jnp.maximum(acc + b_ref[...], 0.0)                    # bias + ReLU

    # Spatial mean-pool per (frame, t) as a matmul against a constant
    # block-diagonal matrix -> stays 2-D / MXU, no in-kernel reshapes.
    out_ref[...] = jnp.dot(pool_ref[...], acc,
                           preferred_element_type=jnp.float32)  # (N*T, feat)


# -----------------------------------------------------------------------------
# CNN3D.forward (featMap=False) with the stand-in 3D feature extractor
# -----------------------------------------------------------------------------
def cnn3d_forward(x6, conv_w, conv_b):
    """x6: (batchSize, T, seqLen, Cin, H, W) f32 -> features (batchSize*seqLen*T, feat)."""
    B, T, S, Cin, H, W = x6.shape
    feat = conv_w.shape[-1]
    N = B * S                     # frames fed to featMod (batchSize*seqLen)
    HW = H * W
    M = N * T * HW

    # CNN3D permute/reshape: (B,T,S,C,H,W) -> (B,S,C,T,H,W) -> (N,C,T,H,W),
    # then to channels-last (N,T,H,W,C) for im2col.  Pure layout plumbing in
    # plain XLA, outside the kernel.
    x = jnp.transpose(x6, (0, 2, 1, 4, 5, 3)).reshape(N, T, H, W, Cin)

    # 3D im2col for a 3x3x3 'same' conv: 27 shifted views, one dense matrix.
    xp = jnp.pad(x, ((0, 0), (1, 1), (1, 1), (1, 1), (0, 0)))
    taps = [xp[:, kt:kt + T, kh:kh + H, kw:kw + W, :]
            for kt in range(3) for kh in range(3) for kw in range(3)]
    patches = jnp.concatenate(taps, axis=-1).reshape(M, 27 * Cin)

    # Pre-fold weight/bias; constant mean-pool matrix (1/HW block-diagonal).
    wf = conv_w.reshape(27 * Cin, feat)       # (kt,kh,kw,cin) fold == tap order
    bf = conv_b.reshape(1, feat)
    pool = jnp.repeat(jnp.eye(N * T, dtype=jnp.float32), HW, axis=1) / HW

    feats = pl.pallas_call(
        _cnn3d_feat_kernel,
        out_shape=jax.ShapeDtypeStruct((N * T, feat), jnp.float32),
        in_specs=[
            pl.BlockSpec((M, 27 * Cin), lambda: (0, 0)),
            pl.BlockSpec((27 * Cin, feat), lambda: (0, 0)),
            pl.BlockSpec((1, feat), lambda: (0, 0)),
            pl.BlockSpec((N * T, M), lambda: (0, 0)),
        ],
        out_specs=pl.BlockSpec((N * T, feat), lambda: (0, 0)),
        compiler_params=pltpu.CompilerParams(vmem_limit_bytes=32 * 1024 * 1024),
    )(patches, wf, bf, pool)
    return feats


# -----------------------------------------------------------------------------
# Module wrapper mirroring CNN3D (returns {'x': ...})
# -----------------------------------------------------------------------------
class PallasCNN3D:
    def __init__(self, in_channels, feat, key):
        k1, k2 = jax.random.split(key)
        # featMod stand-in params, DHWIO layout.
        # NOTE: pretrained PyTorch Conv3d weights (F, C, kt, kh, kw) would need
        # a transpose to (kt, kh, kw, C, F) before use.
        self.conv_w = jax.random.normal(
            k1, (3, 3, 3, in_channels, feat), jnp.float32) * 0.1
        self.conv_b = jax.random.normal(k2, (feat,), jnp.float32) * 0.1
        self.featMap = False
        self.bigMaps = False
        self._fwd = jax.jit(cnn3d_forward)

    def forward(self, x6):
        self.batchSize = x6.shape[0]
        feats = self._fwd(x6, self.conv_w, self.conv_b)
        return {"x": feats}


# -----------------------------------------------------------------------------
# Pure-JAX reference (independent of the kernel) for a correctness check.
# -----------------------------------------------------------------------------
def _reference(x6, conv_w, conv_b):
    B, T, S, C, H, W = x6.shape
    x = jnp.transpose(x6, (0, 2, 1, 4, 5, 3)).reshape(B * S, T, H, W, C)  # NDHWC
    y = lax.conv_general_dilated(
        x, conv_w, window_strides=(1, 1, 1), padding="SAME",
        dimension_numbers=("NDHWC", "DHWIO", "NDHWC"))
    y = jnp.maximum(y + conv_b, 0.0)
    feats = jnp.mean(y, axis=(2, 3))                    # spatial pool -> (N, T, feat)
    return feats.reshape(B * S * T, -1)


if __name__ == "__main__":
    # Small shapes: 2 videos, 4 clips/video (seqLen), 4 frames/clip (T),
    # 3 channels, 16x16 spatial, 32 features.
    batchSize, T, seqLen, Cin, H, W = 2, 4, 4, 3, 16, 16
    feat = 32

    key = jax.random.PRNGKey(0)
    kx, kp = jax.random.split(key)
    x = jax.random.normal(kx, (batchSize, T, seqLen, Cin, H, W), jnp.float32)

    model = PallasCNN3D(Cin, feat, kp)
    out = model.forward(x)
    jax.block_until_ready(out["x"])

    n_rows = batchSize * seqLen * T
    assert out["x"].shape == (n_rows, feat)

    # Numerical check against the pure-JAX reference of the same forward pass.
    ref = _reference(x, model.conv_w, model.conv_b)
    assert jnp.allclose(out["x"], ref, rtol=1e-3, atol=1e-3)

    print("KERNEL_OK")
</pallas_src>

<mosaic_0001>
module attributes {stable_mosaic.version = 11 : i64} {
  func.func @_cnn3d_feat_kernel(%arg0: memref<8192x81xf32, #tpu.memory_space<vmem>>, %arg1: memref<81x32xf32, #tpu.memory_space<vmem>>, %arg2: memref<1x32xf32, #tpu.memory_space<vmem>>, %arg3: memref<32x8192xf32, #tpu.memory_space<vmem>>, %arg4: memref<32x32xf32, #tpu.memory_space<vmem>>) attributes {dimension_semantics = [], scalar_prefetch = 0 : i64, scratch_operands = 0 : i64, tpu.core_type = #tpu.core_type<tc>} {
    %c0 = arith.constant 0 : index
    %c0_0 = arith.constant 0 : index
    %0 = vector.load %arg0[%c0, %c0_0] : memref<8192x81xf32, #tpu.memory_space<vmem>>, vector<8192x81xf32>
    %c0_1 = arith.constant 0 : index
    %c0_2 = arith.constant 0 : index
    %1 = vector.load %arg1[%c0_1, %c0_2] : memref<81x32xf32, #tpu.memory_space<vmem>>, vector<81x32xf32>
    %cst = arith.constant dense<0.000000e+00> : vector<8192x32xf32>
    %2 = tpu.matmul %0, %1, %cst {dimension_numbers = #tpu.dot_dimension_numbers<[1], [0], [0], [1], [0, 0, 1, 1], [], []>} : vector<8192x81xf32>, vector<81x32xf32>, vector<8192x32xf32> -> vector<8192x32xf32>
    %c0_3 = arith.constant 0 : index
    %c0_4 = arith.constant 0 : index
    %3 = vector.load %arg2[%c0_3, %c0_4] : memref<1x32xf32, #tpu.memory_space<vmem>>, vector<1x32xf32>
    %4 = vector.broadcast %3 : vector<1x32xf32> to vector<8192x32xf32>
    %5 = arith.addf %2, %4 : vector<8192x32xf32>
    %cst_5 = arith.constant 0.000000e+00 : f32
    %6 = vector.broadcast %cst_5 : f32 to vector<8192x32xf32>
    %7 = arith.maximumf %5, %6 : vector<8192x32xf32>
    %c0_6 = arith.constant 0 : index
    %c0_7 = arith.constant 0 : index
    %8 = vector.load %arg3[%c0_6, %c0_7] : memref<32x8192xf32, #tpu.memory_space<vmem>>, vector<32x8192xf32>
    %cst_8 = arith.constant dense<0.000000e+00> : vector<32x32xf32>
    %9 = tpu.matmul %8, %7, %cst_8 {dimension_numbers = #tpu.dot_dimension_numbers<[1], [0], [0], [1], [0, 0, 1, 1], [], []>} : vector<32x8192xf32>, vector<8192x32xf32>, vector<32x32xf32> -> vector<32x32xf32>
    %c0_9 = arith.constant 0 : index
    %c0_10 = arith.constant 0 : index
    %10 = vector.load %arg4[%c0_9, %c0_10] : memref<32x32xf32, #tpu.memory_space<vmem>>, vector<32x32xf32>
    tpu.vector_store %arg4[%c0_9, %c0_10], %9 {strides = array<i32>} : memref<32x32xf32, #tpu.memory_space<vmem>>, vector<32x32xf32>,
    return
  }
}

</mosaic_0001>

<bundles_post_ra>
// kernel: cnn3d_forward.1
= control target key start
LH: loop header
LB: loop body
LE: loop exit
PB: predicated region body
PF: predicated region fallthrough
CT: control target
= control target key end

     0   :  { %9 = vsyncpa [#allocation3], 0  ;;  %s24045_s0 = inlined_call_operand.hbm [shape: f32[8192,81], index: 0, kind: input, shape index: {}]   ;;  %s24046_s1 = inlined_call_operand.vmem [shape: f32[81,32], index: 1, kind: input, shape index: {}]   ;;  %s24047_s2 = inlined_call_operand.hbm [shape: f32[1,32], index: 2, kind: input, shape index: {}]   ;;  %s24048_s3 = inlined_call_operand.vmem [shape: f32[32,8192], index: 3, kind: input, shape index: {}]   ;;  %s24049_s4 = inlined_call_operand.hbm [shape: f32[32,32], index: 4, kind: output, shape index: {}]  }
   0x1   :  { %10 = vsyncpa [#allocation6], 0 }
   0x2   :  { %11 = vsyncpa [#allocation4], 0  ;;  %s19543_s15 = smov [#allocation2]   ;;  %s19471_s19 = scalar_lea.hbm %s24045_s0, 131072 }
   0x3   :  { %s17_s16 = sshll.u32 %s19543_s15, 4  ;;  %p19472_p0 = scmp.ne.s32.totalorder %s24045_s0, %s19471_s19  ;;  %s18_s16 = int_to_ptr.vmem [resolvable:$true] %s17_s16 }
   0x4   :  { %p19475_p1 = scmp.lt.u32.totalorder %s19471_s19, %s24045_s0 }
   0x6   :  { %p19477_p2 = pnand %p19475_p1, %p19472_p0 }
   0x8   :  { %19480 = shalt.err (!%p19477_p2)
}
   0x9   :  { %s19481_s24 = scalar_lea.vmem %s18_s16, 131072  ;;  %p19486_p4 = scmp.lt.s32.totalorder %s18_s16, %s18_s16 }
   0xa   :  { %p19482_p3 = scmp.ne.s32.totalorder %s18_s16, %s19481_s24  ;;  %p19487_p5 = scmp.lt.s32.totalorder %s19481_s24, %s19481_s24 }
   0xc   :  { %p19488_p6 = por %p19487_p5, %p19486_p4 }
   0xe   :  { %p19489_p7 = pnand %p19488_p6, %p19482_p3 }
  0x10   :  { %19492 = shalt.err (!%p19489_p7)
}
  0x11   :  { %s19544_s25 = smov 128   ;;  %s19545_s26 = smov 8  }
  0x12   :  { %23 = dma.hbm_to_vmem [thread:$0]  %s24045_s0, 131072, %s18_s16, [#allocation3], %s19544_s25, %s19544_s25, %s19545_s26  }
  0x13   :  { %s19546_s29 = smov [#allocation5]   ;;  %s19493_s7 = scalar_lea.hbm %s24047_s2, 16 }
  0x14   :  { %s32_s30 = sshll.u32 %s19546_s29, 4  ;;  %p19494_p8 = scmp.ne.s32.totalorder %s24047_s2, %s19493_s7  ;;  %s33_s30 = int_to_ptr.vmem [resolvable:$true] %s32_s30 }
  0x15   :  { %p19497_p9 = scmp.lt.u32.totalorder %s19493_s7, %s24047_s2 }
  0x17   :  { %p19499_p10 = pnand %p19497_p9, %p19494_p8 }
  0x19   :  { %19502 = shalt.err (!%p19499_p10)
}
  0x1a   :  { %s19503_s12 = scalar_lea.vmem %s33_s30, 16  ;;  %s19507_s0 = scalar_lea.vmem %s33_s30, 32 }
  0x1b   :  { %p19504_p11 = scmp.ne.s32.totalorder %s33_s30, %s19503_s12  ;;  %p19508_p12 = scmp.lt.s32.totalorder %s33_s30, %s33_s30 }
  0x1c   :  { %p19509_p13 = scmp.lt.s32.totalorder %s19507_s0, %s19503_s12 }
  0x1e   :  { %p19510_p0 = por %p19509_p13, %p19508_p12 }
  0x20   :  { %p19511_p1 = pnand %p19510_p0, %p19504_p11 }
  0x22   :  { %19514 = shalt.err (!%p19511_p1)
}
  0x23   :  { %35 = dma.hbm_to_vmem [thread:$0]  %s24047_s2, 16, %s33_s30, [#allocation6]  }
  0x24   :  { %19537 = dma.done.wait [#allocation3], 131072  }
  0x25   :  { %19538 = vsyncadd [#allocation3], 4294836224 }
  0x26   :  { %19539 = dma.done.wait [#allocation6], 16  }
  0x27   :  { %19540 = vsyncadd [#allocation6], 4294967280  ;;  %v1068_v0 = vld [vmem:[%s24046_s1] sm:$0xff]  ;;  %v1069_v1 = vld [vmem:[%s24046_s1 + $0x8] sm:$0xff]  ;;  %vm1086_vm0 = vcmask 662528   ;;  %vm4159_vm1 = vcmask 1040384  }
  0x28   :  { %v1070_v2 = vld [vmem:[%s24046_s1 + $0x10] sm:$0xff]  ;;  %v18398_v3 = vpack.c.bf16 %v1069_v1, %v1068_v0  ;;  %v1071_v4 = vld [vmem:[%s24046_s1 + $0x18] sm:$0xff]  ;;  %v1072_v6 = vld [vmem:[%s24046_s1 + $0x20] sm:$0xff]  ;;  %vm13348_vm2 = vcmask 261120  }
  0x29   :  { %v18402_v5 = vpack.c.bf16 %v1071_v4, %v1070_v2  ;;  %v1073_v7 = vld [vmem:[%s24046_s1 + $0x28] sm:$0xff]  ;;  %v44_v8 = vld [vmem:[#allocation2] sm:$0xff]  ;;  %v1074_v11 = vld [vmem:[%s24046_s1 + $0x30] sm:$0xff] }
  0x2a   :  { %18399 = vmatprep.subr.bf16.mxu0 %v18398_v3  ;;  %19442 = vmatprep.subr.bf16.mxu1 %v18398_v3  ;;  %v808_v9 = vld [vmem:[#allocation2 + $0x17e0] sm:$0xff]  ;;  %v18406_v10 = vpack.c.bf16 %v1073_v7, %v1072_v6  ;;  %v1075_v12 = vld [vmem:[%s24046_s1 + $0x38] sm:$0xff]  ;;  %v1077_v15 = vld [vmem:[%s24046_s1 + $0x48] sm:$0xff] }
  0x2b   :  { %18401 = vmatpush3.bf16.msra.mxu0 %v18398_v3  ;;  %19448 = vmatpush3.bf16.msra.mxu1 %v18398_v3  ;;  %v18410_v13 = vpack.c.bf16 %v1075_v12, %v1074_v11  ;;  %v1076_v14 = vld [vmem:[%s24046_s1 + $0x40] sm:$0xff]  ;;  %v1078_v17 = vld [vmem:[%s24046_s1 + $0x50] sm:$0x1]  ;;  %v45_v18 = vld [vmem:[#allocation2 + $0x8] sm:$0xff] }
  0x2c   :  { %18403 = vmatprep.subr.bf16.mxu0 %v18402_v5  ;;  %19443 = vmatprep.subr.bf16.mxu1 %v18402_v5  ;;  %v18414_v16 = vpack.c.bf16 %v1077_v15, %v1076_v14  ;;  %v809_v19 = vld [vmem:[#allocation2 + $0x17e8] sm:$0xff]  ;;  %v46_v20 = vld [vmem:[#allocation2 + $0x10] sm:$0xff]  ;;  %v47_v22 = vld [vmem:[#allocation2 + $0x18] sm:$0xff] }
  0x2d   :  { %16862 = vmatprep.mubr.msk.f32.mxu0 %vm1086_vm0, %v44_v8  ;;  %18008 = vmatprep.mubr.msk.f32.mxu1 %vm1086_vm0, %v808_v9  ;;  %v810_v21 = vld [vmem:[#allocation2 + $0x17f0] sm:$0xff]  ;;  %v811_v23 = vld [vmem:[#allocation2 + $0x17f8] sm:$0xff]  ;;  %v48_v24 = vld [vmem:[#allocation2 + $0x20] sm:$0xff] }
  0x2e   :  { %v812_v25 = vld [vmem:[#allocation2 + $0x1800] sm:$0xff]  ;;  %v49_v26 = vld [vmem:[#allocation2 + $0x28] sm:$0xff]  ;;  %v50_v28 = vld [vmem:[#allocation2 + $0x30] sm:$0xff] }
  0x2f   :  { %18405 = vmatpush3.bf16.msra.mxu0 %v18402_v5  ;;  %19449 = vmatpush3.bf16.msra.mxu1 %v18402_v5  ;;  %v813_v27 = vld [vmem:[#allocation2 + $0x1808] sm:$0xff]  ;;  %v814_v29 = vld [vmem:[#allocation2 + $0x1810] sm:$0xff]  ;;  %v51_v30 = vld [vmem:[#allocation2 + $0x38] sm:$0xff] }
  0x30   :  { %18407 = vmatprep.subr.bf16.mxu0 %v18406_v10  ;;  %19444 = vmatprep.subr.bf16.mxu1 %v18406_v10  ;;  %v815_v31 = vld [vmem:[#allocation2 + $0x1818] sm:$0xff]  ;;  %v52_v32 = vld [vmem:[#allocation2 + $0x40] sm:$0xff]  ;;  %v53_v34 = vld [vmem:[#allocation2 + $0x48] sm:$0xff] }
  0x31   :  { %v816_v33 = vld [vmem:[#allocation2 + $0x1820] sm:$0xff]  ;;  %v817_v35 = vld [vmem:[#allocation2 + $0x1828] sm:$0xff]  ;;  %v54_v36 = vld [vmem:[#allocation2 + $0x50] sm:$0xff] }
  0x32   :  { %v818_v37 = vld [vmem:[#allocation2 + $0x1830] sm:$0xff]  ;;  %v55_v38 = vld [vmem:[#allocation2 + $0x58] sm:$0xff]  ;;  %v56_v40 = vld [vmem:[#allocation2 + $0x60] sm:$0xff] }
  0x33   :  { %18409 = vmatpush3.bf16.msra.mxu0 %v18406_v10  ;;  %19450 = vmatpush3.bf16.msra.mxu1 %v18406_v10  ;;  %v819_v39 = vld [vmem:[#allocation2 + $0x1838] sm:$0xff]  ;;  %v820_v41 = vld [vmem:[#allocation2 + $0x1840] sm:$0xff]  ;;  %v57_v42 = vld [vmem:[#allocation2 + $0x68] sm:$0xff] }
  0x34   :  { %18411 = vmatprep.subr.bf16.mxu0 %v18410_v13  ;;  %19445 = vmatprep.subr.bf16.mxu1 %v18410_v13  ;;  %v821_v43 = vld [vmem:[#allocation2 + $0x1848] sm:$0xff]  ;;  %v58_v44 = vld [vmem:[#allocation2 + $0x70] sm:$0xff]  ;;  %v59_v46 = vld [vmem:[#allocation2 + $0x78] sm:$0xff] }
  0x35   :  { %v822_v45 = vld [vmem:[#allocation2 + $0x1850] sm:$0xff]  ;;  %v823_v47 = vld [vmem:[#allocation2 + $0x1858] sm:$0xff]  ;;  %v60_v48 = vld [vmem:[#allocation2 + $0x80] sm:$0xff] }
  0x36   :  { %v824_v49 = vld [vmem:[#allocation2 + $0x1860] sm:$0xff]  ;;  %v61_v50 = vld [vmem:[#allocation2 + $0x88] sm:$0xff]  ;;  %v62_v52 = vld [vmem:[#allocation2 + $0x90] sm:$0xff] }
  0x37   :  { %18413 = vmatpush3.bf16.msra.mxu0 %v18410_v13  ;;  %19451 = vmatpush3.bf16.msra.mxu1 %v18410_v13  ;;  %v825_v51 = vld [vmem:[#allocation2 + $0x1868] sm:$0xff]  ;;  %v826_v53 = vld [vmem:[#allocation2 + $0x1870] sm:$0xff]  ;;  %v63_v54 = vld [vmem:[#allocation2 + $0x98] sm:$0xff] }
  0x38   :  { %18415 = vmatprep.subr.bf16.mxu0 %v18414_v16  ;;  %19446 = vmatprep.subr.bf16.mxu1 %v18414_v16  ;;  %v827_v55 = vld [vmem:[#allocation2 + $0x1878] sm:$0xff]  ;;  %v64_v56 = vld [vmem:[#allocation2 + $0xa0] sm:$0xff]  ;;  %v65_v58 = vld [vmem:[#allocation2 + $0xa8] sm:$0xff] }
  0x39   :  { %v828_v57 = vld [vmem:[#allocation2 + $0x1880] sm:$0xff]  ;;  %v829_v59 = vld [vmem:[#allocation2 + $0x1888] sm:$0xff]  ;;  %v66_v60 = vld [vmem:[#allocation2 + $0xb0] sm:$0xff] }
  0x3a   :  { %v830_v61 = vld [vmem:[#allocation2 + $0x1890] sm:$0xff]  ;;  %v67_v62 = vld [vmem:[#allocation2 + $0xb8] sm:$0xff]  ;;  %v68_v0 = vld [vmem:[#allocation2 + $0xc0] sm:$0xff] }
  0x3b   :  { %18417 = vmatpush3.bf16.msra.mxu0 %v18414_v16  ;;  %19452 = vmatpush3.bf16.msra.mxu1 %v18414_v16  ;;  %v831_v63 = vld [vmem:[#allocation2 + $0x1898] sm:$0xff]  ;;  %v832_v1 = vld [vmem:[#allocation2 + $0x18a0] sm:$0xff]  ;;  %v69_v2 = vld [vmem:[#allocation2 + $0xc8] sm:$0xff] }
  0x3c   :  { %16860 = vmatprep.subr.msk.mxu0 %vm4159_vm1, %v1078_v17  ;;  %19447 = vmatprep.subr.msk.mxu1 %vm4159_vm1, %v1078_v17  ;;  %v833_v3 = vld [vmem:[#allocation2 + $0x18a8] sm:$0xff]  ;;  %v70_v4 = vld [vmem:[#allocation2 + $0xd0] sm:$0xff]  ;;  %v71_v6 = vld [vmem:[#allocation2 + $0xd8] sm:$0xff] }
  0x3d   :  { %v834_v5 = vld [vmem:[#allocation2 + $0x18b0] sm:$0xff]  ;;  %v835_v7 = vld [vmem:[#allocation2 + $0x18b8] sm:$0xff]  ;;  %v72_v8 = vld [vmem:[#allocation2 + $0xe0] sm:$0xff] }
  0x3e   :  { %v836_v9 = vld [vmem:[#allocation2 + $0x18c0] sm:$0xff]  ;;  %v73_v10 = vld [vmem:[#allocation2 + $0xe8] sm:$0xff]  ;;  %v74_v12 = vld [vmem:[#allocation2 + $0xf0] sm:$0xff] }
  0x3f   :  { %16861 = vmatpush3.msk.msra.mxu0 %vm4159_vm1, %v1078_v17  ;;  %19453 = vmatpush3.msk.msra.mxu1 %vm4159_vm1, %v1078_v17  ;;  %v837_v11 = vld [vmem:[#allocation2 + $0x18c8] sm:$0xff]  ;;  %v838_v13 = vld [vmem:[#allocation2 + $0x18d0] sm:$0xff]  ;;  %v75_v14 = vld [vmem:[#allocation2 + $0xf8] sm:$0xff] }
  0x40   :  { %16863 = vmatmul.mubr.msk.f32.vlgmr.msra.gmra.mrb[0].mxu0 %vm1086_vm0, %v45_v18  ;;  %18009 = vmatmul.mubr.msk.f32.vlgmr.msra.gmra.mrb[0].mxu1 %vm1086_vm0, %v809_v19  ;;  %v839_v15 = vld [vmem:[#allocation2 + $0x18d8] sm:$0xff]  ;;  %v76_v16 = vld [vmem:[#allocation2 + $0x100] sm:$0xff]  ;;  %v77_v18 = vld [vmem:[#allocation2 + $0x108] sm:$0xff] }
  0x41   :  { %16865 = vmatprep.mubr.msk.f32.mxu0 %vm1086_vm0, %v46_v20  ;;  %18011 = vmatprep.mubr.msk.f32.mxu1 %vm1086_vm0, %v810_v21  ;;  %v840_v17 = vld [vmem:[#allocation2 + $0x18e0] sm:$0xff]  ;;  %v841_v19 = vld [vmem:[#allocation2 + $0x18e8] sm:$0xff]  ;;  %v78_v20 = vld [vmem:[#allocation2 + $0x110] sm:$0xff] }
  0x42   :  { %v842_v21 = vld [vmem:[#allocation2 + $0x18f0] sm:$0xff] }
  0x44   :  { %16866 = vmatmul.mubr.msk.f32.gmra.mrb[2].mxu0 %vm1086_vm0, %v47_v22  ;;  %18012 = vmatmul.mubr.msk.f32.gmra.mrb[2].mxu1 %vm1086_vm0, %v811_v23  ;;  %v79_v22 = vld [vmem:[#allocation2 + $0x118] sm:$0xff] }
  0x45   :  { %16868 = vmatprep.mubr.msk.f32.mxu0 %vm1086_vm0, %v48_v24  ;;  %18014 = vmatprep.mubr.msk.f32.mxu1 %vm1086_vm0, %v812_v25  ;;  %v843_v23 = vld [vmem:[#allocation2 + $0x18f8] sm:$0xff]  ;;  %v80_v24 = vld [vmem:[#allocation2 + $0x120] sm:$0xff] }
  0x46   :  { %v844_v25 = vld [vmem:[#allocation2 + $0x1900] sm:$0xff] }
  0x48   :  { %16869 = vmatmul.mubr.msk.f32.gmra.mrb[4].mxu0 %vm1086_vm0, %v49_v26  ;;  %18015 = vmatmul.mubr.msk.f32.gmra.mrb[4].mxu1 %vm1086_vm0, %v813_v27  ;;  %v81_v26 = vld [vmem:[#allocation2 + $0x128] sm:$0xff] }
  0x49   :  { %16871 = vmatprep.mubr.msk.f32.mxu0 %vm1086_vm0, %v50_v28  ;;  %18017 = vmatprep.mubr.msk.f32.mxu1 %vm1086_vm0, %v814_v29  ;;  %v845_v27 = vld [vmem:[#allocation2 + $0x1908] sm:$0xff]  ;;  %v82_v28 = vld [vmem:[#allocation2 + $0x130] sm:$0xff] }
  0x4a   :  { %v846_v29 = vld [vmem:[#allocation2 + $0x1910] sm:$0xff] }
  0x4c   :  { %16872 = vmatmul.mubr.msk.f32.gmra.mrb[6].mxu0 %vm1086_vm0, %v51_v30  ;;  %18018 = vmatmul.mubr.msk.f32.gmra.mrb[6].mxu1 %vm1086_vm0, %v815_v31  ;;  %v83_v30 = vld [vmem:[#allocation2 + $0x138] sm:$0xff] }
  0x4d   :  { %16874 = vmatprep.mubr.msk.f32.mxu0 %vm1086_vm0, %v52_v32  ;;  %18020 = vmatprep.mubr.msk.f32.mxu1 %vm1086_vm0, %v816_v33  ;;  %v847_v31 = vld [vmem:[#allocation2 + $0x1918] sm:$0xff]  ;;  %v84_v32 = vld [vmem:[#allocation2 + $0x140] sm:$0xff] }
  0x4e   :  { %v848_v33 = vld [vmem:[#allocation2 + $0x1920] sm:$0xff] }
  0x50   :  { %16875 = vmatmul.mubr.msk.f32.gmra.mrb[8].mxu0 %vm1086_vm0, %v53_v34  ;;  %18021 = vmatmul.mubr.msk.f32.gmra.mrb[8].mxu1 %vm1086_vm0, %v817_v35  ;;  %v85_v34 = vld [vmem:[#allocation2 + $0x148] sm:$0xff] }
  0x51   :  { %16877 = vmatprep.mubr.msk.f32.mxu0 %vm1086_vm0, %v54_v36  ;;  %18023 = vmatprep.mubr.msk.f32.mxu1 %vm1086_vm0, %v818_v37  ;;  %v849_v35 = vld [vmem:[#allocation2 + $0x1928] sm:$0xff]  ;;  %v86_v36 = vld [vmem:[#allocation2 + $0x150] sm:$0xff] }
  0x52   :  { %v850_v37 = vld [vmem:[#allocation2 + $0x1930] sm:$0xff] }
  0x54   :  { %16878 = vmatmul.mubr.msk.f32.gmra.mrb[10].mxu0 %vm1086_vm0, %v55_v38  ;;  %18024 = vmatmul.mubr.msk.f32.gmra.mrb[10].mxu1 %vm1086_vm0, %v819_v39  ;;  %v87_v38 = vld [vmem:[#allocation2 + $0x158] sm:$0xff] }
  0x55   :  { %16880 = vmatprep.mubr.msk.f32.mxu0 %vm1086_vm0, %v56_v40  ;;  %18026 = vmatprep.mubr.msk.f32.mxu1 %vm1086_vm0, %v820_v41  ;;  %v851_v39 = vld [vmem:[#allocation2 + $0x1938] sm:$0xff]  ;;  %v88_v40 = vld [vmem:[#allocation2 + $0x160] sm:$0xff] }
  0x56   :  { %v852_v41 = vld [vmem:[#allocation2 + $0x1940] sm:$0xff] }
  0x58   :  { %16881 = vmatmul.mubr.msk.f32.gmra.mrb[12].mxu0 %vm1086_vm0, %v57_v42  ;;  %18027 = vmatmul.mubr.msk.f32.gmra.mrb[12].mxu1 %vm1086_vm0, %v821_v43  ;;  %v89_v42 = vld [vmem:[#allocation2 + $0x168] sm:$0xff] }
  0x59   :  { %16883 = vmatprep.mubr.msk.f32.mxu0 %vm1086_vm0, %v58_v44  ;;  %18029 = vmatprep.mubr.msk.f32.mxu1 %vm1086_vm0, %v822_v45  ;;  %v853_v43 = vld [vmem:[#allocation2 + $0x1948] sm:$0xff]  ;;  %v90_v44 = vld [vmem:[#allocation2 + $0x170] sm:$0xff] }
  0x5a   :  { %v854_v45 = vld [vmem:[#allocation2 + $0x1950] sm:$0xff] }
  0x5c   :  { %16884 = vmatmul.mubr.msk.f32.gmra.mrb[14].mxu0 %vm1086_vm0, %v59_v46  ;;  %18030 = vmatmul.mubr.msk.f32.gmra.mrb[14].mxu1 %vm1086_vm0, %v823_v47  ;;  %v91_v46 = vld [vmem:[#allocation2 + $0x178] sm:$0xff] }
  0x5d   :  { %16886 = vmatprep.mubr.msk.f32.mxu0 %vm1086_vm0, %v60_v48  ;;  %18032 = vmatprep.mubr.msk.f32.mxu1 %vm1086_vm0, %v824_v49  ;;  %v855_v47 = vld [vmem:[#allocation2 + $0x1958] sm:$0xff]  ;;  %v92_v48 = vld [vmem:[#allocation2 + $0x180] sm:$0xff] }
  0x5e   :  { %v856_v49 = vld [vmem:[#allocation2 + $0x1960] sm:$0xff] }
  0x60   :  { %16887 = vmatmul.mubr.msk.f32.gmra.mrb[16].mxu0 %vm1086_vm0, %v61_v50  ;;  %18033 = vmatmul.mubr.msk.f32.gmra.mrb[16].mxu1 %vm1086_vm0, %v825_v51  ;;  %v93_v50 = vld [vmem:[#allocation2 + $0x188] sm:$0xff] }
  0x61   :  { %16889 = vmatprep.mubr.msk.f32.mxu0 %vm1086_vm0, %v62_v52  ;;  %18035 = vmatprep.mubr.msk.f32.mxu1 %vm1086_vm0, %v826_v53  ;;  %v857_v51 = vld [vmem:[#allocation2 + $0x1968] sm:$0xff]  ;;  %v94_v52 = vld [vmem:[#allocation2 + $0x190] sm:$0xff] }
  0x62   :  { %v858_v53 = vld [vmem:[#allocation2 + $0x1970] sm:$0xff] }
  0x64   :  { %16890 = vmatmul.mubr.msk.f32.gmra.mrb[18].mxu0 %vm1086_vm0, %v63_v54  ;;  %18036 = vmatmul.mubr.msk.f32.gmra.mrb[18].mxu1 %vm1086_vm0, %v827_v55  ;;  %v95_v54 = vld [vmem:[#allocation2 + $0x198] sm:$0xff] }
  0x65   :  { %16892 = vmatprep.mubr.msk.f32.mxu0 %vm1086_vm0, %v64_v56  ;;  %18038 = vmatprep.mubr.msk.f32.mxu1 %vm1086_vm0, %v828_v57  ;;  %v859_v55 = vld [vmem:[#allocation2 + $0x1978] sm:$0xff]  ;;  %v96_v56 = vld [vmem:[#allocation2 + $0x1a0] sm:$0xff] }
  0x66   :  { %v860_v57 = vld [vmem:[#allocation2 + $0x1980] sm:$0xff] }
  0x68   :  { %16893 = vmatmul.mubr.msk.f32.gmra.mrb[20].mxu0 %vm1086_vm0, %v65_v58  ;;  %18039 = vmatmul.mubr.msk.f32.gmra.mrb[20].mxu1 %vm1086_vm0, %v829_v59  ;;  %v97_v58 = vld [vmem:[#allocation2 + $0x1a8] sm:$0xff] }
  0x69   :  { %16895 = vmatprep.mubr.msk.f32.mxu0 %vm1086_vm0, %v66_v60  ;;  %18041 = vmatprep.mubr.msk.f32.mxu1 %vm1086_vm0, %v830_v61  ;;  %v861_v59 = vld [vmem:[#allocation2 + $0x1988] sm:$0xff]  ;;  %v98_v60 = vld [vmem:[#allocation2 + $0x1b0] sm:$0xff] }
  0x6a   :  { %v862_v61 = vld [vmem:[#allocation2 + $0x1990] sm:$0xff] }
  0x6c   :  { %16896 = vmatmul.mubr.msk.f32.gmra.mrb[22].mxu0 %vm1086_vm0, %v67_v62  ;;  %18042 = vmatmul.mubr.msk.f32.gmra.mrb[22].mxu1 %vm1086_vm0, %v831_v63  ;;  %v99_v62 = vld [vmem:[#allocation2 + $0x1b8] sm:$0xff] }
  0x6d   :  { %16898 = vmatprep.mubr.msk.f32.mxu0 %vm1086_vm0, %v68_v0  ;;  %18044 = vmatprep.mubr.msk.f32.mxu1 %vm1086_vm0, %v832_v1  ;;  %v863_v63 = vld [vmem:[#allocation2 + $0x1998] sm:$0xff]  ;;  %v100_v0 = vld [vmem:[#allocation2 + $0x1c0] sm:$0xff] }
  0x6e   :  { %v864_v1 = vld [vmem:[#allocation2 + $0x19a0] sm:$0xff] }
  0x70   :  { %16899 = vmatmul.mubr.msk.f32.gmra.mrb[24].mxu0 %vm1086_vm0, %v69_v2  ;;  %18045 = vmatmul.mubr.msk.f32.gmra.mrb[24].mxu1 %vm1086_vm0, %v833_v3  ;;  %v101_v2 = vld [vmem:[#allocation2 + $0x1c8] sm:$0xff] }
  0x71   :  { %16901 = vmatprep.mubr.msk.f32.mxu0 %vm1086_vm0, %v70_v4  ;;  %18047 = vmatprep.mubr.msk.f32.mxu1 %vm1086_vm0, %v834_v5  ;;  %v865_v3 = vld [vmem:[#allocation2 + $0x19a8] sm:$0xff]  ;;  %v102_v4 = vld [vmem:[#allocation2 + $0x1d0] sm:$0xff] }
  0x72   :  { %v866_v5 = vld [vmem:[#allocation2 + $0x19b0] sm:$0xff] }
  0x74   :  { %16902 = vmatmul.mubr.msk.f32.gmra.mrb[26].mxu0 %vm1086_vm0, %v71_v6  ;;  %18048 = vmatmul.mubr.msk.f32.gmra.mrb[26].mxu1 %vm1086_vm0, %v835_v7  ;;  %v103_v6 = vld [vmem:[#allocation2 + $0x1d8] sm:$0xff] }
  0x75   :  { %16904 = vmatprep.mubr.msk.f32.mxu0 %vm1086_vm0, %v72_v8  ;;  %18050 = vmatprep.mubr.msk.f32.mxu1 %vm1086_vm0, %v836_v9  ;;  %v867_v7 = vld [vmem:[#allocation2 + $0x19b8] sm:$0xff]  ;;  %v104_v8 = vld [vmem:[#allocation2 + $0x1e0] sm:$0xff] }
  0x76   :  { %v868_v9 = vld [vmem:[#allocation2 + $0x19c0] sm:$0xff] }
  0x78   :  { %16905 = vmatmul.mubr.msk.f32.gmra.mrb[28].mxu0 %vm1086_vm0, %v73_v10  ;;  %18051 = vmatmul.mubr.msk.f32.gmra.mrb[28].mxu1 %vm1086_vm0, %v837_v11  ;;  %v105_v10 = vld [vmem:[#allocation2 + $0x1e8] sm:$0xff] }
  0x79   :  { %16907 = vmatprep.mubr.msk.f32.mxu0 %vm1086_vm0, %v74_v12  ;;  %18053 = vmatprep.mubr.msk.f32.mxu1 %vm1086_vm0, %v838_v13  ;;  %v869_v11 = vld [vmem:[#allocation2 + $0x19c8] sm:$0xff]  ;;  %v106_v12 = vld [vmem:[#allocation2 + $0x1f0] sm:$0xff] }
  0x7a   :  { %v870_v13 = vld [vmem:[#allocation2 + $0x19d0] sm:$0xff] }
  0x7c   :  { %16908 = vmatmul.mubr.msk.f32.gmra.mrb[30].mxu0 %vm1086_vm0, %v75_v14  ;;  %18054 = vmatmul.mubr.msk.f32.gmra.mrb[30].mxu1 %vm1086_vm0, %v839_v15  ;;  %v107_v14 = vld [vmem:[#allocation2 + $0x1f8] sm:$0xff] }
  0x7d   :  { %16910 = vmatprep.mubr.msk.f32.mxu0 %vm1086_vm0, %v76_v16  ;;  %18056 = vmatprep.mubr.msk.f32.mxu1 %vm1086_vm0, %v840_v17  ;;  %v871_v15 = vld [vmem:[#allocation2 + $0x19d8] sm:$0xff]  ;;  %v108_v16 = vld [vmem:[#allocation2 + $0x200] sm:$0xff] }
  0x7e   :  { %v872_v17 = vld [vmem:[#allocation2 + $0x19e0] sm:$0xff] }
  0x80   :  { %16911 = vmatmul.mubr.msk.f32.gmra.mrb[32].mxu0 %vm1086_vm0, %v77_v18  ;;  %18057 = vmatmul.mubr.msk.f32.gmra.mrb[32].mxu1 %vm1086_vm0, %v841_v19  ;;  %v109_v18 = vld [vmem:[#allocation2 + $0x208] sm:$0xff] }
  0x81   :  { %16913 = vmatprep.mubr.msk.f32.mxu0 %vm1086_vm0, %v78_v20  ;;  %18059 = vmatprep.mubr.msk.f32.mxu1 %vm1086_vm0, %v842_v21  ;;  %v873_v19 = vld [vmem:[#allocation2 + $0x19e8] sm:$0xff]  ;;  %v110_v20 = vld [vmem:[#allocation2 + $0x210] sm:$0xff] }
  0x82   :  { %v874_v21 = vld [vmem:[#allocation2 + $0x19f0] sm:$0xff] }
  0x84   :  { %16914 = vmatmul.mubr.msk.f32.gmra.mrb[34].mxu0 %vm1086_vm0, %v79_v22  ;;  %18060 = vmatmul.mubr.msk.f32.gmra.mrb[34].mxu1 %vm1086_vm0, %v843_v23  ;;  %v111_v22 = vld [vmem:[#allocation2 + $0x218] sm:$0xff] }
  0x85   :  { %16916 = vmatprep.mubr.msk.f32.mxu0 %vm1086_vm0, %v80_v24  ;;  %18062 = vmatprep.mubr.msk.f32.mxu1 %vm1086_vm0, %v844_v25  ;;  %v875_v23 = vld [vmem:[#allocation2 + $0x19f8] sm:$0xff]  ;;  %v112_v24 = vld [vmem:[#allocation2 + $0x220] sm:$0xff] }
  0x86   :  { %v876_v25 = vld [vmem:[#allocation2 + $0x1a00] sm:$0xff] }
  0x88   :  { %16917 = vmatmul.mubr.msk.f32.gmra.mrb[36].mxu0 %vm1086_vm0, %v81_v26  ;;  %18063 = vmatmul.mubr.msk.f32.gmra.mrb[36].mxu1 %vm1086_vm0, %v845_v27  ;;  %v113_v26 = vld [vmem:[#allocation2 + $0x228] sm:$0xff] }
  0x89   :  { %16919 = vmatprep.mubr.msk.f32.mxu0 %vm1086_vm0, %v82_v28  ;;  %18065 = vmatprep.mubr.msk.f32.mxu1 %vm1086_vm0, %v846_v29  ;;  %v877_v27 = vld [vmem:[#allocation2 + $0x1a08] sm:$0xff]  ;;  %v114_v28 = vld [vmem:[#allocation2 + $0x230] sm:$0xff] }
  0x8a   :  { %v878_v29 = vld [vmem:[#allocation2 + $0x1a10] sm:$0xff] }
  0x8c   :  { %16920 = vmatmul.mubr.msk.f32.gmra.mrb[38].mxu0 %vm1086_vm0, %v83_v30  ;;  %18066 = vmatmul.mubr.msk.f32.gmra.mrb[38].mxu1 %vm1086_vm0, %v847_v31  ;;  %v115_v30 = vld [vmem:[#allocation2 + $0x238] sm:$0xff] }
  0x8d   :  { %16922 = vmatprep.mubr.msk.f32.mxu0 %vm1086_vm0, %v84_v32  ;;  %18068 = vmatprep.mubr.msk.f32.mxu1 %vm1086_vm0, %v848_v33  ;;  %v879_v31 = vld [vmem:[#allocation2 + $0x1a18] sm:$0xff]  ;;  %v116_v32 = vld [vmem:[#allocation2 + $0x240] sm:$0xff] }
  0x8e   :  { %v880_v33 = vld [vmem:[#allocation2 + $0x1a20] sm:$0xff] }
  0x90   :  { %16923 = vmatmul.mubr.msk.f32.gmra.mrb[40].mxu0 %vm1086_vm0, %v85_v34  ;;  %18069 = vmatmul.mubr.msk.f32.gmra.mrb[40].mxu1 %vm1086_vm0, %v849_v35  ;;  %v117_v34 = vld [vmem:[#allocation2 + $0x248] sm:$0xff] }
  0x91   :  { %16925 = vmatprep.mubr.msk.f32.mxu0 %vm1086_vm0, %v86_v36  ;;  %18071 = vmatprep.mubr.msk.f32.mxu1 %vm1086_vm0, %v850_v37  ;;  %v881_v35 = vld [vmem:[#allocation2 + $0x1a28] sm:$0xff]  ;;  %v118_v36 = vld [vmem:[#allocation2 + $0x250] sm:$0xff] }
  0x92   :  { %v882_v37 = vld [vmem:[#allocation2 + $0x1a30] sm:$0xff] }
  0x94   :  { %16926 = vmatmul.mubr.msk.f32.gmra.mrb[42].mxu0 %vm1086_vm0, %v87_v38  ;;  %18072 = vmatmul.mubr.msk.f32.gmra.mrb[42].mxu1 %vm1086_vm0, %v851_v39  ;;  %v119_v38 = vld [vmem:[#allocation2 + $0x258] sm:$0xff] }
  0x95   :  { %16928 = vmatprep.mubr.msk.f32.mxu0 %vm1086_vm0, %v88_v40  ;;  %18074 = vmatprep.mubr.msk.f32.mxu1 %vm1086_vm0, %v852_v41  ;;  %v883_v39 = vld [vmem:[#allocation2 + $0x1a38] sm:$0xff]  ;;  %v120_v40 = vld [vmem:[#allocation2 + $0x260] sm:$0xff] }
  0x96   :  { %v884_v41 = vld [vmem:[#allocation2 + $0x1a40] sm:$0xff] }
  0x98   :  { %16929 = vmatmul.mubr.msk.f32.gmra.mrb[44].mxu0 %vm1086_vm0, %v89_v42  ;;  %18075 = vmatmul.mubr.msk.f32.gmra.mrb[44].mxu1 %vm1086_vm0, %v853_v43  ;;  %v121_v42 = vld [vmem:[#allocation2 + $0x268] sm:$0xff] }
  0x99   :  { %16931 = vmatprep.mubr.msk.f32.mxu0 %vm1086_vm0, %v90_v44  ;;  %18077 = vmatprep.mubr.msk.f32.mxu1 %vm1086_vm0, %v854_v45  ;;  %v885_v43 = vld [vmem:[#allocation2 + $0x1a48] sm:$0xff]  ;;  %v122_v44 = vld [vmem:[#allocation2 + $0x270] sm:$0xff] }
  0x9a   :  { %v886_v45 = vld [vmem:[#allocation2 + $0x1a50] sm:$0xff] }
  0x9c   :  { %16932 = vmatmul.mubr.msk.f32.gmra.mrb[46].mxu0 %vm1086_vm0, %v91_v46  ;;  %18078 = vmatmul.mubr.msk.f32.gmra.mrb[46].mxu1 %vm1086_vm0, %v855_v47  ;;  %v123_v46 = vld [vmem:[#allocation2 + $0x278] sm:$0xff] }
  0x9d   :  { %16934 = vmatprep.mubr.msk.f32.mxu0 %vm1086_vm0, %v92_v48  ;;  %18080 = vmatprep.mubr.msk.f32.mxu1 %vm1086_vm0, %v856_v49  ;;  %v887_v47 = vld [vmem:[#allocation2 + $0x1a58] sm:$0xff]  ;;  %v124_v48 = vld [vmem:[#allocation2 + $0x280] sm:$0xff] }
  0x9e   :  { %v888_v49 = vld [vmem:[#allocation2 + $0x1a60] sm:$0xff] }
  0xa0   :  { %16935 = vmatmul.mubr.msk.f32.gmra.mrb[48].mxu0 %vm1086_vm0, %v93_v50  ;;  %18081 = vmatmul.mubr.msk.f32.gmra.mrb[48].mxu1 %vm1086_vm0, %v857_v51  ;;  %v125_v50 = vld [vmem:[#allocation2 + $0x288] sm:$0xff] }
  0xa1   :  { %16937 = vmatprep.mubr.msk.f32.mxu0 %vm1086_vm0, %v94_v52  ;;  %18083 = vmatprep.mubr.msk.f32.mxu1 %vm1086_vm0, %v858_v53  ;;  %v889_v51 = vld [vmem:[#allocation2 + $0x1a68] sm:$0xff]  ;;  %v126_v52 = vld [vmem:[#allocation2 + $0x290] sm:$0xff] }
  0xa2   :  { %v890_v53 = vld [vmem:[#allocation2 + $0x1a70] sm:$0xff] }
  0xa4   :  { %16938 = vmatmul.mubr.msk.f32.gmra.mrb[50].mxu0 %vm1086_vm0, %v95_v54  ;;  %18084 = vmatmul.mubr.msk.f32.gmra.mrb[50].mxu1 %vm1086_vm0, %v859_v55  ;;  %v127_v54 = vld [vmem:[#allocation2 + $0x298] sm:$0xff] }
  0xa5   :  { %16940 = vmatprep.mubr.msk.f32.mxu0 %vm1086_vm0, %v96_v56  ;;  %18086 = vmatprep.mubr.msk.f32.mxu1 %vm1086_vm0, %v860_v57  ;;  %v891_v55 = vld [vmem:[#allocation2 + $0x1a78] sm:$0xff]  ;;  %v128_v56 = vld [vmem:[#allocation2 + $0x2a0] sm:$0xff] }
  0xa6   :  { %v892_v57 = vld [vmem:[#allocation2 + $0x1a80] sm:$0xff] }
  0xa8   :  { %16941 = vmatmul.mubr.msk.f32.gmra.mrb[52].mxu0 %vm1086_vm0, %v97_v58  ;;  %18087 = vmatmul.mubr.msk.f32.gmra.mrb[52].mxu1 %vm1086_vm0, %v861_v59  ;;  %v129_v58 = vld [vmem:[#allocation2 + $0x2a8] sm:$0xff] }
  0xa9   :  { %16943 = vmatprep.mubr.msk.f32.mxu0 %vm1086_vm0, %v98_v60  ;;  %18089 = vmatprep.mubr.msk.f32.mxu1 %vm1086_vm0, %v862_v61  ;;  %v893_v59 = vld [vmem:[#allocation2 + $0x1a88] sm:$0xff]  ;;  %v130_v60 = vld [vmem:[#allocation2 + $0x2b0] sm:$0xff] }
  0xaa   :  { %v894_v61 = vld [vmem:[#allocation2 + $0x1a90] sm:$0xff] }
  0xac   :  { %16944 = vmatmul.mubr.msk.f32.gmra.mrb[54].mxu0 %vm1086_vm0, %v99_v62  ;;  %18090 = vmatmul.mubr.msk.f32.gmra.mrb[54].mxu1 %vm1086_vm0, %v863_v63  ;;  %v131_v62 = vld [vmem:[#allocation2 + $0x2b8] sm:$0xff] }
  0xad   :  { %16946 = vmatprep.mubr.msk.f32.mxu0 %vm1086_vm0, %v100_v0  ;;  %18092 = vmatprep.mubr.msk.f32.mxu1 %vm1086_vm0, %v864_v1  ;;  %v895_v63 = vld [vmem:[#allocation2 + $0x1a98] sm:$0xff]  ;;  %v132_v0 = vld [vmem:[#allocation2 + $0x2c0] sm:$0xff] }
  0xae   :  { %v896_v1 = vld [vmem:[#allocation2 + $0x1aa0] sm:$0xff] }
  0xb0   :  { %16947 = vmatmul.mubr.msk.f32.gmra.mrb[56].mxu0 %vm1086_vm0, %v101_v2  ;;  %18093 = vmatmul.mubr.msk.f32.gmra.mrb[56].mxu1 %vm1086_vm0, %v865_v3  ;;  %v133_v2 = vld [vmem:[#allocation2 + $0x2c8] sm:$0xff] }
  0xb1   :  { %16949 = vmatprep.mubr.msk.f32.mxu0 %vm1086_vm0, %v102_v4  ;;  %18095 = vmatprep.mubr.msk.f32.mxu1 %vm1086_vm0, %v866_v5  ;;  %v897_v3 = vld [vmem:[#allocation2 + $0x1aa8] sm:$0xff]  ;;  %v134_v4 = vld [vmem:[#allocation2 + $0x2d0] sm:$0xff] }
  0xb2   :  { %v898_v5 = vld [vmem:[#allocation2 + $0x1ab0] sm:$0xff] }
  0xb4   :  { %16950 = vmatmul.mubr.msk.f32.gmra.mrb[58].mxu0 %vm1086_vm0, %v103_v6  ;;  %18096 = vmatmul.mubr.msk.f32.gmra.mrb[58].mxu1 %vm1086_vm0, %v867_v7  ;;  %v135_v6 = vld [vmem:[#allocation2 + $0x2d8] sm:$0xff] }
  0xb5   :  { %16952 = vmatprep.mubr.msk.f32.mxu0 %vm1086_vm0, %v104_v8  ;;  %18098 = vmatprep.mubr.msk.f32.mxu1 %vm1086_vm0, %v868_v9  ;;  %v899_v7 = vld [vmem:[#allocation2 + $0x1ab8] sm:$0xff]  ;;  %v136_v8 = vld [vmem:[#allocation2 + $0x2e0] sm:$0xff] }
  0xb6   :  { %v900_v9 = vld [vmem:[#allocation2 + $0x1ac0] sm:$0xff] }
  0xb8   :  { %16953 = vmatmul.mubr.msk.f32.gmra.mrb[60].mxu0 %vm1086_vm0, %v105_v10  ;;  %18099 = vmatmul.mubr.msk.f32.gmra.mrb[60].mxu1 %vm1086_vm0, %v869_v11  ;;  %v137_v10 = vld [vmem:[#allocation2 + $0x2e8] sm:$0xff] }
  0xb9   :  { %16955 = vmatprep.mubr.msk.f32.mxu0 %vm1086_vm0, %v106_v12  ;;  %18101 = vmatprep.mubr.msk.f32.mxu1 %vm1086_vm0, %v870_v13  ;;  %v901_v11 = vld [vmem:[#allocation2 + $0x1ac8] sm:$0xff]  ;;  %v138_v12 = vld [vmem:[#allocation2 + $0x2f0] sm:$0xff] }
  0xba   :  { %v902_v13 = vld [vmem:[#allocation2 + $0x1ad0] sm:$0xff] }
  0xbc   :  { %16956 = vmatmul.mubr.msk.f32.gmra.mrb[62].mxu0 %vm1086_vm0, %v107_v14  ;;  %18102 = vmatmul.mubr.msk.f32.gmra.mrb[62].mxu1 %vm1086_vm0, %v871_v15  ;;  %v139_v14 = vld [vmem:[#allocation2 + $0x2f8] sm:$0xff] }
  0xbd   :  { %16958 = vmatprep.mubr.msk.f32.mxu0 %vm1086_vm0, %v108_v16  ;;  %18104 = vmatprep.mubr.msk.f32.mxu1 %vm1086_vm0, %v872_v17  ;;  %v903_v15 = vld [vmem:[#allocation2 + $0x1ad8] sm:$0xff]  ;;  %v140_v16 = vld [vmem:[#allocation2 + $0x300] sm:$0xff] }
  0xbe   :  { %v904_v17 = vld [vmem:[#allocation2 + $0x1ae0] sm:$0xff] }
  0xc0   :  { %16959 = vmatmul.mubr.msk.f32.gmra.mrb[64].mxu0 %vm1086_vm0, %v109_v18  ;;  %18105 = vmatmul.mubr.msk.f32.gmra.mrb[64].mxu1 %vm1086_vm0, %v873_v19  ;;  %v141_v18 = vld [vmem:[#allocation2 + $0x308] sm:$0xff] }
  0xc1   :  { %16961 = vmatprep.mubr.msk.f32.mxu0 %vm1086_vm0, %v110_v20  ;;  %18107 = vmatprep.mubr.msk.f32.mxu1 %vm1086_vm0, %v874_v21  ;;  %v905_v19 = vld [vmem:[#allocation2 + $0x1ae8] sm:$0xff]  ;;  %v142_v20 = vld [vmem:[#allocation2 + $0x310] sm:$0xff] }
  0xc2   :  { %v906_v21 = vld [vmem:[#allocation2 + $0x1af0] sm:$0xff] }
  0xc4   :  { %16962 = vmatmul.mubr.msk.f32.gmra.mrb[66].mxu0 %vm1086_vm0, %v111_v22  ;;  %18108 = vmatmul.mubr.msk.f32.gmra.mrb[66].mxu1 %vm1086_vm0, %v875_v23  ;;  %v143_v22 = vld [vmem:[#allocation2 + $0x318] sm:$0xff] }
  0xc5   :  { %16964 = vmatprep.mubr.msk.f32.mxu0 %vm1086_vm0, %v112_v24  ;;  %18110 = vmatprep.mubr.msk.f32.mxu1 %vm1086_vm0, %v876_v25  ;;  %v907_v23 = vld [vmem:[#allocation2 + $0x1af8] sm:$0xff]  ;;  %v144_v24 = vld [vmem:[#allocation2 + $0x320] sm:$0xff] }
  0xc6   :  { %v908_v25 = vld [vmem:[#allocation2 + $0x1b00] sm:$0xff] }
  0xc8   :  { %16965 = vmatmul.mubr.msk.f32.gmra.mrb[68].mxu0 %vm1086_vm0, %v113_v26  ;;  %18111 = vmatmul.mubr.msk.f32.gmra.mrb[68].mxu1 %vm1086_vm0, %v877_v27  ;;  %v145_v26 = vld [vmem:[#allocation2 + $0x328] sm:$0xff] }
  0xc9   :  { %16967 = vmatprep.mubr.msk.f32.mxu0 %vm1086_vm0, %v114_v28  ;;  %18113 = vmatprep.mubr.msk.f32.mxu1 %vm1086_vm0, %v878_v29  ;;  %v909_v27 = vld [vmem:[#allocation2 + $0x1b08] sm:$0xff]  ;;  %v146_v28 = vld [vmem:[#allocation2 + $0x330] sm:$0xff] }
  0xca   :  { %v910_v29 = vld [vmem:[#allocation2 + $0x1b10] sm:$0xff] }
  0xcc   :  { %16968 = vmatmul.mubr.msk.f32.gmra.mrb[70].mxu0 %vm1086_vm0, %v115_v30  ;;  %18114 = vmatmul.mubr.msk.f32.gmra.mrb[70].mxu1 %vm1086_vm0, %v879_v31  ;;  %v147_v30 = vld [vmem:[#allocation2 + $0x338] sm:$0xff] }
  0xcd   :  { %16970 = vmatprep.mubr.msk.f32.mxu0 %vm1086_vm0, %v116_v32  ;;  %18116 = vmatprep.mubr.msk.f32.mxu1 %vm1086_vm0, %v880_v33  ;;  %v911_v31 = vld [vmem:[#allocation2 + $0x1b18] sm:$0xff]  ;;  %v148_v32 = vld [vmem:[#allocation2 + $0x340] sm:$0xff] }
  0xce   :  { %v912_v33 = vld [vmem:[#allocation2 + $0x1b20] sm:$0xff] }
  0xd0   :  { %16971 = vmatmul.mubr.msk.f32.gmra.mrb[72].mxu0 %vm1086_vm0, %v117_v34  ;;  %18117 = vmatmul.mubr.msk.f32.gmra.mrb[72].mxu1 %vm1086_vm0, %v881_v35  ;;  %v149_v34 = vld [vmem:[#allocation2 + $0x348] sm:$0xff] }
  0xd1   :  { %16973 = vmatprep.mubr.msk.f32.mxu0 %vm1086_vm0, %v118_v36  ;;  %18119 = vmatprep.mubr.msk.f32.mxu1 %vm1086_vm0, %v882_v37  ;;  %v913_v35 = vld [vmem:[#allocation2 + $0x1b28] sm:$0xff]  ;;  %v150_v36 = vld [vmem:[#allocation2 + $0x350] sm:$0xff] }
  0xd2   :  { %v914_v37 = vld [vmem:[#allocation2 + $0x1b30] sm:$0xff] }
  0xd4   :  { %16974 = vmatmul.mubr.msk.f32.gmra.mrb[74].mxu0 %vm1086_vm0, %v119_v38  ;;  %18120 = vmatmul.mubr.msk.f32.gmra.mrb[74].mxu1 %vm1086_vm0, %v883_v39  ;;  %v19845_v38 = vld [vmem:[#allocation5] ss:$0 sm:$0xff]  ;;  %v151_v39 = vld [vmem:[#allocation2 + $0x358] sm:$0xff] }
  0xd5   :  { %16976 = vmatprep.mubr.msk.f32.mxu0 %vm1086_vm0, %v120_v40  ;;  %18122 = vmatprep.mubr.msk.f32.mxu1 %vm1086_vm0, %v884_v41  ;;  %v915_v40 = vld [vmem:[#allocation2 + $0x1b38] sm:$0xff]  ;;  %v152_v41 = vld [vmem:[#allocation2 + $0x360] sm:$0xff] }
  0xd8   :  { %16977 = vmatmul.mubr.msk.f32.gmra.mrb[76].mxu0 %vm1086_vm0, %v121_v42  ;;  %18123 = vmatmul.mubr.msk.f32.gmra.mrb[76].mxu1 %vm1086_vm0, %v885_v43  ;;  %v916_v42 = vld [vmem:[#allocation2 + $0x1b40] sm:$0xff] }
  0xd9   :  { %16979 = vmatprep.mubr.msk.f32.mxu0 %vm1086_vm0, %v122_v44  ;;  %18125 = vmatprep.mubr.msk.f32.mxu1 %vm1086_vm0, %v886_v45 }
  0xdc   :  { %16980 = vmatmul.mubr.msk.f32.gmra.mrb[78].mxu0 %vm1086_vm0, %v123_v46  ;;  %18126 = vmatmul.mubr.msk.f32.gmra.mrb[78].mxu1 %vm1086_vm0, %v887_v47  ;;  %v153_v47 = vld [vmem:[#allocation2 + $0x368] sm:$0xff] }
  0xdd   :  { %16982 = vmatprep.mubr.msk.f32.mxu0 %vm1086_vm0, %v124_v48  ;;  %18128 = vmatprep.mubr.msk.f32.mxu1 %vm1086_vm0, %v888_v49  ;;  %v917_v48 = vld [vmem:[#allocation2 + $0x1b48] sm:$0xff] }
  0xe0   :  { %16983 = vmatmul.mubr.msk.f32.gmra.mrb[80].mxu0 %vm1086_vm0, %v125_v50  ;;  %18129 = vmatmul.mubr.msk.f32.gmra.mrb[80].mxu1 %vm1086_vm0, %v889_v51  ;;  %v154_v50 = vld [vmem:[#allocation2 + $0x370] sm:$0xff] }
  0xe1   :  { %16985 = vmatprep.mubr.msk.f32.mxu0 %vm1086_vm0, %v126_v52  ;;  %18131 = vmatprep.mubr.msk.f32.mxu1 %vm1086_vm0, %v890_v53  ;;  %v918_v51 = vld [vmem:[#allocation2 + $0x1b50] sm:$0xff] }
  0xe4   :  { %16986 = vmatmul.mubr.msk.f32.gmra.mrb[82].mxu0 %vm1086_vm0, %v127_v54  ;;  %18132 = vmatmul.mubr.msk.f32.gmra.mrb[82].mxu1 %vm1086_vm0, %v891_v55 }
  0xe5   :  { %16988 = vmatprep.mubr.msk.f32.mxu0 %vm1086_vm0, %v128_v56  ;;  %18134 = vmatprep.mubr.msk.f32.mxu1 %vm1086_vm0, %v892_v57 }
  0xe8   :  { %16989 = vmatmul.mubr.msk.f32.gmra.mrb[84].mxu0 %vm1086_vm0, %v129_v58  ;;  %18135 = vmatmul.mubr.msk.f32.gmra.mrb[84].mxu1 %vm1086_vm0, %v893_v59  ;;  %v155_v58 = vld [vmem:[#allocation2 + $0x378] sm:$0xff] }
  0xe9   :  { %16991 = vmatprep.mubr.msk.f32.mxu0 %vm1086_vm0, %v130_v60  ;;  %18137 = vmatprep.mubr.msk.f32.mxu1 %vm1086_vm0, %v894_v61  ;;  %v919_v59 = vld [vmem:[#allocation2 + $0x1b58] sm:$0xff]  ;;  %v156_v61 = vld [vmem:[#allocation2 + $0x380] sm:$0xff] }
  0xec   :  { %16992 = vmatmul.mubr.msk.f32.gmra.mrb[86].mxu0 %vm1086_vm0, %v131_v62  ;;  %18138 = vmatmul.mubr.msk.f32.gmra.mrb[86].mxu1 %vm1086_vm0, %v895_v63  ;;  %v920_v62 = vld [vmem:[#allocation2 + $0x1b60] sm:$0xff] }
  0xed   :  { %16994 = vmatprep.mubr.msk.f32.mxu0 %vm1086_vm0, %v132_v0  ;;  %18140 = vmatprep.mubr.msk.f32.mxu1 %vm1086_vm0, %v896_v1 }
  0xf0   :  { %16995 = vmatmul.mubr.msk.f32.gmra.mrb[88].mxu0 %vm1086_vm0, %v133_v2  ;;  %18141 = vmatmul.mubr.msk.f32.gmra.mrb[88].mxu1 %vm1086_vm0, %v897_v3 }
  0xf1   :  { %16997 = vmatprep.mubr.msk.f32.mxu0 %vm1086_vm0, %v134_v4  ;;  %18143 = vmatprep.mubr.msk.f32.mxu1 %vm1086_vm0, %v898_v5  ;;  %v157_v5 = vld [vmem:[#allocation2 + $0x388] sm:$0xff] }
  0xf4   :  { %16998 = vmatmul.mubr.msk.f32.gmra.mrb[90].mxu0 %vm1086_vm0, %v135_v6  ;;  %18144 = vmatmul.mubr.msk.f32.gmra.mrb[90].mxu1 %vm1086_vm0, %v899_v7  ;;  %v921_v6 = vld [vmem:[#allocation2 + $0x1b68] sm:$0xff] }
  0xf5   :  { %17000 = vmatprep.mubr.msk.f32.mxu0 %vm1086_vm0, %v136_v8  ;;  %18146 = vmatprep.mubr.msk.f32.mxu1 %vm1086_vm0, %v900_v9  ;;  %v158_v8 = vld [vmem:[#allocation2 + $0x390] sm:$0xff] }
  0xf6   :  { %v922_v9 = vld [vmem:[#allocation2 + $0x1b70] sm:$0xff] }
  0xf8   :  { %17001 = vmatmul.mubr.msk.f32.gmra.mrb[92].mxu0 %vm1086_vm0, %v137_v10  ;;  %18147 = vmatmul.mubr.msk.f32.gmra.mrb[92].mxu1 %vm1086_vm0, %v901_v11 }
  0xf9   :  { %17003 = vmatprep.mubr.msk.f32.mxu0 %vm1086_vm0, %v138_v12  ;;  %18149 = vmatprep.mubr.msk.f32.mxu1 %vm1086_vm0, %v902_v13 }
  0xfc   :  { %17004 = vmatmul.mubr.msk.f32.gmra.mrb[94].mxu0 %vm1086_vm0, %v139_v14  ;;  %18150 = vmatmul.mubr.msk.f32.gmra.mrb[94].mxu1 %vm1086_vm0, %v903_v15 }
  0xfd   :  { %17006 = vmatprep.mubr.msk.f32.mxu0 %vm1086_vm0, %v140_v16  ;;  %18152 = vmatprep.mubr.msk.f32.mxu1 %vm1086_vm0, %v904_v17  ;;  %v159_v16 = vld [vmem:[#allocation2 + $0x398] sm:$0xff] }
  0xfe   :  { %v923_v17 = vld [vmem:[#allocation2 + $0x1b78] sm:$0xff] }
 0x100   :  { %17007 = vmatmul.mubr.msk.f32.gmra.mrb[96].mxu0 %vm1086_vm0, %v141_v18  ;;  %18153 = vmatmul.mubr.msk.f32.gmra.mrb[96].mxu1 %vm1086_vm0, %v905_v19  ;;  %v160_v19 = vld [vmem:[#allocation2 + $0x3a0] sm:$0xff] }
 0x101   :  { %17009 = vmatprep.mubr.msk.f32.mxu0 %vm1086_vm0, %v142_v20  ;;  %18155 = vmatprep.mubr.msk.f32.mxu1 %vm1086_vm0, %v906_v21  ;;  %v924_v20 = vld [vmem:[#allocation2 + $0x1b80] sm:$0xff] }
 0x104   :  { %17010 = vmatmul.mubr.msk.f32.gmra.mrb[98].mxu0 %vm1086_vm0, %v143_v22  ;;  %18156 = vmatmul.mubr.msk.f32.gmra.mrb[98].mxu1 %vm1086_vm0, %v907_v23 }
 0x105   :  { %17012 = vmatprep.mubr.msk.f32.mxu0 %vm1086_vm0, %v144_v24  ;;  %18158 = vmatprep.mubr.msk.f32.mxu1 %vm1086_vm0, %v908_v25 }
 0x108   :  { %17013 = vmatmul.mubr.msk.f32.gmra.mrb[100].mxu0 %vm1086_vm0, %v145_v26  ;;  %18159 = vmatmul.mubr.msk.f32.gmra.mrb[100].mxu1 %vm1086_vm0, %v909_v27  ;;  %v161_v27 = vld [vmem:[#allocation2 + $0x3a8] sm:$0xff] }
 0x109   :  { %17015 = vmatprep.mubr.msk.f32.mxu0 %vm1086_vm0, %v146_v28  ;;  %18161 = vmatprep.mubr.msk.f32.mxu1 %vm1086_vm0, %v910_v29  ;;  %v925_v28 = vld [vmem:[#allocation2 + $0x1b88] sm:$0xff] }
 0x10c   :  { %17016 = vmatmul.mubr.msk.f32.gmra.mrb[102].mxu0 %vm1086_vm0, %v147_v30  ;;  %18162 = vmatmul.mubr.msk.f32.gmra.mrb[102].mxu1 %vm1086_vm0, %v911_v31  ;;  %v162_v30 = vld [vmem:[#allocation2 + $0x3b0] sm:$0xff] }
 0x10d   :  { %17018 = vmatprep.mubr.msk.f32.mxu0 %vm1086_vm0, %v148_v32  ;;  %18164 = vmatprep.mubr.msk.f32.mxu1 %vm1086_vm0, %v912_v33  ;;  %v926_v31 = vld [vmem:[#allocation2 + $0x1b90] sm:$0xff] }
 0x110   :  { %17019 = vmatmul.mubr.msk.f32.gmra.mrb[104].mxu0 %vm1086_vm0, %v149_v34  ;;  %18165 = vmatmul.mubr.msk.f32.gmra.mrb[104].mxu1 %vm1086_vm0, %v913_v35 }
 0x111   :  { %17021 = vmatprep.mubr.msk.f32.mxu0 %vm1086_vm0, %v150_v36  ;;  %18167 = vmatprep.mubr.msk.f32.mxu1 %vm1086_vm0, %v914_v37 }
 0x113   :  { %v16864_v43 = vpop.f32.mrb[0].mxu0 }
 0x114   :  { %v4235_v44 = vadd.f32 %v16864_v43, %v19845_v38  ;;  %v4229_v45 = vpop.f32.mrb[1].mxu0  ;;  %17022 = vmatmul.mubr.msk.f32.gmra.mrb[106].mxu0 %vm1086_vm0, %v151_v39  ;;  %18168 = vmatmul.mubr.msk.f32.gmra.mrb[106].mxu1 %vm1086_vm0, %v915_v40  ;;  %v163_v39 = vld [vmem:[#allocation2 + $0x3b8] sm:$0xff]  ;;  %v928_v43 = vld [vmem:[#allocation2 + $0x1ba0] sm:$0xff] }
 0x115   :  { %v4230_v46 = vadd.f32 %v19845_v38, %v4229_v45  ;;  %17024 = vmatprep.mubr.msk.f32.mxu0 %vm1086_vm0, %v152_v41  ;;  %18170 = vmatprep.mubr.msk.f32.mxu1 %vm1086_vm0, %v916_v42  ;;  %v927_v40 = vld [vmem:[#allocation2 + $0x1b98] sm:$0xff]  ;;  %v164_v42 = vld [vmem:[#allocation2 + $0x3c0] sm:$0xff] }
 0x116   :  { %v9349_v49 = vmax.f32 %v4235_v44, 0.0 }
 0x117   :  { %v9348_v52 = vmax.f32 %v4230_v46, 0.0  ;;  %v16867_v53 = vpop.f32.mrb[2].mxu0 }
 0x118   :  { %v4245_v54 = vadd.f32 %v16867_v53, %v19845_v38  ;;  %v4239_v55 = vpop.f32.mrb[3].mxu0  ;;  %17025 = vmatmul.mubr.msk.f32.gmra.mrb[108].mxu0 %vm1086_vm0, %v153_v47  ;;  %18171 = vmatmul.mubr.msk.f32.gmra.mrb[108].mxu1 %vm1086_vm0, %v917_v48  ;;  %v166_v53 = vld [vmem:[#allocation2 + $0x3d0] sm:$0xff] }
 0x119   :  { %v19858_v56 = vpack.c.bf16 %v9349_v49, %v9348_v52  ;;  %v4240_v57 = vadd.f32 %v19845_v38, %v4239_v55  ;;  %17027 = vmatprep.mubr.msk.f32.mxu0 %vm1086_vm0, %v154_v50  ;;  %18173 = vmatprep.mubr.msk.f32.mxu1 %vm1086_vm0, %v918_v51  ;;  %v165_v50 = vld [vmem:[#allocation2 + $0x3c8] sm:$0xff] }
 0x11a   :  { %v9351_v60 = vmax.f32 %v4245_v54, 0.0  ;;  %v929_v51 = vld [vmem:[#allocation2 + $0x1ba8] sm:$0xff]  ;;  %v930_v54 = vld [vmem:[#allocation2 + $0x1bb0] sm:$0xff] }
 0x11b   :  { %v9350_v63 = vmax.f32 %v4240_v57, 0.0  ;;  %v16870_v0 = vpop.f32.mrb[4].mxu0 }
 0x11c   :  { %v4255_v1 = vadd.f32 %v16870_v0, %v19845_v38  ;;  %v4249_v2 = vpop.f32.mrb[5].mxu0  ;;  %17028 = vmatmul.mubr.msk.f32.gmra.mrb[110].mxu0 %vm1086_vm0, %v155_v58  ;;  %18174 = vmatmul.mubr.msk.f32.gmra.mrb[110].mxu1 %vm1086_vm0, %v919_v59 }
 0x11d   :  { %v19866_v3 = vpack.c.bf16 %v9351_v60, %v9350_v63  ;;  %v4250_v4 = vadd.f32 %v19845_v38, %v4249_v2  ;;  %17030 = vmatprep.mubr.msk.f32.mxu0 %vm1086_vm0, %v156_v61  ;;  %18176 = vmatprep.mubr.msk.f32.mxu1 %vm1086_vm0, %v920_v62  ;;  %v167_v62 = vld [vmem:[#allocation2 + $0x3d8] sm:$0xff]  ;;  %v932_v2 = vld [vmem:[#allocation2 + $0x1bc0] sm:$0xff] }
 0x11e   :  { %v9353_v7 = vmax.f32 %v4255_v1, 0.0  ;;  %v931_v63 = vld [vmem:[#allocation2 + $0x1bb8] sm:$0xff]  ;;  %v168_v1 = vld [vmem:[#allocation2 + $0x3e0] sm:$0xff] }
 0x11f   :  { %v9352_v10 = vmax.f32 %v4250_v4, 0.0  ;;  %v16873_v11 = vpop.f32.mrb[6].mxu0 }
 0x120   :  { %v4265_v12 = vadd.f32 %v16873_v11, %v19845_v38  ;;  %v4259_v13 = vpop.f32.mrb[7].mxu0  ;;  %17031 = vmatmul.mubr.msk.f32.gmra.mrb[112].mxu0 %vm1086_vm0, %v157_v5  ;;  %18177 = vmatmul.mubr.msk.f32.gmra.mrb[112].mxu1 %vm1086_vm0, %v921_v6  ;;  %v933_v11 = vld [vmem:[#allocation2 + $0x1bc8] sm:$0xff] }
 0x121   :  { %v19874_v14 = vpack.c.bf16 %v9353_v7, %v9352_v10  ;;  %v4260_v15 = vadd.f32 %v19845_v38, %v4259_v13  ;;  %17033 = vmatprep.mubr.msk.f32.mxu0 %vm1086_vm0, %v158_v8  ;;  %18179 = vmatprep.mubr.msk.f32.mxu1 %vm1086_vm0, %v922_v9  ;;  %v169_v10 = vld [vmem:[#allocation2 + $0x3e8] sm:$0xff]  ;;  %v170_v13 = vld [vmem:[#allocation2 + $0x3f0] sm:$0xff] }
 0x122   :  { %v9355_v18 = vmax.f32 %v4265_v12, 0.0 }
 0x123   :  { %v9354_v21 = vmax.f32 %v4260_v15, 0.0  ;;  %v16876_v22 = vpop.f32.mrb[8].mxu0  ;;  %v934_v15 = vld [vmem:[#allocation2 + $0x1bd0] sm:$0xff] }
 0x124   :  { %v4275_v23 = vadd.f32 %v16876_v22, %v19845_v38  ;;  %v4269_v24 = vpop.f32.mrb[9].mxu0  ;;  %17034 = vmatmul.mubr.msk.f32.gmra.mrb[114].mxu0 %vm1086_vm0, %v159_v16  ;;  %18180 = vmatmul.mubr.msk.f32.gmra.mrb[114].mxu1 %vm1086_vm0, %v923_v17  ;;  %v171_v22 = vld [vmem:[#allocation2 + $0x3f8] sm:$0xff] }
 0x125   :  { %v19882_v25 = vpack.c.bf16 %v9355_v18, %v9354_v21  ;;  %v4270_v26 = vadd.f32 %v19845_v38, %v4269_v24  ;;  %17036 = vmatprep.mubr.msk.f32.mxu0 %vm1086_vm0, %v160_v19  ;;  %18182 = vmatprep.mubr.msk.f32.mxu1 %vm1086_vm0, %v924_v20 }
 0x126   :  { %v9357_v29 = vmax.f32 %v4275_v23, 0.0  ;;  %v935_v23 = vld [vmem:[#allocation2 + $0x1bd8] sm:$0xff] }
 0x127   :  { %v9356_v32 = vmax.f32 %v4270_v26, 0.0  ;;  %v16879_v33 = vpop.f32.mrb[10].mxu0  ;;  %v172_v26 = vld [vmem:[#allocation2 + $0x400] sm:$0xff] }
 0x128   :  { %v4285_v34 = vadd.f32 %v16879_v33, %v19845_v38  ;;  %v4279_v35 = vpop.f32.mrb[11].mxu0  ;;  %17037 = vmatmul.mubr.msk.f32.gmra.mrb[116].mxu0 %vm1086_vm0, %v161_v27  ;;  %18183 = vmatmul.mubr.msk.f32.gmra.mrb[116].mxu1 %vm1086_vm0, %v925_v28 }
 0x129   :  { %v19890_v36 = vpack.c.bf16 %v9357_v29, %v9356_v32  ;;  %v4280_v37 = vadd.f32 %v19845_v38, %v4279_v35  ;;  %17039 = vmatprep.mubr.msk.f32.mxu0 %vm1086_vm0, %v162_v30  ;;  %18185 = vmatprep.mubr.msk.f32.mxu1 %vm1086_vm0, %v926_v31  ;;  %v936_v29 = vld [vmem:[#allocation2 + $0x1be0] sm:$0xff]  ;;  %v937_v35 = vld [vmem:[#allocation2 + $0x1be8] sm:$0xff] }
 0x12a   :  { %v9359_v41 = vmax.f32 %v4285_v34, 0.0  ;;  %v173_v34 = vld [vmem:[#allocation2 + $0x408] sm:$0xff] }
 0x12b   :  { %v9358_v44 = vmax.f32 %v4280_v37, 0.0  ;;  %v16882_v45 = vpop.f32.mrb[12].mxu0 }
 0x12c   :  { %v4295_v46 = vadd.f32 %v16882_v45, %v19845_v38  ;;  %v4289_v47 = vpop.f32.mrb[13].mxu0  ;;  %17040 = vmatmul.mubr.msk.f32.gmra.mrb[118].mxu0 %vm1086_vm0, %v163_v39  ;;  %18186 = vmatmul.mubr.msk.f32.gmra.mrb[118].mxu1 %vm1086_vm0, %v927_v40  ;;  %v174_v39 = vld [vmem:[#allocation2 + $0x410] sm:$0xff] }
 0x12d   :  { %v19898_v48 = vpack.c.bf16 %v9359_v41, %v9358_v44  ;;  %v4290_v49 = vadd.f32 %v19845_v38, %v4289_v47  ;;  %17042 = vmatprep.mubr.msk.f32.mxu0 %vm1086_vm0, %v164_v42  ;;  %18188 = vmatprep.mubr.msk.f32.mxu1 %vm1086_vm0, %v928_v43  ;;  %v938_v42 = vld [vmem:[#allocation2 + $0x1bf0] sm:$0xff]  ;;  %v939_v47 = vld [vmem:[#allocation2 + $0x1bf8] sm:$0xff] }
 0x12e   :  { %v9361_v52 = vmax.f32 %v4295_v46, 0.0  ;;  %v175_v46 = vld [vmem:[#allocation2 + $0x418] sm:$0xff] }
 0x12f   :  { %v9360_v55 = vmax.f32 %v4290_v49, 0.0  ;;  %v16885_v57 = vpop.f32.mrb[14].mxu0 }
 0x130   :  { %v4305_v58 = vadd.f32 %v16885_v57, %v19845_v38  ;;  %v4299_v59 = vpop.f32.mrb[15].mxu0  ;;  %17043 = vmatmul.mubr.msk.f32.gmra.mrb[120].mxu0 %vm1086_vm0, %v165_v50  ;;  %18189 = vmatmul.mubr.msk.f32.gmra.mrb[120].mxu1 %vm1086_vm0, %v929_v51  ;;  %v176_v50 = vld [vmem:[#allocation2 + $0x420] sm:$0xff] }
 0x131   :  { %v19906_v60 = vpack.c.bf16 %v9361_v52, %v9360_v55  ;;  %v4300_v61 = vadd.f32 %v19845_v38, %v4299_v59  ;;  %17045 = vmatprep.mubr.msk.f32.mxu0 %vm1086_vm0, %v166_v53  ;;  %18191 = vmatprep.mubr.msk.f32.mxu1 %vm1086_vm0, %v930_v54  ;;  %v940_v53 = vld [vmem:[#allocation2 + $0x1c00] sm:$0xff]  ;;  %v941_v59 = vld [vmem:[#allocation2 + $0x1c08] sm:$0xff] }
 0x132   :  { %v9363_v0 = vmax.f32 %v4305_v58, 0.0  ;;  %v177_v58 = vld [vmem:[#allocation2 + $0x428] sm:$0xff] }
 0x133   :  { %v9362_v4 = vmax.f32 %v4300_v61, 0.0  ;;  %v16888_v5 = vpop.f32.mrb[16].mxu0 }
 0x134   :  { %v4315_v6 = vadd.f32 %v16888_v5, %v19845_v38  ;;  %v4309_v7 = vpop.f32.mrb[17].mxu0  ;;  %17046 = vmatmul.mubr.msk.f32.gmra.mrb[122].mxu0 %vm1086_vm0, %v167_v62  ;;  %18192 = vmatmul.mubr.msk.f32.gmra.mrb[122].mxu1 %vm1086_vm0, %v931_v63  ;;  %v178_v62 = vld [vmem:[#allocation2 + $0x430] sm:$0xff] }
 0x135   :  { %v19914_v8 = vpack.c.bf16 %v9363_v0, %v9362_v4  ;;  %v4310_v9 = vadd.f32 %v19845_v38, %v4309_v7  ;;  %17048 = vmatprep.mubr.msk.f32.mxu0 %vm1086_vm0, %v168_v1  ;;  %18194 = vmatprep.mubr.msk.f32.mxu1 %vm1086_vm0, %v932_v2  ;;  %v942_v1 = vld [vmem:[#allocation2 + $0x1c10] sm:$0xff]  ;;  %v943_v7 = vld [vmem:[#allocation2 + $0x1c18] sm:$0xff] }
 0x136   :  { %v9365_v12 = vmax.f32 %v4315_v6, 0.0  ;;  %v179_v6 = vld [vmem:[#allocation2 + $0x438] sm:$0xff] }
 0x137   :  { %v9364_v16 = vmax.f32 %v4310_v9, 0.0  ;;  %v16891_v17 = vpop.f32.mrb[18].mxu0 }
 0x138   :  { %v4325_v18 = vadd.f32 %v16891_v17, %v19845_v38  ;;  %v4319_v19 = vpop.f32.mrb[19].mxu0  ;;  %17049 = vmatmul.mubr.msk.f32.gmra.mrb[124].mxu0 %vm1086_vm0, %v169_v10  ;;  %18195 = vmatmul.mubr.msk.f32.gmra.mrb[124].mxu1 %vm1086_vm0, %v933_v11  ;;  %v180_v10 = vld [vmem:[#allocation2 + $0x440] sm:$0xff] }
 0x139   :  { %v4320_v20 = vadd.f32 %v19845_v38, %v4319_v19  ;;  %17051 = vmatprep.mubr.msk.f32.mxu0 %vm1086_vm0, %v170_v13  ;;  %18197 = vmatprep.mubr.msk.f32.mxu1 %vm1086_vm0, %v934_v15  ;;  %v18418_v21 = vpack.c.bf16 %v9365_v12, %v9364_v16  ;;  %v944_v13 = vld [vmem:[#allocation2 + $0x1c20] sm:$0xff]  ;;  %v945_v19 = vld [vmem:[#allocation2 + $0x1c28] sm:$0xff] }
 0x13a   :  { %v9367_v24 = vmax.f32 %v4325_v18, 0.0  ;;  %v181_v18 = vld [vmem:[#allocation2 + $0x448] sm:$0xff] }
 0x13b   :  { %v9366_v27 = vmax.f32 %v4320_v20, 0.0  ;;  %v16894_v28 = vpop.f32.mrb[20].mxu0  ;;  %18419 = vmatprep.subr.bf16.mxu1 %v18418_v21  ;;  %v182_v21 = vld [vmem:[#allocation2 + $0x450] sm:$0xff] }
 0x13c   :  { %v4335_v30 = vadd.f32 %v16894_v28, %v19845_v38  ;;  %v4329_v31 = vpop.f32.mrb[21].mxu0  ;;  %17052 = vmatmul.mubr.msk.f32.gmra.mrb[126].mxu0 %vm1086_vm0, %v171_v22  ;;  %18198 = vmatmul.mubr.msk.f32.gmra.mrb[126].mxu1 %vm1086_vm0, %v935_v23 }
 0x13d   :  { %v4330_v32 = vadd.f32 %v19845_v38, %v4329_v31  ;;  %18421 = vmatpush3.bf16.msra.mxu1 %v19858_v56  ;;  %17054 = vmatprep.mubr.msk.f32.mxu0 %vm1086_vm0, %v172_v26  ;;  %v18422_v33 = vpack.c.bf16 %v9367_v24, %v9366_v27  ;;  %v946_v24 = vld [vmem:[#allocation2 + $0x1c30] sm:$0xff] }
 0x13e   :  { %v9369_v37 = vmax.f32 %v4335_v30, 0.0  ;;  %18200 = vmatprep.mubr.msk.f32.mxu1 %vm1086_vm0, %v936_v29  ;;  %v183_v29 = vld [vmem:[#allocation2 + $0x458] sm:$0xff] }
 0x13f   :  { %v9368_v40 = vmax.f32 %v4330_v32, 0.0  ;;  %v16897_v41 = vpop.f32.mrb[22].mxu0  ;;  %18423 = vmatprep.subr.bf16.mxu1 %v18422_v33  ;;  %v947_v30 = vld [vmem:[#allocation2 + $0x1c38] sm:$0xff]  ;;  %v184_v32 = vld [vmem:[#allocation2 + $0x460] sm:$0xff] }
 0x140   :  { %v4345_v43 = vadd.f32 %v16897_v41, %v19845_v38  ;;  %v4339_v44 = vpop.f32.mrb[23].mxu0  ;;  %17055 = vmatmul.mubr.msk.f32.gmra.mrb[128].mxu0 %vm1086_vm0, %v173_v34  ;;  %18201 = vmatmul.mubr.msk.f32.gmra.mrb[128].mxu1 %vm1086_vm0, %v937_v35  ;;  %v948_v35 = vld [vmem:[#allocation2 + $0x1c40] sm:$0xff]  ;;  %v185_v41 = vld [vmem:[#allocation2 + $0x468] sm:$0xff] }
 0x141   :  { %v4340_v56 = vadd.f32 %v19845_v38, %v4339_v44  ;;  %18425 = vmatpush3.bf16.msra.mxu1 %v19866_v3  ;;  %17057 = vmatprep.mubr.msk.f32.mxu0 %vm1086_vm0, %v174_v39  ;;  %v18426_v45 = vpack.c.bf16 %v9369_v37, %v9368_v40  ;;  %v186_v44 = vld [vmem:[#allocation2 + $0x470] sm:$0xff] }
 0x142   :  { %v9371_v49 = vmax.f32 %v4345_v43, 0.0  ;;  %18203 = vmatprep.mubr.msk.f32.mxu1 %vm1086_vm0, %v938_v42  ;;  %v949_v42 = vld [vmem:[#allocation2 + $0x1c48] sm:$0xff] }
 0x143   :  { %v9370_v51 = vmax.f32 %v4340_v56, 0.0  ;;  %v16900_v52 = vpop.f32.mrb[24].mxu0  ;;  %18427 = vmatprep.subr.bf16.mxu1 %v18426_v45 }
 0x144   :  { %v4355_v54 = vadd.f32 %v16900_v52, %v19845_v38  ;;  %v4349_v55 = vpop.f32.mrb[25].mxu0  ;;  %17058 = vmatmul.mubr.msk.f32.gmra.mrb[130].mxu0 %vm1086_vm0, %v175_v46  ;;  %18204 = vmatmul.mubr.msk.f32.gmra.mrb[130].mxu1 %vm1086_vm0, %v939_v47  ;;  %v950_v46 = vld [vmem:[#allocation2 + $0x1c50] sm:$0xff]  ;;  %v951_v52 = vld [vmem:[#allocation2 + $0x1c58] sm:$0xff] }
 0x145   :  { %v4350_v3 = vadd.f32 %v19845_v38, %v4349_v55  ;;  %18429 = vmatpush3.bf16.msra.mxu1 %v19874_v14  ;;  %17060 = vmatprep.mubr.msk.f32.mxu0 %vm1086_vm0, %v176_v50  ;;  %v18430_v57 = vpack.c.bf16 %v9371_v49, %v9370_v51  ;;  %v187_v51 = vld [vmem:[#allocation2 + $0x478] sm:$0xff]  ;;  %v952_v55 = vld [vmem:[#allocation2 + $0x1c60] sm:$0xff] }
 0x146   :  { %v9373_v61 = vmax.f32 %v4355_v54, 0.0  ;;  %18206 = vmatprep.mubr.msk.f32.mxu1 %vm1086_vm0, %v940_v53  ;;  %v188_v54 = vld [vmem:[#allocation2 + $0x480] sm:$0xff] }
 0x147   :  { %v9372_v63 = vmax.f32 %v4350_v3, 0.0  ;;  %v16903_v0 = vpop.f32.mrb[26].mxu0  ;;  %18431 = vmatprep.subr.bf16.mxu1 %v18430_v57 }
 0x148   :  { %v4365_v2 = vadd.f32 %v16903_v0, %v19845_v38  ;;  %v4359_v4 = vpop.f32.mrb[27].mxu0  ;;  %17061 = vmatmul.mubr.msk.f32.gmra.mrb[132].mxu0 %vm1086_vm0, %v177_v58  ;;  %18207 = vmatmul.mubr.msk.f32.gmra.mrb[132].mxu1 %vm1086_vm0, %v941_v59 }
 0x149   :  { %v4360_v14 = vadd.f32 %v19845_v38, %v4359_v4  ;;  %18433 = vmatpush3.bf16.msra.mxu1 %v19882_v25  ;;  %17063 = vmatprep.mubr.msk.f32.mxu0 %vm1086_vm0, %v178_v62  ;;  %v18434_v5 = vpack.c.bf16 %v9373_v61, %v9372_v63  ;;  %v189_v62 = vld [vmem:[#allocation2 + $0x488] sm:$0xff] }
 0x14a   :  { %v9375_v9 = vmax.f32 %v4365_v2, 0.0  ;;  %18209 = vmatprep.mubr.msk.f32.mxu1 %vm1086_vm0, %v942_v1  ;;  %v953_v63 = vld [vmem:[#allocation2 + $0x1c68] sm:$0xff]  ;;  %v190_v1 = vld [vmem:[#allocation2 + $0x490] sm:$0xff] }
 0x14b   :  { %v9374_v11 = vmax.f32 %v4360_v14, 0.0  ;;  %v16906_v12 = vpop.f32.mrb[28].mxu0  ;;  %18435 = vmatprep.subr.bf16.mxu1 %v18434_v5  ;;  %v954_v2 = vld [vmem:[#allocation2 + $0x1c70] sm:$0xff] }
 0x14c   :  { %v4375_v15 = vadd.f32 %v16906_v12, %v19845_v38  ;;  %v4369_v16 = vpop.f32.mrb[29].mxu0  ;;  %17064 = vmatmul.mubr.msk.f32.gmra.mrb[134].mxu0 %vm1086_vm0, %v179_v6  ;;  %18210 = vmatmul.mubr.msk.f32.gmra.mrb[134].mxu1 %vm1086_vm0, %v943_v7 }
 0x14d   :  { %v4370_v25 = vadd.f32 %v19845_v38, %v4369_v16  ;;  %18437 = vmatpush3.bf16.msra.mxu1 %v19890_v36  ;;  %17066 = vmatprep.mubr.msk.f32.mxu0 %vm1086_vm0, %v180_v10  ;;  %v18438_v17 = vpack.c.bf16 %v9375_v9, %v9374_v11  ;;  %v191_v10 = vld [vmem:[#allocation2 + $0x498] sm:$0xff] }
 0x14e   :  { %v9377_v20 = vmax.f32 %v4375_v15, 0.0  ;;  %18212 = vmatprep.mubr.msk.f32.mxu1 %vm1086_vm0, %v944_v13  ;;  %v955_v11 = vld [vmem:[#allocation2 + $0x1c78] sm:$0xff]  ;;  %v192_v13 = vld [vmem:[#allocation2 + $0x4a0] sm:$0xff] }
 0x14f   :  { %v9376_v22 = vmax.f32 %v4370_v25, 0.0  ;;  %v16909_v23 = vpop.f32.mrb[30].mxu0  ;;  %18439 = vmatprep.subr.bf16.mxu1 %v18438_v17  ;;  %v956_v15 = vld [vmem:[#allocation2 + $0x1c80] sm:$0xff] }
 0x150   :  { %v4385_v26 = vadd.f32 %v16909_v23, %v19845_v38  ;;  %v4379_v27 = vpop.f32.mrb[31].mxu0  ;;  %17067 = vmatmul.mubr.msk.f32.gmra.mrb[136].mxu0 %vm1086_vm0, %v181_v18  ;;  %18213 = vmatmul.mubr.msk.f32.gmra.mrb[136].mxu1 %vm1086_vm0, %v945_v19 }
 0x151   :  { %v4380_v36 = vadd.f32 %v19845_v38, %v4379_v27  ;;  %18441 = vmatpush3.bf16.msra.mxu1 %v19898_v48  ;;  %17069 = vmatprep.mubr.msk.f32.mxu0 %vm1086_vm0, %v182_v21  ;;  %v18442_v28 = vpack.c.bf16 %v9377_v20, %v9376_v22  ;;  %v193_v21 = vld [vmem:[#allocation2 + $0x4a8] sm:$0xff] }
 0x152   :  { %v9379_v31 = vmax.f32 %v4385_v26, 0.0  ;;  %18215 = vmatprep.mubr.msk.f32.mxu1 %vm1086_vm0, %v946_v24  ;;  %v957_v22 = vld [vmem:[#allocation2 + $0x1c88] sm:$0xff]  ;;  %v194_v24 = vld [vmem:[#allocation2 + $0x4b0] sm:$0xff] }
 0x153   :  { %v9378_v33 = vmax.f32 %v4380_v36, 0.0  ;;  %v16912_v34 = vpop.f32.mrb[32].mxu0  ;;  %18443 = vmatprep.subr.bf16.mxu1 %v18442_v28  ;;  %v958_v26 = vld [vmem:[#allocation2 + $0x1c90] sm:$0xff] }
 0x154   :  { %v4395_v37 = vadd.f32 %v16912_v34, %v19845_v38  ;;  %v4389_v39 = vpop.f32.mrb[33].mxu0  ;;  %17070 = vmatmul.mubr.msk.f32.gmra.mrb[138].mxu0 %vm1086_vm0, %v183_v29  ;;  %18216 = vmatmul.mubr.msk.f32.gmra.mrb[138].mxu1 %vm1086_vm0, %v947_v30 }
 0x155   :  { %v4390_v48 = vadd.f32 %v19845_v38, %v4389_v39  ;;  %18445 = vmatpush3.bf16.msra.mxu1 %v19906_v60  ;;  %17072 = vmatprep.mubr.msk.f32.mxu0 %vm1086_vm0, %v184_v32  ;;  %v18446_v40 = vpack.c.bf16 %v9379_v31, %v9378_v33  ;;  %v195_v32 = vld [vmem:[#allocation2 + $0x4b8] sm:$0xff] }
 0x156   :  { %v9381_v43 = vmax.f32 %v4395_v37, 0.0  ;;  %18218 = vmatprep.mubr.msk.f32.mxu1 %vm1086_vm0, %v948_v35  ;;  %v959_v33 = vld [vmem:[#allocation2 + $0x1c98] sm:$0xff]  ;;  %v196_v35 = vld [vmem:[#allocation2 + $0x4c0] sm:$0xff] }
 0x157   :  { %v9380_v56 = vmax.f32 %v4390_v48, 0.0  ;;  %v16915_v45 = vpop.f32.mrb[34].mxu0  ;;  %18447 = vmatprep.subr.bf16.mxu1 %v18446_v40  ;;  %v960_v37 = vld [vmem:[#allocation2 + $0x1ca0] sm:$0xff] }
 0x158   :  { %v4405_v47 = vadd.f32 %v16915_v45, %v19845_v38  ;;  %v4399_v49 = vpop.f32.mrb[35].mxu0  ;;  %17073 = vmatmul.mubr.msk.f32.gmra.mrb[140].mxu0 %vm1086_vm0, %v185_v41  ;;  %18219 = vmatmul.mubr.msk.f32.gmra.mrb[140].mxu1 %vm1086_vm0, %v949_v42 }
 0x159   :  { %v19977_v60 = vpack.c.bf16 %v9381_v43, %v9380_v56  ;;  %v4400_v50 = vadd.f32 %v19845_v38, %v4399_v49  ;;  %18449 = vmatpush3.bf16.msra.mxu1 %v19914_v8  ;;  %17075 = vmatprep.mubr.msk.f32.mxu0 %vm1086_vm0, %v186_v44  ;;  %v197_v44 = vld [vmem:[#allocation2 + $0x4c8] sm:$0xff] }
 0x15a   :  { %v9383_v53 = vmax.f32 %v4405_v47, 0.0  ;;  %18221 = vmatprep.mubr.msk.f32.mxu1 %vm1086_vm0, %v950_v46  ;;  %v961_v56 = vld [vmem:[#allocation2 + $0x1ca8] sm:$0xff]  ;;  %v198_v46 = vld [vmem:[#allocation2 + $0x4d0] sm:$0xff] }
 0x15b   :  { %v9382_v3 = vmax.f32 %v4400_v50, 0.0  ;;  %v16918_v57 = vpop.f32.mrb[36].mxu0  ;;  %v962_v47 = vld [vmem:[#allocation2 + $0x1cb0] sm:$0xff] }
 0x15c   :  { %v4415_v58 = vadd.f32 %v16918_v57, %v19845_v38  ;;  %v4409_v59 = vpop.f32.mrb[37].mxu0  ;;  %17076 = vmatmul.mubr.msk.f32.gmra.mrb[142].mxu0 %vm1086_vm0, %v187_v51  ;;  %18222 = vmatmul.mubr.msk.f32.gmra.mrb[142].mxu1 %vm1086_vm0, %v951_v52 }
 0x15d   :  { %v19986_v61 = vpack.c.bf16 %v9383_v53, %v9382_v3  ;;  %v4410_v8 = vadd.f32 %v19845_v38, %v4409_v59  ;;  %17078 = vmatprep.mubr.msk.f32.mxu0 %vm1086_vm0, %v188_v54  ;;  %18224 = vmatprep.mubr.msk.f32.mxu1 %vm1086_vm0, %v952_v55  ;;  %v199_v55 = vld [vmem:[#allocation2 + $0x4d8] sm:$0xff]  ;;  %v964_v59 = vld [vmem:[#allocation2 + $0x1cc0] sm:$0xff] }
 0x15e   :  { %v9385_v0 = vmax.f32 %v4415_v58, 0.0  ;;  %v963_v3 = vld [vmem:[#allocation2 + $0x1cb8] sm:$0xff]  ;;  %v200_v58 = vld [vmem:[#allocation2 + $0x4e0] sm:$0xff] }
 0x15f   :  { %v9384_v4 = vmax.f32 %v4410_v8, 0.0  ;;  %v16921_v14 = vpop.f32.mrb[38].mxu0 }
 0x160   :  { %v4425_v5 = vadd.f32 %v16921_v14, %v19845_v38  ;;  %v4419_v6 = vpop.f32.mrb[39].mxu0  ;;  %17079 = vmatmul.mubr.msk.f32.gmra.mrb[144].mxu0 %vm1086_vm0, %v189_v62  ;;  %18225 = vmatmul.mubr.msk.f32.gmra.mrb[144].mxu1 %vm1086_vm0, %v953_v63  ;;  %v965_v14 = vld [vmem:[#allocation2 + $0x1cc8] sm:$0xff] }
 0x161   :  { %v19994_v7 = vpack.c.bf16 %v9385_v0, %v9384_v4  ;;  %v4420_v9 = vadd.f32 %v19845_v38, %v4419_v6  ;;  %17081 = vmatprep.mubr.msk.f32.mxu0 %vm1086_vm0, %v190_v1  ;;  %18227 = vmatprep.mubr.msk.f32.mxu1 %vm1086_vm0, %v954_v2  ;;  %v201_v4 = vld [vmem:[#allocation2 + $0x4e8] sm:$0xff]  ;;  %v202_v6 = vld [vmem:[#allocation2 + $0x4f0] sm:$0xff] }
 0x162   :  { %v9387_v12 = vmax.f32 %v4425_v5, 0.0 }
 0x163   :  { %v9386_v16 = vmax.f32 %v4420_v9, 0.0  ;;  %v16924_v25 = vpop.f32.mrb[40].mxu0  ;;  %v966_v9 = vld [vmem:[#allocation2 + $0x1cd0] sm:$0xff] }
 0x164   :  { %v4435_v17 = vadd.f32 %v16924_v25, %v19845_v38  ;;  %v4429_v18 = vpop.f32.mrb[41].mxu0  ;;  %17082 = vmatmul.mubr.msk.f32.gmra.mrb[146].mxu0 %vm1086_vm0, %v191_v10  ;;  %18228 = vmatmul.mubr.msk.f32.gmra.mrb[146].mxu1 %vm1086_vm0, %v955_v11  ;;  %v203_v25 = vld [vmem:[#allocation2 + $0x4f8] sm:$0xff] }
 0x165   :  { %v20002_v19 = vpack.c.bf16 %v9387_v12, %v9386_v16  ;;  %v4430_v20 = vadd.f32 %v19845_v38, %v4429_v18  ;;  %17084 = vmatprep.mubr.msk.f32.mxu0 %vm1086_vm0, %v192_v13  ;;  %18230 = vmatprep.mubr.msk.f32.mxu1 %vm1086_vm0, %v956_v15 }
 0x166   :  { %v9389_v23 = vmax.f32 %v4435_v17, 0.0  ;;  %v967_v17 = vld [vmem:[#allocation2 + $0x1cd8] sm:$0xff] }
 0x167   :  { %v9388_v27 = vmax.f32 %v4430_v20, 0.0  ;;  %v16927_v36 = vpop.f32.mrb[42].mxu0  ;;  %v204_v20 = vld [vmem:[#allocation2 + $0x500] sm:$0xff] }
 0x168   :  { %v4445_v28 = vadd.f32 %v16927_v36, %v19845_v38  ;;  %v4439_v29 = vpop.f32.mrb[43].mxu0  ;;  %17085 = vmatmul.mubr.msk.f32.gmra.mrb[148].mxu0 %vm1086_vm0, %v193_v21  ;;  %18231 = vmatmul.mubr.msk.f32.gmra.mrb[148].mxu1 %vm1086_vm0, %v957_v22  ;;  %v968_v21 = vld [vmem:[#allocation2 + $0x1ce0] sm:$0xff]  ;;  %v205_v36 = vld [vmem:[#allocation2 + $0x508] sm:$0xff] }
 0x169   :  { %v20010_v30 = vpack.c.bf16 %v9389_v23, %v9388_v27  ;;  %v4440_v31 = vadd.f32 %v19845_v38, %v4439_v29  ;;  %17087 = vmatprep.mubr.msk.f32.mxu0 %vm1086_vm0, %v194_v24  ;;  %18233 = vmatprep.mubr.msk.f32.mxu1 %vm1086_vm0, %v958_v26 }
 0x16a   :  { %v9391_v34 = vmax.f32 %v4445_v28, 0.0  ;;  %v969_v28 = vld [vmem:[#allocation2 + $0x1ce8] sm:$0xff] }
 0x16b   :  { %v9390_v39 = vmax.f32 %v4440_v31, 0.0  ;;  %v16930_v48 = vpop.f32.mrb[44].mxu0 }
 0x16c   :  { %v4455_v40 = vadd.f32 %v16930_v48, %v19845_v38  ;;  %v4449_v41 = vpop.f32.mrb[45].mxu0  ;;  %17088 = vmatmul.mubr.msk.f32.gmra.mrb[150].mxu0 %vm1086_vm0, %v195_v32  ;;  %18234 = vmatmul.mubr.msk.f32.gmra.mrb[150].mxu1 %vm1086_vm0, %v959_v33  ;;  %v206_v32 = vld [vmem:[#allocation2 + $0x510] sm:$0xff] }
 0x16d   :  { %v20018_v42 = vpack.c.bf16 %v9391_v34, %v9390_v39  ;;  %v4450_v43 = vadd.f32 %v19845_v38, %v4449_v41  ;;  %17090 = vmatprep.mubr.msk.f32.mxu0 %vm1086_vm0, %v196_v35  ;;  %18236 = vmatprep.mubr.msk.f32.mxu1 %vm1086_vm0, %v960_v37  ;;  %v970_v33 = vld [vmem:[#allocation2 + $0x1cf0] sm:$0xff]  ;;  %v971_v41 = vld [vmem:[#allocation2 + $0x1cf8] sm:$0xff] }
 0x16e   :  { %v9393_v45 = vmax.f32 %v4455_v40, 0.0  ;;  %v207_v40 = vld [vmem:[#allocation2 + $0x518] sm:$0xff] }
 0x16f   :  { %v9392_v49 = vmax.f32 %v4450_v43, 0.0  ;;  %v16933_v50 = vpop.f32.mrb[46].mxu0 }
 0x170   :  { %v4465_v51 = vadd.f32 %v16933_v50, %v19845_v38  ;;  %v4459_v52 = vpop.f32.mrb[47].mxu0  ;;  %17091 = vmatmul.mubr.msk.f32.gmra.mrb[152].mxu0 %vm1086_vm0, %v197_v44  ;;  %18237 = vmatmul.mubr.msk.f32.gmra.mrb[152].mxu1 %vm1086_vm0, %v961_v56  ;;  %v208_v56 = vld [vmem:[#allocation2 + $0x520] sm:$0xff] }
 0x171   :  { %v20026_v53 = vpack.c.bf16 %v9393_v45, %v9392_v49  ;;  %v4460_v54 = vadd.f32 %v19845_v38, %v4459_v52  ;;  %17093 = vmatprep.mubr.msk.f32.mxu0 %vm1086_vm0, %v198_v46  ;;  %18239 = vmatprep.mubr.msk.f32.mxu1 %vm1086_vm0, %v962_v47  ;;  %v972_v45 = vld [vmem:[#allocation2 + $0x1d00] sm:$0xff]  ;;  %v209_v52 = vld [vmem:[#allocation2 + $0x528] sm:$0xff] }
 0x172   :  { %v9395_v57 = vmax.f32 %v4465_v51, 0.0 }
 0x173   :  { %v9394_v8 = vmax.f32 %v4460_v54, 0.0  ;;  %v16936_v62 = vpop.f32.mrb[48].mxu0  ;;  %v973_v54 = vld [vmem:[#allocation2 + $0x1d08] sm:$0xff] }
 0x174   :  { %v4475_v63 = vadd.f32 %v16936_v62, %v19845_v38  ;;  %v4469_v0 = vpop.f32.mrb[49].mxu0  ;;  %17094 = vmatmul.mubr.msk.f32.gmra.mrb[154].mxu0 %vm1086_vm0, %v199_v55  ;;  %18240 = vmatmul.mubr.msk.f32.gmra.mrb[154].mxu1 %vm1086_vm0, %v963_v3 }
 0x175   :  { %v20034_v1 = vpack.c.bf16 %v9395_v57, %v9394_v8  ;;  %v4470_v2 = vadd.f32 %v19845_v38, %v4469_v0  ;;  %17096 = vmatprep.mubr.msk.f32.mxu0 %vm1086_vm0, %v200_v58  ;;  %18242 = vmatprep.mubr.msk.f32.mxu1 %vm1086_vm0, %v964_v59  ;;  %v210_v57 = vld [vmem:[#allocation2 + $0x530] sm:$0xff] }
 0x176   :  { %v9397_v5 = vmax.f32 %v4475_v63, 0.0  ;;  %v974_v58 = vld [vmem:[#allocation2 + $0x1d10] sm:$0xff] }
 0x177   :  { %v9396_v10 = vmax.f32 %v4470_v2, 0.0  ;;  %v16939_v11 = vpop.f32.mrb[50].mxu0  ;;  %v211_v2 = vld [vmem:[#allocation2 + $0x538] sm:$0xff] }
 0x178   :  { %v4485_v12 = vadd.f32 %v16939_v11, %v19845_v38  ;;  %v4479_v13 = vpop.f32.mrb[51].mxu0  ;;  %17097 = vmatmul.mubr.msk.f32.gmra.mrb[156].mxu0 %vm1086_vm0, %v201_v4  ;;  %18243 = vmatmul.mubr.msk.f32.gmra.mrb[156].mxu1 %vm1086_vm0, %v965_v14  ;;  %v975_v4 = vld [vmem:[#allocation2 + $0x1d18] sm:$0xff] }
 0x179   :  { %v4480_v15 = vadd.f32 %v19845_v38, %v4479_v13  ;;  %17099 = vmatprep.mubr.msk.f32.mxu0 %vm1086_vm0, %v202_v6  ;;  %18245 = vmatprep.mubr.msk.f32.mxu1 %vm1086_vm0, %v966_v9  ;;  %v18450_v16 = vpack.c.bf16 %v9397_v5, %v9396_v10  ;;  %v212_v6 = vld [vmem:[#allocation2 + $0x540] sm:$0xff] }
 0x17a   :  { %v9399_v18 = vmax.f32 %v4485_v12, 0.0  ;;  %v976_v9 = vld [vmem:[#allocation2 + $0x1d20] sm:$0xff] }
 0x17b   :  { %v9398_v22 = vmax.f32 %v4480_v15, 0.0  ;;  %v16942_v23 = vpop.f32.mrb[52].mxu0  ;;  %18451 = vmatprep.subr.bf16.mxu1 %v18450_v16  ;;  %v213_v16 = vld [vmem:[#allocation2 + $0x548] sm:$0xff] }
 0x17c   :  { %v4495_v24 = vadd.f32 %v16942_v23, %v19845_v38  ;;  %v4489_v26 = vpop.f32.mrb[53].mxu0  ;;  %17100 = vmatmul.mubr.msk.f32.gmra.mrb[158].mxu0 %vm1086_vm0, %v203_v25  ;;  %18246 = vmatmul.mubr.msk.f32.gmra.mrb[158].mxu1 %vm1086_vm0, %v967_v17  ;;  %v977_v25 = vld [vmem:[#allocation2 + $0x1d28] sm:$0xff] }
 0x17d   :  { %v4490_v27 = vadd.f32 %v19845_v38, %v4489_v26  ;;  %17102 = vmatprep.mubr.msk.f32.mxu0 %vm1086_vm0, %v204_v20  ;;  %18248 = vmatprep.mubr.msk.f32.mxu1 %vm1086_vm0, %v968_v21  ;;  %v20051_v29 = vpack.c.bf16 %v9399_v18, %v9398_v22  ;;  %v214_v20 = vld [vmem:[#allocation2 + $0x550] sm:$0xff] }
 0x17e   :  { %v9401_v31 = vmax.f32 %v4495_v24, 0.0  ;;  %v978_v21 = vld [vmem:[#allocation2 + $0x1d30] sm:$0xff] }
 0x17f   :  { %v9400_v34 = vmax.f32 %v4490_v27, 0.0  ;;  %v16945_v35 = vpop.f32.mrb[54].mxu0 }
 0x180   :  { %v4505_v37 = vadd.f32 %v16945_v35, %v19845_v38  ;;  %v4499_v39 = vpop.f32.mrb[55].mxu0  ;;  %17103 = vmatmul.mubr.msk.f32.gmra.mrb[160].mxu0 %vm1086_vm0, %v205_v36  ;;  %18249 = vmatmul.mubr.msk.f32.gmra.mrb[160].mxu1 %vm1086_vm0, %v969_v28  ;;  %v215_v36 = vld [vmem:[#allocation2 + $0x558] sm:$0xff] }
 0x181   :  { %v4500_v48 = vadd.f32 %v19845_v38, %v4499_v39  ;;  %17105 = vmatprep.mubr.msk.f32.mxu0 %vm1086_vm0, %v206_v32  ;;  %18251 = vmatprep.mubr.msk.f32.mxu1 %vm1086_vm0, %v970_v33  ;;  %v20059_v43 = vpack.c.bf16 %v9401_v31, %v9400_v34  ;;  %v979_v28 = vld [vmem:[#allocation2 + $0x1d38] sm:$0xff]  ;;  %v216_v33 = vld [vmem:[#allocation2 + $0x560] sm:$0xff] }
 0x182   :  { %v9403_v44 = vmax.f32 %v4505_v37, 0.0  ;;  %v980_v34 = vld [vmem:[#allocation2 + $0x1d40] sm:$0xff] }
 0x183   :  { %v9402_v46 = vmax.f32 %v4500_v48, 0.0  ;;  %v16948_v47 = vpop.f32.mrb[56].mxu0 }
 0x184   :  { %v4515_v49 = vadd.f32 %v16948_v47, %v19845_v38  ;;  %v4509_v50 = vpop.f32.mrb[57].mxu0  ;;  %17106 = vmatmul.mubr.msk.f32.gmra.mrb[162].mxu0 %vm1086_vm0, %v207_v40  ;;  %18252 = vmatmul.mubr.msk.f32.gmra.mrb[162].mxu1 %vm1086_vm0, %v971_v41  ;;  %v217_v41 = vld [vmem:[#allocation2 + $0x568] sm:$0xff]  ;;  %v982_v47 = vld [vmem:[#allocation2 + $0x1d50] sm:$0xff] }
 0x185   :  { %v4510_v51 = vadd.f32 %v19845_v38, %v4509_v50  ;;  %17108 = vmatprep.mubr.msk.f32.mxu0 %vm1086_vm0, %v208_v56  ;;  %18254 = vmatprep.mubr.msk.f32.mxu1 %vm1086_vm0, %v972_v45  ;;  %v20067_v55 = vpack.c.bf16 %v9403_v44, %v9402_v46  ;;  %v981_v44 = vld [vmem:[#allocation2 + $0x1d48] sm:$0xff]  ;;  %v218_v46 = vld [vmem:[#allocation2 + $0x570] sm:$0xff] }
 0x186   :  { %v9405_v3 = vmax.f32 %v4515_v49, 0.0 }
 0x187   :  { %v9404_v59 = vmax.f32 %v4510_v51, 0.0  ;;  %v16951_v8 = vpop.f32.mrb[58].mxu0  ;;  %v20101_v51 = vld [vmem:[#allocation5] ss:$0 sm:$0xff] }
 0x188   :  { %v4525_v62 = vadd.f32 %v16951_v8, %v19845_v38  ;;  %v4519_v63 = vpop.f32.mrb[59].mxu0  ;;  %17109 = vmatmul.mubr.msk.f32.gmra.mrb[164].mxu0 %vm1086_vm0, %v209_v52  ;;  %18255 = vmatmul.mubr.msk.f32.gmra.mrb[164].mxu1 %vm1086_vm0, %v973_v54  ;;  %v220_v8 = vld [vmem:[#allocation2 + $0x580] sm:$0xff] }
 0x189   :  { %v4520_v0 = vadd.f32 %v19845_v38, %v4519_v63  ;;  %17111 = vmatprep.mubr.msk.f32.mxu0 %vm1086_vm0, %v210_v57  ;;  %18257 = vmatprep.mubr.msk.f32.mxu1 %vm1086_vm0, %v974_v58  ;;  %v20075_v14 = vpack.c.bf16 %v9405_v3, %v9404_v59  ;;  %v219_v57 = vld [vmem:[#allocation2 + $0x578] sm:$0xff] }
 0x18a   :  { %v9407_v5 = vmax.f32 %v4525_v62, 0.0  ;;  %v983_v58 = vld [vmem:[#allocation2 + $0x1d58] sm:$0xff]  ;;  %v984_v62 = vld [vmem:[#allocation2 + $0x1d60] sm:$0xff] }
 0x18b   :  { %v9406_v10 = vmax.f32 %v4520_v0, 0.0  ;;  %v16954_v11 = vpop.f32.mrb[60].mxu0 }
 0x18c   :  { %v4535_v12 = vadd.f32 %v16954_v11, %v19845_v38  ;;  %v4529_v13 = vpop.f32.mrb[61].mxu0  ;;  %17112 = vmatmul.mubr.msk.f32.gmra.mrb[166].mxu0 %vm1086_vm0, %v211_v2  ;;  %18258 = vmatmul.mubr.msk.f32.gmra.mrb[166].mxu1 %vm1086_vm0, %v975_v4 }
 0x18d   :  { %v4530_v15 = vadd.f32 %v19845_v38, %v4529_v13  ;;  %17114 = vmatprep.mubr.msk.f32.mxu0 %vm1086_vm0, %v212_v6  ;;  %18260 = vmatprep.mubr.msk.f32.mxu1 %vm1086_vm0, %v976_v9  ;;  %v20083_v17 = vpack.c.bf16 %v9407_v5, %v9406_v10  ;;  %v221_v9 = vld [vmem:[#allocation2 + $0x588] sm:$0xff]  ;;  %v986_v13 = vld [vmem:[#allocation2 + $0x1d70] sm:$0xff] }
 0x18e   :  { %v9409_v18 = vmax.f32 %v4535_v12, 0.0  ;;  %v985_v10 = vld [vmem:[#allocation2 + $0x1d68] sm:$0xff]  ;;  %v222_v12 = vld [vmem:[#allocation2 + $0x590] sm:$0xff] }
 0x18f   :  { %v9408_v22 = vmax.f32 %v4530_v15, 0.0  ;;  %v16957_v23 = vpop.f32.mrb[62].mxu0 }
 0x190   :  { %v4545_v24 = vadd.f32 %v16957_v23, %v19845_v38  ;;  %v4539_v26 = vpop.f32.mrb[63].mxu0  ;;  %17115 = vmatmul.mubr.msk.f32.gmra.mrb[168].mxu0 %vm1086_vm0, %v213_v16  ;;  %18261 = vmatmul.mubr.msk.f32.gmra.mrb[168].mxu1 %vm1086_vm0, %v977_v25  ;;  %v987_v23 = vld [vmem:[#allocation2 + $0x1d78] sm:$0xff] }
 0x191   :  { %v4540_v27 = vadd.f32 %v19845_v38, %v4539_v26  ;;  %17117 = vmatprep.mubr.msk.f32.mxu0 %vm1086_vm0, %v214_v20  ;;  %18263 = vmatprep.mubr.msk.f32.mxu1 %vm1086_vm0, %v978_v21  ;;  %v20091_v31 = vpack.c.bf16 %v9409_v18, %v9408_v22  ;;  %v223_v22 = vld [vmem:[#allocation2 + $0x598] sm:$0xff]  ;;  %v224_v26 = vld [vmem:[#allocation2 + $0x5a0] sm:$0xff] }
 0x192   :  { %v9411_v32 = vmax.f32 %v4545_v24, 0.0 }
 0x193   :  { %v9410_v35 = vmax.f32 %v4540_v27, 0.0  ;;  %v16960_v37 = vpop.f32.mrb[64].mxu0  ;;  %v988_v27 = vld [vmem:[#allocation2 + $0x1d80] sm:$0xff] }
 0x194   :  { %v4555_v39 = vadd.f32 %v16960_v37, %v19845_v38  ;;  %v4549_v48 = vpop.f32.mrb[65].mxu0  ;;  %17118 = vmatmul.mubr.msk.f32.gmra.mrb[170].mxu0 %vm1086_vm0, %v215_v36  ;;  %18264 = vmatmul.mubr.msk.f32.gmra.mrb[170].mxu1 %vm1086_vm0, %v979_v28  ;;  %v225_v37 = vld [vmem:[#allocation2 + $0x5a8] sm:$0xff] }
 0x195   :  { %v4550_v40 = vadd.f32 %v19845_v38, %v4549_v48  ;;  %17120 = vmatprep.mubr.msk.f32.mxu0 %vm1086_vm0, %v216_v33  ;;  %18266 = vmatprep.mubr.msk.f32.mxu1 %vm1086_vm0, %v980_v34  ;;  %v20099_v56 = vpack.c.bf16 %v9411_v32, %v9410_v35 }
 0x196   :  { %v9413_v45 = vmax.f32 %v4555_v39, 0.0  ;;  %v989_v39 = vld [vmem:[#allocation2 + $0x1d88] sm:$0xff] }
 0x197   :  { %v9412_v49 = vmax.f32 %v4550_v40, 0.0  ;;  %v16963_v50 = vpop.f32.mrb[66].mxu0  ;;  %v226_v40 = vld [vmem:[#allocation2 + $0x5b0] sm:$0xff] }
 0x198   :  { %v4565_v52 = vadd.f32 %v20101_v51, %v16963_v50  ;;  %v4559_v54 = vpop.f32.mrb[67].mxu0  ;;  %17121 = vmatmul.mubr.msk.f32.gmra.mrb[172].mxu0 %vm1086_vm0, %v217_v41  ;;  %18267 = vmatmul.mubr.msk.f32.gmra.mrb[172].mxu1 %vm1086_vm0, %v981_v44  ;;  %v990_v41 = vld [vmem:[#allocation2 + $0x1d90] sm:$0xff] }
 0x199   :  { %v20106_v38 = vpack.c.bf16 %v9413_v45, %v9412_v49  ;;  %v4560_v3 = vadd.f32 %v20101_v51, %v4559_v54  ;;  %17123 = vmatprep.mubr.msk.f32.mxu0 %vm1086_vm0, %v218_v46  ;;  %18269 = vmatprep.mubr.msk.f32.mxu1 %vm1086_vm0, %v982_v47  ;;  %v991_v54 = vld [vmem:[#allocation2 + $0x1d98] sm:$0xff] }
 0x19a   :  { %v9415_v59 = vmax.f32 %v4565_v52, 0.0  ;;  %v227_v52 = vld [vmem:[#allocation2 + $0x5b8] sm:$0xff] }
 0x19b   :  { %v9414_v63 = vmax.f32 %v4560_v3, 0.0  ;;  %v16966_v0 = vpop.f32.mrb[68].mxu0 }
 0x19c   :  { %v4575_v2 = vadd.f32 %v20101_v51, %v16966_v0  ;;  %v4569_v4 = vpop.f32.mrb[69].mxu0  ;;  %17124 = vmatmul.mubr.msk.f32.gmra.mrb[174].mxu0 %vm1086_vm0, %v219_v57  ;;  %18270 = vmatmul.mubr.msk.f32.gmra.mrb[174].mxu1 %vm1086_vm0, %v983_v58  ;;  %v228_v57 = vld [vmem:[#allocation2 + $0x5c0] sm:$0xff] }
 0x19d   :  { %v20114_v5 = vpack.c.bf16 %v9415_v59, %v9414_v63  ;;  %v4570_v6 = vadd.f32 %v20101_v51, %v4569_v4  ;;  %17126 = vmatprep.mubr.msk.f32.mxu0 %vm1086_vm0, %v220_v8  ;;  %18272 = vmatprep.mubr.msk.f32.mxu1 %vm1086_vm0, %v984_v62  ;;  %v992_v58 = vld [vmem:[#allocation2 + $0x1da0] sm:$0xff]  ;;  %v229_v4 = vld [vmem:[#allocation2 + $0x5c8] sm:$0xff] }
 0x19e   :  { %v9417_v11 = vmax.f32 %v4575_v2, 0.0 }
 0x19f   :  { %v9416_v15 = vmax.f32 %v4570_v6, 0.0  ;;  %v16969_v16 = vpop.f32.mrb[70].mxu0  ;;  %v993_v6 = vld [vmem:[#allocation2 + $0x1da8] sm:$0xff] }
 0x1a0   :  { %v4585_v25 = vadd.f32 %v20101_v51, %v16969_v16  ;;  %v4579_v18 = vpop.f32.mrb[71].mxu0  ;;  %17127 = vmatmul.mubr.msk.f32.gmra.mrb[176].mxu0 %vm1086_vm0, %v221_v9  ;;  %18273 = vmatmul.mubr.msk.f32.gmra.mrb[176].mxu1 %vm1086_vm0, %v985_v10  ;;  %v230_v10 = vld [vmem:[#allocation2 + $0x5d0] sm:$0xff] }
 0x1a1   :  { %v20122_v20 = vpack.c.bf16 %v9417_v11, %v9416_v15  ;;  %v4580_v21 = vadd.f32 %v20101_v51, %v4579_v18  ;;  %17129 = vmatprep.mubr.msk.f32.mxu0 %vm1086_vm0, %v222_v12  ;;  %18275 = vmatprep.mubr.msk.f32.mxu1 %vm1086_vm0, %v986_v13  ;;  %v994_v11 = vld [vmem:[#allocation2 + $0x1db0] sm:$0xff] }
 0x1a2   :  { %v9419_v24 = vmax.f32 %v4585_v25, 0.0 }
 0x1a3   :  { %v9418_v36 = vmax.f32 %v4580_v21, 0.0  ;;  %v16972_v28 = vpop.f32.mrb[72].mxu0  ;;  %v231_v21 = vld [vmem:[#allocation2 + $0x5d8] sm:$0xff] }
 0x1a4   :  { %v4595_v32 = vadd.f32 %v20101_v51, %v16972_v28  ;;  %v4589_v33 = vpop.f32.mrb[73].mxu0  ;;  %17130 = vmatmul.mubr.msk.f32.gmra.mrb[178].mxu0 %vm1086_vm0, %v223_v22  ;;  %18276 = vmatmul.mubr.msk.f32.gmra.mrb[178].mxu1 %vm1086_vm0, %v987_v23  ;;  %v995_v22 = vld [vmem:[#allocation2 + $0x1db8] sm:$0xff] }
 0x1a5   :  { %v20130_v34 = vpack.c.bf16 %v9419_v24, %v9418_v36  ;;  %v4590_v35 = vadd.f32 %v20101_v51, %v4589_v33  ;;  %17132 = vmatprep.mubr.msk.f32.mxu0 %vm1086_vm0, %v224_v26  ;;  %18278 = vmatprep.mubr.msk.f32.mxu1 %vm1086_vm0, %v988_v27  ;;  %v232_v24 = vld [vmem:[#allocation2 + $0x5e0] sm:$0xff] }
 0x1a6   :  { %v9421_v48 = vmax.f32 %v4595_v32, 0.0  ;;  %v996_v26 = vld [vmem:[#allocation2 + $0x1dc0] sm:$0xff] }
 0x1a7   :  { %v9420_v44 = vmax.f32 %v4590_v35, 0.0  ;;  %v16975_v45 = vpop.f32.mrb[74].mxu0 }
 0x1a8   :  { %v4605_v46 = vadd.f32 %v20101_v51, %v16975_v45  ;;  %v4599_v47 = vpop.f32.mrb[75].mxu0  ;;  %17133 = vmatmul.mubr.msk.f32.gmra.mrb[180].mxu0 %vm1086_vm0, %v225_v37  ;;  %18279 = vmatmul.mubr.msk.f32.gmra.mrb[180].mxu1 %vm1086_vm0, %v989_v39  ;;  %v233_v37 = vld [vmem:[#allocation2 + $0x5e8] sm:$0xff] }
 0x1a9   :  { %v20138_v49 = vpack.c.bf16 %v9421_v48, %v9420_v44  ;;  %v4600_v50 = vadd.f32 %v20101_v51, %v4599_v47  ;;  %17135 = vmatprep.mubr.msk.f32.mxu0 %vm1086_vm0, %v226_v40  ;;  %18281 = vmatprep.mubr.msk.f32.mxu1 %vm1086_vm0, %v990_v41  ;;  %v997_v39 = vld [vmem:[#allocation2 + $0x1dc8] sm:$0xff]  ;;  %v234_v40 = vld [vmem:[#allocation2 + $0x5f0] sm:$0xff] }
 0x1aa   :  { %v9423_v3 = vmax.f32 %v4605_v46, 0.0  ;;  %v998_v41 = vld [vmem:[#allocation2 + $0x1dd0] sm:$0xff] }
 0x1ab   :  { %v9422_v59 = vmax.f32 %v4600_v50, 0.0  ;;  %v16978_v8 = vpop.f32.mrb[76].mxu0 }
 0x1ac   :  { %v4615_v62 = vadd.f32 %v20101_v51, %v16978_v8  ;;  %v4609_v63 = vpop.f32.mrb[77].mxu0  ;;  %17136 = vmatmul.mubr.msk.f32.gmra.mrb[182].mxu0 %vm1086_vm0, %v227_v52  ;;  %18282 = vmatmul.mubr.msk.f32.gmra.mrb[182].mxu1 %vm1086_vm0, %v991_v54  ;;  %v235_v52 = vld [vmem:[#allocation2 + $0x5f8] sm:$0xff] }
 0x1ad   :  { %v20146_v0 = vpack.c.bf16 %v9423_v3, %v9422_v59  ;;  %v4610_v2 = vadd.f32 %v20101_v51, %v4609_v63  ;;  %17138 = vmatprep.mubr.msk.f32.mxu0 %vm1086_vm0, %v228_v57  ;;  %18284 = vmatprep.mubr.msk.f32.mxu1 %vm1086_vm0, %v992_v58  ;;  %v999_v54 = vld [vmem:[#allocation2 + $0x1dd8] sm:$0xff]  ;;  %v236_v58 = vld [vmem:[#allocation2 + $0x600] sm:$0xff] }
 0x1ae   :  { %v9425_v9 = vmax.f32 %v4615_v62, 0.0  ;;  %v1000_v59 = vld [vmem:[#allocation2 + $0x1de0] sm:$0xff] }
 0x1af   :  { %v9424_v12 = vmax.f32 %v4610_v2, 0.0  ;;  %v16981_v13 = vpop.f32.mrb[78].mxu0 }
 0x1b0   :  { %v4625_v15 = vadd.f32 %v20101_v51, %v16981_v13  ;;  %v4619_v16 = vpop.f32.mrb[79].mxu0  ;;  %17139 = vmatmul.mubr.msk.f32.gmra.mrb[184].mxu0 %vm1086_vm0, %v229_v4  ;;  %18285 = vmatmul.mubr.msk.f32.gmra.mrb[184].mxu1 %vm1086_vm0, %v993_v6  ;;  %v237_v6 = vld [vmem:[#allocation2 + $0x608] sm:$0xff]  ;;  %v1002_v13 = vld [vmem:[#allocation2 + $0x1df0] sm:$0xff] }
 0x1b1   :  { %v20154_v25 = vpack.c.bf16 %v9425_v9, %v9424_v12  ;;  %v4620_v18 = vadd.f32 %v20101_v51, %v4619_v16  ;;  %17141 = vmatprep.mubr.msk.f32.mxu0 %vm1086_vm0, %v230_v10  ;;  %18287 = vmatprep.mubr.msk.f32.mxu1 %vm1086_vm0, %v994_v11  ;;  %v1001_v9 = vld [vmem:[#allocation2 + $0x1de8] sm:$0xff]  ;;  %v238_v12 = vld [vmem:[#allocation2 + $0x610] sm:$0xff] }
 0x1b2   :  { %v9427_v23 = vmax.f32 %v4625_v15, 0.0 }
 0x1b3   :  { %v9426_v27 = vmax.f32 %v4620_v18, 0.0  ;;  %v16984_v36 = vpop.f32.mrb[80].mxu0 }
 0x1b4   :  { %v4635_v28 = vadd.f32 %v20101_v51, %v16984_v36  ;;  %v4629_v32 = vpop.f32.mrb[81].mxu0  ;;  %17142 = vmatmul.mubr.msk.f32.gmra.mrb[186].mxu0 %vm1086_vm0, %v231_v21  ;;  %18288 = vmatmul.mubr.msk.f32.gmra.mrb[186].mxu1 %vm1086_vm0, %v995_v22  ;;  %v20186_v22 = vpop.f32.mrb[0].mxu1 }
 0x1b5   :  { %v20162_v33 = vpack.c.bf16 %v9427_v23, %v9426_v27  ;;  %v4630_v35 = vadd.f32 %v20101_v51, %v4629_v32  ;;  %17144 = vmatprep.mubr.msk.f32.mxu0 %vm1086_vm0, %v232_v24  ;;  %18290 = vmatprep.mubr.msk.f32.mxu1 %vm1086_vm0, %v996_v26  ;;  %v239_v24 = vld [vmem:[#allocation2 + $0x618] sm:$0xff]  ;;  %v20191_v27 = vpop.f32.mrb[1].mxu1  ;;  %v240_v32 = vld [vmem:[#allocation2 + $0x620] sm:$0xff] }
 0x1b6   :  { %v9429_v48 = vmax.f32 %v4635_v28, 0.0  ;;  %v1003_v26 = vld [vmem:[#allocation2 + $0x1df8] sm:$0xff] }
 0x1b7   :  { %v9428_v44 = vmax.f32 %v4630_v35, 0.0  ;;  %v16987_v45 = vpop.f32.mrb[82].mxu0  ;;  %v1004_v35 = vld [vmem:[#allocation2 + $0x1e00] sm:$0xff] }
 0x1b8   :  { %v4645_v46 = vadd.f32 %v20101_v51, %v16987_v45  ;;  %v4639_v47 = vpop.f32.mrb[83].mxu0  ;;  %17145 = vmatmul.mubr.msk.f32.gmra.mrb[188].mxu0 %vm1086_vm0, %v233_v37  ;;  %18291 = vmatmul.mubr.msk.f32.gmra.mrb[188].mxu1 %vm1086_vm0, %v997_v39  ;;  %v241_v45 = vld [vmem:[#allocation2 + $0x628] sm:$0xff] }
 0x1b9   :  { %v4640_v50 = vadd.f32 %v20101_v51, %v4639_v47  ;;  %17147 = vmatprep.mubr.msk.f32.mxu0 %vm1086_vm0, %v234_v40  ;;  %18293 = vmatprep.mubr.msk.f32.mxu1 %vm1086_vm0, %v998_v41  ;;  %v20173_v3 = vpack.c.bf16 %v9429_v48, %v9428_v44  ;;  %v20198_v41 = vpop.f32.mrb[2].mxu1 }
 0x1ba   :  { %v9431_v57 = vmax.f32 %v4645_v46, 0.0  ;;  %v1005_v46 = vld [vmem:[#allocation2 + $0x1e08] sm:$0xff]  ;;  %v20203_v47 = vpop.f32.mrb[3].mxu1 }
 0x1bb   :  { %v9430_v8 = vmax.f32 %v4640_v50, 0.0  ;;  %v16990_v62 = vpop.f32.mrb[84].mxu0 }
 0x1bc   :  { %v4655_v63 = vadd.f32 %v20101_v51, %v16990_v62  ;;  %v4649_v2 = vpop.f32.mrb[85].mxu0  ;;  %17148 = vmatmul.mubr.msk.f32.gmra.mrb[190].mxu0 %vm1086_vm0, %v235_v52  ;;  %18294 = vmatmul.mubr.msk.f32.gmra.mrb[190].mxu1 %vm1086_vm0, %v999_v54  ;;  %v242_v54 = vld [vmem:[#allocation2 + $0x630] sm:$0xff] }
 0x1bd   :  { %v4650_v4 = vadd.f32 %v20101_v51, %v4649_v2  ;;  %17150 = vmatprep.mubr.msk.f32.mxu0 %vm1086_vm0, %v236_v58  ;;  %18296 = vmatprep.mubr.msk.f32.mxu1 %vm1086_vm0, %v1000_v59  ;;  %v20181_v10 = vpack.c.bf16 %v9431_v57, %v9430_v8  ;;  %v1006_v57 = vld [vmem:[#allocation2 + $0x1e10] sm:$0xff] }
 0x1be   :  { %v9433_v11 = vmax.f32 %v4655_v63, 0.0  ;;  %v18016_v63 = vpop.f32.mrb[4].mxu1 }
 0x1bf   :  { %v9432_v15 = vmax.f32 %v4650_v4, 0.0  ;;  %v16993_v16 = vpop.f32.mrb[86].mxu0  ;;  %v243_v4 = vld [vmem:[#allocation2 + $0x638] sm:$0xff] }
 0x1c0   :  { %v4665_v18 = vadd.f32 %v20101_v51, %v16993_v16  ;;  %v4659_v21 = vpop.f32.mrb[87].mxu0  ;;  %17151 = vmatmul.mubr.msk.f32.gmra.mrb[192].mxu0 %vm1086_vm0, %v237_v6  ;;  %18297 = vmatmul.mubr.msk.f32.gmra.mrb[192].mxu1 %vm1086_vm0, %v1001_v9  ;;  %v1007_v6 = vld [vmem:[#allocation2 + $0x1e18] sm:$0xff]  ;;  %v8069_v9 = vpop.f32.mrb[5].mxu1  ;;  %v8075_v16 = vadd.f32 %v20101_v51, %v18016_v63 }
 0x1c1   :  { %v4660_v23 = vadd.f32 %v20101_v51, %v4659_v21  ;;  %17153 = vmatprep.mubr.msk.f32.mxu0 %vm1086_vm0, %v238_v12  ;;  %18299 = vmatprep.mubr.msk.f32.mxu1 %vm1086_vm0, %v1002_v13  ;;  %v20193_v36 = vpack.c.bf16 %v9433_v11, %v9432_v15  ;;  %v244_v13 = vld [vmem:[#allocation2 + $0x640] sm:$0xff] }
 0x1c2   :  { %v9435_v28 = vmax.f32 %v4665_v18, 0.0  ;;  %v1008_v15 = vld [vmem:[#allocation2 + $0x1e20] sm:$0xff] }
 0x1c3   :  { %v9434_v37 = vmax.f32 %v4660_v23, 0.0  ;;  %v16996_v39 = vpop.f32.mrb[88].mxu0  ;;  %v8070_v23 = vadd.f32 %v20101_v51, %v8069_v9 }
 0x1c4   :  { %v4675_v48 = vadd.f32 %v20101_v51, %v16996_v39  ;;  %v4669_v40 = vpop.f32.mrb[89].mxu0  ;;  %17154 = vmatmul.mubr.msk.f32.gmra.mrb[194].mxu0 %vm1086_vm0, %v239_v24  ;;  %18300 = vmatmul.mubr.msk.f32.gmra.mrb[194].mxu1 %vm1086_vm0, %v1003_v26 }
 0x1c5   :  { %v4670_v44 = vadd.f32 %v20101_v51, %v4669_v40  ;;  %17156 = vmatprep.mubr.msk.f32.mxu0 %vm1086_vm0, %v240_v32  ;;  %18302 = vmatprep.mubr.msk.f32.mxu1 %vm1086_vm0, %v1004_v35  ;;  %v20205_v50 = vpack.c.bf16 %v9435_v28, %v9434_v37  ;;  %v10117_v28 = vmax.f32 %v8075_v16, 0.0  ;;  %v245_v35 = vld [vmem:[#allocation2 + $0x648] sm:$0xff]  ;;  %v10116_v39 = vmax.f32 %v8070_v23, 0.0 }
 0x1c6   :  { %v9437_v52 = vmax.f32 %v4675_v48, 0.0  ;;  %v1009_v37 = vld [vmem:[#allocation2 + $0x1e28] sm:$0xff] }
 0x1c7   :  { %v9436_v58 = vmax.f32 %v4670_v44, 0.0  ;;  %v16999_v59 = vpop.f32.mrb[90].mxu0  ;;  %v246_v44 = vld [vmem:[#allocation2 + $0x650] sm:$0xff] }
 0x1c8   :  { %v4685_v8 = vadd.f32 %v20101_v51, %v16999_v59  ;;  %v4679_v62 = vpop.f32.mrb[91].mxu0  ;;  %17157 = vmatmul.mubr.msk.f32.gmra.mrb[196].mxu0 %vm1086_vm0, %v241_v45  ;;  %18303 = vmatmul.mubr.msk.f32.gmra.mrb[196].mxu1 %vm1086_vm0, %v1005_v46  ;;  %v1010_v45 = vld [vmem:[#allocation2 + $0x1e30] sm:$0xff] }
 0x1c9   :  { %v4680_v2 = vadd.f32 %v20101_v51, %v4679_v62  ;;  %17159 = vmatprep.mubr.msk.f32.mxu0 %vm1086_vm0, %v242_v54  ;;  %18305 = vmatprep.mubr.msk.f32.mxu1 %vm1086_vm0, %v1006_v57  ;;  %v20213_v11 = vpack.c.bf16 %v9437_v52, %v9436_v58  ;;  %v20225_v54 = vpack.c.bf16 %v10117_v28, %v10116_v39  ;;  %v1011_v62 = vld [vmem:[#allocation2 + $0x1e38] sm:$0xff]  ;;  %v1014_v28 = vld [vmem:[#allocation2 + $0x1e50] sm:$0xff] }
 0x1ca   :  { %v9439_v12 = vmax.f32 %v4685_v8, 0.0  ;;  %v247_v8 = vld [vmem:[#allocation2 + $0x658] sm:$0xff] }
 0x1cb   :  { %v9438_v18 = vmax.f32 %v4680_v2, 0.0  ;;  %v17002_v21 = vpop.f32.mrb[92].mxu0  ;;  %24050 = vst [vmem:[#allocation11_spill] sm:$0xff] %v20225_v54 }
 0x1cc   :  { %v4695_v24 = vadd.f32 %v20101_v51, %v17002_v21  ;;  %v4689_v26 = vpop.f32.mrb[93].mxu0  ;;  %17160 = vmatmul.mubr.msk.f32.gmra.mrb[198].mxu0 %vm1086_vm0, %v243_v4  ;;  %18306 = vmatmul.mubr.msk.f32.gmra.mrb[198].mxu1 %vm1086_vm0, %v1007_v6  ;;  %v248_v4 = vld [vmem:[#allocation2 + $0x660] sm:$0xff]  ;;  %v1013_v21 = vld [vmem:[#allocation2 + $0x1e48] sm:$0xff] }
 0x1cd   :  { %v4690_v32 = vadd.f32 %v20101_v51, %v4689_v26  ;;  %17162 = vmatprep.mubr.msk.f32.mxu0 %vm1086_vm0, %v244_v13  ;;  %18308 = vmatprep.mubr.msk.f32.mxu1 %vm1086_vm0, %v1008_v15  ;;  %v20223_v48 = vpack.c.bf16 %v9439_v12, %v9438_v18  ;;  %v1012_v6 = vld [vmem:[#allocation2 + $0x1e40] sm:$0xff]  ;;  %v249_v18 = vld [vmem:[#allocation2 + $0x668] sm:$0xff]  ;;  %v250_v26 = vld [vmem:[#allocation2 + $0x670] sm:$0xff] }
 0x1ce   :  { %v9441_v40 = vmax.f32 %v4695_v24, 0.0 }
 0x1cf   :  { %v9440_v46 = vmax.f32 %v4690_v32, 0.0  ;;  %v17005_v52 = vpop.f32.mrb[94].mxu0 }
 0x1d0   :  { %v4705_v57 = vadd.f32 %v20101_v51, %v17005_v52  ;;  %v4699_v58 = vpop.f32.mrb[95].mxu0  ;;  %17163 = vmatmul.mubr.msk.f32.gmra.mrb[200].mxu0 %vm1086_vm0, %v245_v35  ;;  %18309 = vmatmul.mubr.msk.f32.gmra.mrb[200].mxu1 %vm1086_vm0, %v1009_v37 }
 0x1d1   :  { %v4700_v59 = vadd.f32 %v20101_v51, %v4699_v58  ;;  %17165 = vmatprep.mubr.msk.f32.mxu0 %vm1086_vm0, %v246_v44  ;;  %18311 = vmatprep.mubr.msk.f32.mxu1 %vm1086_vm0, %v1010_v45  ;;  %v20233_v63 = vpack.c.bf16 %v9441_v40, %v9440_v46  ;;  %v251_v45 = vld [vmem:[#allocation2 + $0x678] sm:$0xff]  ;;  %v1016_v58 = vld [vmem:[#allocation2 + $0x1e60] sm:$0xff] }
 0x1d2   :  { %v9443_v2 = vmax.f32 %v4705_v57, 0.0  ;;  %v1015_v46 = vld [vmem:[#allocation2 + $0x1e58] sm:$0xff]  ;;  %v252_v57 = vld [vmem:[#allocation2 + $0x680] sm:$0xff] }
 0x1d3   :  { %v9442_v9 = vmax.f32 %v4700_v59, 0.0  ;;  %v17008_v12 = vpop.f32.mrb[96].mxu0 }
 0x1d4   :  { %v4715_v13 = vadd.f32 %v20101_v51, %v17008_v12  ;;  %v4709_v15 = vpop.f32.mrb[97].mxu0  ;;  %17166 = vmatmul.mubr.msk.f32.gmra.mrb[202].mxu0 %vm1086_vm0, %v247_v8  ;;  %18312 = vmatmul.mubr.msk.f32.gmra.mrb[202].mxu1 %vm1086_vm0, %v1011_v62  ;;  %v253_v12 = vld [vmem:[#allocation2 + $0x688] sm:$0xff] }
 0x1d5   :  { %v4710_v16 = vadd.f32 %v20101_v51, %v4709_v15  ;;  %17168 = vmatprep.mubr.msk.f32.mxu0 %vm1086_vm0, %v248_v4  ;;  %18314 = vmatprep.mubr.msk.f32.mxu1 %vm1086_vm0, %v1012_v6  ;;  %v20241_v23 = vpack.c.bf16 %v9443_v2, %v9442_v9  ;;  %v18019_v4 = vpop.f32.mrb[6].mxu1 }
 0x1d6   :  { %v9445_v24 = vmax.f32 %v4715_v13, 0.0  ;;  %v1017_v13 = vld [vmem:[#allocation2 + $0x1e68] sm:$0xff]  ;;  %v8079_v15 = vpop.f32.mrb[7].mxu1 }
 0x1d7   :  { %v9444_v32 = vmax.f32 %v4710_v16, 0.0  ;;  %v17011_v35 = vpop.f32.mrb[98].mxu0 }
 0x1d8   :  { %v4725_v37 = vadd.f32 %v20101_v51, %v17011_v35  ;;  %v4719_v39 = vpop.f32.mrb[99].mxu0  ;;  %17169 = vmatmul.mubr.msk.f32.gmra.mrb[204].mxu0 %vm1086_vm0, %v249_v18  ;;  %18315 = vmatmul.mubr.msk.f32.gmra.mrb[204].mxu1 %vm1086_vm0, %v1013_v21  ;;  %v254_v18 = vld [vmem:[#allocation2 + $0x690] sm:$0xff] }
 0x1d9   :  { %v20246_v40 = vpack.c.bf16 %v9445_v24, %v9444_v32  ;;  %v4720_v44 = vadd.f32 %v20101_v51, %v4719_v39  ;;  %17171 = vmatprep.mubr.msk.f32.mxu0 %vm1086_vm0, %v250_v26  ;;  %18317 = vmatprep.mubr.msk.f32.mxu1 %vm1086_vm0, %v1014_v28  ;;  %v1018_v21 = vld [vmem:[#allocation2 + $0x1e70] sm:$0xff]  ;;  %v8085_v24 = vadd.f32 %v20101_v51, %v18019_v4 }
 0x1da   :  { %v9447_v52 = vmax.f32 %v4725_v37, 0.0  ;;  %v18022_v37 = vpop.f32.mrb[8].mxu1 }
 0x1db   :  { %v9446_v59 = vmax.f32 %v4720_v44, 0.0  ;;  %v17014_v8 = vpop.f32.mrb[100].mxu0 }
 0x1dc   :  { %v4735_v62 = vadd.f32 %v20101_v51, %v17014_v8  ;;  %v4729_v2 = vpop.f32.mrb[101].mxu0  ;;  %17172 = vmatmul.mubr.msk.f32.gmra.mrb[206].mxu0 %vm1086_vm0, %v251_v45  ;;  %18318 = vmatmul.mubr.msk.f32.gmra.mrb[206].mxu1 %vm1086_vm0, %v1015_v46  ;;  %v255_v45 = vld [vmem:[#allocation2 + $0x698] sm:$0xff]  ;;  %v256_v8 = vld [vmem:[#allocation2 + $0x6a0] sm:$0xff] }
 0x1dd   :  { %v20254_v6 = vpack.c.bf16 %v9447_v52, %v9446_v59  ;;  %v4730_v9 = vadd.f32 %v20101_v51, %v4729_v2  ;;  %17174 = vmatprep.mubr.msk.f32.mxu0 %vm1086_vm0, %v252_v57  ;;  %18320 = vmatprep.mubr.msk.f32.mxu1 %vm1086_vm0, %v1016_v58  ;;  %v1019_v46 = vld [vmem:[#allocation2 + $0x1e78] sm:$0xff]  ;;  %v10119_v52 = vmax.f32 %v8085_v24, 0.0  ;;  %v8080_v57 = vadd.f32 %v20101_v51, %v8079_v15  ;;  %v8089_v58 = vpop.f32.mrb[9].mxu1  ;;  %v257_v24 = vld [vmem:[#allocation2 + $0x6a8] sm:$0xff] }
 0x1de   :  { %v9449_v16 = vmax.f32 %v4735_v62, 0.0  ;;  %v1020_v62 = vld [vmem:[#allocation2 + $0x1e80] sm:$0xff]  ;;  %v8095_v2 = vadd.f32 %v20101_v51, %v18022_v37  ;;  %v258_v37 = vld [vmem:[#allocation2 + $0x6b0] sm:$0xff] }
 0x1df   :  { %v9448_v26 = vmax.f32 %v4730_v9, 0.0  ;;  %v17017_v28 = vpop.f32.mrb[102].mxu0 }
 0x1e0   :  { %v4745_v32 = vadd.f32 %v20101_v51, %v17017_v28  ;;  %v4739_v35 = vpop.f32.mrb[103].mxu0  ;;  %17175 = vmatmul.mubr.msk.f32.gmra.mrb[208].mxu0 %vm1086_vm0, %v253_v12  ;;  %18321 = vmatmul.mubr.msk.f32.gmra.mrb[208].mxu1 %vm1086_vm0, %v1017_v13  ;;  %v10118_v12 = vmax.f32 %v8080_v57, 0.0 }
 0x1e1   :  { %v20263_v39 = vpack.c.bf16 %v9449_v16, %v9448_v26  ;;  %v4740_v44 = vadd.f32 %v20101_v51, %v4739_v35  ;;  %17177 = vmatprep.mubr.msk.f32.mxu0 %vm1086_vm0, %v254_v18  ;;  %18323 = vmatprep.mubr.msk.f32.mxu1 %vm1086_vm0, %v1018_v21  ;;  %v18025_v18 = vpop.f32.mrb[10].mxu1  ;;  %v1021_v26 = vld [vmem:[#allocation2 + $0x1e88] sm:$0xff] }
 0x1e2   :  { %v9451_v59 = vmax.f32 %v4745_v32, 0.0  ;;  %v20278_v28 = vpack.c.bf16 %v10119_v52, %v10118_v12  ;;  %v8099_v32 = vpop.f32.mrb[11].mxu1  ;;  %v8105_v57 = vadd.f32 %v20101_v51, %v18025_v18 }
 0x1e3   :  { %v9450_v4 = vmax.f32 %v4740_v44, 0.0  ;;  %v17020_v9 = vpop.f32.mrb[104].mxu0  ;;  %v1022_v44 = vld [vmem:[#allocation2 + $0x1e90] sm:$0xff]  ;;  %v8100_v18 = vadd.f32 %v20101_v51, %v8099_v32 }
 0x1e4   :  { %v4755_v13 = vadd.f32 %v20101_v51, %v17020_v9  ;;  %v4749_v16 = vpop.f32.mrb[105].mxu0  ;;  %17178 = vmatmul.mubr.msk.f32.gmra.mrb[210].mxu0 %vm1086_vm0, %v255_v45  ;;  %18324 = vmatmul.mubr.msk.f32.gmra.mrb[210].mxu1 %vm1086_vm0, %v1019_v46  ;;  %24052 = vst [vmem:[#allocation13_spill] sm:$0xff] %v20278_v28  ;;  %v10121_v45 = vmax.f32 %v8095_v2, 0.0  ;;  %v8090_v46 = vadd.f32 %v20101_v51, %v8089_v58  ;;  %v259_v58 = vld [vmem:[#allocation2 + $0x6b8] sm:$0xff]  ;;  %v1024_v28 = vld [vmem:[#allocation2 + $0x1ea0] sm:$0xff] }
 0x1e5   :  { %v20273_v21 = vpack.c.bf16 %v9451_v59, %v9450_v4  ;;  %v4750_v15 = vadd.f32 %v20101_v51, %v4749_v16  ;;  %17180 = vmatprep.mubr.msk.f32.mxu0 %vm1086_vm0, %v256_v8  ;;  %18326 = vmatprep.mubr.msk.f32.mxu1 %vm1086_vm0, %v1020_v62  ;;  %v18028_v62 = vpop.f32.mrb[12].mxu1  ;;  %v1023_v2 = vld [vmem:[#allocation2 + $0x1e98] sm:$0xff]  ;;  %v10123_v16 = vmax.f32 %v8105_v57, 0.0  ;;  %v1025_v57 = vld [vmem:[#allocation2 + $0x1ea8] sm:$0xff] }
 0x1e6   :  { %v9453_v35 = vmax.f32 %v4755_v13, 0.0  ;;  %v10120_v52 = vmax.f32 %v8090_v46, 0.0 }
 0x1e7   :  { %24051 = vst [vmem:[#allocation12_spill] sm:$0xff] %v20273_v21  ;;  %v9452_v59 = vmax.f32 %v4750_v15, 0.0  ;;  %v17023_v4 = vpop.f32.mrb[106].mxu0  ;;  %v8109_v15 = vpop.f32.mrb[13].mxu1 }
 0x1e8   :  { %v4765_v9 = vadd.f32 %v20101_v51, %v17023_v4  ;;  %v4759_v8 = vpop.f32.mrb[107].mxu0  ;;  %17181 = vmatmul.mubr.msk.f32.gmra.mrb[212].mxu0 %vm1086_vm0, %v257_v24  ;;  %18327 = vmatmul.mubr.msk.f32.gmra.mrb[212].mxu1 %vm1086_vm0, %v1021_v26  ;;  %v260_v24 = vld [vmem:[#allocation2 + $0x6c0] sm:$0xff]  ;;  %v20291_v26 = vpack.c.bf16 %v10121_v45, %v10120_v52  ;;  %v261_v45 = vld [vmem:[#allocation2 + $0x6c8] sm:$0xff] }
 0x1e9   :  { %v20285_v12 = vpack.c.bf16 %v9453_v35, %v9452_v59  ;;  %v4760_v13 = vadd.f32 %v20101_v51, %v4759_v8  ;;  %17183 = vmatprep.mubr.msk.f32.mxu0 %vm1086_vm0, %v258_v37  ;;  %18329 = vmatprep.mubr.msk.f32.mxu1 %vm1086_vm0, %v1022_v44  ;;  %v8115_v35 = vadd.f32 %v20101_v51, %v18028_v62  ;;  %v10122_v8 = vmax.f32 %v8100_v18, 0.0  ;;  %v262_v62 = vld [vmem:[#allocation2 + $0x6d0] sm:$0xff] }
 0x1ea   :  { %v9455_v4 = vmax.f32 %v4765_v9, 0.0  ;;  %24054 = vst [vmem:[#allocation15_spill] sm:$0xff] %v20291_v26 }
 0x1eb   :  { %24053 = vst [vmem:[#allocation14_spill] sm:$0xff] %v20285_v12  ;;  %v9454_v46 = vmax.f32 %v4760_v13, 0.0  ;;  %v17026_v59 = vpop.f32.mrb[108].mxu0  ;;  %v20302_v9 = vpack.c.bf16 %v10123_v16, %v10122_v8  ;;  %v1026_v13 = vld [vmem:[#allocation2 + $0x1eb0] sm:$0xff]  ;;  %v10125_v18 = vmax.f32 %v8115_v35, 0.0  ;;  %v264_v8 = vld [vmem:[#allocation2 + $0x6e0] sm:$0xff] }
 0x1ec   :  { %v4775_v37 = vadd.f32 %v20101_v51, %v17026_v59  ;;  %v4769_v54 = vpop.f32.mrb[109].mxu0  ;;  %17184 = vmatmul.mubr.msk.f32.gmra.mrb[214].mxu0 %vm1086_vm0, %v259_v58  ;;  %18330 = vmatmul.mubr.msk.f32.gmra.mrb[214].mxu1 %vm1086_vm0, %v1023_v2  ;;  %v8110_v58 = vadd.f32 %v20101_v51, %v8109_v15  ;;  %v1027_v15 = vld [vmem:[#allocation2 + $0x1eb8] sm:$0xff] }
 0x1ed   :  { %v20297_v44 = vpack.c.bf16 %v9455_v4, %v9454_v46  ;;  %v4770_v32 = vadd.f32 %v20101_v51, %v4769_v54  ;;  %17186 = vmatprep.mubr.msk.f32.mxu0 %vm1086_vm0, %v260_v24  ;;  %18332 = vmatprep.mubr.msk.f32.mxu1 %vm1086_vm0, %v1024_v28  ;;  %24056 = vst [vmem:[#allocation17_spill] sm:$0xff] %v20302_v9  ;;  %v263_v24 = vld [vmem:[#allocation2 + $0x6d8] sm:$0xff] }
 0x1ee   :  { %v9457_v52 = vmax.f32 %v4775_v37, 0.0  ;;  %v10124_v54 = vmax.f32 %v8110_v58, 0.0  ;;  %v1028_v37 = vld [vmem:[#allocation2 + $0x1ec0] sm:$0xff] }
 0x1ef   :  { %24055 = vst [vmem:[#allocation16_spill] sm:$0xff] %v20297_v44  ;;  %v9456_v59 = vmax.f32 %v4770_v32, 0.0  ;;  %v17029_v2 = vpop.f32.mrb[110].mxu0  ;;  %v1036_v44 = vld [vmem:[#allocation2 + $0x1f00] sm:$0xff] }
 0x1f0   :  { %v4785_v4 = vadd.f32 %v20101_v51, %v17029_v2  ;;  %v4779_v46 = vpop.f32.mrb[111].mxu0  ;;  %17187 = vmatmul.mubr.msk.f32.gmra.mrb[216].mxu0 %vm1086_vm0, %v261_v45  ;;  %18333 = vmatmul.mubr.msk.f32.gmra.mrb[216].mxu1 %vm1086_vm0, %v1025_v57  ;;  %v20313_v32 = vpack.c.bf16 %v10125_v18, %v10124_v54  ;;  %v1029_v18 = vld [vmem:[#allocation2 + $0x1ec8] sm:$0xff] }
 0x1f1   :  { %v20308_v28 = vpack.c.bf16 %v9457_v52, %v9456_v59  ;;  %v4780_v16 = vadd.f32 %v20101_v51, %v4779_v46  ;;  %17189 = vmatprep.mubr.msk.f32.mxu0 %vm1086_vm0, %v262_v62  ;;  %18335 = vmatprep.mubr.msk.f32.mxu1 %vm1086_vm0, %v1026_v13  ;;  %v265_v13 = vld [vmem:[#allocation2 + $0x6e8] sm:$0xff]  ;;  %v1030_v46 = vld [vmem:[#allocation2 + $0x1ed0] sm:$0xff] }
 0x1f2   :  { %v9459_v35 = vmax.f32 %v4785_v4, 0.0  ;;  %24058 = vst [vmem:[#allocation19_spill] sm:$0xff] %v20313_v32  ;;  %v266_v4 = vld [vmem:[#allocation2 + $0x6f0] sm:$0xff] }
 0x1f3   :  { %24057 = vst [vmem:[#allocation18_spill] sm:$0xff] %v20308_v28  ;;  %v9458_v2 = vmax.f32 %v4780_v16, 0.0  ;;  %v17032_v45 = vpop.f32.mrb[112].mxu0  ;;  %v272_v28 = vld [vmem:[#allocation2 + $0x720] sm:$0xff] }
 0x1f4   :  { %v4795_v57 = vadd.f32 %v20101_v51, %v17032_v45  ;;  %v4789_v58 = vpop.f32.mrb[113].mxu0  ;;  %17190 = vmatmul.mubr.msk.f32.gmra.mrb[218].mxu0 %vm1086_vm0, %v263_v24  ;;  %18336 = vmatmul.mubr.msk.f32.gmra.mrb[218].mxu1 %vm1086_vm0, %v1027_v15 }
 0x1f5   :  { %v20318_v52 = vpack.c.bf16 %v9459_v35, %v9458_v2  ;;  %v4790_v62 = vadd.f32 %v20101_v51, %v4789_v58  ;;  %17192 = vmatprep.mubr.msk.f32.mxu0 %vm1086_vm0, %v264_v8  ;;  %18338 = vmatprep.mubr.msk.f32.mxu1 %vm1086_vm0, %v1028_v37  ;;  %v267_v35 = vld [vmem:[#allocation2 + $0x6f8] sm:$0xff]  ;;  %v1032_v58 = vld [vmem:[#allocation2 + $0x1ee0] sm:$0xff] }
 0x1f6   :  { %v9461_v59 = vmax.f32 %v4795_v57, 0.0  ;;  %v1031_v8 = vld [vmem:[#allocation2 + $0x1ed8] sm:$0xff]  ;;  %v268_v57 = vld [vmem:[#allocation2 + $0x700] sm:$0xff] }
 0x1f7   :  { %24059 = vst [vmem:[#allocation20_spill] sm:$0xff] %v20318_v52  ;;  %v9460_v54 = vmax.f32 %v4790_v62, 0.0  ;;  %v17035_v16 = vpop.f32.mrb[114].mxu0 }
 0x1f8   :  { %v4805_v45 = vadd.f32 %v20101_v51, %v17035_v16  ;;  %v4799_v24 = vpop.f32.mrb[115].mxu0  ;;  %17193 = vmatmul.mubr.msk.f32.gmra.mrb[220].mxu0 %vm1086_vm0, %v265_v13  ;;  %18339 = vmatmul.mubr.msk.f32.gmra.mrb[220].mxu1 %vm1086_vm0, %v1029_v18  ;;  %v18031_v18 = vpop.f32.mrb[14].mxu1 }
 0x1f9   :  { %v4800_v15 = vadd.f32 %v20101_v51, %v4799_v24  ;;  %17195 = vmatprep.mubr.msk.f32.mxu0 %vm1086_vm0, %v266_v4  ;;  %18341 = vmatprep.mubr.msk.f32.mxu1 %vm1086_vm0, %v1030_v46  ;;  %v20329_v37 = vpack.c.bf16 %v9461_v59, %v9460_v54  ;;  %v269_v59 = vld [vmem:[#allocation2 + $0x708] sm:$0xff]  ;;  %v8119_v54 = vpop.f32.mrb[15].mxu1  ;;  %v8125_v9 = vadd.f32 %v20101_v51, %v18031_v18 }
 0x1fa   :  { %v9463_v2 = vmax.f32 %v4805_v45, 0.0  ;;  %v1033_v46 = vld [vmem:[#allocation2 + $0x1ee8] sm:$0xff] }
 0x1fb   :  { %v9462_v62 = vmax.f32 %v4800_v15, 0.0  ;;  %v17038_v16 = vpop.f32.mrb[116].mxu0  ;;  %v270_v15 = vld [vmem:[#allocation2 + $0x710] sm:$0xff] }
 0x1fc   :  { %v4815_v32 = vadd.f32 %v20101_v51, %v17038_v16  ;;  %v4809_v13 = vpop.f32.mrb[117].mxu0  ;;  %17196 = vmatmul.mubr.msk.f32.gmra.mrb[222].mxu0 %vm1086_vm0, %v267_v35  ;;  %18342 = vmatmul.mubr.msk.f32.gmra.mrb[222].mxu1 %vm1086_vm0, %v1031_v8  ;;  %v1034_v16 = vld [vmem:[#allocation2 + $0x1ef0] sm:$0xff]  ;;  %v8120_v8 = vadd.f32 %v20101_v51, %v8119_v54 }
 0x1fd   :  { %v4810_v4 = vadd.f32 %v20101_v51, %v4809_v13  ;;  %17198 = vmatprep.mubr.msk.f32.mxu0 %vm1086_vm0, %v268_v57  ;;  %18344 = vmatprep.mubr.msk.f32.mxu1 %vm1086_vm0, %v1032_v58  ;;  %v20337_v45 = vpack.c.bf16 %v9463_v2, %v9462_v62  ;;  %v10127_v57 = vmax.f32 %v8125_v9, 0.0  ;;  %v18034_v58 = vpop.f32.mrb[16].mxu1  ;;  %v1035_v62 = vld [vmem:[#allocation2 + $0x1ef8] sm:$0xff] }
 0x1fe   :  { %v9465_v24 = vmax.f32 %v4815_v32, 0.0  ;;  %v271_v32 = vld [vmem:[#allocation2 + $0x718] sm:$0xff]  ;;  %v10126_v18 = vmax.f32 %v8120_v8, 0.0 }
 0x1ff   :  { %v9464_v35 = vmax.f32 %v4810_v4, 0.0  ;;  %v17041_v26 = vpop.f32.mrb[118].mxu0  ;;  %v8129_v4 = vpop.f32.mrb[17].mxu1 }
 0x200   :  { %v4825_v13 = vadd.f32 %v20101_v51, %v17041_v26  ;;  %v4819_v52 = vpop.f32.mrb[119].mxu0  ;;  %17199 = vmatmul.mubr.msk.f32.gmra.mrb[224].mxu0 %vm1086_vm0, %v269_v59  ;;  %18345 = vmatmul.mubr.msk.f32.gmra.mrb[224].mxu1 %vm1086_vm0, %v1033_v46  ;;  %v8135_v59 = vadd.f32 %v20101_v51, %v18034_v58  ;;  %v20350_v12 = vpack.c.bf16 %v10127_v57, %v10126_v18  ;;  %v1037_v57 = vld [vmem:[#allocation2 + $0x1f08] sm:$0xff] }
 0x201   :  { %v4820_v2 = vadd.f32 %v20101_v51, %v4819_v52  ;;  %17201 = vmatprep.mubr.msk.f32.mxu0 %vm1086_vm0, %v270_v15  ;;  %18347 = vmatprep.mubr.msk.f32.mxu1 %vm1086_vm0, %v1034_v16  ;;  %v20347_v54 = vpack.c.bf16 %v9465_v24, %v9464_v35  ;;  %v8130_v52 = vadd.f32 %v20101_v51, %v8129_v4  ;;  %v18037_v35 = vpop.f32.mrb[18].mxu1 }
 0x202   :  { %v9467_v26 = vmax.f32 %v4825_v13, 0.0  ;;  %24060 = vst [vmem:[#allocation21_spill] sm:$0xff] %v20350_v12  ;;  %v10129_v24 = vmax.f32 %v8135_v59, 0.0  ;;  %v273_v13 = vld [vmem:[#allocation2 + $0x728] sm:$0xff]  ;;  %v1038_v12 = vld [vmem:[#allocation2 + $0x1f10] sm:$0xff] }
 0x203   :  { %v9466_v46 = vmax.f32 %v4820_v2, 0.0  ;;  %v17044_v9 = vpop.f32.mrb[120].mxu0  ;;  %v10128_v58 = vmax.f32 %v8130_v52, 0.0  ;;  %v8139_v2 = vpop.f32.mrb[19].mxu1 }
 0x204   :  { %v4835_v15 = vadd.f32 %v20101_v51, %v17044_v9  ;;  %v4829_v16 = vpop.f32.mrb[121].mxu0  ;;  %17202 = vmatmul.mubr.msk.f32.gmra.mrb[226].mxu0 %vm1086_vm0, %v271_v32  ;;  %18348 = vmatmul.mubr.msk.f32.gmra.mrb[226].mxu1 %vm1086_vm0, %v1035_v62  ;;  %v274_v9 = vld [vmem:[#allocation2 + $0x730] sm:$0xff]  ;;  %v8145_v32 = vadd.f32 %v20101_v51, %v18037_v35 }
 0x205   :  { %v4830_v8 = vadd.f32 %v20101_v51, %v4829_v16  ;;  %17204 = vmatprep.mubr.msk.f32.mxu0 %vm1086_vm0, %v272_v28  ;;  %18350 = vmatprep.mubr.msk.f32.mxu1 %vm1086_vm0, %v1036_v44  ;;  %v20359_v18 = vpack.c.bf16 %v9467_v26, %v9466_v46  ;;  %v20362_v21 = vpack.c.bf16 %v10129_v24, %v10128_v58  ;;  %v20368_v46 = vpop.f32.mrb[20].mxu1  ;;  %v1039_v24 = vld [vmem:[#allocation2 + $0x1f18] sm:$0xff] }
 0x206   :  { %v9469_v4 = vmax.f32 %v4835_v15, 0.0  ;;  %v8140_v16 = vadd.f32 %v20101_v51, %v8139_v2  ;;  %v10131_v26 = vmax.f32 %v8145_v32, 0.0  ;;  %24062 = vst [vmem:[#allocation23_spill] sm:$0xff] %v20368_v46  ;;  %v275_v15 = vld [vmem:[#allocation2 + $0x738] sm:$0xff] }
 0x207   :  { %v9468_v62 = vmax.f32 %v4830_v8, 0.0  ;;  %v17047_v59 = vpop.f32.mrb[122].mxu0  ;;  %24061 = vst [vmem:[#allocation22_spill] sm:$0xff] %v20362_v21  ;;  %v20373_v8 = vpop.f32.mrb[21].mxu1 }
 0x208   :  { %v4845_v28 = vadd.f32 %v20101_v51, %v17047_v59  ;;  %v4839_v44 = vpop.f32.mrb[123].mxu0  ;;  %17205 = vmatmul.mubr.msk.f32.gmra.mrb[228].mxu0 %vm1086_vm0, %v273_v13  ;;  %18351 = vmatmul.mubr.msk.f32.gmra.mrb[228].mxu1 %vm1086_vm0, %v1037_v57  ;;  %v10130_v35 = vmax.f32 %v8140_v16, 0.0  ;;  %24063 = vst [vmem:[#allocation24_spill] sm:$0xff] %v20373_v8  ;;  %v276_v13 = vld [vmem:[#allocation2 + $0x740] sm:$0xff] }
 0x209   :  { %v4840_v52 = vadd.f32 %v20101_v51, %v4839_v44  ;;  %17207 = vmatprep.mubr.msk.f32.mxu0 %vm1086_vm0, %v274_v9  ;;  %18353 = vmatprep.mubr.msk.f32.mxu1 %vm1086_vm0, %v1038_v12  ;;  %v20375_v58 = vpack.c.bf16 %v9469_v4, %v9468_v62  ;;  %v1040_v59 = vld [vmem:[#allocation2 + $0x1f20] sm:$0xff]  ;;  %v277_v4 = vld [vmem:[#allocation2 + $0x748] sm:$0xff] }
 0x20a   :  { %v9471_v2 = vmax.f32 %v4845_v28, 0.0  ;;  %v20377_v21 = vpack.c.bf16 %v10131_v26, %v10130_v35  ;;  %v1041_v9 = vld [vmem:[#allocation2 + $0x1f28] sm:$0xff]  ;;  %v278_v28 = vld [vmem:[#allocation2 + $0x750] sm:$0xff] }
 0x20b   :  { %v9470_v57 = vmax.f32 %v4840_v52, 0.0  ;;  %v17050_v32 = vpop.f32.mrb[124].mxu0  ;;  %v1042_v26 = vld [vmem:[#allocation2 + $0x1f30] sm:$0xff] }
 0x20c   :  { %24064 = vst [vmem:[#allocation25_spill] sm:$0xff] %v20377_v21  ;;  %v4855_v44 = vadd.f32 %v20101_v51, %v17050_v32  ;;  %v4849_v46 = vpop.f32.mrb[125].mxu0  ;;  %17208 = vmatmul.mubr.msk.f32.gmra.mrb[230].mxu0 %vm1086_vm0, %v275_v15  ;;  %18354 = vmatmul.mubr.msk.f32.gmra.mrb[230].mxu1 %vm1086_vm0, %v1039_v24  ;;  %v20387_v32 = vld [vmem:[#allocation5] ss:$0 sm:$0xff] }
 0x20d   :  { %v4850_v12 = vadd.f32 %v20101_v51, %v4849_v46  ;;  %17210 = vmatprep.mubr.msk.f32.mxu0 %vm1086_vm0, %v276_v13  ;;  %18356 = vmatprep.mubr.msk.f32.mxu1 %vm1086_vm0, %v1040_v59  ;;  %v20385_v62 = vpack.c.bf16 %v9471_v2, %v9470_v57  ;;  %v279_v46 = vld [vmem:[#allocation2 + $0x758] sm:$0xff]  ;;  %v280_v57 = vld [vmem:[#allocation2 + $0x760] sm:$0xff] }
 0x20e   :  { %v9473_v16 = vmax.f32 %v4855_v44, 0.0  ;;  %v1043_v2 = vld [vmem:[#allocation2 + $0x1f38] sm:$0xff]  ;;  %v1044_v44 = vld [vmem:[#allocation2 + $0x1f40] sm:$0xff] }
 0x20f   :  { %v9472_v52 = vmax.f32 %v4850_v12, 0.0  ;;  %v17053_v35 = vpop.f32.mrb[126].mxu0 }
 0x210   :  { %v4865_v15 = vadd.f32 %v20387_v32, %v17053_v35  ;;  %v4859_v24 = vpop.f32.mrb[127].mxu0  ;;  %17211 = vmatmul.mubr.msk.f32.gmra.mrb[232].mxu0 %vm1086_vm0, %v277_v4  ;;  %18357 = vmatmul.mubr.msk.f32.gmra.mrb[232].mxu1 %vm1086_vm0, %v1041_v9 }
 0x211   :  { %v4860_v51 = vadd.f32 %v20387_v32, %v4859_v24  ;;  %17213 = vmatprep.mubr.msk.f32.mxu0 %vm1086_vm0, %v278_v28  ;;  %18359 = vmatprep.mubr.msk.f32.mxu1 %vm1086_vm0, %v1042_v26  ;;  %v20395_v13 = vpack.c.bf16 %v9473_v16, %v9472_v52  ;;  %v281_v16 = vld [vmem:[#allocation2 + $0x768] sm:$0xff]  ;;  %v1046_v24 = vld [vmem:[#allocation2 + $0x1f50] sm:$0xff] }
 0x212   :  { %v9475_v59 = vmax.f32 %v4865_v15, 0.0  ;;  %v1045_v28 = vld [vmem:[#allocation2 + $0x1f48] sm:$0xff]  ;;  %v282_v15 = vld [vmem:[#allocation2 + $0x770] sm:$0xff] }
 0x213   :  { %v9474_v12 = vmax.f32 %v4860_v51, 0.0  ;;  %v17056_v35 = vpop.f32.mrb[128].mxu0 }
 0x214   :  { %v4875_v21 = vadd.f32 %v20387_v32, %v17056_v35  ;;  %v4869_v4 = vpop.f32.mrb[129].mxu0  ;;  %17214 = vmatmul.mubr.msk.f32.gmra.mrb[234].mxu0 %vm1086_vm0, %v279_v46  ;;  %18360 = vmatmul.mubr.msk.f32.gmra.mrb[234].mxu1 %vm1086_vm0, %v1043_v2 }
 0x215   :  { %v4870_v9 = vadd.f32 %v20387_v32, %v4869_v4  ;;  %17216 = vmatprep.mubr.msk.f32.mxu0 %vm1086_vm0, %v280_v57  ;;  %18362 = vmatprep.mubr.msk.f32.mxu1 %vm1086_vm0, %v1044_v44  ;;  %v20403_v26 = vpack.c.bf16 %v9475_v59, %v9474_v12  ;;  %v1047_v59 = vld [vmem:[#allocation2 + $0x1f58] sm:$0xff]  ;;  %v284_v12 = vld [vmem:[#allocation2 + $0x780] sm:$0xff] }
 0x216   :  { %v9477_v52 = vmax.f32 %v4875_v21, 0.0  ;;  %v283_v21 = vld [vmem:[#allocation2 + $0x778] sm:$0xff]  ;;  %v1048_v4 = vld [vmem:[#allocation2 + $0x1f60] sm:$0xff] }
 0x217   :  { %24065 = vst [vmem:[#allocation26_spill] sm:$0xff] %v20403_v26  ;;  %v9476_v51 = vmax.f32 %v4870_v9, 0.0  ;;  %v17059_v35 = vpop.f32.mrb[130].mxu0 }
 0x218   :  { %v4885_v8 = vadd.f32 %v20387_v32, %v17059_v35  ;;  %v4879_v46 = vpop.f32.mrb[131].mxu0  ;;  %17217 = vmatmul.mubr.msk.f32.gmra.mrb[236].mxu0 %vm1086_vm0, %v281_v16  ;;  %18363 = vmatmul.mubr.msk.f32.gmra.mrb[236].mxu1 %vm1086_vm0, %v1045_v28  ;;  %v20416_v28 = vpop.f32.mrb[22].mxu1 }
 0x219   :  { %v20408_v2 = vpack.c.bf16 %v9477_v52, %v9476_v51  ;;  %v4880_v57 = vadd.f32 %v20387_v32, %v4879_v46  ;;  %17219 = vmatprep.mubr.msk.f32.mxu0 %vm1086_vm0, %v282_v15  ;;  %18365 = vmatprep.mubr.msk.f32.mxu1 %vm1086_vm0, %v1046_v24  ;;  %24067 = vst [vmem:[#allocation28_spill] sm:$0xff] %v20416_v28  ;;  %v1049_v24 = vld [vmem:[#allocation2 + $0x1f68] sm:$0xff]  ;;  %v20423_v51 = vpop.f32.mrb[23].mxu1 }
 0x21a   :  { %v9479_v44 = vmax.f32 %v4885_v8, 0.0  ;;  %v285_v8 = vld [vmem:[#allocation2 + $0x788] sm:$0xff]  ;;  %24069 = vst [vmem:[#allocation30_spill] sm:$0xff] %v20423_v51  ;;  %v1052_v51 = vld [vmem:[#allocation2 + $0x1f80] sm:$0xff] }
 0x21b   :  { %24066 = vst [vmem:[#allocation27_spill] sm:$0xff] %v20408_v2  ;;  %v9478_v9 = vmax.f32 %v4880_v57, 0.0  ;;  %v17062_v35 = vpop.f32.mrb[132].mxu0  ;;  %v286_v57 = vld [vmem:[#allocation2 + $0x790] sm:$0xff] }
 0x21c   :  { %v4895_v26 = vadd.f32 %v20387_v32, %v17062_v35  ;;  %v4889_v16 = vpop.f32.mrb[133].mxu0  ;;  %17220 = vmatmul.mubr.msk.f32.gmra.mrb[238].mxu0 %vm1086_vm0, %v283_v21  ;;  %18366 = vmatmul.mubr.msk.f32.gmra.mrb[238].mxu1 %vm1086_vm0, %v1047_v59  ;;  %v1050_v35 = vld [vmem:[#allocation2 + $0x1f70] sm:$0xff] }
 0x21d   :  { %v20418_v52 = vpack.c.bf16 %v9479_v44, %v9478_v9  ;;  %v4890_v15 = vadd.f32 %v20387_v32, %v4889_v16  ;;  %17222 = vmatprep.mubr.msk.f32.mxu0 %vm1086_vm0, %v284_v12  ;;  %18368 = vmatprep.mubr.msk.f32.mxu1 %vm1086_vm0, %v1048_v4  ;;  %v20428_v44 = vpop.f32.mrb[24].mxu1  ;;  %v1051_v9 = vld [vmem:[#allocation2 + $0x1f78] sm:$0xff] }
 0x21e   :  { %v9481_v46 = vmax.f32 %v4895_v26, 0.0  ;;  %24070 = vst [vmem:[#allocation31_spill] sm:$0xff] %v20428_v44  ;;  %v287_v26 = vld [vmem:[#allocation2 + $0x798] sm:$0xff]  ;;  %v20435_v16 = vpop.f32.mrb[25].mxu1 }
 0x21f   :  { %24068 = vst [vmem:[#allocation29_spill] sm:$0xff] %v20418_v52  ;;  %v9480_v21 = vmax.f32 %v4890_v15, 0.0  ;;  %v17065_v2 = vpop.f32.mrb[134].mxu0  ;;  %24072 = vst [vmem:[#allocation33_spill] sm:$0xff] %v20435_v16  ;;  %v288_v15 = vld [vmem:[#allocation2 + $0x7a0] sm:$0xff]  ;;  %v1054_v16 = vld [vmem:[#allocation2 + $0x1f90] sm:$0xff] }
 0x220   :  { %v4905_v59 = vadd.f32 %v20387_v32, %v17065_v2  ;;  %v4899_v28 = vpop.f32.mrb[135].mxu0  ;;  %17223 = vmatmul.mubr.msk.f32.gmra.mrb[240].mxu0 %vm1086_vm0, %v285_v8  ;;  %18369 = vmatmul.mubr.msk.f32.gmra.mrb[240].mxu1 %vm1086_vm0, %v1049_v24 }
 0x221   :  { %v20430_v12 = vpack.c.bf16 %v9481_v46, %v9480_v21  ;;  %v4900_v4 = vadd.f32 %v20387_v32, %v4899_v28  ;;  %17225 = vmatprep.mubr.msk.f32.mxu0 %vm1086_vm0, %v286_v57  ;;  %18371 = vmatprep.mubr.msk.f32.mxu1 %vm1086_vm0, %v1050_v35  ;;  %v20440_v28 = vpop.f32.mrb[26].mxu1  ;;  %v289_v35 = vld [vmem:[#allocation2 + $0x7a8] sm:$0xff] }
 0x222   :  { %v9483_v2 = vmax.f32 %v4905_v59, 0.0  ;;  %24073 = vst [vmem:[#allocation34_spill] sm:$0xff] %v20440_v28  ;;  %v1053_v21 = vld [vmem:[#allocation2 + $0x1f88] sm:$0xff]  ;;  %v20447_v59 = vpop.f32.mrb[27].mxu1 }
 0x223   :  { %24071 = vst [vmem:[#allocation32_spill] sm:$0xff] %v20430_v12  ;;  %v9482_v8 = vmax.f32 %v4900_v4, 0.0  ;;  %v17068_v52 = vpop.f32.mrb[136].mxu0  ;;  %24075 = vst [vmem:[#allocation36_spill] sm:$0xff] %v20447_v59  ;;  %v290_v4 = vld [vmem:[#allocation2 + $0x7b0] sm:$0xff]  ;;  %v1056_v59 = vld [vmem:[#allocation2 + $0x1fa0] sm:$0xff] }
 0x224   :  { %v4915_v24 = vadd.f32 %v20387_v32, %v17068_v52  ;;  %v4909_v44 = vpop.f32.mrb[137].mxu0  ;;  %17226 = vmatmul.mubr.msk.f32.gmra.mrb[242].mxu0 %vm1086_vm0, %v287_v26  ;;  %18372 = vmatmul.mubr.msk.f32.gmra.mrb[242].mxu1 %vm1086_vm0, %v1051_v9 }
 0x225   :  { %v20442_v46 = vpack.c.bf16 %v9483_v2, %v9482_v8  ;;  %v4910_v57 = vadd.f32 %v20387_v32, %v4909_v44  ;;  %17228 = vmatprep.mubr.msk.f32.mxu0 %vm1086_vm0, %v288_v15  ;;  %18374 = vmatprep.mubr.msk.f32.mxu1 %vm1086_vm0, %v1052_v51  ;;  %v20452_v44 = vpop.f32.mrb[28].mxu1  ;;  %v291_v15 = vld [vmem:[#allocation2 + $0x7b8] sm:$0xff] }
 0x226   :  { %v9485_v52 = vmax.f32 %v4915_v24, 0.0  ;;  %24076 = vst [vmem:[#allocation37_spill] sm:$0xff] %v20452_v44  ;;  %v1055_v8 = vld [vmem:[#allocation2 + $0x1f98] sm:$0xff]  ;;  %v20459_v24 = vpop.f32.mrb[29].mxu1 }
 0x227   :  { %24074 = vst [vmem:[#allocation35_spill] sm:$0xff] %v20442_v46  ;;  %v9484_v26 = vmax.f32 %v4910_v57, 0.0  ;;  %v17071_v12 = vpop.f32.mrb[138].mxu0  ;;  %24078 = vst [vmem:[#allocation39_spill] sm:$0xff] %v20459_v24  ;;  %v292_v57 = vld [vmem:[#allocation2 + $0x7c0] sm:$0xff] }
 0x228   :  { %v4925_v9 = vadd.f32 %v20387_v32, %v17071_v12  ;;  %v4919_v28 = vpop.f32.mrb[139].mxu0  ;;  %17229 = vmatmul.mubr.msk.f32.gmra.mrb[244].mxu0 %vm1086_vm0, %v289_v35  ;;  %18375 = vmatmul.mubr.msk.f32.gmra.mrb[244].mxu1 %vm1086_vm0, %v1053_v21 }
 0x229   :  { %v20454_v2 = vpack.c.bf16 %v9485_v52, %v9484_v26  ;;  %v4920_v51 = vadd.f32 %v20387_v32, %v4919_v28  ;;  %17231 = vmatprep.mubr.msk.f32.mxu0 %vm1086_vm0, %v290_v4  ;;  %18377 = vmatprep.mubr.msk.f32.mxu1 %vm1086_vm0, %v1054_v16  ;;  %v293_v52 = vld [vmem:[#allocation2 + $0x7c8] sm:$0xff] }
 0x22a   :  { %v9487_v12 = vmax.f32 %v4925_v9, 0.0  ;;  %v1057_v4 = vld [vmem:[#allocation2 + $0x1fa8] sm:$0xff]  ;;  %v294_v9 = vld [vmem:[#allocation2 + $0x7d0] sm:$0xff] }
 0x22b   :  { %24077 = vst [vmem:[#allocation38_spill] sm:$0xff] %v20454_v2  ;;  %v9486_v35 = vmax.f32 %v4920_v51, 0.0  ;;  %v17074_v46 = vpop.f32.mrb[140].mxu0  ;;  %v1058_v51 = vld [vmem:[#allocation2 + $0x1fb0] sm:$0xff] }
 0x22c   :  { %v4935_v21 = vadd.f32 %v20387_v32, %v17074_v46  ;;  %v4929_v44 = vpop.f32.mrb[141].mxu0  ;;  %17232 = vmatmul.mubr.msk.f32.gmra.mrb[246].mxu0 %vm1086_vm0, %v291_v15  ;;  %18378 = vmatmul.mubr.msk.f32.gmra.mrb[246].mxu1 %vm1086_vm0, %v1055_v8 }
 0x22d   :  { %v20464_v28 = vpack.c.bf16 %v9487_v12, %v9486_v35  ;;  %v4930_v16 = vadd.f32 %v20387_v32, %v4929_v44  ;;  %17234 = vmatprep.mubr.msk.f32.mxu0 %vm1086_vm0, %v292_v57  ;;  %18380 = vmatprep.mubr.msk.f32.mxu1 %vm1086_vm0, %v1056_v59  ;;  %v295_v59 = vld [vmem:[#allocation2 + $0x7d8] sm:$0xff]  ;;  %v296_v35 = vld [vmem:[#allocation2 + $0x7e0] sm:$0xff] }
 0x22e   :  { %v9489_v26 = vmax.f32 %v4935_v21, 0.0  ;;  %v1059_v12 = vld [vmem:[#allocation2 + $0x1fb8] sm:$0xff]  ;;  %v1060_v21 = vld [vmem:[#allocation2 + $0x1fc0] sm:$0xff] }
 0x22f   :  { %24079 = vst [vmem:[#allocation40_spill] sm:$0xff] %v20464_v28  ;;  %v9488_v24 = vmax.f32 %v4930_v16, 0.0  ;;  %v17077_v46 = vpop.f32.mrb[142].mxu0 }
 0x230   :  { %v4945_v2 = vadd.f32 %v20387_v32, %v17077_v46  ;;  %v4939_v15 = vpop.f32.mrb[143].mxu0  ;;  %17235 = vmatmul.mubr.msk.f32.gmra.mrb[248].mxu0 %vm1086_vm0, %v293_v52  ;;  %18381 = vmatmul.mubr.msk.f32.gmra.mrb[248].mxu1 %vm1086_vm0, %v1057_v4 }
 0x231   :  { %v20472_v8 = vpack.c.bf16 %v9489_v26, %v9488_v24  ;;  %v4940_v44 = vadd.f32 %v20387_v32, %v4939_v15  ;;  %17237 = vmatprep.mubr.msk.f32.mxu0 %vm1086_vm0, %v294_v9  ;;  %18383 = vmatprep.mubr.msk.f32.mxu1 %vm1086_vm0, %v1058_v51  ;;  %v1061_v26 = vld [vmem:[#allocation2 + $0x1fc8] sm:$0xff]  ;;  %v298_v51 = vld [vmem:[#allocation2 + $0x7f0] sm:$0xff] }
 0x232   :  { %v9491_v57 = vmax.f32 %v4945_v2, 0.0  ;;  %v297_v2 = vld [vmem:[#allocation2 + $0x7e8] sm:$0xff]  ;;  %v1062_v15 = vld [vmem:[#allocation2 + $0x1fd0] sm:$0xff] }
 0x233   :  { %24080 = vst [vmem:[#allocation41_spill] sm:$0xff] %v20472_v8  ;;  %v9490_v16 = vmax.f32 %v4940_v44, 0.0  ;;  %v17080_v46 = vpop.f32.mrb[144].mxu0 }
 0x234   :  { %v4955_v28 = vadd.f32 %v20387_v32, %v17080_v46  ;;  %v4949_v52 = vpop.f32.mrb[145].mxu0  ;;  %17238 = vmatmul.mubr.msk.f32.gmra.mrb[250].mxu0 %vm1086_vm0, %v295_v59  ;;  %18384 = vmatmul.mubr.msk.f32.gmra.mrb[250].mxu1 %vm1086_vm0, %v1059_v12 }
 0x235   :  { %v20480_v24 = vpack.c.bf16 %v9491_v57, %v9490_v16  ;;  %v4950_v4 = vadd.f32 %v20387_v32, %v4949_v52  ;;  %17240 = vmatprep.mubr.msk.f32.mxu0 %vm1086_vm0, %v296_v35  ;;  %18386 = vmatprep.mubr.msk.f32.mxu1 %vm1086_vm0, %v1060_v21  ;;  %v299_v57 = vld [vmem:[#allocation2 + $0x7f8] sm:$0xff]  ;;  %v300_v16 = vld [vmem:[#allocation2 + $0x800] sm:$0xff] }
 0x236   :  { %v9493_v9 = vmax.f32 %v4955_v28, 0.0  ;;  %v1063_v35 = vld [vmem:[#allocation2 + $0x1fd8] sm:$0xff]  ;;  %v1064_v52 = vld [vmem:[#allocation2 + $0x1fe0] sm:$0xff] }
 0x237   :  { %24081 = vst [vmem:[#allocation42_spill] sm:$0xff] %v20480_v24  ;;  %v9492_v44 = vmax.f32 %v4950_v4, 0.0  ;;  %v17083_v46 = vpop.f32.mrb[146].mxu0 }
 0x238   :  { %v4965_v8 = vadd.f32 %v20387_v32, %v17083_v46  ;;  %v4959_v59 = vpop.f32.mrb[147].mxu0  ;;  %17241 = vmatmul.mubr.msk.f32.gmra.mrb[252].mxu0 %vm1086_vm0, %v297_v2  ;;  %18387 = vmatmul.mubr.msk.f32.gmra.mrb[252].mxu1 %vm1086_vm0, %v1061_v26  ;;  %v20496_v26 = vpop.f32.mrb[30].mxu1 }
 0x239   :  { %v4960_v12 = vadd.f32 %v20387_v32, %v4959_v59  ;;  %17243 = vmatprep.mubr.msk.f32.mxu0 %vm1086_vm0, %v298_v51  ;;  %18389 = vmatprep.mubr.msk.f32.mxu1 %vm1086_vm0, %v1062_v15  ;;  %v20491_v28 = vpack.c.bf16 %v9493_v9, %v9492_v44  ;;  %24083 = vst [vmem:[#allocation44_spill] sm:$0xff] %v20496_v26  ;;  %v1065_v9 = vld [vmem:[#allocation2 + $0x1fe8] sm:$0xff]  ;;  %v20503_v44 = vpop.f32.mrb[31].mxu1 }
 0x23a   :  { %v9495_v21 = vmax.f32 %v4965_v8, 0.0  ;;  %v301_v8 = vld [vmem:[#allocation2 + $0x808] sm:$0xff]  ;;  %24084 = vst [vmem:[#allocation45_spill] sm:$0xff] %v20503_v44 }
 0x23b   :  { %24082 = vst [vmem:[#allocation43_spill] sm:$0xff] %v20491_v28  ;;  %v9494_v4 = vmax.f32 %v4960_v12, 0.0  ;;  %v17086_v46 = vpop.f32.mrb[148].mxu0  ;;  %v302_v12 = vld [vmem:[#allocation2 + $0x810] sm:$0xff] }
 0x23c   :  { %v4975_v24 = vadd.f32 %v20387_v32, %v17086_v46  ;;  %v4969_v2 = vpop.f32.mrb[149].mxu0  ;;  %17244 = vmatmul.mubr.msk.f32.gmra.mrb[254].mxu0 %vm1086_vm0, %v299_v57  ;;  %18390 = vmatmul.mubr.msk.f32.gmra.mrb[254].mxu1 %vm1086_vm0, %v1063_v35  ;;  %v1066_v46 = vld [vmem:[#allocation2 + $0x1ff0] sm:$0xff] }
 0x23d   :  { %v4970_v51 = vadd.f32 %v20387_v32, %v4969_v2  ;;  %17246 = vmatprep.mubr.msk.f32.mxu0 %vm1086_vm0, %v300_v16  ;;  %18392 = vmatprep.mubr.msk.f32.mxu1 %vm1086_vm0, %v1064_v52  ;;  %v20501_v15 = vpack.c.bf16 %v9495_v21, %v9494_v4  ;;  %v20508_v16 = vpop.f32.mrb[32].mxu1  ;;  %v1067_v21 = vld [vmem:[#allocation2 + $0x1ff8] sm:$0xff] }
 0x23e   :  { %v9497_v59 = vmax.f32 %v4975_v24, 0.0  ;;  %24085 = vst [vmem:[#allocation46_spill] sm:$0xff] %v20508_v16  ;;  %v303_v24 = vld [vmem:[#allocation2 + $0x818] sm:$0xff]  ;;  %v20515_v2 = vpop.f32.mrb[33].mxu1 }
 0x23f   :  { %v9496_v57 = vmax.f32 %v4970_v51, 0.0  ;;  %v17089_v28 = vpop.f32.mrb[150].mxu0  ;;  %24087 = vst [vmem:[#allocation48_spill] sm:$0xff] %v20515_v2  ;;  %v304_v51 = vld [vmem:[#allocation2 + $0x820] sm:$0xff] }
 0x240   :  { %v4985_v35 = vadd.f32 %v20387_v32, %v17089_v28  ;;  %v4979_v26 = vpop.f32.mrb[151].mxu0  ;;  %17247 = vmatmul.mubr.msk.f32.gmra.mrb[0].mxu0 %vm1086_vm0, %v301_v8  ;;  %18393 = vmatmul.mubr.msk.f32.gmra.mrb[0].mxu1 %vm1086_vm0, %v1065_v9  ;;  %v10373_v8 = vld [vmem:[%s24048_s3 + $0x8] sm:$0xff] }
 0x241   :  { %v4980_v52 = vadd.f32 %v20387_v32, %v4979_v26  ;;  %17249 = vmatprep.mubr.msk.f32.mxu0 %vm1086_vm0, %v302_v12  ;;  %18395 = vmatprep.mubr.msk.f32.mxu1 %vm1086_vm0, %v1066_v46  ;;  %v20513_v4 = vpack.c.bf16 %v9497_v59, %v9496_v57  ;;  %v20523_v12 = vpop.f32.mrb[34].mxu1  ;;  %v305_v46 = vld [vmem:[#allocation2 + $0x828] sm:$0xff]  ;;  %v10372_v57 = vld [vmem:[%s24048_s3] sm:$0xff] }
 0x242   :  { %v9499_v28 = vmax.f32 %v4985_v35, 0.0  ;;  %24088 = vst [vmem:[#allocation49_spill] sm:$0xff] %v20523_v12 }
 0x243   :  { %24086 = vst [vmem:[#allocation47_spill] sm:$0xff] %v20513_v4  ;;  %v9498_v9 = vmax.f32 %v4980_v52, 0.0  ;;  %v17092_v16 = vpop.f32.mrb[152].mxu0 }
 0x244   :  { %v4995_v26 = vadd.f32 %v20387_v32, %v17092_v16  ;;  %v4989_v44 = vpop.f32.mrb[153].mxu0  ;;  %17250 = vmatmul.mubr.msk.f32.gmra.mrb[2].mxu0 %vm1086_vm0, %v303_v24  ;;  %18396 = vmatmul.mubr.msk.f32.gmra.mrb[2].mxu1 %vm1086_vm0, %v1067_v21  ;;  %v20532_v16 = vpop.f32.mrb[35].mxu1  ;;  %v306_v24 = vld [vmem:[#allocation2 + $0x830] sm:$0xff] }
 0x245   :  { %v4990_v59 = vadd.f32 %v20387_v32, %v4989_v44  ;;  %17252 = vmatprep.mubr.msk.f32.mxu0 %vm1086_vm0, %v304_v51  ;;  %10692 = vmatprep.mubr.f32.mxu1 %v10373_v8  ;;  %v20530_v35 = vpack.c.bf16 %v9499_v28, %v9498_v9  ;;  %24090 = vst [vmem:[#allocation51_spill] sm:$0xff] %v20532_v16  ;;  %v10437_v44 = vld [vmem:[%s24048_s3 + $0x208] sm:$0xff]  ;;  %v18064_v12 = vpop.f32.mrb[36].mxu1  ;;  %v307_v9 = vld [vmem:[#allocation2 + $0x838] sm:$0xff] }
 0x246   :  { %v9501_v52 = vmax.f32 %v4995_v26, 0.0  ;;  %v10436_v26 = vld [vmem:[%s24048_s3 + $0x200] sm:$0xff]  ;;  %v8229_v16 = vpop.f32.mrb[37].mxu1 }
 0x247   :  { %24089 = vst [vmem:[#allocation50_spill] sm:$0xff] %v20530_v35  ;;  %v9500_v2 = vmax.f32 %v4990_v59, 0.0  ;;  %v17095_v21 = vpop.f32.mrb[154].mxu0 }
 0x248   :  { %v5005_v51 = vadd.f32 %v20387_v32, %v17095_v21  ;;  %v4999_v8 = vpop.f32.mrb[155].mxu0  ;;  %17253 = vmatmul.mubr.msk.f32.gmra.mrb[4].mxu0 %vm1086_vm0, %v305_v46  ;;  %10693 = vmatmul.mubr.f32.vlgmr.msra.gmra.mrb[4].mxu1 %v10372_v57  ;;  %v308_v46 = vld [vmem:[#allocation2 + $0x840] sm:$0xff]  ;;  %v8235_v57 = vadd.f32 %v20387_v32, %v18064_v12  ;;  %v309_v12 = vld [vmem:[#allocation2 + $0x848] sm:$0xff] }
 0x249   :  { %v5000_v28 = vadd.f32 %v20387_v32, %v4999_v8  ;;  %18453 = vmatpush3.bf16.msra.mxu1 %v19977_v60  ;;  %17255 = vmatprep.mubr.msk.f32.mxu0 %vm1086_vm0, %v306_v24  ;;  %v20545_v59 = vpack.c.bf16 %v9501_v52, %v9500_v2  ;;  %v10501_v60 = vld [vmem:[%s24048_s3 + $0x408] sm:$0xff]  ;;  %v8230_v24 = vadd.f32 %v20387_v32, %v8229_v16 }
 0x24a   :  { %v9503_v21 = vmax.f32 %v5005_v51, 0.0  ;;  %18455 = vmatprep.subr.bf16.mxu1 %v20051_v29  ;;  %10697 = vmatprep.mubr.f32.mxu1 %v10437_v44  ;;  %v10149_v52 = vmax.f32 %v8235_v57, 0.0  ;;  %v10500_v44 = vld [vmem:[%s24048_s3 + $0x400] sm:$0xff] }
 0x24b   :  { %v9502_v8 = vmax.f32 %v5000_v28, 0.0  ;;  %v17098_v35 = vpop.f32.mrb[156].mxu0  ;;  %v10148_v16 = vmax.f32 %v8230_v24, 0.0  ;;  %v310_v28 = vld [vmem:[#allocation2 + $0x850] sm:$0xff]  ;;  %v312_v24 = vld [vmem:[#allocation2 + $0x860] sm:$0xff] }
 0x24c   :  { %v5015_v4 = vadd.f32 %v20387_v32, %v17098_v35  ;;  %v5009_v2 = vpop.f32.mrb[157].mxu0  ;;  %17256 = vmatmul.mubr.msk.f32.gmra.mrb[6].mxu0 %vm1086_vm0, %v307_v9  ;;  %10698 = vmatmul.mubr.f32.gmra.mrb[6].mxu1 %v10436_v26 }
 0x24d   :  { %v5010_v29 = vadd.f32 %v20387_v32, %v5009_v2  ;;  %18457 = vmatpush3.bf16.msra.mxu1 %v19986_v61  ;;  %17258 = vmatprep.mubr.msk.f32.mxu0 %vm1086_vm0, %v308_v46  ;;  %v20561_v51 = vpack.c.bf16 %v9503_v21, %v9502_v8  ;;  %v10565_v61 = vld [vmem:[%s24048_s3 + $0x608] sm:$0xff]  ;;  %v20567_v46 = vpack.c.bf16 %v10149_v52, %v10148_v16  ;;  %v10564_v21 = vld [vmem:[%s24048_s3 + $0x600] sm:$0xff] }
 0x24e   :  { %v9505_v35 = vmax.f32 %v5015_v4, 0.0  ;;  %18459 = vmatprep.subr.bf16.mxu1 %v20059_v43  ;;  %10702 = vmatprep.mubr.f32.mxu1 %v10501_v60  ;;  %v311_v43 = vld [vmem:[#allocation2 + $0x858] sm:$0xff] }
 0x24f   :  { %v9504_v9 = vmax.f32 %v5010_v29, 0.0  ;;  %v17101_v26 = vpop.f32.mrb[158].mxu0  ;;  %24091 = vst [vmem:[#allocation52_spill] sm:$0xff] %v20567_v46  ;;  %v24127_v46 = vld [vmem:[#allocation44_spill] sm:$0xff] }
 0x250   :  { %v5025_v57 = vadd.f32 %v20387_v32, %v17101_v26  ;;  %v5019_v2 = vpop.f32.mrb[159].mxu0  ;;  %17259 = vmatmul.mubr.msk.f32.gmra.mrb[8].mxu0 %vm1086_vm0, %v309_v12  ;;  %10703 = vmatmul.mubr.f32.gmra.mrb[8].mxu1 %v10500_v44 }
 0x251   :  { %v5020_v4 = vadd.f32 %v20387_v32, %v5019_v2  ;;  %18461 = vmatpush3.bf16.msra.mxu1 %v19994_v7  ;;  %17261 = vmatprep.mubr.msk.f32.mxu0 %vm1086_vm0, %v310_v28  ;;  %v20577_v8 = vpack.c.bf16 %v9505_v35, %v9504_v9  ;;  %v10375_v7 = vld [vmem:[%s24048_s3 + $0x18] sm:$0xff]  ;;  %v314_v9 = vld [vmem:[#allocation2 + $0x870] sm:$0xff] }
 0x252   :  { %v9507_v60 = vmax.f32 %v5025_v57, 0.0  ;;  %18463 = vmatprep.subr.bf16.mxu1 %v20067_v55  ;;  %10707 = vmatprep.mubr.f32.mxu1 %v10565_v61  ;;  %v313_v55 = vld [vmem:[#allocation2 + $0x868] sm:$0xff] }
 0x253   :  { %v9506_v52 = vmax.f32 %v5020_v4, 0.0  ;;  %v17104_v29 = vpop.f32.mrb[160].mxu0 }
 0x254   :  { %v5035_v12 = vadd.f32 %v20387_v32, %v17104_v29  ;;  %v5029_v44 = vpop.f32.mrb[161].mxu0  ;;  %17262 = vmatmul.mubr.msk.f32.gmra.mrb[10].mxu0 %vm1086_vm0, %v311_v43  ;;  %10708 = vmatmul.mubr.f32.gmra.mrb[10].mxu1 %v10564_v21  ;;  %v315_v43 = vld [vmem:[#allocation2 + $0x878] sm:$0xff] }
 0x255   :  { %v5030_v16 = vadd.f32 %v20387_v32, %v5029_v44  ;;  %18465 = vmatpush3.bf16.msra.mxu1 %v20002_v19  ;;  %17264 = vmatprep.mubr.msk.f32.mxu0 %vm1086_vm0, %v312_v24  ;;  %v20588_v35 = vpack.c.bf16 %v9507_v60, %v9506_v52 }
 0x256   :  { %v9509_v28 = vmax.f32 %v5035_v12, 0.0  ;;  %18467 = vmatprep.subr.bf16.mxu1 %v20075_v14  ;;  %10777 = vmatprep.mubr.f32.mxu1 %v10375_v7  ;;  %v316_v14 = vld [vmem:[#allocation2 + $0x880] sm:$0xff]  ;;  %v18067_v7 = vpop.f32.mrb[38].mxu1 }
 0x257   :  { %v9508_v26 = vmax.f32 %v5030_v16, 0.0  ;;  %v17107_v61 = vpop.f32.mrb[162].mxu0  ;;  %v8239_v16 = vpop.f32.mrb[39].mxu1 }
 0x258   :  { %v5045_v57 = vadd.f32 %v20387_v32, %v17107_v61  ;;  %v5039_v2 = vpop.f32.mrb[163].mxu0  ;;  %17265 = vmatmul.mubr.msk.f32.gmra.mrb[12].mxu0 %vm1086_vm0, %v313_v55  ;;  %v318_v55 = vld [vmem:[#allocation2 + $0x890] sm:$0xff] }
 0x259   :  { %v20593_v4 = vpack.c.bf16 %v9509_v28, %v9508_v26  ;;  %v5040_v19 = vadd.f32 %v20387_v32, %v5039_v2  ;;  %18469 = vmatpush3.bf16.msra.mxu1 %v20010_v30  ;;  %17267 = vmatprep.mubr.msk.f32.mxu0 %vm1086_vm0, %v314_v9  ;;  %v317_v30 = vld [vmem:[#allocation2 + $0x888] sm:$0xff]  ;;  %v8245_v28 = vadd.f32 %v20387_v32, %v18067_v7  ;;  %v18070_v2 = vpop.f32.mrb[40].mxu1 }
 0x25a   :  { %v9511_v21 = vmax.f32 %v5045_v57, 0.0  ;;  %18471 = vmatprep.subr.bf16.mxu1 %v20083_v17 }
 0x25b   :  { %v9510_v60 = vmax.f32 %v5040_v19, 0.0  ;;  %v17110_v24 = vpop.f32.mrb[164].mxu0 }
 0x25c   :  { %v5055_v52 = vadd.f32 %v20387_v32, %v17110_v24  ;;  %v5049_v29 = vpop.f32.mrb[165].mxu0  ;;  %17268 = vmatmul.mubr.msk.f32.gmra.mrb[14].mxu0 %vm1086_vm0, %v315_v43  ;;  %v10151_v43 = vmax.f32 %v8245_v28, 0.0  ;;  %v320_v24 = vld [vmem:[#allocation2 + $0x8a0] sm:$0xff]  ;;  %v10374_v28 = vld [vmem:[%s24048_s3 + $0x10] sm:$0xff] }
 0x25d   :  { %v20601_v12 = vpack.c.bf16 %v9511_v21, %v9510_v60  ;;  %v5050_v44 = vadd.f32 %v20387_v32, %v5049_v29  ;;  %18473 = vmatpush3.bf16.msra.mxu1 %v20018_v42  ;;  %17270 = vmatprep.mubr.msk.f32.mxu0 %vm1086_vm0, %v316_v14  ;;  %v8240_v21 = vadd.f32 %v20387_v32, %v8239_v16  ;;  %v8249_v14 = vpop.f32.mrb[41].mxu1 }
 0x25e   :  { %v9513_v17 = vmax.f32 %v5055_v52, 0.0  ;;  %18475 = vmatprep.subr.bf16.mxu1 %v20091_v31  ;;  %v319_v31 = vld [vmem:[#allocation2 + $0x898] sm:$0xff]  ;;  %v8255_v52 = vadd.f32 %v20387_v32, %v18070_v2 }
 0x25f   :  { %v9512_v9 = vmax.f32 %v5050_v44, 0.0  ;;  %v17113_v26 = vpop.f32.mrb[166].mxu0  ;;  %v10150_v44 = vmax.f32 %v8240_v21, 0.0 }
 0x260   :  { %v5065_v61 = vadd.f32 %v20387_v32, %v17113_v26  ;;  %v5059_v57 = vpop.f32.mrb[167].mxu0  ;;  %17271 = vmatmul.mubr.msk.f32.gmra.mrb[16].mxu0 %vm1086_vm0, %v317_v30  ;;  %v10153_v2 = vmax.f32 %v8255_v52, 0.0  ;;  %v323_v52 = vld [vmem:[#allocation2 + $0x8b8] sm:$0xff] }
 0x261   :  { %v20610_v19 = vpack.c.bf16 %v9513_v17, %v9512_v9  ;;  %v5060_v42 = vadd.f32 %v20387_v32, %v5059_v57  ;;  %18477 = vmatpush3.bf16.msra.mxu1 %v20026_v53  ;;  %17273 = vmatprep.mubr.msk.f32.mxu0 %vm1086_vm0, %v318_v55  ;;  %v18073_v53 = vpop.f32.mrb[42].mxu1  ;;  %v20628_v9 = vpack.c.bf16 %v10151_v43, %v10150_v44  ;;  %v322_v57 = vld [vmem:[#allocation2 + $0x8b0] sm:$0xff] }
 0x262   :  { %v9515_v60 = vmax.f32 %v5065_v61, 0.0  ;;  %18479 = vmatprep.subr.bf16.mxu1 %v20099_v56  ;;  %v321_v56 = vld [vmem:[#allocation2 + $0x8a8] sm:$0xff]  ;;  %v8259_v26 = vpop.f32.mrb[43].mxu1  ;;  %v10438_v44 = vld [vmem:[%s24048_s3 + $0x210] sm:$0xff] }
 0x263   :  { %v9514_v29 = vmax.f32 %v5060_v42, 0.0  ;;  %v17116_v7 = vpop.f32.mrb[168].mxu0  ;;  %24092 = vst [vmem:[#allocation53_spill] sm:$0xff] %v20628_v9  ;;  %v8250_v42 = vadd.f32 %v20387_v32, %v8249_v14 }
 0x264   :  { %v5075_v30 = vadd.f32 %v20387_v32, %v17116_v7  ;;  %v5069_v17 = vpop.f32.mrb[169].mxu0  ;;  %17274 = vmatmul.mubr.msk.f32.gmra.mrb[18].mxu0 %vm1086_vm0, %v319_v31  ;;  %v8265_v31 = vadd.f32 %v20387_v32, %v18073_v53 }
 0x265   :  { %v20620_v55 = vpack.c.bf16 %v9515_v60, %v9514_v29  ;;  %v5070_v16 = vadd.f32 %v20387_v32, %v5069_v17  ;;  %18481 = vmatpush3.bf16.msra.mxu1 %v20034_v1  ;;  %17276 = vmatprep.mubr.msk.f32.mxu0 %vm1086_vm0, %v320_v24  ;;  %v10439_v60 = vld [vmem:[%s24048_s3 + $0x218] sm:$0xff]  ;;  %v10152_v29 = vmax.f32 %v8250_v42, 0.0  ;;  %v8260_v17 = vadd.f32 %v20387_v32, %v8259_v26 }
 0x266   :  { %v9517_v61 = vmax.f32 %v5075_v30, 0.0  ;;  %18483 = vmatprep.subr.bf16.mxu1 %v20173_v3  ;;  %v18076_v3 = vpop.f32.mrb[44].mxu1  ;;  %v10155_v30 = vmax.f32 %v8265_v31, 0.0  ;;  %v10503_v42 = vld [vmem:[%s24048_s3 + $0x418] sm:$0xff] }
 0x267   :  { %v9516_v1 = vmax.f32 %v5070_v16, 0.0  ;;  %v17119_v21 = vpop.f32.mrb[170].mxu0  ;;  %v8269_v53 = vpop.f32.mrb[45].mxu1 }
 0x268   :  { %v5085_v24 = vadd.f32 %v20387_v32, %v17119_v21  ;;  %v5079_v43 = vpop.f32.mrb[171].mxu0  ;;  %17277 = vmatmul.mubr.msk.f32.gmra.mrb[20].mxu0 %vm1086_vm0, %v321_v56  ;;  %10778 = vmatmul.mubr.f32.vlgmr.msra.gmra.mrb[12].mxu1 %v10374_v28  ;;  %v324_v56 = vld [vmem:[#allocation2 + $0x8c0] sm:$0xff]  ;;  %v20648_v28 = vpack.c.bf16 %v10153_v2, %v10152_v29  ;;  %v325_v21 = vld [vmem:[#allocation2 + $0x8c8] sm:$0xff]  ;;  %v326_v29 = vld [vmem:[#allocation2 + $0x8d0] sm:$0xff] }
 0x269   :  { %v20638_v7 = vpack.c.bf16 %v9517_v61, %v9516_v1  ;;  %v5080_v14 = vadd.f32 %v20387_v32, %v5079_v43  ;;  %18485 = vmatpush3.bf16.msra.mxu1 %v20106_v38  ;;  %17279 = vmatprep.mubr.msk.f32.mxu0 %vm1086_vm0, %v322_v57  ;;  %v8275_v38 = vadd.f32 %v20387_v32, %v18076_v3  ;;  %v10154_v1 = vmax.f32 %v8260_v17, 0.0 }
 0x26a   :  { %v9519_v16 = vmax.f32 %v5085_v24, 0.0  ;;  %18487 = vmatprep.subr.bf16.mxu1 %v20181_v10  ;;  %10782 = vmatprep.mubr.f32.mxu1 %v10439_v60  ;;  %24093 = vst [vmem:[#allocation54_spill] sm:$0xff] %v20648_v28  ;;  %v10502_v60 = vld [vmem:[%s24048_s3 + $0x410] sm:$0xff] }
 0x26b   :  { %v9518_v61 = vmax.f32 %v5080_v14, 0.0  ;;  %v17122_v57 = vpop.f32.mrb[172].mxu0  ;;  %v20664_v24 = vpack.c.bf16 %v10155_v30, %v10154_v1  ;;  %v10157_v3 = vmax.f32 %v8275_v38, 0.0  ;;  %v8270_v14 = vadd.f32 %v20387_v32, %v8269_v53  ;;  %v327_v53 = vld [vmem:[#allocation2 + $0x8d8] sm:$0xff]  ;;  %v10566_v38 = vld [vmem:[%s24048_s3 + $0x610] sm:$0xff] }
 0x26c   :  { %v5095_v31 = vadd.f32 %v20387_v32, %v17122_v57  ;;  %v5089_v26 = vpop.f32.mrb[173].mxu0  ;;  %17280 = vmatmul.mubr.msk.f32.gmra.mrb[22].mxu0 %vm1086_vm0, %v323_v52  ;;  %10783 = vmatmul.mubr.f32.gmra.mrb[14].mxu1 %v10438_v44  ;;  %v328_v57 = vld [vmem:[#allocation2 + $0x8e0] sm:$0xff] }
 0x26d   :  { %v20656_v10 = vpack.c.bf16 %v9519_v16, %v9518_v61  ;;  %v5090_v2 = vadd.f32 %v20387_v32, %v5089_v26  ;;  %18489 = vmatpush3.bf16.msra.mxu1 %v20114_v5  ;;  %17282 = vmatprep.mubr.msk.f32.mxu0 %vm1086_vm0, %v324_v56  ;;  %24094 = vst [vmem:[#allocation55_spill] sm:$0xff] %v20664_v24  ;;  %v10567_v5 = vld [vmem:[%s24048_s3 + $0x618] sm:$0xff]  ;;  %v10156_v30 = vmax.f32 %v8270_v14, 0.0 }
 0x26e   :  { %v9521_v43 = vmax.f32 %v5095_v31, 0.0  ;;  %18491 = vmatprep.subr.bf16.mxu1 %v20193_v36  ;;  %10787 = vmatprep.mubr.f32.mxu1 %v10503_v42  ;;  %v24123_v24 = vld [vmem:[#allocation37_spill] sm:$0xff] }
 0x26f   :  { %v9520_v52 = vmax.f32 %v5090_v2, 0.0  ;;  %v17125_v44 = vpop.f32.mrb[174].mxu0  ;;  %v20682_v42 = vpack.c.bf16 %v10157_v3, %v10156_v30 }
 0x270   :  { %v5105_v17 = vadd.f32 %v20387_v32, %v17125_v44  ;;  %v5099_v16 = vpop.f32.mrb[175].mxu0  ;;  %17283 = vmatmul.mubr.msk.f32.gmra.mrb[24].mxu0 %vm1086_vm0, %v325_v21  ;;  %10788 = vmatmul.mubr.f32.gmra.mrb[16].mxu1 %v10502_v60  ;;  %v329_v60 = vld [vmem:[#allocation2 + $0x8e8] sm:$0xff] }
 0x271   :  { %v20673_v56 = vpack.c.bf16 %v9521_v43, %v9520_v52  ;;  %v5100_v36 = vadd.f32 %v20387_v32, %v5099_v16  ;;  %18493 = vmatpush3.bf16.msra.mxu1 %v20122_v20  ;;  %17285 = vmatprep.mubr.msk.f32.mxu0 %vm1086_vm0, %v326_v29  ;;  %24095 = vst [vmem:[#allocation56_spill] sm:$0xff] %v20682_v42  ;;  %v10377_v20 = vld [vmem:[%s24048_s3 + $0x28] sm:$0xff]  ;;  %v330_v29 = vld [vmem:[#allocation2 + $0x8f0] sm:$0xff] }
 0x272   :  { %v9523_v61 = vmax.f32 %v5105_v17, 0.0  ;;  %18495 = vmatprep.subr.bf16.mxu1 %v20205_v50  ;;  %10792 = vmatprep.mubr.f32.mxu1 %v10567_v5 }
 0x273   :  { %v9522_v1 = vmax.f32 %v5100_v36, 0.0  ;;  %v17128_v31 = vpop.f32.mrb[176].mxu0 }
 0x274   :  { %v5115_v26 = vadd.f32 %v20387_v32, %v17128_v31  ;;  %v5109_v2 = vpop.f32.mrb[177].mxu0  ;;  %17286 = vmatmul.mubr.msk.f32.gmra.mrb[26].mxu0 %vm1086_vm0, %v327_v53  ;;  %10793 = vmatmul.mubr.f32.gmra.mrb[18].mxu1 %v10566_v38 }
 0x275   :  { %v20689_v21 = vpack.c.bf16 %v9523_v61, %v9522_v1  ;;  %v5110_v50 = vadd.f32 %v20387_v32, %v5109_v2  ;;  %18497 = vmatpush3.bf16.msra.mxu1 %v20130_v34  ;;  %17288 = vmatprep.mubr.msk.f32.mxu0 %vm1086_vm0, %v328_v57  ;;  %v331_v34 = vld [vmem:[#allocation2 + $0x8f8] sm:$0xff]  ;;  %v18079_v61 = vpop.f32.mrb[46].mxu1 }
 0x276   :  { %v9525_v43 = vmax.f32 %v5115_v26, 0.0  ;;  %18499 = vmatprep.subr.bf16.mxu1 %v20213_v11  ;;  %10862 = vmatprep.mubr.f32.mxu1 %v10377_v20  ;;  %v332_v11 = vld [vmem:[#allocation2 + $0x900] sm:$0xff]  ;;  %v8279_v31 = vpop.f32.mrb[47].mxu1  ;;  %v334_v20 = vld [vmem:[#allocation2 + $0x910] sm:$0xff]  ;;  %v8285_v26 = vadd.f32 %v20387_v32, %v18079_v61  ;;  %v20731_v61 = vadd.f32 %v20387_v32, %v20191_v27 }
 0x277   :  { %v9524_v3 = vmax.f32 %v5110_v50, 0.0  ;;  %v17131_v14 = vpop.f32.mrb[178].mxu0 }
 0x278   :  { %v5125_v52 = vadd.f32 %v20387_v32, %v17131_v14  ;;  %v5119_v44 = vpop.f32.mrb[179].mxu0  ;;  %17289 = vmatmul.mubr.msk.f32.gmra.mrb[28].mxu0 %vm1086_vm0, %v329_v60  ;;  %v8280_v60 = vadd.f32 %v20387_v32, %v8279_v31 }
 0x279   :  { %v5120_v5 = vadd.f32 %v20387_v32, %v5119_v44  ;;  %18501 = vmatpush3.bf16.msra.mxu1 %v20138_v49  ;;  %17291 = vmatprep.mubr.msk.f32.mxu0 %vm1086_vm0, %v330_v29  ;;  %v20700_v17 = vpack.c.bf16 %v9525_v43, %v9524_v3  ;;  %v333_v49 = vld [vmem:[#allocation2 + $0x908] sm:$0xff]  ;;  %v18082_v3 = vpop.f32.mrb[48].mxu1 }
 0x27a   :  { %v9527_v16 = vmax.f32 %v5125_v52, 0.0  ;;  %18503 = vmatprep.subr.bf16.mxu1 %v20223_v48  ;;  %v10158_v44 = vmax.f32 %v8280_v60, 0.0  ;;  %v338_v60 = vld [vmem:[#allocation2 + $0x930] sm:$0xff] }
 0x27b   :  { %v9526_v30 = vmax.f32 %v5120_v5, 0.0  ;;  %v17134_v36 = vpop.f32.mrb[180].mxu0  ;;  %v8289_v5 = vpop.f32.mrb[49].mxu1 }
 0x27c   :  { %v5135_v53 = vadd.f32 %v20387_v32, %v17134_v36  ;;  %v5129_v38 = vpop.f32.mrb[181].mxu0  ;;  %17292 = vmatmul.mubr.msk.f32.gmra.mrb[30].mxu0 %vm1086_vm0, %v331_v34  ;;  %v18085_v31 = vpop.f32.mrb[50].mxu1 }
 0x27d   :  { %v5130_v57 = vadd.f32 %v20387_v32, %v5129_v38  ;;  %18505 = vmatpush3.bf16.msra.mxu1 %v20146_v0  ;;  %17294 = vmatprep.mubr.msk.f32.mxu0 %vm1086_vm0, %v332_v11  ;;  %v20708_v1 = vpack.c.bf16 %v9527_v16, %v9526_v30  ;;  %v10159_v0 = vmax.f32 %v8285_v26, 0.0  ;;  %v336_v16 = vld [vmem:[#allocation2 + $0x920] sm:$0xff]  ;;  %v8295_v11 = vadd.f32 %v20387_v32, %v18082_v3  ;;  %v10441_v3 = vld [vmem:[%s24048_s3 + $0x228] sm:$0xff] }
 0x27e   :  { %v9529_v48 = vmax.f32 %v5135_v53, 0.0  ;;  %18507 = vmatprep.subr.bf16.mxu1 %v20233_v63  ;;  %v335_v63 = vld [vmem:[#allocation2 + $0x918] sm:$0xff]  ;;  %v20724_v30 = vadd.f32 %v20387_v32, %v20186_v22  ;;  %v8290_v38 = vadd.f32 %v20387_v32, %v8289_v5 }
 0x27f   :  { %v9528_v2 = vmax.f32 %v5130_v57, 0.0  ;;  %v17137_v50 = vpop.f32.mrb[182].mxu0 }
 0x280   :  { %v5145_v43 = vadd.f32 %v20387_v32, %v17137_v50  ;;  %v5139_v29 = vpop.f32.mrb[183].mxu0  ;;  %17295 = vmatmul.mubr.msk.f32.gmra.mrb[32].mxu0 %vm1086_vm0, %v333_v49  ;;  %v10161_v49 = vmax.f32 %v8295_v11, 0.0  ;;  %v10160_v26 = vmax.f32 %v8290_v38, 0.0 }
 0x281   :  { %v5140_v14 = vadd.f32 %v20387_v32, %v5139_v29  ;;  %18509 = vmatpush3.bf16.msra.mxu1 %v20154_v25  ;;  %17297 = vmatprep.mubr.msk.f32.mxu0 %vm1086_vm0, %v334_v20  ;;  %v20718_v52 = vpack.c.bf16 %v9529_v48, %v9528_v2  ;;  %v20726_v25 = vpack.c.bf16 %v10159_v0, %v10158_v44  ;;  %v337_v48 = vld [vmem:[#allocation2 + $0x928] sm:$0xff]  ;;  %v10376_v20 = vld [vmem:[%s24048_s3 + $0x20] sm:$0xff]  ;;  %v8299_v2 = vpop.f32.mrb[51].mxu1  ;;  %v10112_v44 = vmax.f32 %v20731_v61, 0.0 }
 0x282   :  { %v9531_v34 = vmax.f32 %v5145_v43, 0.0  ;;  %18511 = vmatprep.subr.bf16.mxu1 %v20241_v23  ;;  %v20744_v43 = vld [vmem:[#allocation5] ss:$0 sm:$0xff]  ;;  %v20759_v11 = vpop.f32.mrb[52].mxu1 }
 0x283   :  { %v9530_v36 = vmax.f32 %v5140_v14, 0.0  ;;  %v17140_v53 = vpop.f32.mrb[184].mxu0  ;;  %24096 = vst [vmem:[#allocation57_spill] sm:$0xff] %v20726_v25  ;;  %v20751_v14 = vpack.c.bf16 %v10161_v49, %v10160_v26 }
 0x284   :  { %v5155_v57 = vadd.f32 %v20387_v32, %v17140_v53  ;;  %v5149_v23 = vpop.f32.mrb[185].mxu0  ;;  %17298 = vmatmul.mubr.msk.f32.gmra.mrb[34].mxu0 %vm1086_vm0, %v335_v63  ;;  %v8300_v63 = vadd.f32 %v20744_v43, %v8299_v2  ;;  %v339_v53 = vld [vmem:[#allocation2 + $0x938] sm:$0xff] }
 0x285   :  { %v5150_v22 = vadd.f32 %v20387_v32, %v5149_v23  ;;  %18513 = vmatpush3.bf16.msra.mxu1 %v20162_v33  ;;  %17300 = vmatprep.mubr.msk.f32.mxu0 %vm1086_vm0, %v336_v16  ;;  %v20741_v27 = vpack.c.bf16 %v9531_v34, %v9530_v36  ;;  %v8305_v32 = vadd.f32 %v20744_v43, %v18085_v31  ;;  %v10113_v33 = vmax.f32 %v20724_v30, 0.0 }
 0x286   :  { %v9533_v50 = vmax.f32 %v5155_v57, 0.0  ;;  %18515 = vmatprep.subr.bf16.mxu1 %v20329_v37  ;;  %24097 = vst [vmem:[#allocation58_spill] sm:$0xff] %v20751_v14  ;;  %v8065_v37 = vadd.f32 %v20744_v43, %v20198_v41  ;;  %v8060_v30 = vadd.f32 %v20744_v43, %v20203_v47  ;;  %v10440_v41 = vld [vmem:[%s24048_s3 + $0x220] sm:$0xff]  ;;  %v10162_v61 = vmax.f32 %v8300_v63, 0.0  ;;  %v20771_v57 = vpop.f32.mrb[53].mxu1  ;;  %v24120_v14 = vld [vmem:[#allocation36_spill] sm:$0xff] }
 0x287   :  { %v9532_v29 = vmax.f32 %v5150_v22, 0.0  ;;  %v17143_v0 = vpop.f32.mrb[186].mxu0  ;;  %v10163_v16 = vmax.f32 %v8305_v32, 0.0  ;;  %v340_v47 = vld [vmem:[#allocation2 + $0x940] sm:$0xff] }
 0x288   :  { %v5165_v5 = vadd.f32 %v20744_v43, %v17143_v0  ;;  %v5159_v34 = vpop.f32.mrb[187].mxu0  ;;  %17301 = vmatmul.mubr.msk.f32.gmra.mrb[36].mxu0 %vm1086_vm0, %v337_v48  ;;  %10863 = vmatmul.mubr.f32.vlgmr.msra.gmra.mrb[20].mxu1 %v10376_v20  ;;  %v10115_v48 = vmax.f32 %v8065_v37, 0.0  ;;  %v10114_v2 = vmax.f32 %v8060_v30, 0.0 }
 0x289   :  { %v5160_v36 = vadd.f32 %v20744_v43, %v5159_v34  ;;  %18517 = vmatpush3.bf16.msra.mxu1 %v20246_v40  ;;  %17303 = vmatprep.mubr.msk.f32.mxu0 %vm1086_vm0, %v338_v60  ;;  %v20769_v38 = vpack.c.bf16 %v9533_v50, %v9532_v29  ;;  %v10505_v40 = vld [vmem:[%s24048_s3 + $0x428] sm:$0xff]  ;;  %v20777_v22 = vpack.c.bf16 %v10163_v16, %v10162_v61  ;;  %v10504_v60 = vld [vmem:[%s24048_s3 + $0x420] sm:$0xff] }
 0x28a   :  { %v9535_v23 = vmax.f32 %v5165_v5, 0.0  ;;  %18519 = vmatprep.subr.bf16.mxu1 %v20337_v45  ;;  %10867 = vmatprep.mubr.f32.mxu1 %v10441_v3  ;;  %v341_v50 = vld [vmem:[#allocation2 + $0x948] sm:$0xff]  ;;  %v20789_v29 = vpack.c.bf16 %v10113_v33, %v10112_v44  ;;  %v342_v3 = vld [vmem:[#allocation2 + $0x950] sm:$0xff]  ;;  %v10568_v44 = vld [vmem:[%s24048_s3 + $0x620] sm:$0xff]  ;;  %v20805_v30 = vpack.c.bf16 %v10115_v48, %v10114_v2 }
 0x28b   :  { %v9534_v49 = vmax.f32 %v5160_v36, 0.0  ;;  %v17146_v31 = vpop.f32.mrb[188].mxu0  ;;  %24098 = vst [vmem:[#allocation59_spill] sm:$0xff] %v20777_v22 }
 0x28c   :  { %v5175_v20 = vadd.f32 %v20744_v43, %v17146_v31  ;;  %v5169_v26 = vpop.f32.mrb[189].mxu0  ;;  %17304 = vmatmul.mubr.msk.f32.gmra.mrb[38].mxu0 %vm1086_vm0, %v339_v53  ;;  %10868 = vmatmul.mubr.f32.gmra.mrb[22].mxu1 %v10440_v41  ;;  %v344_v53 = vld [vmem:[#allocation2 + $0x960] sm:$0xff]  ;;  %v24099_v31 = vld [vmem:[#allocation12_spill] sm:$0xff] }
 0x28d   :  { %v5170_v45 = vadd.f32 %v20744_v43, %v5169_v26  ;;  %18521 = vmatpush3.bf16.msra.mxu1 %v20254_v6  ;;  %17306 = vmatprep.mubr.msk.f32.mxu0 %vm1086_vm0, %v340_v47  ;;  %v20787_v32 = vpack.c.bf16 %v9535_v23, %v9534_v49  ;;  %v10569_v6 = vld [vmem:[%s24048_s3 + $0x628] sm:$0xff] }
 0x28e   :  { %v9537_v0 = vmax.f32 %v5175_v20, 0.0  ;;  %18523 = vmatprep.subr.bf16.mxu1 %v20347_v54  ;;  %10872 = vmatprep.mubr.f32.mxu1 %v10505_v40  ;;  %v343_v54 = vld [vmem:[#allocation2 + $0x958] sm:$0xff]  ;;  %v346_v20 = vld [vmem:[#allocation2 + $0x970] sm:$0xff] }
 0x28f   :  { %v9536_v63 = vmax.f32 %v5170_v45, 0.0  ;;  %v17149_v37 = vpop.f32.mrb[190].mxu0 }
 0x290   :  { %v5185_v5 = vadd.f32 %v20744_v43, %v17149_v37  ;;  %v5179_v34 = vpop.f32.mrb[191].mxu0  ;;  %17307 = vmatmul.mubr.msk.f32.gmra.mrb[40].mxu0 %vm1086_vm0, %v341_v50  ;;  %10873 = vmatmul.mubr.f32.gmra.mrb[24].mxu1 %v10504_v60 }
 0x291   :  { %v5180_v33 = vadd.f32 %v20744_v43, %v5179_v34  ;;  %18525 = vmatpush3.bf16.msra.mxu1 %v20263_v39  ;;  %17309 = vmatprep.mubr.msk.f32.mxu0 %vm1086_vm0, %v342_v3  ;;  %v20803_v16 = vpack.c.bf16 %v9537_v0, %v9536_v63  ;;  %v10379_v39 = vld [vmem:[%s24048_s3 + $0x38] sm:$0xff] }
 0x292   :  { %v9539_v36 = vmax.f32 %v5185_v5, 0.0  ;;  %18527 = vmatprep.subr.bf16.mxu1 %v20359_v18  ;;  %10877 = vmatprep.mubr.f32.mxu1 %v10569_v6  ;;  %v345_v18 = vld [vmem:[#allocation2 + $0x968] sm:$0xff]  ;;  %v24100_v3 = vld [vmem:[#allocation14_spill] sm:$0xff] }
 0x293   :  { %v9538_v41 = vmax.f32 %v5180_v33, 0.0  ;;  %v17152_v61 = vpop.f32.mrb[192].mxu0  ;;  %v347_v63 = vld [vmem:[#allocation2 + $0x978] sm:$0xff] }
 0x294   :  { %v5195_v23 = vadd.f32 %v20744_v43, %v17152_v61  ;;  %v5189_v47 = vpop.f32.mrb[193].mxu0  ;;  %17310 = vmatmul.mubr.msk.f32.gmra.mrb[42].mxu0 %vm1086_vm0, %v343_v54  ;;  %10878 = vmatmul.mubr.f32.gmra.mrb[26].mxu1 %v10568_v44 }
 0x295   :  { %v5190_v49 = vadd.f32 %v20744_v43, %v5189_v47  ;;  %18529 = vmatpush3.bf16.msra.mxu1 %v24099_v31  ;;  %17312 = vmatprep.mubr.msk.f32.mxu0 %vm1086_vm0, %v344_v53  ;;  %v20816_v40 = vpack.c.bf16 %v9539_v36, %v9538_v41  ;;  %v24101_v36 = vld [vmem:[#allocation16_spill] sm:$0xff] }
 0x296   :  { %v9541_v48 = vmax.f32 %v5195_v23, 0.0  ;;  %18531 = vmatprep.subr.bf16.mxu1 %v20375_v58  ;;  %10947 = vmatprep.mubr.f32.mxu1 %v10379_v39  ;;  %v348_v58 = vld [vmem:[#allocation2 + $0x980] sm:$0xff]  ;;  %v349_v53 = vld [vmem:[#allocation2 + $0x988] sm:$0xff] }
 0x297   :  { %v9540_v26 = vmax.f32 %v5190_v49, 0.0  ;;  %v17155_v2 = vpop.f32.mrb[194].mxu0 }
 0x298   :  { %v5205_v45 = vadd.f32 %v20744_v43, %v17155_v2  ;;  %v5199_v50 = vpop.f32.mrb[195].mxu0  ;;  %17313 = vmatmul.mubr.msk.f32.gmra.mrb[44].mxu0 %vm1086_vm0, %v345_v18  ;;  %v24102_v18 = vld [vmem:[#allocation18_spill] sm:$0xff] }
 0x299   :  { %v20821_v60 = vpack.c.bf16 %v9541_v48, %v9540_v26  ;;  %v5200_v0 = vadd.f32 %v20744_v43, %v5199_v50  ;;  %18533 = vmatpush3.bf16.msra.mxu1 %v24100_v3  ;;  %17315 = vmatprep.mubr.msk.f32.mxu0 %vm1086_vm0, %v346_v20  ;;  %v351_v48 = vld [vmem:[#allocation2 + $0x998] sm:$0xff] }
 0x29a   :  { %v9543_v37 = vmax.f32 %v5205_v45, 0.0  ;;  %18535 = vmatprep.subr.bf16.mxu1 %v20385_v62  ;;  %v350_v62 = vld [vmem:[#allocation2 + $0x990] sm:$0xff]  ;;  %v24103_v26 = vld [vmem:[#allocation26_spill] sm:$0xff] }
 0x29b   :  { %v9542_v6 = vmax.f32 %v5200_v0, 0.0  ;;  %v17158_v5 = vpop.f32.mrb[196].mxu0 }
 0x29c   :  { %v5215_v34 = vadd.f32 %v20744_v43, %v17158_v5  ;;  %v5209_v33 = vpop.f32.mrb[197].mxu0  ;;  %17316 = vmatmul.mubr.msk.f32.gmra.mrb[46].mxu0 %vm1086_vm0, %v347_v63 }
 0x29d   :  { %v20829_v54 = vpack.c.bf16 %v9543_v37, %v9542_v6  ;;  %v5210_v44 = vadd.f32 %v20744_v43, %v5209_v33  ;;  %18537 = vmatpush3.bf16.msra.mxu1 %v24101_v36  ;;  %17318 = vmatprep.mubr.msk.f32.mxu0 %vm1086_vm0, %v348_v58  ;;  %v24104_v37 = vld [vmem:[#allocation20_spill] sm:$0xff] }
 0x29e   :  { %v9545_v41 = vmax.f32 %v5215_v34, 0.0  ;;  %18539 = vmatprep.subr.bf16.mxu1 %v20395_v13  ;;  %v352_v13 = vld [vmem:[#allocation2 + $0x9a0] sm:$0xff]  ;;  %v353_v58 = vld [vmem:[#allocation2 + $0x9a8] sm:$0xff]  ;;  %v10378_v6 = vld [vmem:[%s24048_s3 + $0x30] sm:$0xff] }
 0x29f   :  { %v9544_v61 = vmax.f32 %v5210_v44, 0.0  ;;  %v17161_v39 = vpop.f32.mrb[198].mxu0  ;;  %v24105_v34 = vld [vmem:[#allocation43_spill] sm:$0xff]  ;;  %v354_v33 = vld [vmem:[#allocation2 + $0x9b0] sm:$0xff] }
 0x2a0   :  { %v5225_v23 = vadd.f32 %v20744_v43, %v17161_v39  ;;  %v5219_v47 = vpop.f32.mrb[199].mxu0  ;;  %17319 = vmatmul.mubr.msk.f32.gmra.mrb[48].mxu0 %vm1086_vm0, %v349_v53  ;;  %v10443_v53 = vld [vmem:[%s24048_s3 + $0x238] sm:$0xff] }
 0x2a1   :  { %v20837_v49 = vpack.c.bf16 %v9545_v41, %v9544_v61  ;;  %v5220_v31 = vadd.f32 %v20744_v43, %v5219_v47  ;;  %18541 = vmatpush3.bf16.msra.mxu1 %v24102_v18  ;;  %17321 = vmatprep.mubr.msk.f32.mxu0 %vm1086_vm0, %v350_v62  ;;  %v355_v47 = vld [vmem:[#allocation2 + $0x9b8] sm:$0xff] }
 0x2a2   :  { %v9547_v20 = vmax.f32 %v5225_v23, 0.0  ;;  %18543 = vmatprep.subr.bf16.mxu1 %v24103_v26  ;;  %v24106_v23 = vld [vmem:[#allocation27_spill] sm:$0xff] }
 0x2a3   :  { %v9546_v2 = vmax.f32 %v5220_v31, 0.0  ;;  %v17164_v45 = vpop.f32.mrb[200].mxu0  ;;  %v10442_v31 = vld [vmem:[%s24048_s3 + $0x230] sm:$0xff] }
 0x2a4   :  { %v5235_v50 = vadd.f32 %v20744_v43, %v17164_v45  ;;  %v5229_v0 = vpop.f32.mrb[201].mxu0  ;;  %17322 = vmatmul.mubr.msk.f32.gmra.mrb[50].mxu0 %vm1086_vm0, %v351_v48  ;;  %v356_v48 = vld [vmem:[#allocation2 + $0x9c0] sm:$0xff] }
 0x2a5   :  { %v20845_v3 = vpack.c.bf16 %v9547_v20, %v9546_v2  ;;  %v5230_v63 = vadd.f32 %v20744_v43, %v5229_v0  ;;  %18545 = vmatpush3.bf16.msra.mxu1 %v24104_v37  ;;  %17324 = vmatprep.mubr.msk.f32.mxu0 %vm1086_vm0, %v352_v13  ;;  %v10507_v13 = vld [vmem:[%s24048_s3 + $0x438] sm:$0xff]  ;;  %v10506_v37 = vld [vmem:[%s24048_s3 + $0x430] sm:$0xff] }
 0x2a6   :  { %v9549_v5 = vmax.f32 %v5235_v50, 0.0  ;;  %18547 = vmatprep.subr.bf16.mxu1 %v24105_v34 }
 0x2a7   :  { %v9548_v44 = vmax.f32 %v5230_v63, 0.0  ;;  %v17167_v36 = vpop.f32.mrb[202].mxu0  ;;  %v24107_v63 = vld [vmem:[#allocation29_spill] sm:$0xff] }
 0x2a8   :  { %v5245_v41 = vadd.f32 %v20744_v43, %v17167_v36  ;;  %v5239_v62 = vpop.f32.mrb[203].mxu0  ;;  %17325 = vmatmul.mubr.msk.f32.gmra.mrb[52].mxu0 %vm1086_vm0, %v353_v58  ;;  %10948 = vmatmul.mubr.f32.vlgmr.msra.gmra.mrb[28].mxu1 %v10378_v6  ;;  %v24108_v58 = vld [vmem:[#allocation23_spill] sm:$0xff]  ;;  %v358_v36 = vld [vmem:[#allocation2 + $0x9d0] sm:$0xff] }
 0x2a9   :  { %v20859_v61 = vpack.c.bf16 %v9549_v5, %v9548_v44  ;;  %v5240_v39 = vadd.f32 %v20744_v43, %v5239_v62  ;;  %18549 = vmatpush3.bf16.msra.mxu1 %v24106_v23  ;;  %17327 = vmatprep.mubr.msk.f32.mxu0 %vm1086_vm0, %v354_v33  ;;  %v8155_v6 = vadd.f32 %v20744_v43, %v24108_v58  ;;  %v24109_v5 = vld [vmem:[#allocation24_spill] sm:$0xff]  ;;  %v24110_v44 = vld [vmem:[#allocation47_spill] sm:$0xff]  ;;  %v10571_v62 = vld [vmem:[%s24048_s3 + $0x638] sm:$0xff] }
 0x2aa   :  { %v9551_v18 = vmax.f32 %v5245_v41, 0.0  ;;  %18551 = vmatprep.subr.bf16.mxu1 %v20501_v15  ;;  %10952 = vmatprep.mubr.f32.mxu1 %v10443_v53  ;;  %v357_v15 = vld [vmem:[#allocation2 + $0x9c8] sm:$0xff]  ;;  %v8150_v34 = vadd.f32 %v20744_v43, %v24109_v5  ;;  %v24114_v5 = vld [vmem:[#allocation50_spill] sm:$0xff] }
 0x2ab   :  { %v9550_v20 = vmax.f32 %v5240_v39, 0.0  ;;  %v17170_v26 = vpop.f32.mrb[204].mxu0  ;;  %v24111_v39 = vld [vmem:[#allocation28_spill] sm:$0xff] }
 0x2ac   :  { %v5255_v2 = vadd.f32 %v20744_v43, %v17170_v26  ;;  %v5249_v45 = vpop.f32.mrb[205].mxu0  ;;  %17328 = vmatmul.mubr.msk.f32.gmra.mrb[54].mxu0 %vm1086_vm0, %v355_v47  ;;  %10953 = vmatmul.mubr.f32.gmra.mrb[30].mxu1 %v10442_v31  ;;  %v8165_v23 = vadd.f32 %v20744_v43, %v24111_v39  ;;  %v24115_v39 = vld [vmem:[#allocation31_spill] sm:$0xff] }
 0x2ad   :  { %v20873_v50 = vpack.c.bf16 %v9551_v18, %v9550_v20  ;;  %v5250_v0 = vadd.f32 %v20744_v43, %v5249_v45  ;;  %18553 = vmatpush3.bf16.msra.mxu1 %v24107_v63  ;;  %17330 = vmatprep.mubr.msk.f32.mxu0 %vm1086_vm0, %v356_v48  ;;  %v20893_v18 = vpop.f32.mrb[54].mxu1  ;;  %v24112_v48 = vld [vmem:[#allocation30_spill] sm:$0xff] }
 0x2ae   :  { %v9553_v33 = vmax.f32 %v5255_v2, 0.0  ;;  %18555 = vmatprep.subr.bf16.mxu1 %v24110_v44  ;;  %10957 = vmatprep.mubr.f32.mxu1 %v10507_v13  ;;  %v8160_v20 = vadd.f32 %v20744_v43, %v24112_v48  ;;  %v24113_v2 = vld [vmem:[#allocation32_spill] sm:$0xff]  ;;  %v359_v45 = vld [vmem:[#allocation2 + $0x9d8] sm:$0xff]  ;;  %v20905_v63 = vpop.f32.mrb[55].mxu1 }
 0x2af   :  { %v9552_v53 = vmax.f32 %v5250_v0, 0.0  ;;  %v17173_v41 = vpop.f32.mrb[206].mxu0  ;;  %v10570_v0 = vld [vmem:[%s24048_s3 + $0x630] sm:$0xff] }
 0x2b0   :  { %v5265_v47 = vadd.f32 %v20744_v43, %v17173_v41  ;;  %v5259_v31 = vpop.f32.mrb[207].mxu0  ;;  %17331 = vmatmul.mubr.msk.f32.gmra.mrb[56].mxu0 %vm1086_vm0, %v357_v15  ;;  %10958 = vmatmul.mubr.f32.gmra.mrb[32].mxu1 %v10506_v37  ;;  %v10133_v15 = vmax.f32 %v8155_v6, 0.0  ;;  %v10132_v37 = vmax.f32 %v8150_v34, 0.0  ;;  %v10135_v41 = vmax.f32 %v8165_v23, 0.0  ;;  %v20915_v6 = vpop.f32.mrb[56].mxu1  ;;  %v24117_v23 = vld [vmem:[#allocation35_spill] sm:$0xff] }
 0x2b1   :  { %v20897_v26 = vpack.c.bf16 %v9553_v33, %v9552_v53  ;;  %v5260_v13 = vadd.f32 %v20744_v43, %v5259_v31  ;;  %18557 = vmatpush3.bf16.msra.mxu1 %v24113_v2  ;;  %17333 = vmatprep.mubr.msk.f32.mxu0 %vm1086_vm0, %v358_v36  ;;  %v360_v33 = vld [vmem:[#allocation2 + $0x9e0] sm:$0xff]  ;;  %v10381_v36 = vld [vmem:[%s24048_s3 + $0x48] sm:$0xff]  ;;  %v8175_v31 = vadd.f32 %v20744_v43, %v24115_v39  ;;  %v10134_v34 = vmax.f32 %v8160_v20, 0.0 }
 0x2b2   :  { %v9555_v58 = vmax.f32 %v5265_v47, 0.0  ;;  %18559 = vmatprep.subr.bf16.mxu1 %v24114_v5  ;;  %10962 = vmatprep.mubr.f32.mxu1 %v10571_v62  ;;  %v24116_v62 = vld [vmem:[#allocation33_spill] sm:$0xff]  ;;  %v361_v39 = vld [vmem:[#allocation2 + $0x9e8] sm:$0xff]  ;;  %v20927_v20 = vpack.c.bf16 %v10133_v15, %v10132_v37  ;;  %v24121_v37 = vld [vmem:[#allocation38_spill] sm:$0xff] }
 0x2b3   :  { %v9554_v44 = vmax.f32 %v5260_v13, 0.0  ;;  %v17176_v53 = vpop.f32.mrb[208].mxu0  ;;  %v8170_v47 = vadd.f32 %v20744_v43, %v24116_v62 }
 0x2b4   :  { %v5275_v48 = vadd.f32 %v20744_v43, %v17176_v53  ;;  %v5269_v2 = vpop.f32.mrb[209].mxu0  ;;  %17334 = vmatmul.mubr.msk.f32.gmra.mrb[58].mxu0 %vm1086_vm0, %v359_v45  ;;  %10963 = vmatmul.mubr.f32.gmra.mrb[34].mxu1 %v10570_v0  ;;  %v20924_v53 = vpop.f32.mrb[57].mxu1  ;;  %v362_v45 = vld [vmem:[#allocation2 + $0x9f0] sm:$0xff]  ;;  %24118 = vst [vmem:[#allocation12_spill] sm:$0xff] %v20927_v20 }
 0x2b5   :  { %v20919_v13 = vpack.c.bf16 %v9555_v58, %v9554_v44  ;;  %v5270_v5 = vadd.f32 %v20744_v43, %v5269_v2  ;;  %18561 = vmatpush3.bf16.msra.mxu1 %v24117_v23  ;;  %17336 = vmatprep.mubr.msk.f32.mxu0 %vm1086_vm0, %v360_v33  ;;  %v10137_v58 = vmax.f32 %v8175_v31, 0.0  ;;  %v24119_v44 = vld [vmem:[#allocation34_spill] sm:$0xff]  ;;  %v8180_v23 = vadd.f32 %v20744_v43, %v24120_v14 }
 0x2b6   :  { %v9557_v22 = vmax.f32 %v5275_v48, 0.0  ;;  %18563 = vmatprep.subr.bf16.mxu1 %v20545_v59  ;;  %11032 = vmatprep.mubr.f32.mxu1 %v10381_v36  ;;  %v8185_v2 = vadd.f32 %v20744_v43, %v24119_v44  ;;  %v20935_v48 = vpop.f32.mrb[58].mxu1  ;;  %v10136_v59 = vmax.f32 %v8170_v47, 0.0  ;;  %v363_v36 = vld [vmem:[#allocation2 + $0x9f8] sm:$0xff]  ;;  %v20944_v14 = vpack.c.bf16 %v10135_v41, %v10134_v34 }
 0x2b7   :  { %v9556_v0 = vmax.f32 %v5270_v5, 0.0  ;;  %v17179_v62 = vpop.f32.mrb[210].mxu0  ;;  %v20942_v5 = vpop.f32.mrb[59].mxu1  ;;  %v10138_v34 = vmax.f32 %v8180_v23, 0.0 }
 0x2b8   :  { %v5285_v33 = vadd.f32 %v20744_v43, %v17179_v62  ;;  %v5279_v25 = vpop.f32.mrb[211].mxu0  ;;  %17337 = vmatmul.mubr.msk.f32.gmra.mrb[60].mxu0 %vm1086_vm0, %v361_v39  ;;  %24122 = vst [vmem:[#allocation14_spill] sm:$0xff] %v20944_v14  ;;  %v364_v39 = vld [vmem:[#allocation2 + $0xa00] sm:$0xff]  ;;  %v10139_v47 = vmax.f32 %v8185_v2, 0.0  ;;  %v20953_v41 = vpop.f32.mrb[60].mxu1  ;;  %v365_v2 = vld [vmem:[#allocation2 + $0xa08] sm:$0xff] }
 0x2b9   :  { %v5280_v15 = vadd.f32 %v20744_v43, %v5279_v25  ;;  %18565 = vmatpush3.bf16.msra.mxu1 %v24121_v37  ;;  %17339 = vmatprep.mubr.msk.f32.mxu0 %vm1086_vm0, %v362_v45  ;;  %v20940_v31 = vpack.c.bf16 %v9557_v22, %v9556_v0  ;;  %v8195_v25 = vadd.f32 %v20744_v43, %v24123_v24  ;;  %v24124_v37 = vld [vmem:[#allocation39_spill] sm:$0xff]  ;;  %v20960_v24 = vpop.f32.mrb[61].mxu1 }
 0x2ba   :  { %v9559_v62 = vmax.f32 %v5285_v33, 0.0  ;;  %18567 = vmatprep.subr.bf16.mxu1 %v20561_v51  ;;  %v8190_v45 = vadd.f32 %v20744_v43, %v24124_v37  ;;  %v24125_v33 = vld [vmem:[#allocation40_spill] sm:$0xff]  ;;  %v20962_v37 = vpack.c.bf16 %v10137_v58, %v10136_v59 }
 0x2bb   :  { %v9558_v44 = vmax.f32 %v5280_v15, 0.0  ;;  %v17182_v42 = vpop.f32.mrb[212].mxu0  ;;  %v10141_v23 = vmax.f32 %v8195_v25, 0.0 }
 0x2bc   :  { %v5295_v22 = vadd.f32 %v20744_v43, %v17182_v42  ;;  %v5289_v0 = vpop.f32.mrb[213].mxu0  ;;  %17340 = vmatmul.mubr.msk.f32.gmra.mrb[62].mxu0 %vm1086_vm0, %v363_v36  ;;  %24126 = vst [vmem:[#allocation16_spill] sm:$0xff] %v20962_v37  ;;  %v366_v36 = vld [vmem:[#allocation2 + $0xa10] sm:$0xff]  ;;  %v10140_v58 = vmax.f32 %v8190_v45, 0.0 }
 0x2bd   :  { %v5290_v51 = vadd.f32 %v20744_v43, %v5289_v0  ;;  %18569 = vmatpush3.bf16.msra.mxu1 %v24125_v33  ;;  %17342 = vmatprep.mubr.msk.f32.mxu0 %vm1086_vm0, %v364_v39  ;;  %v20958_v15 = vpack.c.bf16 %v9559_v62, %v9558_v44  ;;  %v8205_v0 = vadd.f32 %v20744_v43, %v24127_v46  ;;  %v24128_v33 = vld [vmem:[#allocation45_spill] sm:$0xff] }
 0x2be   :  { %v9561_v42 = vmax.f32 %v5295_v22, 0.0  ;;  %18571 = vmatprep.subr.bf16.mxu1 %v20577_v8  ;;  %v8200_v39 = vadd.f32 %v20744_v43, %v24128_v33  ;;  %v24129_v22 = vld [vmem:[#allocation41_spill] sm:$0xff]  ;;  %v368_v33 = vld [vmem:[#allocation2 + $0xa20] sm:$0xff] }
 0x2bf   :  { %v9560_v28 = vmax.f32 %v5290_v51, 0.0  ;;  %v17185_v9 = vpop.f32.mrb[214].mxu0  ;;  %v367_v8 = vld [vmem:[#allocation2 + $0xa18] sm:$0xff]  ;;  %v20976_v51 = vpack.c.bf16 %v10139_v47, %v10138_v34  ;;  %v10143_v14 = vmax.f32 %v8205_v0, 0.0 }
 0x2c0   :  { %v5305_v62 = vadd.f32 %v20744_v43, %v17185_v9  ;;  %v5299_v44 = vpop.f32.mrb[215].mxu0  ;;  %17343 = vmatmul.mubr.msk.f32.gmra.mrb[64].mxu0 %vm1086_vm0, %v365_v2  ;;  %v24130_v2 = vld [vmem:[#allocation46_spill] sm:$0xff] }
 0x2c1   :  { %v5300_v59 = vadd.f32 %v20744_v43, %v5299_v44  ;;  %18573 = vmatpush3.bf16.msra.mxu1 %v24129_v22  ;;  %17345 = vmatprep.mubr.msk.f32.mxu0 %vm1086_vm0, %v366_v36  ;;  %v20974_v25 = vpack.c.bf16 %v9561_v42, %v9560_v28  ;;  %v8215_v45 = vadd.f32 %v20744_v43, %v24130_v2  ;;  %v24131_v44 = vld [vmem:[#allocation48_spill] sm:$0xff]  ;;  %v10142_v28 = vmax.f32 %v8200_v39, 0.0  ;;  %v24132_v34 = vld [vmem:[#allocation42_spill] sm:$0xff]  ;;  %v24133_v2 = vld [vmem:[#allocation49_spill] sm:$0xff] }
 0x2c2   :  { %v9563_v46 = vmax.f32 %v5305_v62, 0.0  ;;  %18575 = vmatprep.subr.bf16.mxu1 %v20588_v35  ;;  %v8210_v22 = vadd.f32 %v20744_v43, %v24131_v44  ;;  %v369_v35 = vld [vmem:[#allocation2 + $0xa28] sm:$0xff]  ;;  %v10380_v42 = vld [vmem:[%s24048_s3 + $0x40] sm:$0xff]  ;;  %v20993_v62 = vpack.c.bf16 %v10141_v23, %v10140_v58  ;;  %v8225_v44 = vadd.f32 %v20744_v43, %v24133_v2 }
 0x2c3   :  { %v9562_v9 = vmax.f32 %v5300_v59, 0.0  ;;  %v17188_v37 = vpop.f32.mrb[216].mxu0  ;;  %v370_v59 = vld [vmem:[#allocation2 + $0xa30] sm:$0xff]  ;;  %v21013_v2 = vpack.c.bf16 %v10143_v14, %v10142_v28 }
 0x2c4   :  { %v5315_v36 = vadd.f32 %v20744_v43, %v17188_v37  ;;  %v5309_v20 = vpop.f32.mrb[217].mxu0  ;;  %17346 = vmatmul.mubr.msk.f32.gmra.mrb[66].mxu0 %vm1086_vm0, %v367_v8 }
 0x2c5   :  { %v5310_v47 = vadd.f32 %v20744_v43, %v5309_v20  ;;  %18577 = vmatpush3.bf16.msra.mxu1 %v24132_v34  ;;  %17348 = vmatprep.mubr.msk.f32.mxu0 %vm1086_vm0, %v368_v33  ;;  %v20991_v0 = vpack.c.bf16 %v9563_v46, %v9562_v9  ;;  %v10445_v20 = vld [vmem:[%s24048_s3 + $0x248] sm:$0xff]  ;;  %v10145_v33 = vmax.f32 %v8215_v45, 0.0  ;;  %v371_v45 = vld [vmem:[#allocation2 + $0xa38] sm:$0xff] }
 0x2c6   :  { %v9565_v37 = vmax.f32 %v5315_v36, 0.0  ;;  %18579 = vmatprep.subr.bf16.mxu1 %v20700_v17  ;;  %v24134_v34 = vld [vmem:[#allocation51_spill] sm:$0xff]  ;;  %v10144_v17 = vmax.f32 %v8210_v22, 0.0 }
 0x2c7   :  { %v9564_v39 = vmax.f32 %v5310_v47, 0.0  ;;  %v17191_v8 = vpop.f32.mrb[218].mxu0  ;;  %v8220_v46 = vadd.f32 %v20744_v43, %v24134_v34  ;;  %v10444_v36 = vld [vmem:[%s24048_s3 + $0x240] sm:$0xff] }
 0x2c8   :  { %v5325_v23 = vadd.f32 %v20744_v43, %v17191_v8  ;;  %v5319_v58 = vpop.f32.mrb[219].mxu0  ;;  %17349 = vmatmul.mubr.msk.f32.gmra.mrb[68].mxu0 %vm1086_vm0, %v369_v35  ;;  %11033 = vmatmul.mubr.f32.vlgmr.msra.gmra.mrb[36].mxu1 %v10380_v42  ;;  %v372_v35 = vld [vmem:[#allocation2 + $0xa40] sm:$0xff] }
 0x2c9   :  { %v5320_v9 = vadd.f32 %v20744_v43, %v5319_v58  ;;  %18581 = vmatpush3.bf16.msra.mxu1 %v20593_v4  ;;  %17351 = vmatprep.mubr.msk.f32.mxu0 %vm1086_vm0, %v370_v59  ;;  %v21011_v47 = vpack.c.bf16 %v9565_v37, %v9564_v39  ;;  %v10509_v4 = vld [vmem:[%s24048_s3 + $0x448] sm:$0xff]  ;;  %v10147_v59 = vmax.f32 %v8225_v44, 0.0  ;;  %v10146_v14 = vmax.f32 %v8220_v46, 0.0  ;;  %v10508_v37 = vld [vmem:[%s24048_s3 + $0x440] sm:$0xff] }
 0x2ca   :  { %v9567_v8 = vmax.f32 %v5325_v23, 0.0  ;;  %18583 = vmatprep.subr.bf16.mxu1 %v20708_v1  ;;  %11037 = vmatprep.mubr.f32.mxu1 %v10445_v20  ;;  %v373_v1 = vld [vmem:[#allocation2 + $0xa48] sm:$0xff]  ;;  %v21029_v20 = vpack.c.bf16 %v10145_v33, %v10144_v17  ;;  %v374_v23 = vld [vmem:[#allocation2 + $0xa50] sm:$0xff]  ;;  %v10572_v17 = vld [vmem:[%s24048_s3 + $0x640] sm:$0xff] }
 0x2cb   :  { %v9566_v22 = vmax.f32 %v5320_v9, 0.0  ;;  %v17194_v42 = vpop.f32.mrb[220].mxu0 }
 0x2cc   :  { %v5335_v34 = vadd.f32 %v20744_v43, %v17194_v42  ;;  %v5329_v58 = vpop.f32.mrb[221].mxu0  ;;  %17352 = vmatmul.mubr.msk.f32.gmra.mrb[70].mxu0 %vm1086_vm0, %v371_v45  ;;  %11038 = vmatmul.mubr.f32.gmra.mrb[38].mxu1 %v10444_v36  ;;  %v376_v42 = vld [vmem:[#allocation2 + $0xa60] sm:$0xff] }
 0x2cd   :  { %v5330_v28 = vadd.f32 %v20744_v43, %v5329_v58  ;;  %18585 = vmatpush3.bf16.msra.mxu1 %v20601_v12  ;;  %17354 = vmatprep.mubr.msk.f32.mxu0 %vm1086_vm0, %v372_v35  ;;  %v21027_v39 = vpack.c.bf16 %v9567_v8, %v9566_v22  ;;  %v10573_v12 = vld [vmem:[%s24048_s3 + $0x648] sm:$0xff]  ;;  %v21045_v35 = vpack.c.bf16 %v10147_v59, %v10146_v14 }
 0x2ce   :  { %v9569_v44 = vmax.f32 %v5335_v34, 0.0  ;;  %18587 = vmatprep.subr.bf16.mxu1 %v20718_v52  ;;  %11042 = vmatprep.mubr.f32.mxu1 %v10509_v4  ;;  %v375_v52 = vld [vmem:[#allocation2 + $0xa58] sm:$0xff] }
 0x2cf   :  { %v9568_v46 = vmax.f32 %v5330_v28, 0.0  ;;  %v17197_v9 = vpop.f32.mrb[222].mxu0 }
 0x2d0   :  { %v5345_v45 = vadd.f32 %v20744_v43, %v17197_v9  ;;  %v5339_v36 = vpop.f32.mrb[223].mxu0  ;;  %17355 = vmatmul.mubr.msk.f32.gmra.mrb[72].mxu0 %vm1086_vm0, %v373_v1  ;;  %11043 = vmatmul.mubr.f32.gmra.mrb[40].mxu1 %v10508_v37  ;;  %v378_v37 = vld [vmem:[#allocation2 + $0xa70] sm:$0xff] }
 0x2d1   :  { %v5340_v33 = vadd.f32 %v20744_v43, %v5339_v36  ;;  %18589 = vmatpush3.bf16.msra.mxu1 %v20610_v19  ;;  %17357 = vmatprep.mubr.msk.f32.mxu0 %vm1086_vm0, %v374_v23  ;;  %v21043_v8 = vpack.c.bf16 %v9569_v44, %v9568_v46  ;;  %v10383_v19 = vld [vmem:[%s24048_s3 + $0x58] sm:$0xff] }
 0x2d2   :  { %v9571_v22 = vmax.f32 %v5345_v45, 0.0  ;;  %18591 = vmatprep.subr.bf16.mxu1 %v20741_v27  ;;  %11047 = vmatprep.mubr.f32.mxu1 %v10573_v12  ;;  %v377_v27 = vld [vmem:[#allocation2 + $0xa68] sm:$0xff]  ;;  %v379_v45 = vld [vmem:[#allocation2 + $0xa78] sm:$0xff] }
 0x2d3   :  { %v9570_v4 = vmax.f32 %v5340_v33, 0.0  ;;  %v17200_v34 = vpop.f32.mrb[224].mxu0 }
 0x2d4   :  { %v5355_v58 = vadd.f32 %v20744_v43, %v17200_v34  ;;  %v5349_v28 = vpop.f32.mrb[225].mxu0  ;;  %17358 = vmatmul.mubr.msk.f32.gmra.mrb[74].mxu0 %vm1086_vm0, %v375_v52  ;;  %11048 = vmatmul.mubr.f32.gmra.mrb[42].mxu1 %v10572_v17 }
 0x2d5   :  { %v5350_v59 = vadd.f32 %v20744_v43, %v5349_v28  ;;  %18593 = vmatpush3.bf16.msra.mxu1 %v20620_v55  ;;  %17360 = vmatprep.mubr.msk.f32.mxu0 %vm1086_vm0, %v376_v42  ;;  %v21056_v14 = vpack.c.bf16 %v9571_v22, %v9570_v4 }
 0x2d6   :  { %v9573_v1 = vmax.f32 %v5355_v58, 0.0  ;;  %18595 = vmatprep.subr.bf16.mxu1 %v20769_v38  ;;  %11117 = vmatprep.mubr.f32.mxu1 %v10383_v19  ;;  %v380_v38 = vld [vmem:[#allocation2 + $0xa80] sm:$0xff] }
 0x2d7   :  { %v9572_v44 = vmax.f32 %v5350_v59, 0.0  ;;  %v17203_v23 = vpop.f32.mrb[226].mxu0 }
 0x2d8   :  { %v5365_v46 = vadd.f32 %v20744_v43, %v17203_v23  ;;  %v5359_v9 = vpop.f32.mrb[227].mxu0  ;;  %17361 = vmatmul.mubr.msk.f32.gmra.mrb[76].mxu0 %vm1086_vm0, %v377_v27 }
 0x2d9   :  { %v21061_v12 = vpack.c.bf16 %v9573_v1, %v9572_v44  ;;  %v5360_v55 = vadd.f32 %v20744_v43, %v5359_v9  ;;  %18597 = vmatpush3.bf16.msra.mxu1 %v20638_v7  ;;  %17363 = vmatprep.mubr.msk.f32.mxu0 %vm1086_vm0, %v378_v37  ;;  %v381_v7 = vld [vmem:[#allocation2 + $0xa88] sm:$0xff] }
 0x2da   :  { %v9575_v36 = vmax.f32 %v5365_v46, 0.0  ;;  %18599 = vmatprep.subr.bf16.mxu1 %v20787_v32  ;;  %v382_v32 = vld [vmem:[#allocation2 + $0xa90] sm:$0xff] }
 0x2db   :  { %v9574_v33 = vmax.f32 %v5360_v55, 0.0  ;;  %v17206_v52 = vpop.f32.mrb[228].mxu0 }
 0x2dc   :  { %v5375_v17 = vadd.f32 %v20744_v43, %v17206_v52  ;;  %v5369_v22 = vpop.f32.mrb[229].mxu0  ;;  %17364 = vmatmul.mubr.msk.f32.gmra.mrb[78].mxu0 %vm1086_vm0, %v379_v45 }
 0x2dd   :  { %v21069_v42 = vpack.c.bf16 %v9575_v36, %v9574_v33  ;;  %v5370_v4 = vadd.f32 %v20744_v43, %v5369_v22  ;;  %18601 = vmatpush3.bf16.msra.mxu1 %v20656_v10  ;;  %17366 = vmatprep.mubr.msk.f32.mxu0 %vm1086_vm0, %v380_v38  ;;  %v383_v10 = vld [vmem:[#allocation2 + $0xa98] sm:$0xff]  ;;  %v386_v38 = vld [vmem:[#allocation2 + $0xab0] sm:$0xff] }
 0x2de   :  { %v9577_v34 = vmax.f32 %v5375_v17, 0.0  ;;  %18603 = vmatprep.subr.bf16.mxu1 %v20803_v16  ;;  %v384_v16 = vld [vmem:[#allocation2 + $0xaa0] sm:$0xff]  ;;  %v10447_v17 = vld [vmem:[%s24048_s3 + $0x258] sm:$0xff] }
 0x2df   :  { %v9576_v19 = vmax.f32 %v5370_v4, 0.0  ;;  %v17209_v58 = vpop.f32.mrb[230].mxu0 }
 0x2e0   :  { %v5385_v28 = vadd.f32 %v20744_v43, %v17209_v58  ;;  %v5379_v59 = vpop.f32.mrb[231].mxu0  ;;  %17367 = vmatmul.mubr.msk.f32.gmra.mrb[80].mxu0 %vm1086_vm0, %v381_v7 }
 0x2e1   :  { %v21077_v27 = vpack.c.bf16 %v9577_v34, %v9576_v19  ;;  %v5380_v1 = vadd.f32 %v20744_v43, %v5379_v59  ;;  %18605 = vmatpush3.bf16.msra.mxu1 %v20673_v56  ;;  %17369 = vmatprep.mubr.msk.f32.mxu0 %vm1086_vm0, %v382_v32  ;;  %v385_v56 = vld [vmem:[#allocation2 + $0xaa8] sm:$0xff]  ;;  %v10446_v34 = vld [vmem:[%s24048_s3 + $0x250] sm:$0xff]  ;;  %v388_v19 = vld [vmem:[#allocation2 + $0xac0] sm:$0xff] }
 0x2e2   :  { %v9579_v37 = vmax.f32 %v5385_v28, 0.0  ;;  %18607 = vmatprep.subr.bf16.mxu1 %v20816_v40  ;;  %v10382_v40 = vld [vmem:[%s24048_s3 + $0x50] sm:$0xff]  ;;  %v10511_v59 = vld [vmem:[%s24048_s3 + $0x458] sm:$0xff] }
 0x2e3   :  { %v9578_v44 = vmax.f32 %v5380_v1, 0.0  ;;  %v17212_v23 = vpop.f32.mrb[232].mxu0 }
 0x2e4   :  { %v5395_v46 = vadd.f32 %v20744_v43, %v17212_v23  ;;  %v5389_v9 = vpop.f32.mrb[233].mxu0  ;;  %17370 = vmatmul.mubr.msk.f32.gmra.mrb[82].mxu0 %vm1086_vm0, %v383_v10  ;;  %v390_v23 = vld [vmem:[#allocation2 + $0xad0] sm:$0xff] }
 0x2e5   :  { %v21085_v55 = vpack.c.bf16 %v9579_v37, %v9578_v44  ;;  %v5390_v45 = vadd.f32 %v20744_v43, %v5389_v9  ;;  %18609 = vmatpush3.bf16.msra.mxu1 %v20689_v21  ;;  %17372 = vmatprep.mubr.msk.f32.mxu0 %vm1086_vm0, %v384_v16  ;;  %v10510_v16 = vld [vmem:[%s24048_s3 + $0x450] sm:$0xff]  ;;  %v8310_v9 = vadd.f32 %v20744_v43, %v20771_v57 }
 0x2e6   :  { %v9581_v36 = vmax.f32 %v5395_v46, 0.0  ;;  %18611 = vmatprep.subr.bf16.mxu1 %v20940_v31  ;;  %v387_v31 = vld [vmem:[#allocation2 + $0xab8] sm:$0xff]  ;;  %v8315_v46 = vadd.f32 %v20744_v43, %v20759_v11 }
 0x2e7   :  { %v9580_v33 = vmax.f32 %v5390_v45, 0.0  ;;  %v17215_v52 = vpop.f32.mrb[234].mxu0 }
 0x2e8   :  { %v5405_v22 = vadd.f32 %v20744_v43, %v17215_v52  ;;  %v5399_v21 = vpop.f32.mrb[235].mxu0  ;;  %17373 = vmatmul.mubr.msk.f32.gmra.mrb[84].mxu0 %vm1086_vm0, %v385_v56  ;;  %11118 = vmatmul.mubr.f32.vlgmr.msra.gmra.mrb[44].mxu1 %v10382_v40  ;;  %v10575_v56 = vld [vmem:[%s24048_s3 + $0x658] sm:$0xff]  ;;  %v10574_v52 = vld [vmem:[%s24048_s3 + $0x650] sm:$0xff] }
 0x2e9   :  { %v21099_v4 = vpack.c.bf16 %v9581_v36, %v9580_v33  ;;  %v5400_v7 = vadd.f32 %v20744_v43, %v5399_v21  ;;  %18613 = vmatpush3.bf16.msra.mxu1 %v20821_v60  ;;  %17375 = vmatprep.mubr.msk.f32.mxu0 %vm1086_vm0, %v386_v38  ;;  %v21133_v38 = vpop.f32.mrb[62].mxu1  ;;  %v391_v33 = vld [vmem:[#allocation2 + $0xad8] sm:$0xff]  ;;  %v392_v21 = vld [vmem:[#allocation2 + $0xae0] sm:$0xff] }
 0x2ea   :  { %v9583_v32 = vmax.f32 %v5405_v22, 0.0  ;;  %18615 = vmatprep.subr.bf16.mxu1 %v20958_v15  ;;  %11122 = vmatprep.mubr.f32.mxu1 %v10447_v17  ;;  %v389_v15 = vld [vmem:[#allocation2 + $0xac8] sm:$0xff]  ;;  %v8320_v17 = vadd.f32 %v20744_v43, %v20905_v63  ;;  %v21145_v22 = vpop.f32.mrb[63].mxu1 }
 0x2eb   :  { %v9582_v58 = vmax.f32 %v5400_v7, 0.0  ;;  %v17218_v28 = vpop.f32.mrb[236].mxu0  ;;  %v10165_v7 = vmax.f32 %v8315_v46, 0.0 }
 0x2ec   :  { %v5415_v60 = vadd.f32 %v20744_v43, %v17218_v28  ;;  %v5409_v1 = vpop.f32.mrb[237].mxu0  ;;  %17376 = vmatmul.mubr.msk.f32.gmra.mrb[86].mxu0 %vm1086_vm0, %v387_v31  ;;  %11123 = vmatmul.mubr.f32.gmra.mrb[46].mxu1 %v10446_v34  ;;  %v10164_v31 = vmax.f32 %v8310_v9, 0.0  ;;  %v21155_v28 = vpop.f32.mrb[64].mxu1 }
 0x2ed   :  { %v21113_v10 = vpack.c.bf16 %v9583_v32, %v9582_v58  ;;  %v5410_v37 = vadd.f32 %v20744_v43, %v5409_v1  ;;  %18617 = vmatpush3.bf16.msra.mxu1 %v20829_v54  ;;  %17378 = vmatprep.mubr.msk.f32.mxu0 %vm1086_vm0, %v388_v19  ;;  %v10385_v32 = vld [vmem:[%s24048_s3 + $0x68] sm:$0xff] }
 0x2ee   :  { %v9585_v44 = vmax.f32 %v5415_v60, 0.0  ;;  %18619 = vmatprep.subr.bf16.mxu1 %v20974_v25  ;;  %11127 = vmatprep.mubr.f32.mxu1 %v10511_v59  ;;  %v8325_v25 = vadd.f32 %v20744_v43, %v20893_v18  ;;  %v393_v1 = vld [vmem:[#allocation2 + $0xae8] sm:$0xff] }
 0x2ef   :  { %v9584_v45 = vmax.f32 %v5410_v37, 0.0  ;;  %v17221_v54 = vpop.f32.mrb[238].mxu0  ;;  %v10166_v37 = vmax.f32 %v8320_v17, 0.0 }
 0x2f0   :  { %v5425_v40 = vadd.f32 %v20744_v43, %v17221_v54  ;;  %v5419_v36 = vpop.f32.mrb[239].mxu0  ;;  %17379 = vmatmul.mubr.msk.f32.gmra.mrb[88].mxu0 %vm1086_vm0, %v389_v15  ;;  %11128 = vmatmul.mubr.f32.gmra.mrb[48].mxu1 %v10510_v16  ;;  %v10167_v63 = vmax.f32 %v8325_v25, 0.0  ;;  %v8330_v15 = vadd.f32 %v20744_v43, %v20924_v53  ;;  %v21164_v16 = vpop.f32.mrb[65].mxu1 }
 0x2f1   :  { %v21135_v11 = vpack.c.bf16 %v9585_v44, %v9584_v45  ;;  %v5420_v57 = vadd.f32 %v20744_v43, %v5419_v36  ;;  %18621 = vmatpush3.bf16.msra.mxu1 %v20837_v49  ;;  %17381 = vmatprep.mubr.msk.f32.mxu0 %vm1086_vm0, %v390_v23  ;;  %v21167_v23 = vpack.c.bf16 %v10165_v7, %v10164_v31 }
 0x2f2   :  { %v9587_v18 = vmax.f32 %v5425_v40, 0.0  ;;  %18623 = vmatprep.subr.bf16.mxu1 %v20991_v0  ;;  %11132 = vmatprep.mubr.f32.mxu1 %v10575_v56  ;;  %v8335_v0 = vadd.f32 %v20744_v43, %v20915_v6  ;;  %v394_v6 = vld [vmem:[#allocation2 + $0xaf0] sm:$0xff]  ;;  %v21171_v56 = vld [vmem:[#allocation5] ss:$0 sm:$0xff]  ;;  %v21177_v40 = vpop.f32.mrb[66].mxu1 }
 0x2f3   :  { %v9586_v49 = vmax.f32 %v5420_v57, 0.0  ;;  %v17224_v34 = vpop.f32.mrb[240].mxu0  ;;  %v8345_v53 = vadd.f32 %v21171_v56, %v20935_v48  ;;  %v10168_v57 = vmax.f32 %v8330_v15, 0.0 }
 0x2f4   :  { %v5435_v19 = vadd.f32 %v20744_v43, %v17224_v34  ;;  %v5429_v58 = vpop.f32.mrb[241].mxu0  ;;  %17382 = vmatmul.mubr.msk.f32.gmra.mrb[90].mxu0 %vm1086_vm0, %v391_v33  ;;  %11133 = vmatmul.mubr.f32.gmra.mrb[50].mxu1 %v10574_v52  ;;  %v10169_v54 = vmax.f32 %v8335_v0, 0.0  ;;  %v21184_v33 = vpop.f32.mrb[67].mxu1  ;;  %v21186_v52 = vpack.c.bf16 %v10167_v63, %v10166_v37  ;;  %v398_v0 = vld [vmem:[#allocation2 + $0xb10] sm:$0xff] }
 0x2f5   :  { %v21157_v59 = vpack.c.bf16 %v9587_v18, %v9586_v49  ;;  %v5430_v60 = vadd.f32 %v20744_v43, %v5429_v58  ;;  %18625 = vmatpush3.bf16.msra.mxu1 %v20845_v3  ;;  %17384 = vmatprep.mubr.msk.f32.mxu0 %vm1086_vm0, %v392_v21  ;;  %v8355_v21 = vadd.f32 %v21171_v56, %v20953_v41  ;;  %v10171_v49 = vmax.f32 %v8345_v53, 0.0  ;;  %v18112_v34 = vpop.f32.mrb[68].mxu1 }
 0x2f6   :  { %v9589_v44 = vmax.f32 %v5435_v19, 0.0  ;;  %18627 = vmatprep.subr.bf16.mxu1 %v21011_v47  ;;  %11202 = vmatprep.mubr.f32.mxu1 %v10385_v32  ;;  %v8340_v47 = vadd.f32 %v21171_v56, %v20942_v5  ;;  %v396_v5 = vld [vmem:[#allocation2 + $0xb00] sm:$0xff]  ;;  %v8389_v58 = vpop.f32.mrb[69].mxu1  ;;  %v21200_v63 = vpack.c.bf16 %v10169_v54, %v10168_v57  ;;  %v399_v54 = vld [vmem:[#allocation2 + $0xb18] sm:$0xff] }
 0x2f7   :  { %v9588_v46 = vmax.f32 %v5430_v60, 0.0  ;;  %v17227_v9 = vpop.f32.mrb[242].mxu0  ;;  %v8395_v60 = vadd.f32 %v21171_v56, %v18112_v34  ;;  %v10173_v15 = vmax.f32 %v8355_v21, 0.0  ;;  %v8370_v21 = vadd.f32 %v21171_v56, %v21164_v16 }
 0x2f8   :  { %v5445_v3 = vadd.f32 %v20744_v43, %v17227_v9  ;;  %v5439_v45 = vpop.f32.mrb[243].mxu0  ;;  %17385 = vmatmul.mubr.msk.f32.gmra.mrb[92].mxu0 %vm1086_vm0, %v393_v1  ;;  %v395_v43 = vld [vmem:[#allocation2 + $0xaf8] sm:$0xff]  ;;  %v10170_v41 = vmax.f32 %v8340_v47, 0.0  ;;  %v8365_v9 = vadd.f32 %v21171_v56, %v21133_v38  ;;  %v400_v38 = vld [vmem:[#allocation2 + $0xb20] sm:$0xff] }
 0x2f9   :  { %v5440_v36 = vadd.f32 %v21171_v56, %v5439_v45  ;;  %18629 = vmatpush3.bf16.msra.mxu1 %v20859_v61  ;;  %17387 = vmatprep.mubr.msk.f32.mxu0 %vm1086_vm0, %v394_v6  ;;  %v21182_v25 = vpack.c.bf16 %v9589_v44, %v9588_v46  ;;  %v8350_v61 = vadd.f32 %v21171_v56, %v20960_v24 }
 0x2fa   :  { %v9591_v48 = vmax.f32 %v5445_v3, 0.0  ;;  %18631 = vmatprep.subr.bf16.mxu1 %v21027_v39  ;;  %v397_v39 = vld [vmem:[#allocation2 + $0xb08] sm:$0xff]  ;;  %v10181_v3 = vmax.f32 %v8395_v60, 0.0 }
 0x2fb   :  { %v9590_v17 = vmax.f32 %v5440_v36, 0.0  ;;  %v17230_v18 = vpop.f32.mrb[244].mxu0  ;;  %v10172_v44 = vmax.f32 %v8350_v61, 0.0  ;;  %v21216_v36 = vpack.c.bf16 %v10171_v49, %v10170_v41 }
 0x2fc   :  { %v5455_v7 = vadd.f32 %v21171_v56, %v17230_v18  ;;  %v5449_v31 = vpop.f32.mrb[245].mxu0  ;;  %17388 = vmatmul.mubr.msk.f32.gmra.mrb[94].mxu0 %vm1086_vm0, %v395_v43  ;;  %v8375_v18 = vadd.f32 %v21171_v56, %v21155_v28  ;;  %v402_v28 = vld [vmem:[#allocation2 + $0xb30] sm:$0xff] }
 0x2fd   :  { %v5450_v32 = vadd.f32 %v21171_v56, %v5449_v31  ;;  %18633 = vmatpush3.bf16.msra.mxu1 %v20873_v50  ;;  %17390 = vmatprep.mubr.msk.f32.mxu0 %vm1086_vm0, %v396_v5  ;;  %v21198_v19 = vpack.c.bf16 %v9591_v48, %v9590_v17  ;;  %v8390_v50 = vadd.f32 %v21171_v56, %v8389_v58 }
 0x2fe   :  { %v9593_v24 = vmax.f32 %v5455_v7, 0.0  ;;  %18635 = vmatprep.subr.bf16.mxu1 %v21043_v8  ;;  %v8360_v8 = vadd.f32 %v21171_v56, %v21145_v22  ;;  %v10384_v7 = vld [vmem:[%s24048_s3 + $0x60] sm:$0xff]  ;;  %v21233_v34 = vpack.c.bf16 %v10173_v15, %v10172_v44  ;;  %v10176_v44 = vmax.f32 %v8370_v21, 0.0 }
 0x2ff   :  { %v9592_v1 = vmax.f32 %v5450_v32, 0.0  ;;  %v17233_v37 = vpop.f32.mrb[246].mxu0  ;;  %v10180_v47 = vmax.f32 %v8390_v50, 0.0  ;;  %v10448_v15 = vld [vmem:[%s24048_s3 + $0x260] sm:$0xff] }
 0x300   :  { %v5465_v6 = vadd.f32 %v21171_v56, %v17233_v37  ;;  %v5459_v46 = vpop.f32.mrb[247].mxu0  ;;  %17391 = vmatmul.mubr.msk.f32.gmra.mrb[96].mxu0 %vm1086_vm0, %v397_v39  ;;  %v10174_v49 = vmax.f32 %v8360_v8, 0.0  ;;  %24136 = vst [vmem:[#allocation26_spill] sm:$0xff] %v21233_v34 }
 0x301   :  { %v5460_v45 = vadd.f32 %v21171_v56, %v5459_v46  ;;  %18637 = vmatpush3.bf16.msra.mxu1 %v20897_v26  ;;  %17393 = vmatprep.mubr.msk.f32.mxu0 %vm1086_vm0, %v398_v0  ;;  %v21214_v53 = vpack.c.bf16 %v9593_v24, %v9592_v1  ;;  %v21219_v22 = vpack.c.bf16 %v10181_v3, %v10180_v47  ;;  %v10175_v26 = vmax.f32 %v8365_v9, 0.0  ;;  %v403_v1 = vld [vmem:[#allocation2 + $0xb38] sm:$0xff]  ;;  %v10512_v47 = vld [vmem:[%s24048_s3 + $0x460] sm:$0xff] }
 0x302   :  { %v9595_v43 = vmax.f32 %v5465_v6, 0.0  ;;  %18639 = vmatprep.subr.bf16.mxu1 %v21056_v14  ;;  %v401_v14 = vld [vmem:[#allocation2 + $0xb28] sm:$0xff]  ;;  %v10177_v24 = vmax.f32 %v8375_v18, 0.0  ;;  %v8385_v0 = vadd.f32 %v21171_v56, %v21177_v40  ;;  %v404_v40 = vld [vmem:[#allocation2 + $0xb40] sm:$0xff] }
 0x303   :  { %v9594_v57 = vmax.f32 %v5460_v45, 0.0  ;;  %v17236_v48 = vpop.f32.mrb[248].mxu0  ;;  %24135 = vst [vmem:[#allocation18_spill] sm:$0xff] %v21219_v22  ;;  %v21251_v50 = vpack.c.bf16 %v10175_v26, %v10174_v49 }
 0x304   :  { %v5475_v5 = vadd.f32 %v21171_v56, %v17236_v48  ;;  %v5469_v17 = vpop.f32.mrb[249].mxu0  ;;  %17394 = vmatmul.mubr.msk.f32.gmra.mrb[98].mxu0 %vm1086_vm0, %v399_v54  ;;  %v10179_v3 = vmax.f32 %v8385_v0, 0.0  ;;  %v406_v48 = vld [vmem:[#allocation2 + $0xb50] sm:$0xff]  ;;  %v409_v0 = vld [vmem:[#allocation2 + $0xb68] sm:$0xff] }
 0x305   :  { %v5470_v61 = vadd.f32 %v21171_v56, %v5469_v17  ;;  %18641 = vmatpush3.bf16.msra.mxu1 %v20919_v13  ;;  %17396 = vmatprep.mubr.msk.f32.mxu0 %vm1086_vm0, %v400_v38  ;;  %v18654_v31 = vpack.c.bf16 %v9595_v43, %v9594_v57  ;;  %v10449_v13 = vld [vmem:[%s24048_s3 + $0x268] sm:$0xff]  ;;  %24137 = vst [vmem:[#allocation20_spill] sm:$0xff] %v21251_v50 }
 0x306   :  { %v9597_v32 = vmax.f32 %v5475_v5, 0.0  ;;  %18643 = vmatprep.subr.bf16.mxu1 %v21182_v25  ;;  %v8380_v25 = vadd.f32 %v21171_v56, %v21184_v33  ;;  %v21265_v38 = vpack.c.bf16 %v10177_v24, %v10176_v44 }
 0x307   :  { %v9596_v16 = vmax.f32 %v5470_v61, 0.0  ;;  %v17239_v39 = vpop.f32.mrb[250].mxu0 }
 0x308   :  { %v5485_v41 = vadd.f32 %v21171_v56, %v17239_v39  ;;  %v5479_v58 = vpop.f32.mrb[251].mxu0  ;;  %17397 = vmatmul.mubr.msk.f32.gmra.mrb[100].mxu0 %vm1086_vm0, %v401_v14  ;;  %11203 = vmatmul.mubr.f32.vlgmr.msra.gmra.mrb[52].mxu1 %v10384_v7  ;;  %v10178_v43 = vmax.f32 %v8380_v25, 0.0  ;;  %24138 = vst [vmem:[#allocation43_spill] sm:$0xff] %v21265_v38  ;;  %v10576_v14 = vld [vmem:[%s24048_s3 + $0x660] sm:$0xff]  ;;  %v18115_v39 = vpop.f32.mrb[70].mxu1 }
 0x309   :  { %v5480_v60 = vadd.f32 %v21171_v56, %v5479_v58  ;;  %18645 = vmatpush3.bf16.msra.mxu1 %v21061_v12  ;;  %17399 = vmatprep.mubr.msk.f32.mxu0 %vm1086_vm0, %v402_v28  ;;  %v18658_v37 = vpack.c.bf16 %v9597_v32, %v9596_v16  ;;  %v10513_v12 = vld [vmem:[%s24048_s3 + $0x468] sm:$0xff]  ;;  %v408_v32 = vld [vmem:[#allocation2 + $0xb60] sm:$0xff]  ;;  %v8405_v58 = vadd.f32 %v21171_v56, %v18115_v39  ;;  %v8399_v24 = vpop.f32.mrb[71].mxu1 }
 0x30a   :  { %v9599_v6 = vmax.f32 %v5485_v41, 0.0  ;;  %18647 = vmatprep.subr.bf16.mxu1 %v21198_v19  ;;  %11207 = vmatprep.mubr.f32.mxu1 %v10449_v13  ;;  %v405_v19 = vld [vmem:[#allocation2 + $0xb48] sm:$0xff]  ;;  %v21279_v7 = vpack.c.bf16 %v10179_v3, %v10178_v43  ;;  %v556_v38 = vld [vmem:[#allocation2 + $0x1000] sm:$0xff] }
 0x30b   :  { %v9598_v33 = vmax.f32 %v5480_v60, 0.0  ;;  %v17242_v46 = vpop.f32.mrb[252].mxu0  ;;  %v8400_v60 = vadd.f32 %v21171_v56, %v8399_v24  ;;  %v10183_v44 = vmax.f32 %v8405_v58, 0.0 }
 0x30c   :  { %v5495_v9 = vadd.f32 %v21171_v56, %v17242_v46  ;;  %v5489_v8 = vpop.f32.mrb[253].mxu0  ;;  %17400 = vmatmul.mubr.msk.f32.gmra.mrb[102].mxu0 %vm1086_vm0, %v403_v1  ;;  %11208 = vmatmul.mubr.f32.gmra.mrb[54].mxu1 %v10448_v15  ;;  %24139 = vst [vmem:[#allocation27_spill] sm:$0xff] %v21279_v7  ;;  %v410_v15 = vld [vmem:[#allocation2 + $0xb70] sm:$0xff]  ;;  %v18118_v46 = vpop.f32.mrb[72].mxu1 }
 0x30d   :  { %v5490_v45 = vadd.f32 %v21171_v56, %v5489_v8  ;;  %18649 = vmatpush3.bf16.msra.mxu1 %v21069_v42  ;;  %17402 = vmatprep.mubr.msk.f32.mxu0 %vm1086_vm0, %v404_v40  ;;  %v18662_v54 = vpack.c.bf16 %v9599_v6, %v9598_v33  ;;  %v10577_v42 = vld [vmem:[%s24048_s3 + $0x668] sm:$0xff]  ;;  %v10182_v33 = vmax.f32 %v8400_v60, 0.0  ;;  %v8415_v43 = vadd.f32 %v21171_v56, %v18118_v46 }
 0x30e   :  { %v9601_v57 = vmax.f32 %v5495_v9, 0.0  ;;  %18651 = vmatprep.subr.bf16.mxu1 %v21214_v53  ;;  %11212 = vmatprep.mubr.f32.mxu1 %v10513_v12  ;;  %v407_v53 = vld [vmem:[#allocation2 + $0xb58] sm:$0xff] }
 0x30f   :  { %v9600_v5 = vmax.f32 %v5490_v45, 0.0  ;;  %v17245_v17 = vpop.f32.mrb[254].mxu0  ;;  %v21298_v45 = vpack.c.bf16 %v10183_v44, %v10182_v33 }
 0x310   :  { %v5505_v26 = vadd.f32 %v21171_v56, %v17245_v17  ;;  %v5499_v18 = vpop.f32.mrb[255].mxu0  ;;  %17403 = vmatmul.mubr.msk.f32.gmra.mrb[104].mxu0 %vm1086_vm0, %v405_v19  ;;  %11213 = vmatmul.mubr.f32.gmra.mrb[56].mxu1 %v10512_v47  ;;  %v412_v47 = vld [vmem:[#allocation2 + $0xb80] sm:$0xff] }
 0x311   :  { %v5500_v21 = vadd.f32 %v21171_v56, %v5499_v18  ;;  %18653 = vmatpush3.bf16.msra.mxu1 %v21077_v27  ;;  %17405 = vmatprep.mubr.msk.f32.mxu0 %vm1086_vm0, %v406_v48  ;;  %v18666_v61 = vpack.c.bf16 %v9601_v57, %v9600_v5  ;;  %v10387_v27 = vld [vmem:[%s24048_s3 + $0x78] sm:$0xff]  ;;  %24140 = vst [vmem:[#allocation29_spill] sm:$0xff] %v21298_v45 }
 0x312   :  { %v9603_v49 = vmax.f32 %v5505_v26, 0.0  ;;  %18655 = vmatprep.subr.bf16.mxu1 %v18654_v31  ;;  %11217 = vmatprep.mubr.f32.mxu1 %v10577_v42 }
 0x313   :  { %v9602_v28 = vmax.f32 %v5500_v21, 0.0  ;;  %v17248_v16 = vpop.f32.mrb[0].mxu0 }
 0x314   :  { %v5515_v13 = vadd.f32 %v21171_v56, %v17248_v16  ;;  %v5509_v41 = vpop.f32.mrb[1].mxu0  ;;  %17406 = vmatmul.mubr.msk.f32.gmra.mrb[106].mxu0 %vm1086_vm0, %v407_v53  ;;  %11218 = vmatmul.mubr.f32.gmra.mrb[58].mxu1 %v10576_v14  ;;  %v413_v14 = vld [vmem:[#allocation2 + $0xb88] sm:$0xff] }
 0x315   :  { %v5510_v31 = vadd.f32 %v21171_v56, %v5509_v41  ;;  %18657 = vmatpush3.bf16.msra.mxu1 %v21085_v55  ;;  %17408 = vmatprep.mubr.msk.f32.mxu0 %vm1086_vm0, %v408_v32  ;;  %v18670_v25 = vpack.c.bf16 %v9603_v49, %v9602_v28  ;;  %v8409_v55 = vpop.f32.mrb[73].mxu1  ;;  %v414_v28 = vld [vmem:[#allocation2 + $0xb90] sm:$0xff] }
 0x316   :  { %v9605_v1 = vmax.f32 %v5515_v13, 0.0  ;;  %18659 = vmatprep.subr.bf16.mxu1 %v18658_v37  ;;  %11287 = vmatprep.mubr.f32.mxu1 %v10387_v27  ;;  %v411_v37 = vld [vmem:[#allocation2 + $0xb78] sm:$0xff]  ;;  %v8410_v57 = vadd.f32 %v21171_v56, %v8409_v55  ;;  %v18121_v17 = vpop.f32.mrb[74].mxu1 }
 0x317   :  { %v9604_v6 = vmax.f32 %v5510_v31, 0.0  ;;  %v17251_v40 = vpop.f32.mrb[2].mxu0  ;;  %v8419_v21 = vpop.f32.mrb[75].mxu1  ;;  %v8425_v49 = vadd.f32 %v21171_v56, %v18121_v17  ;;  %v418_v17 = vld [vmem:[#allocation2 + $0xbb0] sm:$0xff] }
 0x318   :  { %v5525_v12 = vadd.f32 %v21171_v56, %v17251_v40  ;;  %v5519_v9 = vpop.f32.mrb[3].mxu0  ;;  %17409 = vmatmul.mubr.msk.f32.gmra.mrb[108].mxu0 %vm1086_vm0, %v409_v0  ;;  %v10184_v18 = vmax.f32 %v8410_v57, 0.0  ;;  %v8420_v27 = vadd.f32 %v21171_v56, %v8419_v21  ;;  %v18124_v58 = vpop.f32.mrb[76].mxu1  ;;  %v10386_v57 = vld [vmem:[%s24048_s3 + $0x70] sm:$0xff] }
 0x319   :  { %v21293_v8 = vpack.c.bf16 %v9605_v1, %v9604_v6  ;;  %v5520_v3 = vadd.f32 %v21171_v56, %v5519_v9  ;;  %18661 = vmatpush3.bf16.msra.mxu1 %v21099_v4  ;;  %17411 = vmatprep.mubr.msk.f32.mxu0 %vm1086_vm0, %v410_v15  ;;  %v10185_v4 = vmax.f32 %v8415_v43, 0.0  ;;  %v10187_v41 = vmax.f32 %v8425_v49, 0.0  ;;  %v8429_v0 = vpop.f32.mrb[77].mxu1  ;;  %v415_v1 = vld [vmem:[#allocation2 + $0xb98] sm:$0xff]  ;;  %v416_v6 = vld [vmem:[#allocation2 + $0xba0] sm:$0xff]  ;;  %v417_v43 = vld [vmem:[#allocation2 + $0xba8] sm:$0xff] }
 0x31a   :  { %v9607_v19 = vmax.f32 %v5525_v12, 0.0  ;;  %18663 = vmatprep.subr.bf16.mxu1 %v18662_v54  ;;  %v8435_v15 = vadd.f32 %v21171_v56, %v18124_v58  ;;  %v8430_v33 = vadd.f32 %v21171_v56, %v8429_v0  ;;  %v18127_v55 = vpop.f32.mrb[78].mxu1 }
 0x31b   :  { %v9606_v48 = vmax.f32 %v5520_v3, 0.0  ;;  %v17254_v5 = vpop.f32.mrb[4].mxu0  ;;  %v21310_v16 = vpack.c.bf16 %v10185_v4, %v10184_v18 }
 0x31c   :  { %v5535_v42 = vadd.f32 %v21171_v56, %v17254_v5  ;;  %v5529_v26 = vpop.f32.mrb[5].mxu0  ;;  %17412 = vmatmul.mubr.msk.f32.gmra.mrb[110].mxu0 %vm1086_vm0, %v411_v37  ;;  %v10189_v9 = vmax.f32 %v8435_v15, 0.0 }
 0x31d   :  { %v21304_v53 = vpack.c.bf16 %v9607_v19, %v9606_v48  ;;  %v5530_v54 = vadd.f32 %v21171_v56, %v5529_v26  ;;  %18665 = vmatpush3.bf16.msra.mxu1 %v21113_v10  ;;  %17414 = vmatprep.mubr.msk.f32.mxu0 %vm1086_vm0, %v412_v47  ;;  %24141 = vst [vmem:[#allocation23_spill] sm:$0xff] %v21310_v16  ;;  %v10186_v10 = vmax.f32 %v8420_v27, 0.0  ;;  %v8439_v19 = vpop.f32.mrb[79].mxu1 }
 0x31e   :  { %v9609_v32 = vmax.f32 %v5535_v42, 0.0  ;;  %18667 = vmatprep.subr.bf16.mxu1 %v18666_v61  ;;  %v8445_v48 = vadd.f32 %v21171_v56, %v18127_v55  ;;  %v10451_v42 = vld [vmem:[%s24048_s3 + $0x278] sm:$0xff]  ;;  %v8440_v4 = vadd.f32 %v21171_v56, %v8439_v19 }
 0x31f   :  { %v9608_v39 = vmax.f32 %v5530_v54, 0.0  ;;  %v17257_v13 = vpop.f32.mrb[6].mxu0  ;;  %v21321_v40 = vpack.c.bf16 %v10187_v41, %v10186_v10  ;;  %v18130_v54 = vpop.f32.mrb[80].mxu1  ;;  %v10450_v41 = vld [vmem:[%s24048_s3 + $0x270] sm:$0xff]  ;;  %v10515_v10 = vld [vmem:[%s24048_s3 + $0x478] sm:$0xff] }
 0x320   :  { %v5545_v24 = vadd.f32 %v21171_v56, %v17257_v13  ;;  %v5539_v31 = vpop.f32.mrb[7].mxu0  ;;  %17415 = vmatmul.mubr.msk.f32.gmra.mrb[112].mxu0 %vm1086_vm0, %v413_v14  ;;  %v10191_v21 = vmax.f32 %v8445_v48, 0.0  ;;  %v419_v13 = vld [vmem:[#allocation2 + $0xbb8] sm:$0xff]  ;;  %v8455_v58 = vadd.f32 %v21171_v56, %v18130_v54 }
 0x321   :  { %v21315_v60 = vpack.c.bf16 %v9609_v32, %v9608_v39  ;;  %v5540_v61 = vadd.f32 %v21171_v56, %v5539_v31  ;;  %18669 = vmatpush3.bf16.msra.mxu1 %v21135_v11  ;;  %17417 = vmatprep.mubr.msk.f32.mxu0 %vm1086_vm0, %v414_v28  ;;  %24142 = vst [vmem:[#allocation24_spill] sm:$0xff] %v21321_v40  ;;  %v10188_v11 = vmax.f32 %v8430_v33, 0.0  ;;  %v10190_v32 = vmax.f32 %v8440_v4, 0.0  ;;  %v8449_v28 = vpop.f32.mrb[81].mxu1  ;;  %v420_v31 = vld [vmem:[#allocation2 + $0xbc0] sm:$0xff] }
 0x322   :  { %v9611_v44 = vmax.f32 %v5545_v24, 0.0  ;;  %18671 = vmatprep.subr.bf16.mxu1 %v18670_v25 }
 0x323   :  { %v9610_v46 = vmax.f32 %v5540_v61, 0.0  ;;  %v17260_v12 = vpop.f32.mrb[8].mxu0  ;;  %v21338_v26 = vpack.c.bf16 %v10189_v9, %v10188_v11  ;;  %v21354_v0 = vpack.c.bf16 %v10191_v21, %v10190_v32  ;;  %v8450_v61 = vadd.f32 %v21171_v56, %v8449_v28  ;;  %v10514_v11 = vld [vmem:[%s24048_s3 + $0x470] sm:$0xff]  ;;  %v423_v28 = vld [vmem:[#allocation2 + $0xbd8] sm:$0xff] }
 0x324   :  { %v5555_v3 = vadd.f32 %v21171_v56, %v17260_v12  ;;  %v5549_v37 = vpop.f32.mrb[9].mxu0  ;;  %17418 = vmatmul.mubr.msk.f32.gmra.mrb[114].mxu0 %vm1086_vm0, %v415_v1 }
 0x325   :  { %v21326_v47 = vpack.c.bf16 %v9611_v44, %v9610_v46  ;;  %v5550_v25 = vadd.f32 %v21171_v56, %v5549_v37  ;;  %18673 = vmatpush3.bf16.msra.mxu1 %v21157_v59  ;;  %17420 = vmatprep.mubr.msk.f32.mxu0 %vm1086_vm0, %v416_v6  ;;  %24143 = vst [vmem:[#allocation47_spill] sm:$0xff] %v21338_v26  ;;  %24144 = vst [vmem:[#allocation28_spill] sm:$0xff] %v21354_v0  ;;  %v10193_v44 = vmax.f32 %v8455_v58, 0.0  ;;  %v18133_v6 = vpop.f32.mrb[82].mxu1  ;;  %v421_v37 = vld [vmem:[#allocation2 + $0xbc8] sm:$0xff]  ;;  %v424_v58 = vld [vmem:[#allocation2 + $0xbe0] sm:$0xff] }
 0x326   :  { %v9613_v5 = vmax.f32 %v5555_v3, 0.0  ;;  %v10192_v12 = vmax.f32 %v8450_v61, 0.0  ;;  %v8459_v9 = vpop.f32.mrb[83].mxu1  ;;  %v8465_v19 = vadd.f32 %v21171_v56, %v18133_v6  ;;  %v550_v0 = vld [vmem:[#allocation2 + $0xfd0] sm:$0xff] }
 0x327   :  { %v9612_v59 = vmax.f32 %v5550_v25, 0.0  ;;  %v17263_v18 = vpop.f32.mrb[10].mxu0 }
 0x328   :  { %v5565_v14 = vadd.f32 %v21171_v56, %v17263_v18  ;;  %v5559_v49 = vpop.f32.mrb[11].mxu0  ;;  %17421 = vmatmul.mubr.msk.f32.gmra.mrb[116].mxu0 %vm1086_vm0, %v417_v43  ;;  %11288 = vmatmul.mubr.f32.vlgmr.msra.gmra.mrb[60].mxu1 %v10386_v57  ;;  %v422_v43 = vld [vmem:[#allocation2 + $0xbd0] sm:$0xff]  ;;  %v10579_v57 = vld [vmem:[%s24048_s3 + $0x678] sm:$0xff]  ;;  %v21370_v48 = vpack.c.bf16 %v10193_v44, %v10192_v12  ;;  %v10195_v4 = vmax.f32 %v8465_v19, 0.0 }
 0x329   :  { %v21343_v27 = vpack.c.bf16 %v9613_v5, %v9612_v59  ;;  %v5560_v39 = vadd.f32 %v21171_v56, %v5559_v49  ;;  %17423 = vmatprep.mubr.msk.f32.mxu0 %vm1086_vm0, %v418_v17  ;;  %11292 = vmatprep.mubr.f32.mxu1 %v10451_v42  ;;  %v8460_v5 = vadd.f32 %v21171_v56, %v8459_v9  ;;  %v18136_v59 = vpop.f32.mrb[84].mxu1 }
 0x32a   :  { %v9615_v24 = vmax.f32 %v5565_v14, 0.0  ;;  %24145 = vst [vmem:[#allocation30_spill] sm:$0xff] %v21370_v48  ;;  %v8469_v14 = vpop.f32.mrb[85].mxu1  ;;  %v549_v48 = vld [vmem:[#allocation2 + $0xfc8] sm:$0xff] }
 0x32b   :  { %v9614_v1 = vmax.f32 %v5560_v39, 0.0  ;;  %v17266_v15 = vpop.f32.mrb[12].mxu0  ;;  %v10194_v54 = vmax.f32 %v8460_v5, 0.0  ;;  %v10578_v39 = vld [vmem:[%s24048_s3 + $0x670] sm:$0xff]  ;;  %v18139_v44 = vpop.f32.mrb[86].mxu1 }
 0x32c   :  { %v5575_v33 = vadd.f32 %v21171_v56, %v17266_v15  ;;  %v5569_v46 = vpop.f32.mrb[13].mxu0  ;;  %17424 = vmatmul.mubr.msk.f32.gmra.mrb[118].mxu0 %vm1086_vm0, %v419_v13  ;;  %11293 = vmatmul.mubr.f32.gmra.mrb[62].mxu1 %v10450_v41  ;;  %v8475_v13 = vadd.f32 %v21171_v56, %v18136_v59  ;;  %v8479_v12 = vpop.f32.mrb[87].mxu1 }
 0x32d   :  { %v21359_v55 = vpack.c.bf16 %v9615_v24, %v9614_v1  ;;  %v5570_v3 = vadd.f32 %v21171_v56, %v5569_v46  ;;  %17426 = vmatprep.mubr.msk.f32.mxu0 %vm1086_vm0, %v420_v31  ;;  %11297 = vmatprep.mubr.f32.mxu1 %v10515_v10  ;;  %v10389_v24 = vld [vmem:[%s24048_s3 + $0x88] sm:$0xff]  ;;  %v21386_v31 = vpack.c.bf16 %v10195_v4, %v10194_v54  ;;  %v18142_v4 = vpop.f32.mrb[88].mxu1 }
 0x32e   :  { %v9617_v25 = vmax.f32 %v5575_v33, 0.0  ;;  %v8470_v10 = vadd.f32 %v21171_v56, %v8469_v14  ;;  %v10197_v15 = vmax.f32 %v8475_v13, 0.0  ;;  %v8495_v54 = vadd.f32 %v21171_v56, %v18142_v4  ;;  %v8489_v14 = vpop.f32.mrb[89].mxu1 }
 0x32f   :  { %v9616_v17 = vmax.f32 %v5570_v3, 0.0  ;;  %v17269_v42 = vpop.f32.mrb[14].mxu0  ;;  %24146 = vst [vmem:[#allocation32_spill] sm:$0xff] %v21386_v31  ;;  %v8490_v13 = vadd.f32 %v21171_v56, %v8489_v14 }
 0x330   :  { %v5585_v18 = vadd.f32 %v21171_v56, %v17269_v42  ;;  %v5579_v21 = vpop.f32.mrb[15].mxu0  ;;  %17427 = vmatmul.mubr.msk.f32.gmra.mrb[120].mxu0 %vm1086_vm0, %v421_v37  ;;  %11298 = vmatmul.mubr.f32.gmra.mrb[64].mxu1 %v10514_v11  ;;  %v10196_v46 = vmax.f32 %v8470_v10, 0.0  ;;  %v425_v37 = vld [vmem:[#allocation2 + $0xbe8] sm:$0xff]  ;;  %v8485_v11 = vadd.f32 %v21171_v56, %v18139_v44  ;;  %v18145_v44 = vpop.f32.mrb[90].mxu1 }
 0x331   :  { %v21375_v49 = vpack.c.bf16 %v9617_v25, %v9616_v17  ;;  %v5580_v32 = vadd.f32 %v21171_v56, %v5579_v21  ;;  %17429 = vmatprep.mubr.msk.f32.mxu0 %vm1086_vm0, %v422_v43  ;;  %11302 = vmatprep.mubr.f32.mxu1 %v10579_v57  ;;  %v426_v25 = vld [vmem:[#allocation2 + $0xbf0] sm:$0xff]  ;;  %v8480_v43 = vadd.f32 %v21171_v56, %v8479_v12  ;;  %v8499_v12 = vpop.f32.mrb[91].mxu1 }
 0x332   :  { %v9619_v41 = vmax.f32 %v5585_v18, 0.0  ;;  %v21397_v57 = vpack.c.bf16 %v10197_v15, %v10196_v46  ;;  %v10199_v42 = vmax.f32 %v8485_v11, 0.0  ;;  %v10200_v15 = vmax.f32 %v8490_v13, 0.0  ;;  %v429_v11 = vld [vmem:[#allocation2 + $0xc08] sm:$0xff] }
 0x333   :  { %v9618_v61 = vmax.f32 %v5580_v32, 0.0  ;;  %v17272_v1 = vpop.f32.mrb[16].mxu0  ;;  %v10198_v21 = vmax.f32 %v8480_v43, 0.0  ;;  %v8505_v46 = vadd.f32 %v21171_v56, %v18145_v44 }
 0x334   :  { %v5595_v6 = vadd.f32 %v21171_v56, %v17272_v1  ;;  %v5589_v33 = vpop.f32.mrb[17].mxu0  ;;  %17430 = vmatmul.mubr.msk.f32.gmra.mrb[122].mxu0 %vm1086_vm0, %v423_v28  ;;  %11303 = vmatmul.mubr.f32.gmra.mrb[66].mxu1 %v10578_v39  ;;  %24147 = vst [vmem:[#allocation50_spill] sm:$0xff] %v21397_v57  ;;  %v427_v39 = vld [vmem:[#allocation2 + $0xbf8] sm:$0xff] }
 0x335   :  { %v21391_v9 = vpack.c.bf16 %v9619_v41, %v9618_v61  ;;  %v5590_v3 = vadd.f32 %v21171_v56, %v5589_v33  ;;  %17432 = vmatprep.mubr.msk.f32.mxu0 %vm1086_vm0, %v424_v58  ;;  %11372 = vmatprep.mubr.f32.mxu1 %v10389_v24  ;;  %v428_v58 = vld [vmem:[#allocation2 + $0xc00] sm:$0xff]  ;;  %v10201_v24 = vmax.f32 %v8495_v54, 0.0  ;;  %v21405_v10 = vpack.c.bf16 %v10199_v42, %v10198_v21 }
 0x336   :  { %v9621_v19 = vmax.f32 %v5595_v6, 0.0 }
 0x337   :  { %v9620_v5 = vmax.f32 %v5590_v3, 0.0  ;;  %v17275_v17 = vpop.f32.mrb[18].mxu0  ;;  %24148 = vst [vmem:[#allocation31_spill] sm:$0xff] %v21405_v10 }
 0x338   :  { %v5605_v59 = vadd.f32 %v21171_v56, %v17275_v17  ;;  %v5599_v18 = vpop.f32.mrb[19].mxu0  ;;  %17433 = vmatmul.mubr.msk.f32.gmra.mrb[124].mxu0 %vm1086_vm0, %v425_v37  ;;  %v10203_v17 = vmax.f32 %v8505_v46, 0.0 }
 0x339   :  { %v5600_v32 = vadd.f32 %v21171_v56, %v5599_v18  ;;  %17435 = vmatprep.mubr.msk.f32.mxu0 %vm1086_vm0, %v426_v25  ;;  %v18674_v28 = vpack.c.bf16 %v9621_v19, %v9620_v5  ;;  %v8500_v19 = vadd.f32 %v21171_v56, %v8499_v12  ;;  %v21414_v25 = vpack.c.bf16 %v10201_v24, %v10200_v15  ;;  %v430_v5 = vld [vmem:[#allocation2 + $0xc10] sm:$0xff]  ;;  %v432_v24 = vld [vmem:[#allocation2 + $0xc20] sm:$0xff] }
 0x33a   :  { %v9623_v41 = vmax.f32 %v5605_v59, 0.0  ;;  %v18148_v59 = vpop.f32.mrb[92].mxu1 }
 0x33b   :  { %v9622_v61 = vmax.f32 %v5600_v32, 0.0  ;;  %v17278_v1 = vpop.f32.mrb[20].mxu0  ;;  %18675 = vmatprep.subr.bf16.mxu1 %v18674_v28  ;;  %24149 = vst [vmem:[#allocation33_spill] sm:$0xff] %v21414_v25  ;;  %v8515_v54 = vadd.f32 %v21171_v56, %v18148_v59  ;;  %v8509_v14 = vpop.f32.mrb[93].mxu1  ;;  %v552_v25 = vld [vmem:[#allocation2 + $0xfe0] sm:$0xff] }
 0x33c   :  { %v5615_v6 = vadd.f32 %v21171_v56, %v17278_v1  ;;  %v5609_v33 = vpop.f32.mrb[21].mxu0  ;;  %17436 = vmatmul.mubr.msk.f32.gmra.mrb[126].mxu0 %vm1086_vm0, %v427_v39  ;;  %18677 = vmatpush3.bf16.msra.mxu1 %v21293_v8  ;;  %v10202_v8 = vmax.f32 %v8500_v19, 0.0  ;;  %v431_v39 = vld [vmem:[#allocation2 + $0xc18] sm:$0xff]  ;;  %v8510_v13 = vadd.f32 %v21171_v56, %v8509_v14  ;;  %v18151_v44 = vpop.f32.mrb[94].mxu1 }
 0x33d   :  { %v5610_v3 = vadd.f32 %v21171_v56, %v5609_v33  ;;  %17438 = vmatprep.mubr.msk.f32.mxu0 %vm1086_vm0, %v428_v58  ;;  %v18678_v37 = vpack.c.bf16 %v9623_v41, %v9622_v61  ;;  %v10205_v61 = vmax.f32 %v8515_v54, 0.0  ;;  %v8525_v46 = vadd.f32 %v21171_v56, %v18151_v44  ;;  %v8519_v12 = vpop.f32.mrb[95].mxu1 }
 0x33e   :  { %v9625_v43 = vmax.f32 %v5615_v6, 0.0  ;;  %v21423_v41 = vpack.c.bf16 %v10203_v17, %v10202_v8  ;;  %v8520_v19 = vadd.f32 %v21171_v56, %v8519_v12  ;;  %v434_v17 = vld [vmem:[#allocation2 + $0xc30] sm:$0xff]  ;;  %v18154_v59 = vpop.f32.mrb[96].mxu1 }
 0x33f   :  { %v9624_v42 = vmax.f32 %v5610_v3, 0.0  ;;  %v17281_v4 = vpop.f32.mrb[22].mxu0  ;;  %18679 = vmatprep.subr.bf16.mxu1 %v18678_v37  ;;  %v8535_v54 = vadd.f32 %v21171_v56, %v18154_v59  ;;  %v8529_v14 = vpop.f32.mrb[97].mxu1 }
 0x340   :  { %v5625_v18 = vadd.f32 %v21171_v56, %v17281_v4  ;;  %v5619_v21 = vpop.f32.mrb[23].mxu0  ;;  %17439 = vmatmul.mubr.msk.f32.gmra.mrb[128].mxu0 %vm1086_vm0, %v429_v11  ;;  %18681 = vmatpush3.bf16.msra.mxu1 %v21304_v53  ;;  %24150 = vst [vmem:[#allocation35_spill] sm:$0xff] %v21423_v41  ;;  %v10204_v53 = vmax.f32 %v8510_v13, 0.0  ;;  %v433_v11 = vld [vmem:[#allocation2 + $0xc28] sm:$0xff]  ;;  %v8530_v13 = vadd.f32 %v21171_v56, %v8529_v14  ;;  %v18157_v44 = vpop.f32.mrb[98].mxu1 }
 0x341   :  { %v5620_v32 = vadd.f32 %v21171_v56, %v5619_v21  ;;  %17441 = vmatprep.mubr.msk.f32.mxu0 %vm1086_vm0, %v430_v5  ;;  %v18682_v28 = vpack.c.bf16 %v9625_v43, %v9624_v42  ;;  %v10207_v42 = vmax.f32 %v8525_v46, 0.0  ;;  %v8545_v46 = vadd.f32 %v21171_v56, %v18157_v44  ;;  %v8539_v12 = vpop.f32.mrb[99].mxu1 }
 0x342   :  { %v9627_v58 = vmax.f32 %v5625_v18, 0.0  ;;  %v21432_v43 = vpack.c.bf16 %v10205_v61, %v10204_v53  ;;  %v436_v61 = vld [vmem:[#allocation2 + $0xc40] sm:$0xff]  ;;  %v18160_v59 = vpop.f32.mrb[100].mxu1 }
 0x343   :  { %v9626_v1 = vmax.f32 %v5620_v32, 0.0  ;;  %v17284_v15 = vpop.f32.mrb[24].mxu0  ;;  %18683 = vmatprep.subr.bf16.mxu1 %v18682_v28  ;;  %v8549_v14 = vpop.f32.mrb[101].mxu1 }
 0x344   :  { %v5635_v6 = vadd.f32 %v21171_v56, %v17284_v15  ;;  %v5629_v33 = vpop.f32.mrb[25].mxu0  ;;  %17442 = vmatmul.mubr.msk.f32.gmra.mrb[130].mxu0 %vm1086_vm0, %v431_v39  ;;  %18685 = vmatpush3.bf16.msra.mxu1 %v21315_v60  ;;  %24151 = vst [vmem:[#allocation34_spill] sm:$0xff] %v21432_v43  ;;  %v10206_v60 = vmax.f32 %v8520_v19, 0.0  ;;  %v435_v39 = vld [vmem:[#allocation2 + $0xc38] sm:$0xff]  ;;  %v8540_v19 = vadd.f32 %v21171_v56, %v8539_v12  ;;  %v18163_v44 = vpop.f32.mrb[102].mxu1 }
 0x345   :  { %v5630_v3 = vadd.f32 %v21171_v56, %v5629_v33  ;;  %17444 = vmatprep.mubr.msk.f32.mxu0 %vm1086_vm0, %v432_v24  ;;  %v18686_v37 = vpack.c.bf16 %v9627_v58, %v9626_v1  ;;  %v10209_v1 = vmax.f32 %v8535_v54, 0.0  ;;  %v8555_v54 = vadd.f32 %v21171_v56, %v18160_v59  ;;  %v8559_v12 = vpop.f32.mrb[103].mxu1 }
 0x346   :  { %v9629_v5 = vmax.f32 %v5635_v6, 0.0  ;;  %v21441_v58 = vpack.c.bf16 %v10207_v42, %v10206_v60  ;;  %v438_v42 = vld [vmem:[#allocation2 + $0xc50] sm:$0xff]  ;;  %v18166_v59 = vpop.f32.mrb[104].mxu1 }
 0x347   :  { %v9628_v4 = vmax.f32 %v5630_v3, 0.0  ;;  %v17287_v8 = vpop.f32.mrb[26].mxu0  ;;  %18687 = vmatprep.subr.bf16.mxu1 %v18686_v37 }
 0x348   :  { %v5645_v18 = vadd.f32 %v21171_v56, %v17287_v8  ;;  %v5639_v21 = vpop.f32.mrb[27].mxu0  ;;  %17445 = vmatmul.mubr.msk.f32.gmra.mrb[132].mxu0 %vm1086_vm0, %v433_v11  ;;  %18689 = vmatpush3.bf16.msra.mxu1 %v21326_v47  ;;  %24152 = vst [vmem:[#allocation36_spill] sm:$0xff] %v21441_v58  ;;  %v10208_v47 = vmax.f32 %v8530_v13, 0.0  ;;  %v437_v11 = vld [vmem:[#allocation2 + $0xc48] sm:$0xff]  ;;  %v8550_v13 = vadd.f32 %v21171_v56, %v8549_v14  ;;  %v8569_v14 = vpop.f32.mrb[105].mxu1 }
 0x349   :  { %v5640_v32 = vadd.f32 %v21171_v56, %v5639_v21  ;;  %17447 = vmatprep.mubr.msk.f32.mxu0 %vm1086_vm0, %v434_v17  ;;  %v18690_v28 = vpack.c.bf16 %v9629_v5, %v9628_v4  ;;  %v10211_v4 = vmax.f32 %v8545_v46, 0.0  ;;  %v8565_v46 = vadd.f32 %v21171_v56, %v18163_v44 }
 0x34a   :  { %v9631_v24 = vmax.f32 %v5645_v18, 0.0  ;;  %v21450_v5 = vpack.c.bf16 %v10209_v1, %v10208_v47  ;;  %v440_v1 = vld [vmem:[#allocation2 + $0xc60] sm:$0xff] }
 0x34b   :  { %v9630_v15 = vmax.f32 %v5640_v32, 0.0  ;;  %v17290_v53 = vpop.f32.mrb[28].mxu0  ;;  %18691 = vmatprep.subr.bf16.mxu1 %v18690_v28 }
 0x34c   :  { %v5655_v6 = vadd.f32 %v21171_v56, %v17290_v53  ;;  %v5649_v33 = vpop.f32.mrb[29].mxu0  ;;  %17448 = vmatmul.mubr.msk.f32.gmra.mrb[134].mxu0 %vm1086_vm0, %v435_v39  ;;  %18693 = vmatpush3.bf16.msra.mxu1 %v21343_v27  ;;  %24153 = vst [vmem:[#allocation38_spill] sm:$0xff] %v21450_v5  ;;  %v10210_v27 = vmax.f32 %v8540_v19, 0.0  ;;  %v439_v39 = vld [vmem:[#allocation2 + $0xc58] sm:$0xff] }
 0x34d   :  { %v5650_v3 = vadd.f32 %v21171_v56, %v5649_v33  ;;  %17450 = vmatprep.mubr.msk.f32.mxu0 %vm1086_vm0, %v436_v61  ;;  %v18694_v37 = vpack.c.bf16 %v9631_v24, %v9630_v15  ;;  %v10213_v15 = vmax.f32 %v8555_v54, 0.0  ;;  %v10388_v54 = vld [vmem:[%s24048_s3 + $0x80] sm:$0xff] }
 0x34e   :  { %v9633_v17 = vmax.f32 %v5655_v6, 0.0  ;;  %v21459_v24 = vpack.c.bf16 %v10211_v4, %v10210_v27  ;;  %v442_v4 = vld [vmem:[#allocation2 + $0xc70] sm:$0xff] }
 0x34f   :  { %v9632_v8 = vmax.f32 %v5650_v3, 0.0  ;;  %v17293_v60 = vpop.f32.mrb[30].mxu0  ;;  %18695 = vmatprep.subr.bf16.mxu1 %v18694_v37 }
 0x350   :  { %v5665_v18 = vadd.f32 %v21171_v56, %v17293_v60  ;;  %v5659_v21 = vpop.f32.mrb[31].mxu0  ;;  %17451 = vmatmul.mubr.msk.f32.gmra.mrb[136].mxu0 %vm1086_vm0, %v437_v11  ;;  %18697 = vmatpush3.bf16.msra.mxu1 %v21359_v55  ;;  %24154 = vst [vmem:[#allocation37_spill] sm:$0xff] %v21459_v24  ;;  %v10212_v55 = vmax.f32 %v8550_v13, 0.0  ;;  %v441_v11 = vld [vmem:[#allocation2 + $0xc68] sm:$0xff] }
 0x351   :  { %v5660_v32 = vadd.f32 %v21171_v56, %v5659_v21  ;;  %17453 = vmatprep.mubr.msk.f32.mxu0 %vm1086_vm0, %v438_v42  ;;  %v18698_v28 = vpack.c.bf16 %v9633_v17, %v9632_v8  ;;  %v8560_v17 = vadd.f32 %v21171_v56, %v8559_v12  ;;  %v10215_v8 = vmax.f32 %v8565_v46, 0.0  ;;  %v10453_v13 = vld [vmem:[%s24048_s3 + $0x288] sm:$0xff]  ;;  %v10452_v12 = vld [vmem:[%s24048_s3 + $0x280] sm:$0xff] }
 0x352   :  { %v9635_v61 = vmax.f32 %v5665_v18, 0.0  ;;  %v21467_v19 = vpack.c.bf16 %v10213_v15, %v10212_v55  ;;  %v444_v15 = vld [vmem:[#allocation2 + $0xc80] sm:$0xff] }
 0x353   :  { %v9634_v53 = vmax.f32 %v5660_v32, 0.0  ;;  %v17296_v47 = vpop.f32.mrb[32].mxu0  ;;  %18699 = vmatprep.subr.bf16.mxu1 %v18698_v28 }
 0x354   :  { %v5675_v6 = vadd.f32 %v21171_v56, %v17296_v47  ;;  %v5669_v33 = vpop.f32.mrb[33].mxu0  ;;  %17454 = vmatmul.mubr.msk.f32.gmra.mrb[138].mxu0 %vm1086_vm0, %v439_v39  ;;  %18701 = vmatpush3.bf16.msra.mxu1 %v21375_v49  ;;  %24155 = vst [vmem:[#allocation39_spill] sm:$0xff] %v21467_v19  ;;  %v10214_v49 = vmax.f32 %v8560_v17, 0.0  ;;  %v443_v39 = vld [vmem:[#allocation2 + $0xc78] sm:$0xff]  ;;  %v21494_v17 = vld [vmem:[#allocation5] ss:$0 sm:$0xff] }
 0x355   :  { %v5670_v3 = vadd.f32 %v21171_v56, %v5669_v33  ;;  %17456 = vmatprep.mubr.msk.f32.mxu0 %vm1086_vm0, %v440_v1  ;;  %v18702_v37 = vpack.c.bf16 %v9635_v61, %v9634_v53  ;;  %v8570_v53 = vadd.f32 %v21171_v56, %v8569_v14 }
 0x356   :  { %v9637_v42 = vmax.f32 %v5675_v6, 0.0  ;;  %v21483_v61 = vpack.c.bf16 %v10215_v8, %v10214_v49  ;;  %v18169_v6 = vpop.f32.mrb[106].mxu1  ;;  %v446_v49 = vld [vmem:[#allocation2 + $0xc90] sm:$0xff] }
 0x357   :  { %v9636_v60 = vmax.f32 %v5670_v3, 0.0  ;;  %v17299_v27 = vpop.f32.mrb[34].mxu0  ;;  %18703 = vmatprep.subr.bf16.mxu1 %v18702_v37  ;;  %v10216_v3 = vmax.f32 %v8570_v53, 0.0  ;;  %v8579_v37 = vpop.f32.mrb[107].mxu1  ;;  %v8585_v8 = vadd.f32 %v21494_v17, %v18169_v6 }
 0x358   :  { %v5685_v18 = vadd.f32 %v21171_v56, %v17299_v27  ;;  %v5679_v21 = vpop.f32.mrb[35].mxu0  ;;  %17457 = vmatmul.mubr.msk.f32.gmra.mrb[140].mxu0 %vm1086_vm0, %v441_v11  ;;  %18705 = vmatpush3.bf16.msra.mxu1 %v21391_v9  ;;  %24156 = vst [vmem:[#allocation40_spill] sm:$0xff] %v21483_v61  ;;  %v8575_v9 = vadd.f32 %v21171_v56, %v18166_v59 }
 0x359   :  { %v21476_v32 = vpack.c.bf16 %v9637_v42, %v9636_v60  ;;  %v5680_v28 = vadd.f32 %v21171_v56, %v5679_v21  ;;  %17459 = vmatprep.mubr.msk.f32.mxu0 %vm1086_vm0, %v442_v4  ;;  %v445_v4 = vld [vmem:[#allocation2 + $0xc88] sm:$0xff]  ;;  %v8580_v60 = vadd.f32 %v21494_v17, %v8579_v37 }
 0x35a   :  { %v9639_v1 = vmax.f32 %v5685_v18, 0.0  ;;  %v10217_v44 = vmax.f32 %v8575_v9, 0.0  ;;  %v10516_v9 = vld [vmem:[%s24048_s3 + $0x480] sm:$0xff] }
 0x35b   :  { %v9638_v47 = vmax.f32 %v5680_v28, 0.0  ;;  %v17302_v55 = vpop.f32.mrb[36].mxu0  ;;  %11373 = vmatmul.mubr.f32.vlgmr.msra.gmra.mrb[68].mxu1 %v10388_v54  ;;  %v10219_v54 = vmax.f32 %v8585_v8, 0.0  ;;  %v10218_v14 = vmax.f32 %v8580_v60, 0.0  ;;  %v18172_v28 = vpop.f32.mrb[108].mxu1  ;;  %v10580_v60 = vld [vmem:[%s24048_s3 + $0x680] sm:$0xff] }
 0x35c   :  { %v5695_v33 = vadd.f32 %v21171_v56, %v17302_v55  ;;  %v5689_v46 = vpop.f32.mrb[37].mxu0  ;;  %17460 = vmatmul.mubr.msk.f32.gmra.mrb[142].mxu0 %vm1086_vm0, %v443_v39  ;;  %11377 = vmatprep.mubr.f32.mxu1 %v10453_v13  ;;  %v10517_v56 = vld [vmem:[%s24048_s3 + $0x488] sm:$0xff]  ;;  %v21503_v59 = vpack.c.bf16 %v10217_v44, %v10216_v3  ;;  %v8595_v6 = vadd.f32 %v21494_v17, %v18172_v28 }
 0x35d   :  { %v21492_v11 = vpack.c.bf16 %v9639_v1, %v9638_v47  ;;  %v5690_v42 = vadd.f32 %v21494_v17, %v5689_v46  ;;  %17462 = vmatprep.mubr.msk.f32.mxu0 %vm1086_vm0, %v444_v15  ;;  %v8589_v1 = vpop.f32.mrb[109].mxu1  ;;  %v447_v47 = vld [vmem:[#allocation2 + $0xc98] sm:$0xff]  ;;  %v10581_v55 = vld [vmem:[%s24048_s3 + $0x688] sm:$0xff]  ;;  %v21517_v44 = vpack.c.bf16 %v10219_v54, %v10218_v14  ;;  %v448_v46 = vld [vmem:[#allocation2 + $0xca0] sm:$0xff] }
 0x35e   :  { %v9641_v27 = vmax.f32 %v5695_v33, 0.0  ;;  %24157 = vst [vmem:[#allocation44_spill] sm:$0xff] %v21503_v59  ;;  %v449_v54 = vld [vmem:[#allocation2 + $0xca8] sm:$0xff]  ;;  %v10391_v14 = vld [vmem:[%s24048_s3 + $0x98] sm:$0xff] }
 0x35f   :  { %v9640_v18 = vmax.f32 %v5690_v42, 0.0  ;;  %v17305_v21 = vpop.f32.mrb[38].mxu0  ;;  %11378 = vmatmul.mubr.f32.gmra.mrb[70].mxu1 %v10452_v12  ;;  %24158 = vst [vmem:[#allocation45_spill] sm:$0xff] %v21517_v44  ;;  %v8590_v12 = vadd.f32 %v21494_v17, %v8589_v1  ;;  %v10221_v42 = vmax.f32 %v8595_v6, 0.0 }
 0x360   :  { %v5705_v39 = vadd.f32 %v21494_v17, %v17305_v21  ;;  %v5699_v13 = vpop.f32.mrb[39].mxu0  ;;  %17463 = vmatmul.mubr.msk.f32.gmra.mrb[144].mxu0 %vm1086_vm0, %v445_v4  ;;  %11382 = vmatprep.mubr.f32.mxu1 %v10517_v56  ;;  %v18175_v4 = vpop.f32.mrb[110].mxu1 }
 0x361   :  { %v21510_v15 = vpack.c.bf16 %v9641_v27, %v9640_v18  ;;  %v5700_v53 = vadd.f32 %v21494_v17, %v5699_v13  ;;  %17465 = vmatprep.mubr.msk.f32.mxu0 %vm1086_vm0, %v446_v49  ;;  %v10220_v27 = vmax.f32 %v8590_v12, 0.0  ;;  %v8599_v49 = vpop.f32.mrb[111].mxu1  ;;  %v8605_v28 = vadd.f32 %v21494_v17, %v18175_v4 }
 0x362   :  { %v9643_v33 = vmax.f32 %v5705_v39, 0.0  ;;  %v8600_v39 = vadd.f32 %v21494_v17, %v8599_v49 }
 0x363   :  { %v9642_v3 = vmax.f32 %v5700_v53, 0.0  ;;  %v17308_v37 = vpop.f32.mrb[40].mxu0  ;;  %11383 = vmatmul.mubr.f32.gmra.mrb[72].mxu1 %v10516_v9  ;;  %v450_v9 = vld [vmem:[#allocation2 + $0xcb0] sm:$0xff]  ;;  %v21535_v1 = vpack.c.bf16 %v10221_v42, %v10220_v27  ;;  %v451_v42 = vld [vmem:[#allocation2 + $0xcb8] sm:$0xff]  ;;  %v452_v27 = vld [vmem:[#allocation2 + $0xcc0] sm:$0xff] }
 0x364   :  { %v5715_v56 = vadd.f32 %v21494_v17, %v17308_v37  ;;  %v5709_v8 = vpop.f32.mrb[41].mxu0  ;;  %17466 = vmatmul.mubr.msk.f32.gmra.mrb[146].mxu0 %vm1086_vm0, %v447_v47  ;;  %11387 = vmatprep.mubr.f32.mxu1 %v10581_v55  ;;  %v10223_v55 = vmax.f32 %v8605_v28, 0.0  ;;  %v10222_v6 = vmax.f32 %v8600_v39, 0.0 }
 0x365   :  { %v21526_v18 = vpack.c.bf16 %v9643_v33, %v9642_v3  ;;  %v5710_v21 = vadd.f32 %v21494_v17, %v5709_v8  ;;  %17468 = vmatprep.mubr.msk.f32.mxu0 %vm1086_vm0, %v448_v46  ;;  %24159 = vst [vmem:[#allocation41_spill] sm:$0xff] %v21535_v1  ;;  %v18178_v33 = vpop.f32.mrb[112].mxu1 }
 0x366   :  { %v9645_v13 = vmax.f32 %v5715_v56, 0.0  ;;  %v8609_v3 = vpop.f32.mrb[113].mxu1  ;;  %v21543_v56 = vpack.c.bf16 %v10223_v55, %v10222_v6  ;;  %v8615_v8 = vadd.f32 %v21494_v17, %v18178_v33  ;;  %v453_v6 = vld [vmem:[#allocation2 + $0xcc8] sm:$0xff] }
 0x367   :  { %v9644_v53 = vmax.f32 %v5710_v21, 0.0  ;;  %v17311_v47 = vpop.f32.mrb[42].mxu0  ;;  %11388 = vmatmul.mubr.f32.gmra.mrb[74].mxu1 %v10580_v60  ;;  %v8610_v49 = vadd.f32 %v21494_v17, %v8609_v3  ;;  %v454_v3 = vld [vmem:[#allocation2 + $0xcd0] sm:$0xff] }
 0x368   :  { %v5725_v46 = vadd.f32 %v21494_v17, %v17311_v47  ;;  %v5719_v12 = vpop.f32.mrb[43].mxu0  ;;  %17469 = vmatmul.mubr.msk.f32.gmra.mrb[148].mxu0 %vm1086_vm0, %v449_v54  ;;  %11457 = vmatprep.mubr.f32.mxu1 %v10391_v14  ;;  %24160 = vst [vmem:[#allocation46_spill] sm:$0xff] %v21543_v56  ;;  %v10225_v54 = vmax.f32 %v8615_v8, 0.0  ;;  %v18181_v14 = vpop.f32.mrb[114].mxu1 }
 0x369   :  { %v21539_v37 = vpack.c.bf16 %v9645_v13, %v9644_v53  ;;  %v5720_v4 = vadd.f32 %v21494_v17, %v5719_v12  ;;  %17471 = vmatprep.mubr.msk.f32.mxu0 %vm1086_vm0, %v450_v9  ;;  %v10224_v53 = vmax.f32 %v8610_v49, 0.0  ;;  %v8619_v9 = vpop.f32.mrb[115].mxu1  ;;  %v8625_v33 = vadd.f32 %v21494_v17, %v18181_v14 }
 0x36a   :  { %v9647_v60 = vmax.f32 %v5725_v46, 0.0  ;;  %v8620_v46 = vadd.f32 %v21494_v17, %v8619_v9  ;;  %v18184_v56 = vpop.f32.mrb[116].mxu1 }
 0x36b   :  { %v9646_v21 = vmax.f32 %v5720_v4, 0.0  ;;  %v17314_v28 = vpop.f32.mrb[44].mxu0  ;;  %v21555_v4 = vpack.c.bf16 %v10225_v54, %v10224_v53  ;;  %v8635_v53 = vadd.f32 %v21494_v17, %v18184_v56  ;;  %v457_v56 = vld [vmem:[#allocation2 + $0xce8] sm:$0xff] }
 0x36c   :  { %v5735_v39 = vadd.f32 %v21494_v17, %v17314_v28  ;;  %v5729_v13 = vpop.f32.mrb[45].mxu0  ;;  %17472 = vmatmul.mubr.msk.f32.gmra.mrb[150].mxu0 %vm1086_vm0, %v451_v42  ;;  %v10227_v42 = vmax.f32 %v8625_v33, 0.0  ;;  %v10226_v49 = vmax.f32 %v8620_v46, 0.0 }
 0x36d   :  { %v21549_v47 = vpack.c.bf16 %v9647_v60, %v9646_v21  ;;  %v5730_v55 = vadd.f32 %v21494_v17, %v5729_v13  ;;  %17474 = vmatprep.mubr.msk.f32.mxu0 %vm1086_vm0, %v452_v27  ;;  %24161 = vst [vmem:[#allocation48_spill] sm:$0xff] %v21555_v4  ;;  %v8629_v27 = vpop.f32.mrb[117].mxu1  ;;  %v10229_v4 = vmax.f32 %v8635_v53, 0.0 }
 0x36e   :  { %v9649_v12 = vmax.f32 %v5735_v39, 0.0  ;;  %v455_v39 = vld [vmem:[#allocation2 + $0xcd8] sm:$0xff]  ;;  %v21563_v54 = vpack.c.bf16 %v10227_v42, %v10226_v49  ;;  %v8630_v33 = vadd.f32 %v21494_v17, %v8629_v27 }
 0x36f   :  { %v9648_v8 = vmax.f32 %v5730_v55, 0.0  ;;  %v17317_v28 = vpop.f32.mrb[46].mxu0  ;;  %v456_v55 = vld [vmem:[#allocation2 + $0xce0] sm:$0xff] }
 0x370   :  { %v5745_v60 = vadd.f32 %v21494_v17, %v17317_v28  ;;  %v5739_v21 = vpop.f32.mrb[47].mxu0  ;;  %17475 = vmatmul.mubr.msk.f32.gmra.mrb[152].mxu0 %vm1086_vm0, %v453_v6  ;;  %24162 = vst [vmem:[#allocation42_spill] sm:$0xff] %v21563_v54  ;;  %v18187_v6 = vpop.f32.mrb[118].mxu1 }
 0x371   :  { %v21559_v13 = vpack.c.bf16 %v9649_v12, %v9648_v8  ;;  %v5740_v14 = vadd.f32 %v21494_v17, %v5739_v21  ;;  %17477 = vmatprep.mubr.msk.f32.mxu0 %vm1086_vm0, %v454_v3  ;;  %v10228_v21 = vmax.f32 %v8630_v33, 0.0  ;;  %v8639_v3 = vpop.f32.mrb[119].mxu1  ;;  %v8645_v49 = vadd.f32 %v21494_v17, %v18187_v6 }
 0x372   :  { %v9651_v9 = vmax.f32 %v5745_v60, 0.0  ;;  %v8640_v60 = vadd.f32 %v21494_v17, %v8639_v3  ;;  %v18190_v44 = vpop.f32.mrb[120].mxu1 }
 0x373   :  { %v9650_v46 = vmax.f32 %v5740_v14, 0.0  ;;  %v17320_v28 = vpop.f32.mrb[48].mxu0  ;;  %v458_v14 = vld [vmem:[#allocation2 + $0xcf0] sm:$0xff]  ;;  %v21575_v53 = vpack.c.bf16 %v10229_v4, %v10228_v21  ;;  %v459_v4 = vld [vmem:[#allocation2 + $0xcf8] sm:$0xff] }
 0x374   :  { %v5755_v12 = vadd.f32 %v21494_v17, %v17320_v28  ;;  %v5749_v8 = vpop.f32.mrb[49].mxu0  ;;  %17478 = vmatmul.mubr.msk.f32.gmra.mrb[154].mxu0 %vm1086_vm0, %v455_v39  ;;  %v10231_v39 = vmax.f32 %v8645_v49, 0.0  ;;  %v10230_v33 = vmax.f32 %v8640_v60, 0.0  ;;  %v460_v49 = vld [vmem:[#allocation2 + $0xd00] sm:$0xff] }
 0x375   :  { %v21569_v1 = vpack.c.bf16 %v9651_v9, %v9650_v46  ;;  %v5750_v42 = vadd.f32 %v21494_v17, %v5749_v8  ;;  %17480 = vmatprep.mubr.msk.f32.mxu0 %vm1086_vm0, %v456_v55  ;;  %24163 = vst [vmem:[#allocation49_spill] sm:$0xff] %v21575_v53  ;;  %v8655_v55 = vadd.f32 %v21494_v17, %v18190_v44  ;;  %v8649_v8 = vpop.f32.mrb[121].mxu1  ;;  %v548_v53 = vld [vmem:[#allocation2 + $0xfc0] sm:$0xff] }
 0x376   :  { %v9653_v27 = vmax.f32 %v5755_v12, 0.0  ;;  %v8650_v21 = vadd.f32 %v21494_v17, %v8649_v8  ;;  %v21583_v3 = vpack.c.bf16 %v10231_v39, %v10230_v33  ;;  %v18193_v61 = vpop.f32.mrb[122].mxu1  ;;  %v461_v33 = vld [vmem:[#allocation2 + $0xd08] sm:$0xff] }
 0x377   :  { %v9652_v28 = vmax.f32 %v5750_v42, 0.0  ;;  %v17323_v54 = vpop.f32.mrb[50].mxu0  ;;  %v10233_v60 = vmax.f32 %v8655_v55, 0.0 }
 0x378   :  { %v5765_v9 = vadd.f32 %v21494_v17, %v17323_v54  ;;  %v5759_v46 = vpop.f32.mrb[51].mxu0  ;;  %17481 = vmatmul.mubr.msk.f32.gmra.mrb[156].mxu0 %vm1086_vm0, %v457_v56  ;;  %24164 = vst [vmem:[#allocation51_spill] sm:$0xff] %v21583_v3  ;;  %v10232_v56 = vmax.f32 %v8650_v21, 0.0 }
 0x379   :  { %v5760_v6 = vadd.f32 %v21494_v17, %v5759_v46  ;;  %17483 = vmatprep.mubr.msk.f32.mxu0 %vm1086_vm0, %v458_v14  ;;  %v18706_v12 = vpack.c.bf16 %v9653_v27, %v9652_v28  ;;  %v8665_v27 = vadd.f32 %v21494_v17, %v18193_v61  ;;  %v8659_v14 = vpop.f32.mrb[123].mxu1 }
 0x37a   :  { %v9655_v42 = vmax.f32 %v5765_v9, 0.0  ;;  %v8660_v9 = vadd.f32 %v21494_v17, %v8659_v14  ;;  %v21592_v46 = vpack.c.bf16 %v10233_v60, %v10232_v56  ;;  %v464_v14 = vld [vmem:[#allocation2 + $0xd20] sm:$0xff] }
 0x37b   :  { %v9654_v54 = vmax.f32 %v5760_v6, 0.0  ;;  %v17326_v59 = vpop.f32.mrb[52].mxu0  ;;  %18707 = vmatprep.subr.bf16.mxu1 %v18706_v12  ;;  %v10235_v8 = vmax.f32 %v8665_v27, 0.0 }
 0x37c   :  { %v5775_v44 = vadd.f32 %v21494_v17, %v17326_v59  ;;  %v5769_v19 = vpop.f32.mrb[53].mxu0  ;;  %17484 = vmatmul.mubr.msk.f32.gmra.mrb[158].mxu0 %vm1086_vm0, %v459_v4  ;;  %18709 = vmatpush3.bf16.msra.mxu1 %v21476_v32  ;;  %24165 = vst [vmem:[#allocation60_spill] sm:$0xff] %v21592_v46  ;;  %v462_v59 = vld [vmem:[#allocation2 + $0xd10] sm:$0xff]  ;;  %v10234_v32 = vmax.f32 %v8660_v9, 0.0  ;;  %v18196_v4 = vpop.f32.mrb[124].mxu1 }
 0x37d   :  { %v5770_v28 = vadd.f32 %v21494_v17, %v5769_v19  ;;  %17486 = vmatprep.mubr.msk.f32.mxu0 %vm1086_vm0, %v460_v49  ;;  %v18710_v39 = vpack.c.bf16 %v9655_v42, %v9654_v54  ;;  %v8675_v19 = vadd.f32 %v21494_v17, %v18196_v4  ;;  %v8669_v42 = vpop.f32.mrb[125].mxu1  ;;  %v463_v54 = vld [vmem:[#allocation2 + $0xd18] sm:$0xff] }
 0x37e   :  { %v9657_v55 = vmax.f32 %v5775_v44, 0.0  ;;  %v8670_v56 = vadd.f32 %v21494_v17, %v8669_v42  ;;  %v21601_v44 = vpack.c.bf16 %v10235_v8, %v10234_v32  ;;  %v18199_v9 = vpop.f32.mrb[126].mxu1  ;;  %v465_v32 = vld [vmem:[#allocation2 + $0xd28] sm:$0xff]  ;;  %v466_v42 = vld [vmem:[#allocation2 + $0xd30] sm:$0xff] }
 0x37f   :  { %v9656_v6 = vmax.f32 %v5770_v28, 0.0  ;;  %v17329_v12 = vpop.f32.mrb[54].mxu0  ;;  %18711 = vmatprep.subr.bf16.mxu1 %v18710_v39  ;;  %v10237_v28 = vmax.f32 %v8675_v19, 0.0 }
 0x380   :  { %v5785_v61 = vadd.f32 %v21494_v17, %v17329_v12  ;;  %v5779_v21 = vpop.f32.mrb[55].mxu0  ;;  %17487 = vmatmul.mubr.msk.f32.gmra.mrb[160].mxu0 %vm1086_vm0, %v461_v33  ;;  %18713 = vmatpush3.bf16.msra.mxu1 %v21492_v11  ;;  %24166 = vst [vmem:[#allocation61_spill] sm:$0xff] %v21601_v44  ;;  %v10236_v11 = vmax.f32 %v8670_v56, 0.0 }
 0x381   :  { %v5780_v49 = vadd.f32 %v21494_v17, %v5779_v21  ;;  %17489 = vmatprep.mubr.msk.f32.mxu0 %vm1086_vm0, %v462_v59  ;;  %v18714_v60 = vpack.c.bf16 %v9657_v55, %v9656_v6  ;;  %v8685_v55 = vadd.f32 %v21494_v17, %v18199_v9  ;;  %v8679_v59 = vpop.f32.mrb[127].mxu1 }
 0x382   :  { %v9659_v27 = vmax.f32 %v5785_v61, 0.0  ;;  %v8680_v61 = vadd.f32 %v21494_v17, %v8679_v59  ;;  %v21610_v21 = vpack.c.bf16 %v10237_v28, %v10236_v11  ;;  %v18202_v56 = vpop.f32.mrb[128].mxu1  ;;  %v467_v11 = vld [vmem:[#allocation2 + $0xd38] sm:$0xff]  ;;  %v468_v59 = vld [vmem:[#allocation2 + $0xd40] sm:$0xff] }
 0x383   :  { %v9658_v39 = vmax.f32 %v5780_v49, 0.0  ;;  %v17332_v33 = vpop.f32.mrb[56].mxu0  ;;  %18715 = vmatprep.subr.bf16.mxu1 %v18714_v60  ;;  %v10239_v49 = vmax.f32 %v8685_v55, 0.0 }
 0x384   :  { %v5795_v12 = vadd.f32 %v21494_v17, %v17332_v33  ;;  %v5789_v4 = vpop.f32.mrb[57].mxu0  ;;  %17490 = vmatmul.mubr.msk.f32.gmra.mrb[162].mxu0 %vm1086_vm0, %v463_v54  ;;  %18717 = vmatpush3.bf16.msra.mxu1 %v21510_v15  ;;  %24167 = vst [vmem:[#allocation62_spill] sm:$0xff] %v21610_v21  ;;  %v10238_v15 = vmax.f32 %v8680_v61, 0.0 }
 0x385   :  { %v5790_v8 = vadd.f32 %v21494_v17, %v5789_v4  ;;  %17492 = vmatprep.mubr.msk.f32.mxu0 %vm1086_vm0, %v464_v14  ;;  %v18718_v6 = vpack.c.bf16 %v9659_v27, %v9658_v39  ;;  %v8695_v27 = vadd.f32 %v21494_v17, %v18202_v56  ;;  %v8689_v14 = vpop.f32.mrb[129].mxu1 }
 0x386   :  { %v9661_v19 = vmax.f32 %v5795_v12, 0.0  ;;  %v8690_v12 = vadd.f32 %v21494_v17, %v8689_v14  ;;  %v21619_v4 = vpack.c.bf16 %v10239_v49, %v10238_v15  ;;  %v18205_v61 = vpop.f32.mrb[130].mxu1  ;;  %v469_v15 = vld [vmem:[#allocation2 + $0xd48] sm:$0xff]  ;;  %v470_v14 = vld [vmem:[#allocation2 + $0xd50] sm:$0xff] }
 0x387   :  { %v9660_v60 = vmax.f32 %v5790_v8, 0.0  ;;  %v17335_v54 = vpop.f32.mrb[58].mxu0  ;;  %18719 = vmatprep.subr.bf16.mxu1 %v18718_v6  ;;  %v10241_v8 = vmax.f32 %v8695_v27, 0.0 }
 0x388   :  { %v5805_v33 = vadd.f32 %v21494_v17, %v17335_v54  ;;  %v5799_v9 = vpop.f32.mrb[59].mxu0  ;;  %17493 = vmatmul.mubr.msk.f32.gmra.mrb[164].mxu0 %vm1086_vm0, %v465_v32  ;;  %18721 = vmatpush3.bf16.msra.mxu1 %v21526_v18  ;;  %24168 = vst [vmem:[#allocation63_spill] sm:$0xff] %v21619_v4  ;;  %v10240_v18 = vmax.f32 %v8690_v12, 0.0 }
 0x389   :  { %v5800_v28 = vadd.f32 %v21494_v17, %v5799_v9  ;;  %17495 = vmatprep.mubr.msk.f32.mxu0 %vm1086_vm0, %v466_v42  ;;  %v18722_v39 = vpack.c.bf16 %v9661_v19, %v9660_v60  ;;  %v8705_v19 = vadd.f32 %v21494_v17, %v18205_v61  ;;  %v8699_v42 = vpop.f32.mrb[131].mxu1 }
 0x38a   :  { %v9663_v55 = vmax.f32 %v5805_v33, 0.0  ;;  %v8700_v33 = vadd.f32 %v21494_v17, %v8699_v42  ;;  %v21628_v9 = vpack.c.bf16 %v10241_v8, %v10240_v18  ;;  %v18208_v12 = vpop.f32.mrb[132].mxu1  ;;  %v471_v18 = vld [vmem:[#allocation2 + $0xd58] sm:$0xff]  ;;  %v472_v42 = vld [vmem:[#allocation2 + $0xd60] sm:$0xff] }
 0x38b   :  { %v9662_v6 = vmax.f32 %v5800_v28, 0.0  ;;  %v17338_v32 = vpop.f32.mrb[60].mxu0  ;;  %18723 = vmatprep.subr.bf16.mxu1 %v18722_v39  ;;  %v10243_v28 = vmax.f32 %v8705_v19, 0.0 }
 0x38c   :  { %v5815_v54 = vadd.f32 %v21494_v17, %v17338_v32  ;;  %v5809_v56 = vpop.f32.mrb[61].mxu0  ;;  %17496 = vmatmul.mubr.msk.f32.gmra.mrb[166].mxu0 %vm1086_vm0, %v467_v11  ;;  %18725 = vmatpush3.bf16.msra.mxu1 %v21539_v37  ;;  %24169 = vst [vmem:[#allocation64_spill] sm:$0xff] %v21628_v9  ;;  %v10242_v37 = vmax.f32 %v8700_v33, 0.0 }
 0x38d   :  { %v5810_v49 = vadd.f32 %v21494_v17, %v5809_v56  ;;  %17498 = vmatprep.mubr.msk.f32.mxu0 %vm1086_vm0, %v468_v59  ;;  %v18726_v60 = vpack.c.bf16 %v9663_v55, %v9662_v6  ;;  %v8715_v55 = vadd.f32 %v21494_v17, %v18208_v12  ;;  %v8709_v59 = vpop.f32.mrb[133].mxu1 }
 0x38e   :  { %v9665_v27 = vmax.f32 %v5815_v54, 0.0  ;;  %v8710_v54 = vadd.f32 %v21494_v17, %v8709_v59  ;;  %v21637_v56 = vpack.c.bf16 %v10243_v28, %v10242_v37  ;;  %v18211_v33 = vpop.f32.mrb[134].mxu1  ;;  %v473_v37 = vld [vmem:[#allocation2 + $0xd68] sm:$0xff]  ;;  %v474_v59 = vld [vmem:[#allocation2 + $0xd70] sm:$0xff] }
 0x38f   :  { %v9664_v39 = vmax.f32 %v5810_v49, 0.0  ;;  %v17341_v11 = vpop.f32.mrb[62].mxu0  ;;  %18727 = vmatprep.subr.bf16.mxu1 %v18726_v60  ;;  %v10245_v49 = vmax.f32 %v8715_v55, 0.0 }
 0x390   :  { %v5825_v32 = vadd.f32 %v21494_v17, %v17341_v11  ;;  %v5819_v61 = vpop.f32.mrb[63].mxu0  ;;  %17499 = vmatmul.mubr.msk.f32.gmra.mrb[168].mxu0 %vm1086_vm0, %v469_v15  ;;  %18729 = vmatpush3.bf16.msra.mxu1 %v21549_v47  ;;  %24170 = vst [vmem:[#allocation65_spill] sm:$0xff] %v21637_v56  ;;  %v10244_v47 = vmax.f32 %v8710_v54, 0.0 }
 0x391   :  { %v5820_v8 = vadd.f32 %v21494_v17, %v5819_v61  ;;  %17501 = vmatprep.mubr.msk.f32.mxu0 %vm1086_vm0, %v470_v14  ;;  %v18730_v6 = vpack.c.bf16 %v9665_v27, %v9664_v39  ;;  %v8725_v27 = vadd.f32 %v21494_v17, %v18211_v33  ;;  %v8719_v14 = vpop.f32.mrb[135].mxu1 }
 0x392   :  { %v9667_v19 = vmax.f32 %v5825_v32, 0.0  ;;  %v21645_v32 = vpack.c.bf16 %v10245_v49, %v10244_v47  ;;  %v8720_v61 = vadd.f32 %v21494_v17, %v8719_v14  ;;  %v18214_v54 = vpop.f32.mrb[136].mxu1  ;;  %v475_v47 = vld [vmem:[#allocation2 + $0xd78] sm:$0xff]  ;;  %v476_v14 = vld [vmem:[#allocation2 + $0xd80] sm:$0xff] }
 0x393   :  { %v9666_v60 = vmax.f32 %v5820_v8, 0.0  ;;  %v17344_v15 = vpop.f32.mrb[64].mxu0  ;;  %18731 = vmatprep.subr.bf16.mxu1 %v18730_v6  ;;  %v10247_v8 = vmax.f32 %v8725_v27, 0.0 }
 0x394   :  { %v5835_v11 = vadd.f32 %v21494_v17, %v17344_v15  ;;  %v5829_v12 = vpop.f32.mrb[65].mxu0  ;;  %17502 = vmatmul.mubr.msk.f32.gmra.mrb[170].mxu0 %vm1086_vm0, %v471_v18  ;;  %18733 = vmatpush3.bf16.msra.mxu1 %v21559_v13  ;;  %24171 = vst [vmem:[#allocation66_spill] sm:$0xff] %v21645_v32  ;;  %v10246_v13 = vmax.f32 %v8720_v61, 0.0 }
 0x395   :  { %v5830_v28 = vadd.f32 %v21494_v17, %v5829_v12  ;;  %17504 = vmatprep.mubr.msk.f32.mxu0 %vm1086_vm0, %v472_v42  ;;  %v18734_v39 = vpack.c.bf16 %v9667_v19, %v9666_v60  ;;  %v10390_v19 = vld [vmem:[%s24048_s3 + $0x90] sm:$0xff]  ;;  %v8729_v42 = vpop.f32.mrb[137].mxu1 }
 0x396   :  { %v9669_v55 = vmax.f32 %v5835_v11, 0.0  ;;  %v10455_v11 = vld [vmem:[%s24048_s3 + $0x298] sm:$0xff]  ;;  %v21661_v12 = vpack.c.bf16 %v10247_v8, %v10246_v13  ;;  %v10454_v8 = vld [vmem:[%s24048_s3 + $0x290] sm:$0xff] }
 0x397   :  { %v9668_v6 = vmax.f32 %v5830_v28, 0.0  ;;  %v17347_v18 = vpop.f32.mrb[66].mxu0  ;;  %18735 = vmatprep.subr.bf16.mxu1 %v18734_v39  ;;  %v8730_v28 = vadd.f32 %v21494_v17, %v8729_v42 }
 0x398   :  { %v5845_v15 = vadd.f32 %v21494_v17, %v17347_v18  ;;  %v5839_v33 = vpop.f32.mrb[67].mxu0  ;;  %17505 = vmatmul.mubr.msk.f32.gmra.mrb[172].mxu0 %vm1086_vm0, %v473_v37  ;;  %18737 = vmatpush3.bf16.msra.mxu1 %v21569_v1  ;;  %24172 = vst [vmem:[#allocation67_spill] sm:$0xff] %v21661_v12  ;;  %v8735_v1 = vadd.f32 %v21494_v17, %v18214_v54 }
 0x399   :  { %v21654_v49 = vpack.c.bf16 %v9669_v55, %v9668_v6  ;;  %v5840_v60 = vadd.f32 %v21494_v17, %v5839_v33  ;;  %17507 = vmatprep.mubr.msk.f32.mxu0 %vm1086_vm0, %v474_v59  ;;  %v18217_v55 = vpop.f32.mrb[138].mxu1  ;;  %v10248_v18 = vmax.f32 %v8730_v28, 0.0  ;;  %v477_v33 = vld [vmem:[#allocation2 + $0xd88] sm:$0xff] }
 0x39a   :  { %v9671_v27 = vmax.f32 %v5845_v15, 0.0  ;;  %v10249_v61 = vmax.f32 %v8735_v1, 0.0  ;;  %v8739_v13 = vpop.f32.mrb[139].mxu1  ;;  %v8745_v42 = vadd.f32 %v21494_v17, %v18217_v55  ;;  %v10518_v55 = vld [vmem:[%s24048_s3 + $0x490] sm:$0xff] }
 0x39b   :  { %v9670_v39 = vmax.f32 %v5840_v60, 0.0  ;;  %v17350_v37 = vpop.f32.mrb[68].mxu0  ;;  %11458 = vmatmul.mubr.f32.vlgmr.msra.gmra.mrb[76].mxu1 %v10390_v19  ;;  %v10519_v19 = vld [vmem:[%s24048_s3 + $0x498] sm:$0xff]  ;;  %v8740_v60 = vadd.f32 %v21494_v17, %v8739_v13 }
 0x39c   :  { %v5855_v59 = vadd.f32 %v21494_v17, %v17350_v37  ;;  %v5849_v6 = vpop.f32.mrb[69].mxu0  ;;  %17508 = vmatmul.mubr.msk.f32.gmra.mrb[174].mxu0 %vm1086_vm0, %v475_v47  ;;  %11462 = vmatprep.mubr.f32.mxu1 %v10455_v11  ;;  %v478_v11 = vld [vmem:[#allocation2 + $0xd90] sm:$0xff]  ;;  %v21679_v1 = vpack.c.bf16 %v10249_v61, %v10248_v18  ;;  %v10583_v18 = vld [vmem:[%s24048_s3 + $0x698] sm:$0xff] }
 0x39d   :  { %v21670_v54 = vpack.c.bf16 %v9671_v27, %v9670_v39  ;;  %v5850_v15 = vadd.f32 %v21494_v17, %v5849_v6  ;;  %17510 = vmatprep.mubr.msk.f32.mxu0 %vm1086_vm0, %v476_v14  ;;  %v10251_v39 = vmax.f32 %v8745_v42, 0.0  ;;  %v10250_v37 = vmax.f32 %v8740_v60, 0.0  ;;  %v18220_v6 = vpop.f32.mrb[140].mxu1  ;;  %v480_v42 = vld [vmem:[#allocation2 + $0xda0] sm:$0xff] }
 0x39e   :  { %v9673_v47 = vmax.f32 %v5855_v59, 0.0  ;;  %24173 = vst [vmem:[#allocation68_spill] sm:$0xff] %v21679_v1  ;;  %v8749_v59 = vpop.f32.mrb[141].mxu1 }
 0x39f   :  { %v9672_v28 = vmax.f32 %v5850_v15, 0.0  ;;  %v17353_v27 = vpop.f32.mrb[70].mxu0  ;;  %11463 = vmatmul.mubr.f32.gmra.mrb[78].mxu1 %v10454_v8  ;;  %v479_v8 = vld [vmem:[#allocation2 + $0xd98] sm:$0xff]  ;;  %v21693_v15 = vpack.c.bf16 %v10251_v39, %v10250_v37  ;;  %v8750_v60 = vadd.f32 %v21494_v17, %v8749_v59  ;;  %v10582_v39 = vld [vmem:[%s24048_s3 + $0x690] sm:$0xff] }
 0x3a0   :  { %v5865_v14 = vadd.f32 %v21494_v17, %v17353_v27  ;;  %v5859_v12 = vpop.f32.mrb[71].mxu0  ;;  %17511 = vmatmul.mubr.msk.f32.gmra.mrb[176].mxu0 %vm1086_vm0, %v477_v33  ;;  %11467 = vmatprep.mubr.f32.mxu1 %v10519_v19  ;;  %v8755_v33 = vadd.f32 %v21494_v17, %v18220_v6 }
 0x3a1   :  { %v21686_v13 = vpack.c.bf16 %v9673_v47, %v9672_v28  ;;  %v5860_v61 = vadd.f32 %v21494_v17, %v5859_v12  ;;  %17513 = vmatprep.mubr.msk.f32.mxu0 %vm1086_vm0, %v478_v11  ;;  %24174 = vst [vmem:[#allocation69_spill] sm:$0xff] %v21693_v15  ;;  %v18223_v12 = vpop.f32.mrb[142].mxu1  ;;  %v10252_v37 = vmax.f32 %v8750_v60, 0.0 }
 0x3a2   :  { %v9675_v19 = vmax.f32 %v5865_v14, 0.0  ;;  %v10253_v28 = vmax.f32 %v8755_v33, 0.0  ;;  %v8759_v6 = vpop.f32.mrb[143].mxu1 }
 0x3a3   :  { %v9674_v27 = vmax.f32 %v5860_v61, 0.0  ;;  %v17356_v47 = vpop.f32.mrb[72].mxu0  ;;  %11468 = vmatmul.mubr.f32.gmra.mrb[80].mxu1 %v10518_v55  ;;  %v481_v55 = vld [vmem:[#allocation2 + $0xda8] sm:$0xff]  ;;  %v18226_v32 = vpop.f32.mrb[144].mxu1 }
 0x3a4   :  { %v5875_v11 = vadd.f32 %v21494_v17, %v17356_v47  ;;  %v5869_v1 = vpop.f32.mrb[73].mxu0  ;;  %17514 = vmatmul.mubr.msk.f32.gmra.mrb[178].mxu0 %vm1086_vm0, %v479_v8  ;;  %11472 = vmatprep.mubr.f32.mxu1 %v10583_v18  ;;  %v10393_v61 = vld [vmem:[%s24048_s3 + $0xa8] sm:$0xff]  ;;  %v8765_v8 = vadd.f32 %v21494_v17, %v18223_v12  ;;  %v8760_v18 = vadd.f32 %v21494_v17, %v8759_v6  ;;  %v482_v47 = vld [vmem:[#allocation2 + $0xdb0] sm:$0xff]  ;;  %v8769_v9 = vpop.f32.mrb[145].mxu1 }
 0x3a5   :  { %v21702_v14 = vpack.c.bf16 %v9675_v19, %v9674_v27  ;;  %v5870_v59 = vadd.f32 %v21494_v17, %v5869_v1  ;;  %17516 = vmatprep.mubr.msk.f32.mxu0 %vm1086_vm0, %v480_v42  ;;  %v21711_v15 = vpack.c.bf16 %v10253_v28, %v10252_v37  ;;  %v483_v28 = vld [vmem:[#allocation2 + $0xdb8] sm:$0xff] }
 0x3a6   :  { %v9677_v33 = vmax.f32 %v5875_v11, 0.0  ;;  %v10255_v27 = vmax.f32 %v8765_v8, 0.0  ;;  %v10254_v1 = vmax.f32 %v8760_v18, 0.0  ;;  %v8770_v8 = vadd.f32 %v21494_v17, %v8769_v9 }
 0x3a7   :  { %24175 = vst [vmem:[#allocation70_spill] sm:$0xff] %v21711_v15  ;;  %v9676_v60 = vmax.f32 %v5870_v59, 0.0  ;;  %v17359_v19 = vpop.f32.mrb[74].mxu0  ;;  %11473 = vmatmul.mubr.f32.gmra.mrb[82].mxu1 %v10582_v39  ;;  %v8775_v39 = vadd.f32 %v21494_v17, %v18226_v32  ;;  %v484_v59 = vld [vmem:[#allocation2 + $0xdc0] sm:$0xff]  ;;  %v485_v32 = vld [vmem:[#allocation2 + $0xdc8] sm:$0xff] }
 0x3a8   :  { %v5885_v42 = vadd.f32 %v21494_v17, %v17359_v19  ;;  %v5879_v56 = vpop.f32.mrb[75].mxu0  ;;  %17517 = vmatmul.mubr.msk.f32.gmra.mrb[180].mxu0 %vm1086_vm0, %v481_v55  ;;  %11542 = vmatprep.mubr.f32.mxu1 %v10393_v61  ;;  %v21719_v37 = vpack.c.bf16 %v10255_v27, %v10254_v1  ;;  %v18229_v61 = vpop.f32.mrb[146].mxu1 }
 0x3a9   :  { %v21715_v12 = vpack.c.bf16 %v9677_v33, %v9676_v60  ;;  %v5880_v11 = vadd.f32 %v21494_v17, %v5879_v56  ;;  %17519 = vmatprep.mubr.msk.f32.mxu0 %vm1086_vm0, %v482_v47  ;;  %v10257_v55 = vmax.f32 %v8775_v39, 0.0  ;;  %v10256_v56 = vmax.f32 %v8770_v8, 0.0  ;;  %v8779_v47 = vpop.f32.mrb[147].mxu1 }
 0x3aa   :  { %24176 = vst [vmem:[#allocation71_spill] sm:$0xff] %v21719_v37  ;;  %v9679_v6 = vmax.f32 %v5885_v42, 0.0  ;;  %v8785_v9 = vadd.f32 %v21494_v17, %v18229_v61  ;;  %v8780_v1 = vadd.f32 %v21494_v17, %v8779_v47  ;;  %v18232_v4 = vpop.f32.mrb[148].mxu1 }
 0x3ab   :  { %v9678_v18 = vmax.f32 %v5880_v11, 0.0  ;;  %v17362_v19 = vpop.f32.mrb[76].mxu0  ;;  %v486_v11 = vld [vmem:[#allocation2 + $0xdd0] sm:$0xff]  ;;  %v21731_v39 = vpack.c.bf16 %v10257_v55, %v10256_v56  ;;  %v8795_v56 = vadd.f32 %v21494_v17, %v18232_v4  ;;  %v489_v4 = vld [vmem:[#allocation2 + $0xde8] sm:$0xff] }
 0x3ac   :  { %v5895_v33 = vadd.f32 %v21494_v17, %v17362_v19  ;;  %v5889_v60 = vpop.f32.mrb[77].mxu0  ;;  %17520 = vmatmul.mubr.msk.f32.gmra.mrb[182].mxu0 %vm1086_vm0, %v483_v28  ;;  %v10259_v28 = vmax.f32 %v8785_v9, 0.0  ;;  %v10258_v8 = vmax.f32 %v8780_v1, 0.0 }
 0x3ad   :  { %v21725_v15 = vpack.c.bf16 %v9679_v6, %v9678_v18  ;;  %v5890_v27 = vadd.f32 %v21494_v17, %v5889_v60  ;;  %17522 = vmatprep.mubr.msk.f32.mxu0 %vm1086_vm0, %v484_v59  ;;  %24177 = vst [vmem:[#allocation72_spill] sm:$0xff] %v21731_v39  ;;  %v8789_v59 = vpop.f32.mrb[149].mxu1  ;;  %v10261_v39 = vmax.f32 %v8795_v56, 0.0 }
 0x3ae   :  { %v9681_v42 = vmax.f32 %v5895_v33, 0.0  ;;  %v487_v33 = vld [vmem:[#allocation2 + $0xdd8] sm:$0xff]  ;;  %v21739_v55 = vpack.c.bf16 %v10259_v28, %v10258_v8  ;;  %v8790_v9 = vadd.f32 %v21494_v17, %v8789_v59 }
 0x3af   :  { %v9680_v19 = vmax.f32 %v5890_v27, 0.0  ;;  %v17365_v37 = vpop.f32.mrb[78].mxu0  ;;  %v488_v27 = vld [vmem:[#allocation2 + $0xde0] sm:$0xff] }
 0x3b0   :  { %v5905_v6 = vadd.f32 %v21494_v17, %v17365_v37  ;;  %v5899_v18 = vpop.f32.mrb[79].mxu0  ;;  %17523 = vmatmul.mubr.msk.f32.gmra.mrb[184].mxu0 %vm1086_vm0, %v485_v32  ;;  %24178 = vst [vmem:[#allocation73_spill] sm:$0xff] %v21739_v55  ;;  %v18235_v32 = vpop.f32.mrb[150].mxu1 }
 0x3b1   :  { %v21735_v60 = vpack.c.bf16 %v9681_v42, %v9680_v19  ;;  %v5900_v61 = vadd.f32 %v21494_v17, %v5899_v18  ;;  %17525 = vmatprep.mubr.msk.f32.mxu0 %vm1086_vm0, %v486_v11  ;;  %v10260_v18 = vmax.f32 %v8790_v9, 0.0  ;;  %v8799_v11 = vpop.f32.mrb[151].mxu1  ;;  %v8805_v8 = vadd.f32 %v21494_v17, %v18235_v32 }
 0x3b2   :  { %v9683_v47 = vmax.f32 %v5905_v6, 0.0  ;;  %v8800_v6 = vadd.f32 %v21494_v17, %v8799_v11  ;;  %v18238_v44 = vpop.f32.mrb[152].mxu1 }
 0x3b3   :  { %v9682_v37 = vmax.f32 %v5900_v61, 0.0  ;;  %v17368_v1 = vpop.f32.mrb[80].mxu0  ;;  %v490_v61 = vld [vmem:[#allocation2 + $0xdf0] sm:$0xff]  ;;  %v21751_v56 = vpack.c.bf16 %v10261_v39, %v10260_v18  ;;  %v491_v39 = vld [vmem:[#allocation2 + $0xdf8] sm:$0xff] }
 0x3b4   :  { %v5915_v42 = vadd.f32 %v21494_v17, %v17368_v1  ;;  %v5909_v19 = vpop.f32.mrb[81].mxu0  ;;  %17526 = vmatmul.mubr.msk.f32.gmra.mrb[186].mxu0 %vm1086_vm0, %v487_v33  ;;  %v10263_v33 = vmax.f32 %v8805_v8, 0.0  ;;  %v10262_v9 = vmax.f32 %v8800_v6, 0.0  ;;  %v492_v8 = vld [vmem:[#allocation2 + $0xe00] sm:$0xff] }
 0x3b5   :  { %v21745_v21 = vpack.c.bf16 %v9683_v47, %v9682_v37  ;;  %v5910_v28 = vadd.f32 %v21494_v17, %v5909_v19  ;;  %17528 = vmatprep.mubr.msk.f32.mxu0 %vm1086_vm0, %v488_v27  ;;  %24179 = vst [vmem:[#allocation74_spill] sm:$0xff] %v21751_v56  ;;  %v8815_v27 = vadd.f32 %v21494_v17, %v18238_v44  ;;  %v8809_v19 = vpop.f32.mrb[153].mxu1 }
 0x3b6   :  { %v9685_v59 = vmax.f32 %v5915_v42, 0.0  ;;  %v8810_v18 = vadd.f32 %v21494_v17, %v8809_v19  ;;  %v21759_v11 = vpack.c.bf16 %v10263_v33, %v10262_v9  ;;  %v18241_v46 = vpop.f32.mrb[154].mxu1  ;;  %v493_v9 = vld [vmem:[#allocation2 + $0xe08] sm:$0xff] }
 0x3b7   :  { %v9684_v1 = vmax.f32 %v5910_v28, 0.0  ;;  %v17371_v55 = vpop.f32.mrb[82].mxu0  ;;  %v10265_v6 = vmax.f32 %v8815_v27, 0.0 }
 0x3b8   :  { %v5925_v47 = vadd.f32 %v21494_v17, %v17371_v55  ;;  %v5919_v37 = vpop.f32.mrb[83].mxu0  ;;  %17529 = vmatmul.mubr.msk.f32.gmra.mrb[188].mxu0 %vm1086_vm0, %v489_v4  ;;  %24180 = vst [vmem:[#allocation75_spill] sm:$0xff] %v21759_v11  ;;  %v10264_v4 = vmax.f32 %v8810_v18, 0.0 }
 0x3b9   :  { %v5920_v32 = vadd.f32 %v21494_v17, %v5919_v37  ;;  %17531 = vmatprep.mubr.msk.f32.mxu0 %vm1086_vm0, %v490_v61  ;;  %v18738_v42 = vpack.c.bf16 %v9685_v59, %v9684_v1  ;;  %v8825_v59 = vadd.f32 %v21494_v17, %v18241_v46  ;;  %v8819_v61 = vpop.f32.mrb[155].mxu1 }
 0x3ba   :  { %v9687_v28 = vmax.f32 %v5925_v47, 0.0  ;;  %v8820_v47 = vadd.f32 %v21494_v17, %v8819_v61  ;;  %v21768_v37 = vpack.c.bf16 %v10265_v6, %v10264_v4  ;;  %v496_v61 = vld [vmem:[#allocation2 + $0xe20] sm:$0xff] }
 0x3bb   :  { %v9686_v55 = vmax.f32 %v5920_v32, 0.0  ;;  %v17374_v56 = vpop.f32.mrb[84].mxu0  ;;  %18739 = vmatprep.subr.bf16.mxu1 %v18738_v42  ;;  %v10267_v19 = vmax.f32 %v8825_v59, 0.0 }
 0x3bc   :  { %v5935_v44 = vadd.f32 %v21494_v17, %v17374_v56  ;;  %v5929_v3 = vpop.f32.mrb[85].mxu0  ;;  %17532 = vmatmul.mubr.msk.f32.gmra.mrb[190].mxu0 %vm1086_vm0, %v491_v39  ;;  %18741 = vmatpush3.bf16.msra.mxu1 %v21654_v49  ;;  %24181 = vst [vmem:[#allocation76_spill] sm:$0xff] %v21768_v37  ;;  %v494_v56 = vld [vmem:[#allocation2 + $0xe10] sm:$0xff]  ;;  %v10266_v49 = vmax.f32 %v8820_v47, 0.0  ;;  %v18244_v39 = vpop.f32.mrb[156].mxu1 }
 0x3bd   :  { %v5930_v1 = vadd.f32 %v21494_v17, %v5929_v3  ;;  %17534 = vmatprep.mubr.msk.f32.mxu0 %vm1086_vm0, %v492_v8  ;;  %v18742_v33 = vpack.c.bf16 %v9687_v28, %v9686_v55  ;;  %v8835_v3 = vadd.f32 %v21494_v17, %v18244_v39  ;;  %v8829_v28 = vpop.f32.mrb[157].mxu1  ;;  %v495_v55 = vld [vmem:[#allocation2 + $0xe18] sm:$0xff] }
 0x3be   :  { %v9689_v27 = vmax.f32 %v5935_v44, 0.0  ;;  %v8830_v4 = vadd.f32 %v21494_v17, %v8829_v28  ;;  %v21777_v44 = vpack.c.bf16 %v10267_v19, %v10266_v49  ;;  %v18247_v47 = vpop.f32.mrb[158].mxu1  ;;  %v498_v28 = vld [vmem:[#allocation2 + $0xe30] sm:$0xff] }
 0x3bf   :  { %v9688_v32 = vmax.f32 %v5930_v1, 0.0  ;;  %v17377_v42 = vpop.f32.mrb[86].mxu0  ;;  %18743 = vmatprep.subr.bf16.mxu1 %v18742_v33  ;;  %v10269_v1 = vmax.f32 %v8835_v3, 0.0  ;;  %v8839_v19 = vpop.f32.mrb[159].mxu1 }
 0x3c0   :  { %v5945_v46 = vadd.f32 %v21494_v17, %v17377_v42  ;;  %v5939_v18 = vpop.f32.mrb[87].mxu0  ;;  %17535 = vmatmul.mubr.msk.f32.gmra.mrb[192].mxu0 %vm1086_vm0, %v493_v9  ;;  %18745 = vmatpush3.bf16.msra.mxu1 %v21670_v54  ;;  %24182 = vst [vmem:[#allocation77_spill] sm:$0xff] %v21777_v44  ;;  %v10268_v54 = vmax.f32 %v8830_v4, 0.0  ;;  %v18250_v4 = vpop.f32.mrb[160].mxu1 }
 0x3c1   :  { %v5940_v8 = vadd.f32 %v21494_v17, %v5939_v18  ;;  %17537 = vmatprep.mubr.msk.f32.mxu0 %vm1086_vm0, %v494_v56  ;;  %v18746_v6 = vpack.c.bf16 %v9689_v27, %v9688_v32  ;;  %v21782_v27 = vld [vmem:[#allocation5] ss:$0 sm:$0xff] }
 0x3c2   :  { %v9691_v59 = vmax.f32 %v5945_v46, 0.0  ;;  %v8845_v56 = vadd.f32 %v21782_v27, %v18247_v47  ;;  %v497_v46 = vld [vmem:[#allocation2 + $0xe28] sm:$0xff]  ;;  %v8840_v18 = vadd.f32 %v21782_v27, %v8839_v19  ;;  %v21788_v3 = vpack.c.bf16 %v10269_v1, %v10268_v54  ;;  %v499_v54 = vld [vmem:[#allocation2 + $0xe38] sm:$0xff]  ;;  %v500_v19 = vld [vmem:[#allocation2 + $0xe40] sm:$0xff] }
 0x3c3   :  { %v9690_v33 = vmax.f32 %v5940_v8, 0.0  ;;  %v17380_v9 = vpop.f32.mrb[88].mxu0  ;;  %18747 = vmatprep.subr.bf16.mxu1 %v18746_v6 }
 0x3c4   :  { %v5955_v42 = vadd.f32 %v21494_v17, %v17380_v9  ;;  %v5949_v39 = vpop.f32.mrb[89].mxu0  ;;  %17538 = vmatmul.mubr.msk.f32.gmra.mrb[194].mxu0 %vm1086_vm0, %v495_v55  ;;  %18749 = vmatpush3.bf16.msra.mxu1 %v21686_v13  ;;  %24183 = vst [vmem:[#allocation78_spill] sm:$0xff] %v21788_v3  ;;  %v10271_v8 = vmax.f32 %v8845_v56, 0.0  ;;  %v10270_v55 = vmax.f32 %v8840_v18, 0.0 }
 0x3c5   :  { %v5950_v32 = vadd.f32 %v21782_v27, %v5949_v39  ;;  %17540 = vmatprep.mubr.msk.f32.mxu0 %vm1086_vm0, %v496_v61  ;;  %v18750_v49 = vpack.c.bf16 %v9691_v59, %v9690_v33  ;;  %v8855_v59 = vadd.f32 %v21782_v27, %v18250_v4  ;;  %v8849_v61 = vpop.f32.mrb[161].mxu1 }
 0x3c6   :  { %v9693_v17 = vmax.f32 %v5955_v42, 0.0  ;;  %v8850_v42 = vadd.f32 %v21782_v27, %v8849_v61  ;;  %v21797_v39 = vpack.c.bf16 %v10271_v8, %v10270_v55  ;;  %v18253_v18 = vpop.f32.mrb[162].mxu1  ;;  %v501_v55 = vld [vmem:[#allocation2 + $0xe48] sm:$0xff]  ;;  %v502_v61 = vld [vmem:[#allocation2 + $0xe50] sm:$0xff] }
 0x3c7   :  { %v9692_v6 = vmax.f32 %v5950_v32, 0.0  ;;  %v17383_v13 = vpop.f32.mrb[90].mxu0  ;;  %18751 = vmatprep.subr.bf16.mxu1 %v18750_v49  ;;  %v10273_v32 = vmax.f32 %v8855_v59, 0.0 }
 0x3c8   :  { %v5965_v9 = vadd.f32 %v21782_v27, %v17383_v13  ;;  %v5959_v47 = vpop.f32.mrb[91].mxu0  ;;  %17541 = vmatmul.mubr.msk.f32.gmra.mrb[196].mxu0 %vm1086_vm0, %v497_v46  ;;  %18753 = vmatpush3.bf16.msra.mxu1 %v21702_v14  ;;  %24184 = vst [vmem:[#allocation79_spill] sm:$0xff] %v21797_v39  ;;  %v10272_v14 = vmax.f32 %v8850_v42, 0.0 }
 0x3c9   :  { %v5960_v1 = vadd.f32 %v21782_v27, %v5959_v47  ;;  %17543 = vmatprep.mubr.msk.f32.mxu0 %vm1086_vm0, %v498_v28  ;;  %v18754_v33 = vpack.c.bf16 %v9693_v17, %v9692_v6  ;;  %v8865_v17 = vadd.f32 %v21782_v27, %v18253_v18  ;;  %v8859_v28 = vpop.f32.mrb[163].mxu1 }
 0x3ca   :  { %v9695_v56 = vmax.f32 %v5965_v9, 0.0  ;;  %v8860_v9 = vadd.f32 %v21782_v27, %v8859_v28  ;;  %v21806_v47 = vpack.c.bf16 %v10273_v32, %v10272_v14  ;;  %v18256_v42 = vpop.f32.mrb[164].mxu1  ;;  %v503_v14 = vld [vmem:[#allocation2 + $0xe58] sm:$0xff]  ;;  %v504_v28 = vld [vmem:[#allocation2 + $0xe60] sm:$0xff] }
 0x3cb   :  { %v9694_v49 = vmax.f32 %v5960_v1, 0.0  ;;  %v17386_v46 = vpop.f32.mrb[92].mxu0  ;;  %18755 = vmatprep.subr.bf16.mxu1 %v18754_v33  ;;  %v10275_v1 = vmax.f32 %v8865_v17, 0.0 }
 0x3cc   :  { %v5975_v13 = vadd.f32 %v21782_v27, %v17386_v46  ;;  %v5969_v4 = vpop.f32.mrb[93].mxu0  ;;  %17544 = vmatmul.mubr.msk.f32.gmra.mrb[198].mxu0 %vm1086_vm0, %v499_v54  ;;  %18757 = vmatpush3.bf16.msra.mxu1 %v21715_v12  ;;  %24185 = vst [vmem:[#allocation80_spill] sm:$0xff] %v21806_v47  ;;  %v10274_v12 = vmax.f32 %v8860_v9, 0.0 }
 0x3cd   :  { %v5970_v8 = vadd.f32 %v21782_v27, %v5969_v4  ;;  %17546 = vmatprep.mubr.msk.f32.mxu0 %vm1086_vm0, %v500_v19  ;;  %v18758_v6 = vpack.c.bf16 %v9695_v56, %v9694_v49  ;;  %v8875_v56 = vadd.f32 %v21782_v27, %v18256_v42  ;;  %v8869_v19 = vpop.f32.mrb[165].mxu1 }
 0x3ce   :  { %v9697_v59 = vmax.f32 %v5975_v13, 0.0  ;;  %v8870_v13 = vadd.f32 %v21782_v27, %v8869_v19  ;;  %v21815_v4 = vpack.c.bf16 %v10275_v1, %v10274_v12  ;;  %v18259_v9 = vpop.f32.mrb[166].mxu1  ;;  %v505_v12 = vld [vmem:[#allocation2 + $0xe68] sm:$0xff]  ;;  %v506_v19 = vld [vmem:[#allocation2 + $0xe70] sm:$0xff] }
 0x3cf   :  { %v9696_v33 = vmax.f32 %v5970_v8, 0.0  ;;  %v17389_v54 = vpop.f32.mrb[94].mxu0  ;;  %18759 = vmatprep.subr.bf16.mxu1 %v18758_v6  ;;  %v10277_v8 = vmax.f32 %v8875_v56, 0.0 }
 0x3d0   :  { %v5985_v46 = vadd.f32 %v21782_v27, %v17389_v54  ;;  %v5979_v18 = vpop.f32.mrb[95].mxu0  ;;  %17547 = vmatmul.mubr.msk.f32.gmra.mrb[200].mxu0 %vm1086_vm0, %v501_v55  ;;  %18761 = vmatpush3.bf16.msra.mxu1 %v21725_v15  ;;  %24186 = vst [vmem:[#allocation81_spill] sm:$0xff] %v21815_v4  ;;  %v10276_v15 = vmax.f32 %v8870_v13, 0.0 }
 0x3d1   :  { %v5980_v32 = vadd.f32 %v21782_v27, %v5979_v18  ;;  %17549 = vmatprep.mubr.msk.f32.mxu0 %vm1086_vm0, %v502_v61  ;;  %v18762_v49 = vpack.c.bf16 %v9697_v59, %v9696_v33  ;;  %v8885_v59 = vadd.f32 %v21782_v27, %v18259_v9  ;;  %v8879_v61 = vpop.f32.mrb[167].mxu1 }
 0x3d2   :  { %v9699_v17 = vmax.f32 %v5985_v46, 0.0  ;;  %v21823_v46 = vpack.c.bf16 %v10277_v8, %v10276_v15  ;;  %v8880_v18 = vadd.f32 %v21782_v27, %v8879_v61  ;;  %v18262_v13 = vpop.f32.mrb[168].mxu1  ;;  %v507_v15 = vld [vmem:[#allocation2 + $0xe78] sm:$0xff]  ;;  %v508_v61 = vld [vmem:[#allocation2 + $0xe80] sm:$0xff] }
 0x3d3   :  { %v9698_v6 = vmax.f32 %v5980_v32, 0.0  ;;  %v17392_v55 = vpop.f32.mrb[96].mxu0  ;;  %18763 = vmatprep.subr.bf16.mxu1 %v18762_v49  ;;  %v10279_v32 = vmax.f32 %v8885_v59, 0.0 }
 0x3d4   :  { %v5995_v54 = vadd.f32 %v21782_v27, %v17392_v55  ;;  %v5989_v42 = vpop.f32.mrb[97].mxu0  ;;  %17550 = vmatmul.mubr.msk.f32.gmra.mrb[202].mxu0 %vm1086_vm0, %v503_v14  ;;  %18765 = vmatpush3.bf16.msra.mxu1 %v21735_v60  ;;  %24187 = vst [vmem:[#allocation82_spill] sm:$0xff] %v21823_v46  ;;  %v10278_v60 = vmax.f32 %v8880_v18, 0.0 }
 0x3d5   :  { %v5990_v1 = vadd.f32 %v21782_v27, %v5989_v42  ;;  %17552 = vmatprep.mubr.msk.f32.mxu0 %vm1086_vm0, %v504_v28  ;;  %v18766_v33 = vpack.c.bf16 %v9699_v17, %v9698_v6  ;;  %v10392_v17 = vld [vmem:[%s24048_s3 + $0xa0] sm:$0xff]  ;;  %v8889_v28 = vpop.f32.mrb[169].mxu1 }
 0x3d6   :  { %v9701_v56 = vmax.f32 %v5995_v54, 0.0  ;;  %v10457_v54 = vld [vmem:[%s24048_s3 + $0x2a8] sm:$0xff]  ;;  %v21839_v42 = vpack.c.bf16 %v10279_v32, %v10278_v60  ;;  %v10456_v32 = vld [vmem:[%s24048_s3 + $0x2a0] sm:$0xff] }
 0x3d7   :  { %v9700_v49 = vmax.f32 %v5990_v1, 0.0  ;;  %v17395_v14 = vpop.f32.mrb[98].mxu0  ;;  %18767 = vmatprep.subr.bf16.mxu1 %v18766_v33  ;;  %v8890_v1 = vadd.f32 %v21782_v27, %v8889_v28 }
 0x3d8   :  { %v6005_v55 = vadd.f32 %v21782_v27, %v17395_v14  ;;  %v5999_v9 = vpop.f32.mrb[99].mxu0  ;;  %17553 = vmatmul.mubr.msk.f32.gmra.mrb[204].mxu0 %vm1086_vm0, %v505_v12  ;;  %18769 = vmatpush3.bf16.msra.mxu1 %v21745_v21  ;;  %24188 = vst [vmem:[#allocation83_spill] sm:$0xff] %v21839_v42  ;;  %v8895_v21 = vadd.f32 %v21782_v27, %v18262_v13 }
 0x3d9   :  { %v21832_v8 = vpack.c.bf16 %v9701_v56, %v9700_v49  ;;  %v6000_v6 = vadd.f32 %v21782_v27, %v5999_v9  ;;  %17555 = vmatprep.mubr.msk.f32.mxu0 %vm1086_vm0, %v506_v19  ;;  %v18265_v56 = vpop.f32.mrb[170].mxu1  ;;  %v10280_v14 = vmax.f32 %v8890_v1, 0.0  ;;  %v509_v9 = vld [vmem:[#allocation2 + $0xe88] sm:$0xff] }
 0x3da   :  { %v9703_v59 = vmax.f32 %v6005_v55, 0.0  ;;  %v10281_v18 = vmax.f32 %v8895_v21, 0.0  ;;  %v8899_v60 = vpop.f32.mrb[171].mxu1  ;;  %v8905_v28 = vadd.f32 %v21782_v27, %v18265_v56  ;;  %v10520_v56 = vld [vmem:[%s24048_s3 + $0x4a0] sm:$0xff] }
 0x3db   :  { %v9702_v33 = vmax.f32 %v6000_v6, 0.0  ;;  %v17398_v12 = vpop.f32.mrb[100].mxu0  ;;  %11543 = vmatmul.mubr.f32.vlgmr.msra.gmra.mrb[84].mxu1 %v10392_v17  ;;  %v10521_v17 = vld [vmem:[%s24048_s3 + $0x4a8] sm:$0xff]  ;;  %v8900_v6 = vadd.f32 %v21782_v27, %v8899_v60 }
 0x3dc   :  { %v6015_v19 = vadd.f32 %v21782_v27, %v17398_v12  ;;  %v6009_v49 = vpop.f32.mrb[101].mxu0  ;;  %17556 = vmatmul.mubr.msk.f32.gmra.mrb[206].mxu0 %vm1086_vm0, %v507_v15  ;;  %11547 = vmatprep.mubr.f32.mxu1 %v10457_v54  ;;  %v510_v54 = vld [vmem:[#allocation2 + $0xe90] sm:$0xff]  ;;  %v21857_v21 = vpack.c.bf16 %v10281_v18, %v10280_v14  ;;  %v10585_v14 = vld [vmem:[%s24048_s3 + $0x6a8] sm:$0xff] }
 0x3dd   :  { %v21848_v13 = vpack.c.bf16 %v9703_v59, %v9702_v33  ;;  %v6010_v55 = vadd.f32 %v21782_v27, %v6009_v49  ;;  %17558 = vmatprep.mubr.msk.f32.mxu0 %vm1086_vm0, %v508_v61  ;;  %v10283_v33 = vmax.f32 %v8905_v28, 0.0  ;;  %v10282_v12 = vmax.f32 %v8900_v6, 0.0  ;;  %v18268_v49 = vpop.f32.mrb[172].mxu1  ;;  %v512_v28 = vld [vmem:[#allocation2 + $0xea0] sm:$0xff] }
 0x3de   :  { %v9705_v15 = vmax.f32 %v6015_v19, 0.0  ;;  %24189 = vst [vmem:[#allocation84_spill] sm:$0xff] %v21857_v21  ;;  %v8909_v19 = vpop.f32.mrb[173].mxu1 }
 0x3df   :  { %v9704_v1 = vmax.f32 %v6010_v55, 0.0  ;;  %v17401_v59 = vpop.f32.mrb[102].mxu0  ;;  %11548 = vmatmul.mubr.f32.gmra.mrb[86].mxu1 %v10456_v32  ;;  %v511_v32 = vld [vmem:[#allocation2 + $0xe98] sm:$0xff]  ;;  %v21871_v55 = vpack.c.bf16 %v10283_v33, %v10282_v12  ;;  %v8910_v6 = vadd.f32 %v21782_v27, %v8909_v19  ;;  %v10584_v33 = vld [vmem:[%s24048_s3 + $0x6a0] sm:$0xff] }
 0x3e0   :  { %v6025_v61 = vadd.f32 %v21782_v27, %v17401_v59  ;;  %v6019_v42 = vpop.f32.mrb[103].mxu0  ;;  %17559 = vmatmul.mubr.msk.f32.gmra.mrb[208].mxu0 %vm1086_vm0, %v509_v9  ;;  %11552 = vmatprep.mubr.f32.mxu1 %v10521_v17  ;;  %v8915_v9 = vadd.f32 %v21782_v27, %v18268_v49 }
 0x3e1   :  { %v21864_v60 = vpack.c.bf16 %v9705_v15, %v9704_v1  ;;  %v6020_v18 = vadd.f32 %v21782_v27, %v6019_v42  ;;  %17561 = vmatprep.mubr.msk.f32.mxu0 %vm1086_vm0, %v510_v54  ;;  %24190 = vst [vmem:[#allocation85_spill] sm:$0xff] %v21871_v55  ;;  %v18271_v42 = vpop.f32.mrb[174].mxu1  ;;  %v10284_v12 = vmax.f32 %v8910_v6, 0.0 }
 0x3e2   :  { %v9707_v17 = vmax.f32 %v6025_v61, 0.0  ;;  %v10285_v1 = vmax.f32 %v8915_v9, 0.0  ;;  %v8919_v49 = vpop.f32.mrb[175].mxu1 }
 0x3e3   :  { %v9706_v59 = vmax.f32 %v6020_v18, 0.0  ;;  %v17404_v15 = vpop.f32.mrb[104].mxu0  ;;  %11553 = vmatmul.mubr.f32.gmra.mrb[88].mxu1 %v10520_v56  ;;  %v513_v56 = vld [vmem:[#allocation2 + $0xea8] sm:$0xff]  ;;  %v10395_v18 = vld [vmem:[%s24048_s3 + $0xb8] sm:$0xff]  ;;  %v18274_v46 = vpop.f32.mrb[176].mxu1 }
 0x3e4   :  { %v6035_v54 = vadd.f32 %v21782_v27, %v17404_v15  ;;  %v6029_v21 = vpop.f32.mrb[105].mxu0  ;;  %17562 = vmatmul.mubr.msk.f32.gmra.mrb[210].mxu0 %vm1086_vm0, %v511_v32  ;;  %11557 = vmatprep.mubr.f32.mxu1 %v10585_v14  ;;  %v8925_v32 = vadd.f32 %v21782_v27, %v18271_v42  ;;  %v8920_v14 = vadd.f32 %v21782_v27, %v8919_v49  ;;  %v514_v15 = vld [vmem:[#allocation2 + $0xeb0] sm:$0xff]  ;;  %v8929_v47 = vpop.f32.mrb[177].mxu1 }
 0x3e5   :  { %v21880_v61 = vpack.c.bf16 %v9707_v17, %v9706_v59  ;;  %v6030_v19 = vadd.f32 %v21782_v27, %v6029_v21  ;;  %17564 = vmatprep.mubr.msk.f32.mxu0 %vm1086_vm0, %v512_v28  ;;  %v21889_v55 = vpack.c.bf16 %v10285_v1, %v10284_v12  ;;  %v515_v1 = vld [vmem:[#allocation2 + $0xeb8] sm:$0xff] }
 0x3e6   :  { %v9709_v9 = vmax.f32 %v6035_v54, 0.0  ;;  %v10287_v59 = vmax.f32 %v8925_v32, 0.0  ;;  %v10286_v21 = vmax.f32 %v8920_v14, 0.0  ;;  %v8930_v32 = vadd.f32 %v21782_v27, %v8929_v47 }
 0x3e7   :  { %24191 = vst [vmem:[#allocation86_spill] sm:$0xff] %v21889_v55  ;;  %v9708_v6 = vmax.f32 %v6030_v19, 0.0  ;;  %v17407_v17 = vpop.f32.mrb[106].mxu0  ;;  %11558 = vmatmul.mubr.f32.gmra.mrb[90].mxu1 %v10584_v33  ;;  %v8935_v33 = vadd.f32 %v21782_v27, %v18274_v46  ;;  %v516_v19 = vld [vmem:[#allocation2 + $0xec0] sm:$0xff]  ;;  %v517_v46 = vld [vmem:[#allocation2 + $0xec8] sm:$0xff] }
 0x3e8   :  { %v6045_v28 = vadd.f32 %v21782_v27, %v17407_v17  ;;  %v6039_v4 = vpop.f32.mrb[107].mxu0  ;;  %17565 = vmatmul.mubr.msk.f32.gmra.mrb[212].mxu0 %vm1086_vm0, %v513_v56  ;;  %11627 = vmatprep.mubr.f32.mxu1 %v10395_v18  ;;  %v21897_v12 = vpack.c.bf16 %v10287_v59, %v10286_v21  ;;  %v18277_v18 = vpop.f32.mrb[178].mxu1 }
 0x3e9   :  { %v21893_v42 = vpack.c.bf16 %v9709_v9, %v9708_v6  ;;  %v6040_v54 = vadd.f32 %v21782_v27, %v6039_v4  ;;  %17567 = vmatprep.mubr.msk.f32.mxu0 %vm1086_vm0, %v514_v15  ;;  %v10289_v56 = vmax.f32 %v8935_v33, 0.0  ;;  %v10288_v4 = vmax.f32 %v8930_v32, 0.0  ;;  %v8939_v15 = vpop.f32.mrb[179].mxu1 }
 0x3ea   :  { %24192 = vst [vmem:[#allocation87_spill] sm:$0xff] %v21897_v12  ;;  %v9711_v49 = vmax.f32 %v6045_v28, 0.0  ;;  %v8945_v47 = vadd.f32 %v21782_v27, %v18277_v18  ;;  %v8940_v21 = vadd.f32 %v21782_v27, %v8939_v15  ;;  %v18280_v39 = vpop.f32.mrb[180].mxu1 }
 0x3eb   :  { %v9710_v14 = vmax.f32 %v6040_v54, 0.0  ;;  %v17410_v17 = vpop.f32.mrb[108].mxu0  ;;  %v518_v54 = vld [vmem:[#allocation2 + $0xed0] sm:$0xff]  ;;  %v21909_v33 = vpack.c.bf16 %v10289_v56, %v10288_v4  ;;  %v8955_v4 = vadd.f32 %v21782_v27, %v18280_v39  ;;  %v521_v39 = vld [vmem:[#allocation2 + $0xee8] sm:$0xff] }
 0x3ec   :  { %v6055_v9 = vadd.f32 %v21782_v27, %v17410_v17  ;;  %v6049_v6 = vpop.f32.mrb[109].mxu0  ;;  %17568 = vmatmul.mubr.msk.f32.gmra.mrb[214].mxu0 %vm1086_vm0, %v515_v1  ;;  %v10291_v1 = vmax.f32 %v8945_v47, 0.0  ;;  %v10290_v32 = vmax.f32 %v8940_v21, 0.0 }
 0x3ed   :  { %v21903_v55 = vpack.c.bf16 %v9711_v49, %v9710_v14  ;;  %v6050_v59 = vadd.f32 %v21782_v27, %v6049_v6  ;;  %17570 = vmatprep.mubr.msk.f32.mxu0 %vm1086_vm0, %v516_v19  ;;  %24193 = vst [vmem:[#allocation88_spill] sm:$0xff] %v21909_v33  ;;  %v8949_v19 = vpop.f32.mrb[181].mxu1  ;;  %v10293_v33 = vmax.f32 %v8955_v4, 0.0 }
 0x3ee   :  { %v9713_v28 = vmax.f32 %v6055_v9, 0.0  ;;  %v519_v9 = vld [vmem:[#allocation2 + $0xed8] sm:$0xff]  ;;  %v21917_v56 = vpack.c.bf16 %v10291_v1, %v10290_v32  ;;  %v8950_v47 = vadd.f32 %v21782_v27, %v8949_v19 }
 0x3ef   :  { %v9712_v17 = vmax.f32 %v6050_v59, 0.0  ;;  %v17413_v12 = vpop.f32.mrb[110].mxu0  ;;  %v520_v59 = vld [vmem:[#allocation2 + $0xee0] sm:$0xff] }
 0x3f0   :  { %v6065_v49 = vadd.f32 %v21782_v27, %v17413_v12  ;;  %v6059_v14 = vpop.f32.mrb[111].mxu0  ;;  %17571 = vmatmul.mubr.msk.f32.gmra.mrb[216].mxu0 %vm1086_vm0, %v517_v46  ;;  %24194 = vst [vmem:[#allocation89_spill] sm:$0xff] %v21917_v56  ;;  %v18283_v46 = vpop.f32.mrb[182].mxu1 }
 0x3f1   :  { %v21913_v6 = vpack.c.bf16 %v9713_v28, %v9712_v17  ;;  %v6060_v18 = vadd.f32 %v21782_v27, %v6059_v14  ;;  %17573 = vmatprep.mubr.msk.f32.mxu0 %vm1086_vm0, %v518_v54  ;;  %v10292_v14 = vmax.f32 %v8950_v47, 0.0  ;;  %v8959_v54 = vpop.f32.mrb[183].mxu1  ;;  %v8965_v32 = vadd.f32 %v21782_v27, %v18283_v46 }
 0x3f2   :  { %v9715_v15 = vmax.f32 %v6065_v49, 0.0  ;;  %v8960_v49 = vadd.f32 %v21782_v27, %v8959_v54  ;;  %v18286_v44 = vpop.f32.mrb[184].mxu1 }
 0x3f3   :  { %v9714_v12 = vmax.f32 %v6060_v18, 0.0  ;;  %v17416_v21 = vpop.f32.mrb[112].mxu0  ;;  %v522_v18 = vld [vmem:[#allocation2 + $0xef0] sm:$0xff]  ;;  %v21929_v4 = vpack.c.bf16 %v10293_v33, %v10292_v14  ;;  %v523_v33 = vld [vmem:[#allocation2 + $0xef8] sm:$0xff] }
 0x3f4   :  { %v6075_v28 = vadd.f32 %v21782_v27, %v17416_v21  ;;  %v6069_v17 = vpop.f32.mrb[113].mxu0  ;;  %17574 = vmatmul.mubr.msk.f32.gmra.mrb[218].mxu0 %vm1086_vm0, %v519_v9  ;;  %v10295_v9 = vmax.f32 %v8965_v32, 0.0  ;;  %v10294_v47 = vmax.f32 %v8960_v49, 0.0  ;;  %v524_v32 = vld [vmem:[#allocation2 + $0xf00] sm:$0xff] }
 0x3f5   :  { %v21923_v3 = vpack.c.bf16 %v9715_v15, %v9714_v12  ;;  %v6070_v1 = vadd.f32 %v21782_v27, %v6069_v17  ;;  %17576 = vmatprep.mubr.msk.f32.mxu0 %vm1086_vm0, %v520_v59  ;;  %24195 = vst [vmem:[#allocation90_spill] sm:$0xff] %v21929_v4  ;;  %v8975_v59 = vadd.f32 %v21782_v27, %v18286_v44  ;;  %v8969_v17 = vpop.f32.mrb[185].mxu1 }
 0x3f6   :  { %v9717_v19 = vmax.f32 %v6075_v28, 0.0  ;;  %v8970_v14 = vadd.f32 %v21782_v27, %v8969_v17  ;;  %v21937_v54 = vpack.c.bf16 %v10295_v9, %v10294_v47  ;;  %v18289_v37 = vpop.f32.mrb[186].mxu1  ;;  %v525_v47 = vld [vmem:[#allocation2 + $0xf08] sm:$0xff] }
 0x3f7   :  { %v9716_v21 = vmax.f32 %v6070_v1, 0.0  ;;  %v17419_v56 = vpop.f32.mrb[114].mxu0  ;;  %v10297_v49 = vmax.f32 %v8975_v59, 0.0 }
 0x3f8   :  { %v6085_v15 = vadd.f32 %v21782_v27, %v17419_v56  ;;  %v6079_v12 = vpop.f32.mrb[115].mxu0  ;;  %17577 = vmatmul.mubr.msk.f32.gmra.mrb[220].mxu0 %vm1086_vm0, %v521_v39  ;;  %24196 = vst [vmem:[#allocation91_spill] sm:$0xff] %v21937_v54  ;;  %v10296_v39 = vmax.f32 %v8970_v14, 0.0  ;;  %v547_v54 = vld [vmem:[#allocation2 + $0xfb8] sm:$0xff] }
 0x3f9   :  { %v6080_v46 = vadd.f32 %v21782_v27, %v6079_v12  ;;  %17579 = vmatprep.mubr.msk.f32.mxu0 %vm1086_vm0, %v522_v18  ;;  %v18770_v28 = vpack.c.bf16 %v9717_v19, %v9716_v21  ;;  %v8985_v19 = vadd.f32 %v21782_v27, %v18289_v37  ;;  %v8979_v18 = vpop.f32.mrb[187].mxu1 }
 0x3fa   :  { %v9719_v1 = vmax.f32 %v6085_v15, 0.0  ;;  %v8980_v15 = vadd.f32 %v21782_v27, %v8979_v18  ;;  %v21946_v12 = vpack.c.bf16 %v10297_v49, %v10296_v39  ;;  %v528_v18 = vld [vmem:[#allocation2 + $0xf20] sm:$0xff] }
 0x3fb   :  { %v9718_v56 = vmax.f32 %v6080_v46, 0.0  ;;  %v17422_v4 = vpop.f32.mrb[116].mxu0  ;;  %18771 = vmatprep.subr.bf16.mxu1 %v18770_v28  ;;  %v10299_v17 = vmax.f32 %v8985_v19, 0.0 }
 0x3fc   :  { %v6095_v44 = vadd.f32 %v21782_v27, %v17422_v4  ;;  %v6089_v11 = vpop.f32.mrb[117].mxu0  ;;  %17580 = vmatmul.mubr.msk.f32.gmra.mrb[222].mxu0 %vm1086_vm0, %v523_v33  ;;  %18773 = vmatpush3.bf16.msra.mxu1 %v21832_v8  ;;  %24197 = vst [vmem:[#allocation92_spill] sm:$0xff] %v21946_v12  ;;  %v526_v4 = vld [vmem:[#allocation2 + $0xf10] sm:$0xff]  ;;  %v10298_v8 = vmax.f32 %v8980_v15, 0.0  ;;  %v18292_v33 = vpop.f32.mrb[188].mxu1 }
 0x3fd   :  { %v6090_v21 = vadd.f32 %v21782_v27, %v6089_v11  ;;  %17582 = vmatprep.mubr.msk.f32.mxu0 %vm1086_vm0, %v524_v32  ;;  %v18774_v9 = vpack.c.bf16 %v9719_v1, %v9718_v56  ;;  %v8995_v11 = vadd.f32 %v21782_v27, %v18292_v33  ;;  %v8989_v1 = vpop.f32.mrb[189].mxu1  ;;  %v527_v56 = vld [vmem:[#allocation2 + $0xf18] sm:$0xff] }
 0x3fe   :  { %v9721_v59 = vmax.f32 %v6095_v44, 0.0  ;;  %v8990_v39 = vadd.f32 %v21782_v27, %v8989_v1  ;;  %v21955_v44 = vpack.c.bf16 %v10299_v17, %v10298_v8  ;;  %v18295_v15 = vpop.f32.mrb[190].mxu1  ;;  %v529_v8 = vld [vmem:[#allocation2 + $0xf28] sm:$0xff]  ;;  %v530_v1 = vld [vmem:[#allocation2 + $0xf30] sm:$0xff] }
 0x3ff   :  { %v9720_v46 = vmax.f32 %v6090_v21, 0.0  ;;  %v17425_v28 = vpop.f32.mrb[118].mxu0  ;;  %18775 = vmatprep.subr.bf16.mxu1 %v18774_v9  ;;  %v10301_v21 = vmax.f32 %v8995_v11, 0.0 }
 0x400   :  { %v6105_v37 = vadd.f32 %v21782_v27, %v17425_v28  ;;  %v6099_v14 = vpop.f32.mrb[119].mxu0  ;;  %17583 = vmatmul.mubr.msk.f32.gmra.mrb[224].mxu0 %vm1086_vm0, %v525_v47  ;;  %18777 = vmatpush3.bf16.msra.mxu1 %v21848_v13  ;;  %24198 = vst [vmem:[#allocation93_spill] sm:$0xff] %v21955_v44  ;;  %v10300_v13 = vmax.f32 %v8990_v39, 0.0 }
 0x401   :  { %v6100_v32 = vadd.f32 %v21782_v27, %v6099_v14  ;;  %17585 = vmatprep.mubr.msk.f32.mxu0 %vm1086_vm0, %v526_v4  ;;  %v18778_v49 = vpack.c.bf16 %v9721_v59, %v9720_v46  ;;  %v9005_v59 = vadd.f32 %v21782_v27, %v18295_v15  ;;  %v8999_v4 = vpop.f32.mrb[191].mxu1 }
 0x402   :  { %v9723_v19 = vmax.f32 %v6105_v37, 0.0  ;;  %v9000_v37 = vadd.f32 %v21782_v27, %v8999_v4  ;;  %v21964_v14 = vpack.c.bf16 %v10301_v21, %v10300_v13  ;;  %v18298_v39 = vpop.f32.mrb[192].mxu1  ;;  %v531_v13 = vld [vmem:[#allocation2 + $0xf38] sm:$0xff] }
 0x403   :  { %v9722_v9 = vmax.f32 %v6100_v32, 0.0  ;;  %v17428_v47 = vpop.f32.mrb[120].mxu0  ;;  %18779 = vmatprep.subr.bf16.mxu1 %v18778_v49  ;;  %v10303_v32 = vmax.f32 %v9005_v59, 0.0 }
 0x404   :  { %v6115_v28 = vadd.f32 %v21782_v27, %v17428_v47  ;;  %v6109_v33 = vpop.f32.mrb[121].mxu0  ;;  %17586 = vmatmul.mubr.msk.f32.gmra.mrb[226].mxu0 %vm1086_vm0, %v527_v56  ;;  %18781 = vmatpush3.bf16.msra.mxu1 %v21864_v60  ;;  %24199 = vst [vmem:[#allocation94_spill] sm:$0xff] %v21964_v14  ;;  %v10302_v60 = vmax.f32 %v9000_v37, 0.0  ;;  %v536_v14 = vld [vmem:[#allocation2 + $0xf60] sm:$0xff] }
 0x405   :  { %v6110_v17 = vadd.f32 %v21782_v27, %v6109_v33  ;;  %17588 = vmatprep.mubr.msk.f32.mxu0 %vm1086_vm0, %v528_v18  ;;  %v18782_v46 = vpack.c.bf16 %v9723_v19, %v9722_v9  ;;  %v9015_v19 = vadd.f32 %v21782_v27, %v18298_v39  ;;  %v9009_v18 = vpop.f32.mrb[193].mxu1 }
 0x406   :  { %v9725_v11 = vmax.f32 %v6115_v28, 0.0  ;;  %v9010_v28 = vadd.f32 %v21782_v27, %v9009_v18  ;;  %v18301_v33 = vpop.f32.mrb[194].mxu1  ;;  %v21973_v59 = vpack.c.bf16 %v10303_v32, %v10302_v60  ;;  %v533_v18 = vld [vmem:[#allocation2 + $0xf48] sm:$0xff] }
 0x407   :  { %v9724_v49 = vmax.f32 %v6110_v17, 0.0  ;;  %v17431_v56 = vpop.f32.mrb[122].mxu0  ;;  %18783 = vmatprep.subr.bf16.mxu1 %v18782_v46  ;;  %v532_v17 = vld [vmem:[#allocation2 + $0xf40] sm:$0xff]  ;;  %v10305_v46 = vmax.f32 %v9015_v19, 0.0  ;;  %v21976_v39 = vadd.f32 %v21782_v27, %v18301_v33 }
 0x408   :  { %v6125_v47 = vadd.f32 %v21782_v27, %v17431_v56  ;;  %v6119_v15 = vpop.f32.mrb[123].mxu0  ;;  %17589 = vmatmul.mubr.msk.f32.gmra.mrb[228].mxu0 %vm1086_vm0, %v529_v8  ;;  %18785 = vmatpush3.bf16.msra.mxu1 %v21880_v61  ;;  %24200 = vst [vmem:[#allocation95_spill] sm:$0xff] %v21973_v59  ;;  %v9019_v8 = vpop.f32.mrb[195].mxu1  ;;  %v10304_v56 = vmax.f32 %v9010_v28, 0.0  ;;  %v534_v28 = vld [vmem:[#allocation2 + $0xf50] sm:$0xff] }
 0x409   :  { %v6120_v21 = vadd.f32 %v21782_v27, %v6119_v15  ;;  %17591 = vmatprep.mubr.msk.f32.mxu0 %vm1086_vm0, %v530_v1  ;;  %v18786_v9 = vpack.c.bf16 %v9725_v11, %v9724_v49  ;;  %v18304_v15 = vpop.f32.mrb[196].mxu1  ;;  %v9020_v32 = vadd.f32 %v21782_v27, %v9019_v8 }
 0x40a   :  { %v9727_v4 = vmax.f32 %v6125_v47, 0.0  ;;  %v9035_v49 = vadd.f32 %v21782_v27, %v18304_v15  ;;  %v9029_v60 = vpop.f32.mrb[197].mxu1  ;;  %v21986_v59 = vpack.c.bf16 %v10305_v46, %v10304_v56  ;;  %v10307_v15 = vmax.f32 %v21976_v39, 0.0 }
 0x40b   :  { %v9726_v37 = vmax.f32 %v6120_v21, 0.0  ;;  %v17434_v61 = vpop.f32.mrb[124].mxu0  ;;  %18787 = vmatprep.subr.bf16.mxu1 %v18786_v9  ;;  %v18307_v21 = vpop.f32.mrb[198].mxu1 }
 0x40c   :  { %v6135_v11 = vadd.f32 %v21782_v27, %v17434_v61  ;;  %v6129_v1 = vpop.f32.mrb[125].mxu0  ;;  %17592 = vmatmul.mubr.msk.f32.gmra.mrb[230].mxu0 %vm1086_vm0, %v531_v13  ;;  %18789 = vmatpush3.bf16.msra.mxu1 %v21893_v42  ;;  %v10309_v33 = vmax.f32 %v9035_v49, 0.0  ;;  %v9030_v61 = vadd.f32 %v21782_v27, %v9029_v60  ;;  %v9039_v13 = vpop.f32.mrb[199].mxu1  ;;  %24201 = vst [vmem:[#allocation96_spill] sm:$0xff] %v21986_v59  ;;  %v10306_v49 = vmax.f32 %v9020_v32, 0.0 }
 0x40d   :  { %v6130_v47 = vadd.f32 %v21782_v27, %v6129_v1  ;;  %17594 = vmatprep.mubr.msk.f32.mxu0 %vm1086_vm0, %v532_v17  ;;  %v18790_v19 = vpack.c.bf16 %v9727_v4, %v9726_v37  ;;  %v9045_v1 = vadd.f32 %v21782_v27, %v18307_v21  ;;  %v9040_v17 = vadd.f32 %v21782_v27, %v9039_v13  ;;  %v18310_v4 = vpop.f32.mrb[200].mxu1 }
 0x40e   :  { %v9729_v9 = vmax.f32 %v6135_v11, 0.0  ;;  %v10308_v46 = vmax.f32 %v9030_v61, 0.0  ;;  %v9055_v56 = vadd.f32 %v21782_v27, %v18310_v4  ;;  %v9049_v60 = vpop.f32.mrb[201].mxu1 }
 0x40f   :  { %v9728_v42 = vmax.f32 %v6130_v47, 0.0  ;;  %v17437_v8 = vpop.f32.mrb[126].mxu0  ;;  %18791 = vmatprep.subr.bf16.mxu1 %v18790_v19  ;;  %v535_v19 = vld [vmem:[#allocation2 + $0xf58] sm:$0xff]  ;;  %v10311_v21 = vmax.f32 %v9045_v1, 0.0  ;;  %v10310_v13 = vmax.f32 %v9040_v17, 0.0  ;;  %v18313_v59 = vpop.f32.mrb[202].mxu1 }
 0x410   :  { %v6145_v37 = vadd.f32 %v21782_v27, %v17437_v8  ;;  %v6139_v11 = vpop.f32.mrb[127].mxu0  ;;  %17595 = vmatmul.mubr.msk.f32.gmra.mrb[232].mxu0 %vm1086_vm0, %v533_v18  ;;  %18793 = vmatpush3.bf16.msra.mxu1 %v21903_v55  ;;  %v21997_v44 = vpack.c.bf16 %v10309_v33, %v10308_v46  ;;  %v10313_v18 = vmax.f32 %v9055_v56, 0.0  ;;  %v9050_v55 = vadd.f32 %v21782_v27, %v9049_v60  ;;  %v9059_v32 = vpop.f32.mrb[203].mxu1  ;;  %v537_v60 = vld [vmem:[#allocation2 + $0xf68] sm:$0xff] }
 0x411   :  { %v6140_v47 = vadd.f32 %v21782_v27, %v6139_v11  ;;  %17597 = vmatprep.mubr.msk.f32.mxu0 %vm1086_vm0, %v534_v28  ;;  %v18794_v39 = vpack.c.bf16 %v9729_v9, %v9728_v42  ;;  %v22000_v12 = vpack.c.bf16 %v10311_v21, %v10310_v13  ;;  %v9065_v28 = vadd.f32 %v21782_v27, %v18313_v59  ;;  %v18316_v42 = vpop.f32.mrb[204].mxu1 }
 0x412   :  { %v9731_v8 = vmax.f32 %v6145_v37, 0.0  ;;  %24202 = vst [vmem:[#allocation97_spill] sm:$0xff] %v21997_v44  ;;  %v9060_v9 = vadd.f32 %v21782_v27, %v9059_v32  ;;  %v10312_v33 = vmax.f32 %v9050_v55, 0.0  ;;  %v9075_v37 = vadd.f32 %v21782_v27, %v18316_v42  ;;  %v9069_v11 = vpop.f32.mrb[205].mxu1  ;;  %v538_v32 = vld [vmem:[#allocation2 + $0xf70] sm:$0xff] }
 0x413   :  { %v9730_v61 = vmax.f32 %v6140_v47, 0.0  ;;  %v17440_v4 = vpop.f32.mrb[128].mxu0  ;;  %18795 = vmatprep.subr.bf16.mxu1 %v18794_v39  ;;  %24203 = vst [vmem:[#allocation98_spill] sm:$0xff] %v22000_v12  ;;  %v22008_v46 = vpack.c.bf16 %v10307_v15, %v10306_v49  ;;  %v10315_v47 = vmax.f32 %v9065_v28, 0.0  ;;  %v18319_v21 = vpop.f32.mrb[206].mxu1  ;;  %v9070_v55 = vadd.f32 %v21782_v27, %v9069_v11 }
 0x414   :  { %v6155_v1 = vadd.f32 %v21782_v27, %v17440_v4  ;;  %v6149_v17 = vpop.f32.mrb[129].mxu0  ;;  %17598 = vmatmul.mubr.msk.f32.gmra.mrb[234].mxu0 %vm1086_vm0, %v535_v19  ;;  %18797 = vmatpush3.bf16.msra.mxu1 %v21913_v6  ;;  %v10314_v39 = vmax.f32 %v9060_v9, 0.0  ;;  %v22012_v19 = vpack.c.bf16 %v10313_v18, %v10312_v33  ;;  %v10317_v6 = vmax.f32 %v9075_v37, 0.0  ;;  %v9079_v4 = vpop.f32.mrb[207].mxu1  ;;  %v10394_v18 = vld [vmem:[%s24048_s3 + $0xb0] sm:$0xff]  ;;  %v539_v33 = vld [vmem:[#allocation2 + $0xf78] sm:$0xff] }
 0x415   :  { %24204 = vst [vmem:[#allocation99_spill] sm:$0xff] %v22008_v46  ;;  %v6150_v56 = vadd.f32 %v21782_v27, %v6149_v17  ;;  %17600 = vmatprep.mubr.msk.f32.mxu0 %vm1086_vm0, %v536_v14  ;;  %v18798_v59 = vpack.c.bf16 %v9731_v8, %v9730_v61  ;;  %v18322_v17 = vpop.f32.mrb[208].mxu1  ;;  %v10316_v61 = vmax.f32 %v9070_v55, 0.0  ;;  %v10459_v37 = vld [vmem:[%s24048_s3 + $0x2b8] sm:$0xff]  ;;  %v9085_v11 = vadd.f32 %v21782_v27, %v18319_v21 }
 0x416   :  { %v9733_v13 = vmax.f32 %v6155_v1, 0.0  ;;  %24205 = vst [vmem:[#allocation100_spill] sm:$0xff] %v22012_v19  ;;  %v22015_v49 = vpack.c.bf16 %v10315_v47, %v10314_v39  ;;  %v9089_v28 = vpop.f32.mrb[209].mxu1  ;;  %v9095_v39 = vadd.f32 %v21782_v27, %v18322_v17 }
 0x417   :  { %v9732_v42 = vmax.f32 %v6150_v56, 0.0  ;;  %v17443_v15 = vpop.f32.mrb[130].mxu0  ;;  %18799 = vmatprep.subr.bf16.mxu1 %v18798_v59  ;;  %v18325_v56 = vpop.f32.mrb[210].mxu1  ;;  %v22032_v47 = vpack.c.bf16 %v10317_v6, %v10316_v61  ;;  %v10458_v6 = vld [vmem:[%s24048_s3 + $0x2b0] sm:$0xff] }
 0x418   :  { %24206 = vst [vmem:[#allocation101_spill] sm:$0xff] %v22015_v49  ;;  %v6165_v14 = vadd.f32 %v21782_v27, %v17443_v15  ;;  %v6159_v8 = vpop.f32.mrb[131].mxu0  ;;  %17601 = vmatmul.mubr.msk.f32.gmra.mrb[236].mxu0 %vm1086_vm0, %v537_v60  ;;  %18801 = vmatpush3.bf16.msra.mxu1 %v21923_v3  ;;  %v9080_v3 = vadd.f32 %v21782_v27, %v9079_v4  ;;  %v540_v60 = vld [vmem:[#allocation2 + $0xf80] sm:$0xff]  ;;  %v9099_v55 = vpop.f32.mrb[211].mxu1  ;;  %v10319_v15 = vmax.f32 %v9085_v11, 0.0  ;;  %v10321_v17 = vmax.f32 %v9095_v39, 0.0 }
 0x419   :  { %v22023_v9 = vpack.c.bf16 %v9733_v13, %v9732_v42  ;;  %v6160_v1 = vadd.f32 %v21782_v27, %v6159_v8  ;;  %17603 = vmatprep.mubr.msk.f32.mxu0 %vm1086_vm0, %v538_v32  ;;  %24207 = vst [vmem:[#allocation102_spill] sm:$0xff] %v22032_v47  ;;  %v9090_v13 = vadd.f32 %v21782_v27, %v9089_v28  ;;  %v22036_v49 = vpop.f32.mrb[212].mxu1 }
 0x41a   :  { %v9735_v59 = vmax.f32 %v6165_v14, 0.0  ;;  %v10318_v8 = vmax.f32 %v9080_v3, 0.0  ;;  %v22043_v61 = vpop.f32.mrb[213].mxu1  ;;  %v9105_v11 = vadd.f32 %v21782_v27, %v18325_v56  ;;  %v10522_v56 = vld [vmem:[%s24048_s3 + $0x4b0] sm:$0xff] }
 0x41b   :  { %v9734_v32 = vmax.f32 %v6160_v1, 0.0  ;;  %v17446_v42 = vpop.f32.mrb[132].mxu0  ;;  %11628 = vmatmul.mubr.f32.vlgmr.msra.gmra.mrb[92].mxu1 %v10394_v18  ;;  %v10320_v14 = vmax.f32 %v9090_v13, 0.0  ;;  %v541_v1 = vld [vmem:[#allocation2 + $0xf88] sm:$0xff]  ;;  %v22055_v3 = vpop.f32.mrb[214].mxu1  ;;  %v542_v13 = vld [vmem:[#allocation2 + $0xf90] sm:$0xff] }
 0x41c   :  { %v6175_v21 = vadd.f32 %v21782_v27, %v17446_v42  ;;  %v6169_v4 = vpop.f32.mrb[133].mxu0  ;;  %17604 = vmatmul.mubr.msk.f32.gmra.mrb[238].mxu0 %vm1086_vm0, %v539_v33  ;;  %11632 = vmatprep.mubr.f32.mxu1 %v10459_v37  ;;  %v10523_v33 = vld [vmem:[%s24048_s3 + $0x4b8] sm:$0xff]  ;;  %v22052_v37 = vpack.c.bf16 %v10319_v15, %v10318_v8  ;;  %v10323_v47 = vmax.f32 %v9105_v11, 0.0  ;;  %v544_v11 = vld [vmem:[#allocation2 + $0xfa0] sm:$0xff] }
 0x41d   :  { %v22045_v28 = vpack.c.bf16 %v9735_v59, %v9734_v32  ;;  %v6170_v18 = vadd.f32 %v21782_v27, %v6169_v4  ;;  %17606 = vmatprep.mubr.msk.f32.mxu0 %vm1086_vm0, %v540_v60  ;;  %v22057_v42 = vpack.c.bf16 %v10321_v17, %v10320_v14  ;;  %v9100_v59 = vadd.f32 %v21782_v27, %v9099_v55  ;;  %v22060_v32 = vpop.f32.mrb[215].mxu1  ;;  %v543_v14 = vld [vmem:[#allocation2 + $0xf98] sm:$0xff] }
 0x41e   :  { %24208 = vst [vmem:[#allocation103_spill] sm:$0xff] %v22052_v37  ;;  %v9737_v39 = vmax.f32 %v6175_v21, 0.0  ;;  %v22062_v19 = vpop.f32.mrb[216].mxu1 }
 0x41f   :  { %24209 = vst [vmem:[#allocation104_spill] sm:$0xff] %v22057_v42  ;;  %v9736_v60 = vmax.f32 %v6170_v18, 0.0  ;;  %v17449_v4 = vpop.f32.mrb[134].mxu0  ;;  %11633 = vmatmul.mubr.f32.gmra.mrb[94].mxu1 %v10458_v6  ;;  %v10322_v21 = vmax.f32 %v9100_v59, 0.0  ;;  %v22069_v55 = vpop.f32.mrb[217].mxu1  ;;  %v10587_v18 = vld [vmem:[%s24048_s3 + $0x6b8] sm:$0xff] }
 0x420   :  { %v6185_v15 = vadd.f32 %v21782_v27, %v17449_v4  ;;  %v6179_v8 = vpop.f32.mrb[135].mxu0  ;;  %17607 = vmatmul.mubr.msk.f32.gmra.mrb[240].mxu0 %vm1086_vm0, %v541_v1  ;;  %11637 = vmatprep.mubr.f32.mxu1 %v10523_v33  ;;  %v22078_v1 = vpop.f32.mrb[218].mxu1 }
 0x421   :  { %v22071_v17 = vpack.c.bf16 %v9737_v39, %v9736_v60  ;;  %v6180_v6 = vadd.f32 %v21782_v27, %v6179_v8  ;;  %17609 = vmatprep.mubr.msk.f32.mxu0 %vm1086_vm0, %v542_v13  ;;  %v22080_v4 = vpack.c.bf16 %v10323_v47, %v10322_v21  ;;  %v22082_v59 = vpop.f32.mrb[219].mxu1  ;;  %v22086_v27 = vld [vmem:[#allocation5] ss:$0 sm:$0xff]  ;;  %v10586_v47 = vld [vmem:[%s24048_s3 + $0x6b0] sm:$0xff] }
 0x422   :  { %v9739_v33 = vmax.f32 %v6185_v15, 0.0  ;;  %v22084_v60 = vpop.f32.mrb[220].mxu1 }
 0x423   :  { %24210 = vst [vmem:[#allocation105_spill] sm:$0xff] %v22080_v4  ;;  %v9738_v42 = vmax.f32 %v6180_v6, 0.0  ;;  %v17452_v39 = vpop.f32.mrb[136].mxu0  ;;  %11638 = vmatmul.mubr.f32.gmra.mrb[96].mxu1 %v10522_v56  ;;  %v22093_v15 = vpop.f32.mrb[221].mxu1  ;;  %v545_v6 = vld [vmem:[#allocation2 + $0xfa8] sm:$0xff] }
 0x424   :  { %v6195_v13 = vadd.f32 %v22086_v27, %v17452_v39  ;;  %v6189_v8 = vpop.f32.mrb[137].mxu0  ;;  %17610 = vmatmul.mubr.msk.f32.gmra.mrb[242].mxu0 %vm1086_vm0, %v543_v14  ;;  %11642 = vmatprep.mubr.f32.mxu1 %v10587_v18  ;;  %v10397_v39 = vld [vmem:[%s24048_s3 + $0xc8] sm:$0xff]  ;;  %v22102_v4 = vpop.f32.mrb[222].mxu1  ;;  %v546_v18 = vld [vmem:[#allocation2 + $0xfb0] sm:$0xff] }
 0x425   :  { %v22095_v21 = vpack.c.bf16 %v9739_v33, %v9738_v42  ;;  %v6190_v56 = vadd.f32 %v22086_v27, %v6189_v8  ;;  %17612 = vmatprep.mubr.msk.f32.mxu0 %vm1086_vm0, %v544_v11  ;;  %v22104_v37 = vpop.f32.mrb[223].mxu1 }
 0x426   :  { %v9741_v14 = vmax.f32 %v6195_v13, 0.0  ;;  %v22106_v42 = vpop.f32.mrb[224].mxu1 }
 0x427   :  { %v9740_v12 = vmax.f32 %v6190_v56, 0.0  ;;  %v17455_v44 = vpop.f32.mrb[138].mxu0  ;;  %11643 = vmatmul.mubr.f32.gmra.mrb[98].mxu1 %v10586_v47  ;;  %v22110_v11 = vpop.f32.mrb[225].mxu1 }
 0x428   :  { %v6205_v33 = vadd.f32 %v22086_v27, %v17455_v44  ;;  %v6199_v8 = vpop.f32.mrb[139].mxu0  ;;  %17613 = vmatmul.mubr.msk.f32.gmra.mrb[244].mxu0 %vm1086_vm0, %v545_v6  ;;  %11712 = vmatprep.mubr.f32.mxu1 %v10397_v39  ;;  %v22116_v56 = vpop.f32.mrb[226].mxu1  ;;  %v22120_v44 = vadd.f32 %v22086_v27, %v22036_v49 }
 0x429   :  { %v22112_v46 = vpack.c.bf16 %v9741_v14, %v9740_v12  ;;  %v6200_v13 = vadd.f32 %v22086_v27, %v6199_v8  ;;  %17615 = vmatprep.mubr.msk.f32.mxu0 %vm1086_vm0, %v546_v18  ;;  %v22122_v31 = vpop.f32.mrb[227].mxu1  ;;  %v22126_v12 = vadd.f32 %v22086_v27, %v22043_v61 }
 0x42a   :  { %v9743_v47 = vmax.f32 %v6205_v33, 0.0  ;;  %v18352_v14 = vpop.f32.mrb[228].mxu1 }
 0x42b   :  { %v9742_v6 = vmax.f32 %v6200_v13, 0.0  ;;  %v17458_v39 = vpop.f32.mrb[140].mxu0  ;;  %v9189_v33 = vpop.f32.mrb[229].mxu1  ;;  %v9195_v58 = vadd.f32 %v22086_v27, %v18352_v14  ;;  %v22150_v14 = vadd.f32 %v22086_v27, %v22062_v19 }
 0x42c   :  { %v6215_v18 = vadd.f32 %v22086_v27, %v17458_v39  ;;  %v6209_v8 = vpop.f32.mrb[141].mxu0  ;;  %17616 = vmatmul.mubr.msk.f32.gmra.mrb[246].mxu0 %vm1086_vm0, %v547_v54  ;;  %v18355_v13 = vpop.f32.mrb[230].mxu1  ;;  %v9190_v39 = vadd.f32 %v22086_v27, %v9189_v33 }
 0x42d   :  { %v22130_v24 = vpack.c.bf16 %v9743_v47, %v9742_v6  ;;  %v6210_v49 = vadd.f32 %v22086_v27, %v6209_v8  ;;  %17618 = vmatprep.mubr.msk.f32.mxu0 %vm1086_vm0, %v548_v53  ;;  %v9199_v26 = vpop.f32.mrb[231].mxu1  ;;  %v22140_v6 = vadd.f32 %v22086_v27, %v22055_v3  ;;  %v22144_v53 = vadd.f32 %v22086_v27, %v22060_v32  ;;  %v551_v32 = vld [vmem:[#allocation2 + $0xfd8] sm:$0xff] }
 0x42e   :  { %v9745_v5 = vmax.f32 %v6215_v18, 0.0  ;;  %v18358_v18 = vpop.f32.mrb[232].mxu1  ;;  %v10341_v33 = vmax.f32 %v9195_v58, 0.0  ;;  %v9205_v41 = vadd.f32 %v22086_v27, %v18355_v13 }
 0x42f   :  { %v9744_v43 = vmax.f32 %v6210_v49, 0.0  ;;  %v17461_v54 = vpop.f32.mrb[142].mxu0  ;;  %v10340_v49 = vmax.f32 %v9190_v39, 0.0  ;;  %v9209_v47 = vpop.f32.mrb[233].mxu1  ;;  %v9215_v58 = vadd.f32 %v22086_v27, %v18358_v18 }
 0x430   :  { %v6225_v8 = vadd.f32 %v22086_v27, %v17461_v54  ;;  %v6219_v61 = vpop.f32.mrb[143].mxu0  ;;  %17619 = vmatmul.mubr.msk.f32.gmra.mrb[248].mxu0 %vm1086_vm0, %v549_v48  ;;  %v9200_v54 = vadd.f32 %v22086_v27, %v9199_v26  ;;  %v18361_v16 = vpop.f32.mrb[234].mxu1  ;;  %v9210_v19 = vadd.f32 %v22086_v27, %v9209_v47 }
 0x431   :  { %v22152_v40 = vpack.c.bf16 %v9745_v5, %v9744_v43  ;;  %v6220_v3 = vadd.f32 %v22086_v27, %v6219_v61  ;;  %17621 = vmatprep.mubr.msk.f32.mxu0 %vm1086_vm0, %v550_v0  ;;  %v22158_v45 = vpack.c.bf16 %v10341_v33, %v10340_v49  ;;  %v9219_v43 = vpop.f32.mrb[235].mxu1  ;;  %v10343_v0 = vmax.f32 %v9205_v41, 0.0  ;;  %v553_v41 = vld [vmem:[#allocation2 + $0xfe8] sm:$0xff] }
 0x432   :  { %v9747_v48 = vmax.f32 %v6225_v8, 0.0  ;;  %v10342_v10 = vmax.f32 %v9200_v54, 0.0  ;;  %v18364_v22 = vpop.f32.mrb[236].mxu1  ;;  %v22167_v8 = vadd.f32 %v22086_v27, %v22069_v55  ;;  %v10345_v18 = vmax.f32 %v9215_v58, 0.0 }
 0x433   :  { %24211 = vst [vmem:[#allocation106_spill] sm:$0xff] %v22158_v45  ;;  %v9746_v5 = vmax.f32 %v6220_v3, 0.0  ;;  %v17464_v39 = vpop.f32.mrb[144].mxu0  ;;  %v10344_v33 = vmax.f32 %v9210_v19, 0.0  ;;  %v9229_v47 = vpop.f32.mrb[237].mxu1  ;;  %v554_v45 = vld [vmem:[#allocation2 + $0xff0] sm:$0xff]  ;;  %v9220_v55 = vadd.f32 %v22086_v27, %v9219_v43  ;;  %v9235_v58 = vadd.f32 %v22086_v27, %v18364_v22 }
 0x434   :  { %v6235_v13 = vadd.f32 %v22086_v27, %v17464_v39  ;;  %v6229_v26 = vpop.f32.mrb[145].mxu0  ;;  %17622 = vmatmul.mubr.msk.f32.gmra.mrb[250].mxu0 %vm1086_vm0, %v551_v32  ;;  %v22173_v54 = vpack.c.bf16 %v10343_v0, %v10342_v10  ;;  %v9225_v39 = vadd.f32 %v22086_v27, %v18361_v16  ;;  %v18367_v61 = vpop.f32.mrb[238].mxu1 }
 0x435   :  { %v22169_v49 = vpack.c.bf16 %v9747_v48, %v9746_v5  ;;  %v6230_v3 = vadd.f32 %v22086_v27, %v6229_v26  ;;  %17624 = vmatprep.mubr.msk.f32.mxu0 %vm1086_vm0, %v552_v25  ;;  %v22176_v57 = vpack.c.bf16 %v10345_v18, %v10344_v33  ;;  %v9239_v48 = vpop.f32.mrb[239].mxu1  ;;  %v9230_v25 = vadd.f32 %v22086_v27, %v9229_v47 }
 0x436   :  { %24212 = vst [vmem:[#allocation107_spill] sm:$0xff] %v22173_v54  ;;  %v9749_v32 = vmax.f32 %v6235_v13, 0.0  ;;  %v10347_v26 = vmax.f32 %v9225_v39, 0.0  ;;  %v9245_v10 = vadd.f32 %v22086_v27, %v18367_v61  ;;  %v18370_v0 = vpop.f32.mrb[240].mxu1  ;;  %v10346_v13 = vmax.f32 %v9220_v55, 0.0  ;;  %v555_v39 = vld [vmem:[#allocation2 + $0xff8] sm:$0xff] }
 0x437   :  { %24213 = vst [vmem:[#allocation108_spill] sm:$0xff] %v22176_v57  ;;  %v9748_v19 = vmax.f32 %v6230_v3, 0.0  ;;  %v17467_v5 = vpop.f32.mrb[146].mxu0  ;;  %v10349_v18 = vmax.f32 %v9235_v58, 0.0  ;;  %v9240_v43 = vadd.f32 %v22086_v27, %v9239_v48  ;;  %v9249_v33 = vpop.f32.mrb[241].mxu1  ;;  %v10348_v47 = vmax.f32 %v9230_v25, 0.0 }
 0x438   :  { %v6245_v16 = vadd.f32 %v22086_v27, %v17467_v5  ;;  %v6239_v54 = vpop.f32.mrb[147].mxu0  ;;  %17625 = vmatmul.mubr.msk.f32.gmra.mrb[252].mxu0 %vm1086_vm0, %v553_v41  ;;  %v10351_v57 = vmax.f32 %v9245_v10, 0.0  ;;  %v18373_v61 = vpop.f32.mrb[242].mxu1  ;;  %v22187_v5 = vpack.c.bf16 %v10347_v26, %v10346_v13  ;;  %v9255_v41 = vadd.f32 %v22086_v27, %v18370_v0 }
 0x439   :  { %v6240_v22 = vadd.f32 %v22086_v27, %v6239_v54  ;;  %17627 = vmatprep.mubr.msk.f32.mxu0 %vm1086_vm0, %v554_v45  ;;  %v18802_v3 = vpack.c.bf16 %v9749_v32, %v9748_v19  ;;  %v10350_v50 = vmax.f32 %v9240_v43, 0.0  ;;  %v9259_v55 = vpop.f32.mrb[243].mxu1  ;;  %v22190_v34 = vpack.c.bf16 %v10349_v18, %v10348_v47  ;;  %v557_v43 = vld [vmem:[#allocation2 + $0x1008] sm:$0xff]  ;;  %v558_v47 = vld [vmem:[#allocation2 + $0x1010] sm:$0xff] }
 0x43a   :  { %v9751_v7 = vmax.f32 %v6245_v16, 0.0  ;;  %24214 = vst [vmem:[#allocation109_spill] sm:$0xff] %v22187_v5  ;;  %v9250_v45 = vadd.f32 %v22086_v27, %v9249_v33  ;;  %v9265_v54 = vadd.f32 %v22086_v27, %v18373_v61  ;;  %v22194_v32 = vpop.f32.mrb[244].mxu1  ;;  %v10353_v10 = vmax.f32 %v9255_v41, 0.0 }
 0x43b   :  { %v9750_v58 = vmax.f32 %v6240_v22, 0.0  ;;  %v17470_v48 = vpop.f32.mrb[148].mxu0  ;;  %18803 = vmatprep.subr.bf16.mxu1 %v18802_v3  ;;  %24215 = vst [vmem:[#allocation110_spill] sm:$0xff] %v22190_v34  ;;  %v22199_v26 = vpack.c.bf16 %v10351_v57, %v10350_v50  ;;  %v9260_v0 = vadd.f32 %v22086_v27, %v9259_v55  ;;  %v22202_v16 = vpop.f32.mrb[245].mxu1  ;;  %v10326_v50 = vmax.f32 %v22144_v53, 0.0 }
 0x43c   :  { %v6255_v19 = vadd.f32 %v22086_v27, %v17470_v48  ;;  %v6249_v25 = vpop.f32.mrb[149].mxu0  ;;  %17628 = vmatmul.mubr.msk.f32.gmra.mrb[254].mxu0 %vm1086_vm0, %v555_v39  ;;  %18805 = vmatpush3.bf16.msra.mxu1 %v22023_v9  ;;  %v10352_v33 = vmax.f32 %v9250_v45, 0.0  ;;  %v10355_v22 = vmax.f32 %v9265_v54, 0.0  ;;  %v22206_v3 = vpop.f32.mrb[246].mxu1  ;;  %v9145_v57 = vadd.f32 %v22086_v27, %v22078_v1 }
 0x43d   :  { %24216 = vst [vmem:[#allocation111_spill] sm:$0xff] %v22199_v26  ;;  %v6250_v13 = vadd.f32 %v22086_v27, %v6249_v25  ;;  %17630 = vmatprep.mubr.msk.f32.mxu0 %vm1086_vm0, %v556_v38  ;;  %v18806_v18 = vpack.c.bf16 %v9751_v7, %v9750_v58  ;;  %v10354_v9 = vmax.f32 %v9260_v0, 0.0  ;;  %v22211_v61 = vpop.f32.mrb[247].mxu1  ;;  %v9140_v38 = vadd.f32 %v22086_v27, %v22082_v59  ;;  %v559_v25 = vld [vmem:[#allocation2 + $0x1018] sm:$0xff] }
 0x43e   :  { %v9753_v39 = vmax.f32 %v6255_v19, 0.0  ;;  %v9155_v7 = vadd.f32 %v22086_v27, %v22084_v60  ;;  %v22217_v58 = vpack.c.bf16 %v10353_v10, %v10352_v33  ;;  %v22219_v48 = vpop.f32.mrb[248].mxu1  ;;  %v9150_v1 = vadd.f32 %v22086_v27, %v22093_v15 }
 0x43f   :  { %v9752_v41 = vmax.f32 %v6250_v13, 0.0  ;;  %v17473_v55 = vpop.f32.mrb[150].mxu0  ;;  %18807 = vmatprep.subr.bf16.mxu1 %v18806_v18  ;;  %v22226_v54 = vpack.c.bf16 %v10355_v22, %v10354_v9  ;;  %v22228_v59 = vpop.f32.mrb[249].mxu1  ;;  %v10329_v10 = vmax.f32 %v22150_v14, 0.0  ;;  %v10328_v0 = vmax.f32 %v22167_v8, 0.0  ;;  %v560_v18 = vld [vmem:[#allocation2 + $0x1020] sm:$0xff] }
 0x440   :  { %24217 = vst [vmem:[#allocation112_spill] sm:$0xff] %v22217_v58  ;;  %v6265_v53 = vadd.f32 %v22086_v27, %v17473_v55  ;;  %v6259_v45 = vpop.f32.mrb[151].mxu0  ;;  %17631 = vmatmul.mubr.msk.f32.gmra.mrb[0].mxu0 %vm1086_vm0, %v557_v43  ;;  %18809 = vmatpush3.bf16.msra.mxu1 %v22045_v28  ;;  %v22234_v13 = vpop.f32.mrb[250].mxu1  ;;  %v9165_v15 = vadd.f32 %v22086_v27, %v22102_v4  ;;  %v24219_v22 = vmax.f32 %v22126_v12, 0.0  ;;  %v10331_v9 = vmax.f32 %v9145_v57, 0.0 }
 0x441   :  { %24218 = vst [vmem:[#allocation113_spill] sm:$0xff] %v22226_v54  ;;  %v6260_v60 = vadd.f32 %v22086_v27, %v6259_v45  ;;  %17633 = vmatprep.mubr.msk.f32.mxu0 %vm1086_vm0, %v558_v47  ;;  %v18810_v19 = vpack.c.bf16 %v9753_v39, %v9752_v41  ;;  %v9160_v43 = vadd.f32 %v22086_v27, %v22104_v37  ;;  %v22240_v33 = vpop.f32.mrb[251].mxu1  ;;  %v24220_v39 = vmax.f32 %v22120_v44, 0.0 }
 0x442   :  { %v9755_v28 = vmax.f32 %v6265_v53, 0.0  ;;  %v10330_v41 = vmax.f32 %v9140_v38, 0.0  ;;  %v22248_v55 = vpop.f32.mrb[252].mxu1  ;;  %v24221_v4 = vmax.f32 %v22140_v6, 0.0  ;;  %v10333_v44 = vmax.f32 %v9155_v7, 0.0 }
 0x443   :  { %v22246_v47 = vpack.c.bf16 %v24220_v39, %v24219_v22  ;;  %v9754_v14 = vmax.f32 %v6260_v60, 0.0  ;;  %v17476_v8 = vpop.f32.mrb[152].mxu0  ;;  %18811 = vmatprep.subr.bf16.mxu1 %v18810_v19  ;;  %v10332_v12 = vmax.f32 %v9150_v1, 0.0  ;;  %v22257_v60 = vpop.f32.mrb[253].mxu1  ;;  %v561_v19 = vld [vmem:[#allocation2 + $0x1028] sm:$0xff]  ;;  %v9175_v6 = vadd.f32 %v22086_v27, %v22106_v42 }
 0x444   :  { %v22252_v53 = vpack.c.bf16 %v24221_v4, %v10326_v50  ;;  %v6275_v37 = vadd.f32 %v22086_v27, %v17476_v8  ;;  %v6269_v45 = vpop.f32.mrb[153].mxu0  ;;  %17634 = vmatmul.mubr.msk.f32.gmra.mrb[2].mxu0 %vm1086_vm0, %v559_v25  ;;  %18813 = vmatpush3.bf16.msra.mxu1 %v22071_v17  ;;  %v9170_v50 = vadd.f32 %v22086_v27, %v22110_v11  ;;  %v22265_v22 = vpop.f32.mrb[254].mxu1  ;;  %v562_v17 = vld [vmem:[#allocation2 + $0x1030] sm:$0xff]  ;;  %v10335_v7 = vmax.f32 %v9165_v15, 0.0 }
 0x445   :  { %v6270_v57 = vadd.f32 %v22086_v27, %v6269_v45  ;;  %17636 = vmatprep.mubr.msk.f32.mxu0 %vm1086_vm0, %v560_v18  ;;  %v18814_v38 = vpack.c.bf16 %v9755_v28, %v9754_v14  ;;  %v10334_v1 = vmax.f32 %v9160_v43, 0.0  ;;  %v22267_v39 = vpop.f32.mrb[255].mxu1  ;;  %v22269_v8 = vpack.c.bf16 %v10329_v10, %v10328_v0 }
 0x446   :  { %24222 = vst [vmem:[#allocation114_spill] sm:$0xff] %v22252_v53  ;;  %v9757_v25 = vmax.f32 %v6275_v37, 0.0  ;;  %v22271_v28 = vpop.f32.mrb[0].mxu1  ;;  %v22273_v14 = vpack.c.bf16 %v10331_v9, %v10330_v41  ;;  %v22280_v43 = vpack.c.bf16 %v10333_v44, %v10332_v12  ;;  %v563_v37 = vld [vmem:[#allocation2 + $0x1038] sm:$0xff]  ;;  %v9185_v9 = vadd.f32 %v22086_v27, %v22116_v56 }
 0x447   :  { %24223 = vst [vmem:[#allocation115_spill] sm:$0xff] %v22269_v8  ;;  %v9756_v4 = vmax.f32 %v6270_v57, 0.0  ;;  %v17479_v18 = vpop.f32.mrb[154].mxu0  ;;  %18815 = vmatprep.subr.bf16.mxu1 %v18814_v38  ;;  %v22278_v15 = vpop.f32.mrb[1].mxu1  ;;  %v9180_v41 = vadd.f32 %v22086_v27, %v22122_v31  ;;  %v10337_v38 = vmax.f32 %v9175_v6, 0.0  ;;  %v22292_v12 = vpack.c.bf16 %v10335_v7, %v10334_v1 }
 0x448   :  { %24224 = vst [vmem:[#allocation116_spill] sm:$0xff] %v22273_v14  ;;  %v6285_v42 = vadd.f32 %v22086_v27, %v17479_v18  ;;  %v6279_v11 = vpop.f32.mrb[155].mxu0  ;;  %17637 = vmatmul.mubr.msk.f32.gmra.mrb[4].mxu0 %vm1086_vm0, %v561_v19  ;;  %18817 = vmatpush3.bf16.msra.mxu1 %v22095_v21  ;;  %24225 = vst [vmem:[#allocation117_spill] sm:$0xff] %v22280_v43  ;;  %v22288_v45 = vpop.f32.mrb[2].mxu1  ;;  %v564_v21 = vld [vmem:[#allocation2 + $0x1040] sm:$0xff]  ;;  %v10336_v19 = vmax.f32 %v9170_v50, 0.0 }
 0x449   :  { %v6280_v10 = vadd.f32 %v22086_v27, %v6279_v11  ;;  %17639 = vmatprep.mubr.msk.f32.mxu0 %vm1086_vm0, %v562_v17  ;;  %v18818_v0 = vpack.c.bf16 %v9757_v25, %v9756_v4  ;;  %v22290_v44 = vpop.f32.mrb[3].mxu1  ;;  %24226 = vst [vmem:[#allocation118_spill] sm:$0xff] %v22292_v12  ;;  %v565_v50 = vld [vmem:[#allocation2 + $0x1048] sm:$0xff]  ;;  %v10339_v7 = vmax.f32 %v9185_v9, 0.0  ;;  %v10338_v1 = vmax.f32 %v9180_v41, 0.0 }
 0x44a   :  { %v9759_v57 = vmax.f32 %v6285_v42, 0.0  ;;  %v15464_v25 = vpop.f32.mrb[4].mxu1 }
 0x44b   :  { %v9758_v18 = vmax.f32 %v6280_v10, 0.0  ;;  %v17482_v17 = vpop.f32.mrb[156].mxu0  ;;  %18819 = vmatprep.subr.bf16.mxu1 %v18818_v0  ;;  %v15465_v31 = vpop.f32.mrb[5].mxu1  ;;  %v566_v0 = vld [vmem:[#allocation2 + $0x1050] sm:$0xff] }
 0x44c   :  { %v6295_v4 = vadd.f32 %v22086_v27, %v17482_v17  ;;  %v6289_v56 = vpop.f32.mrb[157].mxu0  ;;  %17640 = vmatmul.mubr.msk.f32.gmra.mrb[6].mxu0 %vm1086_vm0, %v563_v37  ;;  %18821 = vmatpush3.bf16.msra.mxu1 %v22112_v46  ;;  %v15467_v11 = vpop.f32.mrb[6].mxu1  ;;  %v15466_v54 = vadd.f32 %v15465_v31, %v15464_v25  ;;  %v22299_v17 = vpack.c.bf16 %v10337_v38, %v10336_v19 }
 0x44d   :  { %v6290_v42 = vadd.f32 %v22086_v27, %v6289_v56  ;;  %17642 = vmatprep.mubr.msk.f32.mxu0 %vm1086_vm0, %v564_v21  ;;  %v18822_v6 = vpack.c.bf16 %v9759_v57, %v9758_v18  ;;  %v15468_v58 = vpop.f32.mrb[7].mxu1  ;;  %v567_v21 = vld [vmem:[#allocation2 + $0x1058] sm:$0xff]  ;;  %v22306_v19 = vpack.c.bf16 %v10339_v7, %v10338_v1  ;;  %v569_v1 = vld [vmem:[#allocation2 + $0x1068] sm:$0xff] }
 0x44e   :  { %v9761_v10 = vmax.f32 %v6295_v4, 0.0  ;;  %24227 = vst [vmem:[#allocation119_spill] sm:$0xff] %v22299_v17  ;;  %v15469_v46 = vadd.f32 %v15468_v58, %v15467_v11  ;;  %v15470_v34 = vpop.f32.mrb[8].mxu1  ;;  %v568_v58 = vld [vmem:[#allocation2 + $0x1060] sm:$0xff] }
 0x44f   :  { %v9760_v26 = vmax.f32 %v6290_v42, 0.0  ;;  %v17485_v37 = vpop.f32.mrb[158].mxu0  ;;  %18823 = vmatprep.subr.bf16.mxu1 %v18822_v6  ;;  %v15471_v9 = vpop.f32.mrb[9].mxu1  ;;  %24228 = vst [vmem:[#allocation120_spill] sm:$0xff] %v22306_v19 }
 0x450   :  { %v6305_v56 = vadd.f32 %v22086_v27, %v17485_v37  ;;  %v6299_v5 = vpop.f32.mrb[159].mxu0  ;;  %17643 = vmatmul.mubr.msk.f32.gmra.mrb[8].mxu0 %vm1086_vm0, %v565_v50  ;;  %18825 = vmatpush3.bf16.msra.mxu1 %v22130_v24  ;;  %v15473_v38 = vpop.f32.mrb[10].mxu1  ;;  %v15472_v25 = vadd.f32 %v15471_v9, %v15470_v34 }
 0x451   :  { %v6300_v41 = vadd.f32 %v22086_v27, %v6299_v5  ;;  %17645 = vmatprep.mubr.msk.f32.mxu0 %vm1086_vm0, %v566_v0  ;;  %v18826_v57 = vpack.c.bf16 %v9761_v10, %v9760_v26  ;;  %v15474_v4 = vpop.f32.mrb[11].mxu1  ;;  %v570_v0 = vld [vmem:[#allocation2 + $0x1070] sm:$0xff] }
 0x452   :  { %v9763_v18 = vmax.f32 %v6305_v56, 0.0  ;;  %v22308_v6 = vadd.f32 %v15474_v4, %v15473_v38  ;;  %v15508_v24 = vpop.f32.mrb[12].mxu1 }
 0x453   :  { %v9762_v31 = vmax.f32 %v6300_v41, 0.0  ;;  %v17488_v42 = vpop.f32.mrb[160].mxu0  ;;  %18827 = vmatprep.subr.bf16.mxu1 %v18826_v57  ;;  %v15509_v26 = vpop.f32.mrb[13].mxu1 }
 0x454   :  { %v6315_v50 = vadd.f32 %v22086_v27, %v17488_v42  ;;  %v6309_v5 = vpop.f32.mrb[161].mxu0  ;;  %17646 = vmatmul.mubr.msk.f32.gmra.mrb[10].mxu0 %vm1086_vm0, %v567_v21  ;;  %18829 = vmatpush3.bf16.msra.mxu1 %v22152_v40  ;;  %v15511_v11 = vpop.f32.mrb[14].mxu1  ;;  %v15510_v37 = vadd.f32 %v15509_v26, %v15508_v24  ;;  %v10396_v40 = vld [vmem:[%s24048_s3 + $0xc0] sm:$0xff]  ;;  %v571_v42 = vld [vmem:[#allocation2 + $0x1078] sm:$0xff]  ;;  %v10461_v24 = vld [vmem:[%s24048_s3 + $0x2c8] sm:$0xff] }
 0x455   :  { %v6310_v7 = vadd.f32 %v22086_v27, %v6309_v5  ;;  %17648 = vmatprep.mubr.msk.f32.mxu0 %vm1086_vm0, %v568_v58  ;;  %v18830_v34 = vpack.c.bf16 %v9763_v18, %v9762_v31  ;;  %v15512_v56 = vpop.f32.mrb[15].mxu1  ;;  %v572_v26 = vld [vmem:[#allocation2 + $0x1080] sm:$0xff] }
 0x456   :  { %v9765_v10 = vmax.f32 %v6315_v50, 0.0  ;;  %v15514_v57 = vpop.f32.mrb[16].mxu1  ;;  %v10780_v18 = vadd.f32 %v15510_v37, %v15466_v54  ;;  %v15513_v50 = vadd.f32 %v15512_v56, %v15511_v11  ;;  %v10460_v11 = vld [vmem:[%s24048_s3 + $0x2c0] sm:$0xff] }
 0x457   :  { %v9764_v9 = vmax.f32 %v6310_v7, 0.0  ;;  %v17491_v41 = vpop.f32.mrb[162].mxu0  ;;  %18831 = vmatprep.subr.bf16.mxu1 %v18830_v34  ;;  %v15515_v58 = vpop.f32.mrb[17].mxu1 }
 0x458   :  { %v6325_v21 = vadd.f32 %v22086_v27, %v17491_v41  ;;  %v6319_v38 = vpop.f32.mrb[163].mxu0  ;;  %17649 = vmatmul.mubr.msk.f32.gmra.mrb[12].mxu0 %vm1086_vm0, %v569_v1  ;;  %18833 = vmatpush3.bf16.msra.mxu1 %v22169_v49  ;;  %v15517_v5 = vpop.f32.mrb[18].mxu1  ;;  %v15516_v7 = vadd.f32 %v15515_v58, %v15514_v57 }
 0x459   :  { %v22321_v4 = vpack.c.bf16 %v9765_v10, %v9764_v9  ;;  %v6320_v31 = vadd.f32 %v22086_v27, %v6319_v38  ;;  %17651 = vmatprep.mubr.msk.f32.mxu0 %vm1086_vm0, %v570_v0  ;;  %v15518_v34 = vpop.f32.mrb[19].mxu1  ;;  %v10785_v10 = vadd.f32 %v15513_v50, %v15469_v46  ;;  %v573_v46 = vld [vmem:[#allocation2 + $0x1088] sm:$0xff] }
 0x45a   :  { %v9767_v49 = vmax.f32 %v6325_v21, 0.0  ;;  %v15552_v37 = vpop.f32.mrb[20].mxu1  ;;  %v10790_v0 = vadd.f32 %v15516_v7, %v15472_v25  ;;  %v10525_v38 = vld [vmem:[%s24048_s3 + $0x4c8] sm:$0xff] }
 0x45b   :  { %v9766_v1 = vmax.f32 %v6320_v31, 0.0  ;;  %v17494_v54 = vpop.f32.mrb[164].mxu0  ;;  %11713 = vmatmul.mubr.f32.vlgmr.msra.gmra.mrb[100].mxu1 %v10396_v40  ;;  %v15553_v56 = vpop.f32.mrb[21].mxu1  ;;  %v15519_v40 = vadd.f32 %v15518_v34, %v15517_v5  ;;  %v10524_v5 = vld [vmem:[%s24048_s3 + $0x4c0] sm:$0xff] }
 0x45c   :  { %v6335_v9 = vadd.f32 %v22086_v27, %v17494_v54  ;;  %v6329_v41 = vpop.f32.mrb[165].mxu0  ;;  %17652 = vmatmul.mubr.msk.f32.gmra.mrb[14].mxu0 %vm1086_vm0, %v571_v42  ;;  %11717 = vmatprep.mubr.f32.mxu1 %v10461_v24  ;;  %v15555_v58 = vpop.f32.mrb[22].mxu1  ;;  %v574_v42 = vld [vmem:[#allocation2 + $0x1090] sm:$0xff]  ;;  %v15554_v24 = vadd.f32 %v15553_v56, %v15552_v37 }
 0x45d   :  { %v22333_v21 = vpack.c.bf16 %v9767_v49, %v9766_v1  ;;  %v6330_v57 = vadd.f32 %v22086_v27, %v6329_v41  ;;  %17654 = vmatprep.mubr.msk.f32.mxu0 %vm1086_vm0, %v572_v26  ;;  %v15556_v50 = vpop.f32.mrb[23].mxu1  ;;  %v10795_v49 = vadd.f32 %v15519_v40, %v22308_v6  ;;  %v575_v6 = vld [vmem:[#allocation2 + $0x1098] sm:$0xff] }
 0x45e   :  { %v9769_v31 = vmax.f32 %v6335_v9, 0.0  ;;  %v15558_v7 = vpop.f32.mrb[24].mxu1  ;;  %v10865_v34 = vadd.f32 %v15554_v24, %v10780_v18  ;;  %v15557_v56 = vadd.f32 %v15556_v50, %v15555_v58  ;;  %v10588_v58 = vld [vmem:[%s24048_s3 + $0x6c0] sm:$0xff] }
 0x45f   :  { %v9768_v54 = vmax.f32 %v6330_v57, 0.0  ;;  %v17497_v25 = vpop.f32.mrb[166].mxu0  ;;  %11718 = vmatmul.mubr.f32.gmra.mrb[102].mxu1 %v10460_v11  ;;  %v15559_v9 = vpop.f32.mrb[25].mxu1  ;;  %v10589_v11 = vld [vmem:[%s24048_s3 + $0x6c8] sm:$0xff] }
 0x460   :  { %v6345_v1 = vadd.f32 %v22086_v27, %v17497_v25  ;;  %v6339_v26 = vpop.f32.mrb[167].mxu0  ;;  %17655 = vmatmul.mubr.msk.f32.gmra.mrb[16].mxu0 %vm1086_vm0, %v573_v46  ;;  %11722 = vmatprep.mubr.f32.mxu1 %v10525_v38  ;;  %v15561_v57 = vpop.f32.mrb[26].mxu1  ;;  %v576_v38 = vld [vmem:[#allocation2 + $0x10a0] sm:$0xff]  ;;  %v15560_v40 = vadd.f32 %v15559_v9, %v15558_v7 }
 0x461   :  { %v22346_v37 = vpack.c.bf16 %v9769_v31, %v9768_v54  ;;  %v6340_v41 = vadd.f32 %v22086_v27, %v6339_v26  ;;  %17657 = vmatprep.mubr.msk.f32.mxu0 %vm1086_vm0, %v574_v42  ;;  %v15562_v25 = vpop.f32.mrb[27].mxu1  ;;  %v10870_v31 = vadd.f32 %v15557_v56, %v10785_v10  ;;  %v577_v10 = vld [vmem:[#allocation2 + $0x10a8] sm:$0xff] }
 0x462   :  { %v9771_v46 = vmax.f32 %v6345_v1, 0.0  ;;  %v15596_v24 = vpop.f32.mrb[28].mxu1  ;;  %v10875_v42 = vadd.f32 %v15560_v40, %v10790_v0  ;;  %v15563_v9 = vadd.f32 %v15562_v25, %v15561_v57  ;;  %v579_v25 = vld [vmem:[#allocation2 + $0x10b8] sm:$0xff] }
 0x463   :  { %v9770_v19 = vmax.f32 %v6340_v41, 0.0  ;;  %v17500_v18 = vpop.f32.mrb[168].mxu0  ;;  %11723 = vmatmul.mubr.f32.gmra.mrb[104].mxu1 %v10524_v5  ;;  %v15597_v50 = vpop.f32.mrb[29].mxu1  ;;  %v10399_v5 = vld [vmem:[%s24048_s3 + $0xd8] sm:$0xff] }
 0x464   :  { %v6355_v54 = vadd.f32 %v22086_v27, %v17500_v18  ;;  %v6349_v26 = vpop.f32.mrb[169].mxu0  ;;  %17658 = vmatmul.mubr.msk.f32.gmra.mrb[18].mxu0 %vm1086_vm0, %v575_v6  ;;  %11727 = vmatprep.mubr.f32.mxu1 %v10589_v11  ;;  %v15599_v41 = vpop.f32.mrb[30].mxu1  ;;  %v578_v11 = vld [vmem:[#allocation2 + $0x10b0] sm:$0xff]  ;;  %v15598_v56 = vadd.f32 %v15597_v50, %v15596_v24 }
 0x465   :  { %v22358_v1 = vpack.c.bf16 %v9771_v46, %v9770_v19  ;;  %v6350_v7 = vadd.f32 %v22086_v27, %v6349_v26  ;;  %17660 = vmatprep.mubr.msk.f32.mxu0 %vm1086_vm0, %v576_v38  ;;  %v15600_v18 = vpop.f32.mrb[31].mxu1  ;;  %v10880_v19 = vadd.f32 %v15563_v9, %v10795_v49  ;;  %v580_v49 = vld [vmem:[#allocation2 + $0x10c0] sm:$0xff] }
 0x466   :  { %v9773_v6 = vmax.f32 %v6355_v54, 0.0  ;;  %v15602_v46 = vpop.f32.mrb[32].mxu1  ;;  %v10950_v38 = vadd.f32 %v15598_v56, %v10865_v34  ;;  %v15601_v24 = vadd.f32 %v15600_v18, %v15599_v41 }
 0x467   :  { %v9772_v17 = vmax.f32 %v6350_v7, 0.0  ;;  %v17503_v0 = vpop.f32.mrb[170].mxu0  ;;  %11728 = vmatmul.mubr.f32.gmra.mrb[106].mxu1 %v10588_v58  ;;  %v15603_v12 = vpop.f32.mrb[33].mxu1 }
 0x468   :  { %v6365_v40 = vadd.f32 %v22086_v27, %v17503_v0  ;;  %v6359_v26 = vpop.f32.mrb[171].mxu0  ;;  %17661 = vmatmul.mubr.msk.f32.gmra.mrb[20].mxu0 %vm1086_vm0, %v577_v10  ;;  %11797 = vmatprep.mubr.f32.mxu1 %v10399_v5  ;;  %v15605_v54 = vpop.f32.mrb[34].mxu1  ;;  %v15604_v50 = vadd.f32 %v15603_v12, %v15602_v46  ;;  %v10955_v14 = vadd.f32 %v15601_v24, %v10870_v31  ;;  %v581_v12 = vld [vmem:[#allocation2 + $0x10c8] sm:$0xff] }
 0x469   :  { %v22367_v43 = vpack.c.bf16 %v9773_v6, %v9772_v17  ;;  %v6360_v57 = vadd.f32 %v22086_v27, %v6359_v26  ;;  %17663 = vmatprep.mubr.msk.f32.mxu0 %vm1086_vm0, %v578_v11  ;;  %v15606_v7 = vpop.f32.mrb[35].mxu1  ;;  %v9275_v17 = vadd.f32 %v22086_v27, %v22194_v32  ;;  %v9270_v31 = vadd.f32 %v22086_v27, %v22202_v16  ;;  %v582_v26 = vld [vmem:[#allocation2 + $0x10d0] sm:$0xff] }
 0x46a   :  { %v9775_v58 = vmax.f32 %v6365_v40, 0.0  ;;  %v15640_v10 = vpop.f32.mrb[36].mxu1  ;;  %v10960_v6 = vadd.f32 %v15604_v50, %v10875_v42  ;;  %v15607_v18 = vadd.f32 %v15606_v7, %v15605_v54  ;;  %v22383_v42 = vadd.f32 %v22086_v27, %v22206_v3  ;;  %v583_v3 = vld [vmem:[#allocation2 + $0x10d8] sm:$0xff] }
 0x46b   :  { %v9774_v9 = vmax.f32 %v6360_v57, 0.0  ;;  %v17506_v0 = vpop.f32.mrb[172].mxu0  ;;  %v15641_v11 = vpop.f32.mrb[37].mxu1  ;;  %v10357_v7 = vmax.f32 %v9275_v17, 0.0 }
 0x46c   :  { %v6375_v34 = vadd.f32 %v22086_v27, %v17506_v0  ;;  %v6369_v5 = vpop.f32.mrb[173].mxu0  ;;  %17664 = vmatmul.mubr.msk.f32.gmra.mrb[22].mxu0 %vm1086_vm0, %v579_v25  ;;  %v15643_v46 = vpop.f32.mrb[38].mxu1  ;;  %v15642_v57 = vadd.f32 %v15641_v11, %v15640_v10  ;;  %v10359_v17 = vmax.f32 %v22383_v42, 0.0 }
 0x46d   :  { %v22375_v41 = vpack.c.bf16 %v9775_v58, %v9774_v9  ;;  %v6370_v56 = vadd.f32 %v22086_v27, %v6369_v5  ;;  %17666 = vmatprep.mubr.msk.f32.mxu0 %vm1086_vm0, %v580_v49  ;;  %v15644_v25 = vpop.f32.mrb[39].mxu1  ;;  %v22387_v58 = vadd.f32 %v22086_v27, %v22211_v61  ;;  %v10965_v49 = vadd.f32 %v15607_v18, %v10880_v19 }
 0x46e   :  { %v9777_v40 = vmax.f32 %v6375_v34, 0.0  ;;  %v15646_v50 = vpop.f32.mrb[40].mxu1  ;;  %v11035_v9 = vadd.f32 %v15642_v57, %v10950_v38  ;;  %v10356_v5 = vmax.f32 %v9270_v31, 0.0  ;;  %v15645_v61 = vadd.f32 %v15644_v25, %v15643_v46 }
 0x46f   :  { %v9776_v24 = vmax.f32 %v6370_v56, 0.0  ;;  %v17509_v32 = vpop.f32.mrb[174].mxu0  ;;  %v15647_v0 = vpop.f32.mrb[41].mxu1  ;;  %v584_v56 = vld [vmem:[#allocation2 + $0x10e0] sm:$0xff]  ;;  %v10358_v38 = vmax.f32 %v22387_v58, 0.0  ;;  %v22401_v31 = vadd.f32 %v22086_v27, %v22219_v48  ;;  %v9290_v46 = vadd.f32 %v22086_v27, %v22228_v59 }
 0x470   :  { %v6385_v16 = vadd.f32 %v22086_v27, %v17509_v32  ;;  %v6379_v54 = vpop.f32.mrb[175].mxu0  ;;  %17667 = vmatmul.mubr.msk.f32.gmra.mrb[24].mxu0 %vm1086_vm0, %v581_v12  ;;  %v15649_v11 = vpop.f32.mrb[42].mxu1  ;;  %v15648_v18 = vadd.f32 %v15647_v0, %v15646_v50  ;;  %v11040_v12 = vadd.f32 %v15645_v61, %v10955_v14  ;;  %v585_v14 = vld [vmem:[#allocation2 + $0x10e8] sm:$0xff]  ;;  %v586_v0 = vld [vmem:[#allocation2 + $0x10f0] sm:$0xff]  ;;  %v22413_v48 = vadd.f32 %v22086_v27, %v22234_v13 }
 0x471   :  { %v22391_v10 = vpack.c.bf16 %v9777_v40, %v9776_v24  ;;  %v6380_v34 = vadd.f32 %v22086_v27, %v6379_v54  ;;  %17669 = vmatprep.mubr.msk.f32.mxu0 %vm1086_vm0, %v582_v26  ;;  %v15650_v32 = vpop.f32.mrb[43].mxu1  ;;  %v10360_v13 = vmax.f32 %v9290_v46, 0.0 }
 0x472   :  { %v9779_v19 = vmax.f32 %v6385_v16, 0.0  ;;  %v15684_v40 = vpop.f32.mrb[44].mxu1  ;;  %v11045_v26 = vadd.f32 %v15648_v18, %v10960_v6  ;;  %v22409_v16 = vpack.c.bf16 %v10357_v7, %v10356_v5 }
 0x473   :  { %v9778_v8 = vmax.f32 %v6380_v34, 0.0  ;;  %v17512_v53 = vpop.f32.mrb[176].mxu0  ;;  %v15685_v25 = vpop.f32.mrb[45].mxu1 }
 0x474   :  { %v6395_v57 = vadd.f32 %v22086_v27, %v17512_v53  ;;  %v6389_v24 = vpop.f32.mrb[177].mxu0  ;;  %17670 = vmatmul.mubr.msk.f32.gmra.mrb[26].mxu0 %vm1086_vm0, %v583_v3  ;;  %v15651_v53 = vadd.f32 %v15650_v32, %v15649_v11  ;;  %v15687_v58 = vpop.f32.mrb[46].mxu1  ;;  %v15686_v59 = vadd.f32 %v15685_v25, %v15684_v40  ;;  %v22417_v3 = vadd.f32 %v22086_v27, %v22240_v33  ;;  %v587_v33 = vld [vmem:[#allocation2 + $0x10f8] sm:$0xff] }
 0x475   :  { %v22405_v50 = vpack.c.bf16 %v9779_v19, %v9778_v8  ;;  %v6390_v42 = vadd.f32 %v22086_v27, %v6389_v24  ;;  %17672 = vmatprep.mubr.msk.f32.mxu0 %vm1086_vm0, %v584_v56  ;;  %v15688_v6 = vpop.f32.mrb[47].mxu1  ;;  %v10361_v56 = vmax.f32 %v22401_v31, 0.0  ;;  %v22424_v25 = vpack.c.bf16 %v10359_v17, %v10358_v38  ;;  %v22435_v38 = vld [vmem:[#allocation5] ss:$0 sm:$0xff] }
 0x476   :  { %v9781_v54 = vmax.f32 %v6395_v57, 0.0  ;;  %v11050_v61 = vadd.f32 %v15651_v53, %v10965_v49  ;;  %v15689_v19 = vadd.f32 %v15688_v6, %v15687_v58  ;;  %v15690_v11 = vpop.f32.mrb[48].mxu1  ;;  %v11120_v18 = vadd.f32 %v15686_v59, %v11035_v9  ;;  %v588_v53 = vld [vmem:[#allocation2 + $0x1100] sm:$0xff] }
 0x477   :  { %v9780_v34 = vmax.f32 %v6390_v42, 0.0  ;;  %v17515_v8 = vpop.f32.mrb[178].mxu0  ;;  %v15691_v32 = vpop.f32.mrb[49].mxu1  ;;  %v10363_v9 = vmax.f32 %v22413_v48, 0.0  ;;  %v22429_v31 = vadd.f32 %v22086_v27, %v22248_v55  ;;  %v10362_v17 = vmax.f32 %v22417_v3, 0.0 }
 0x478   :  { %v6405_v7 = vadd.f32 %v22086_v27, %v17515_v8  ;;  %v6399_v5 = vpop.f32.mrb[179].mxu0  ;;  %17673 = vmatmul.mubr.msk.f32.gmra.mrb[28].mxu0 %vm1086_vm0, %v585_v14  ;;  %v11125_v24 = vadd.f32 %v15689_v19, %v11040_v12  ;;  %v15693_v49 = vpop.f32.mrb[50].mxu1  ;;  %v15692_v58 = vadd.f32 %v15691_v32, %v15690_v11  ;;  %v9310_v48 = vadd.f32 %v22435_v38, %v22257_v60  ;;  %v590_v32 = vld [vmem:[#allocation2 + $0x1110] sm:$0xff] }
 0x479   :  { %v6400_v40 = vadd.f32 %v22086_v27, %v6399_v5  ;;  %17675 = vmatprep.mubr.msk.f32.mxu0 %vm1086_vm0, %v586_v0  ;;  %v18834_v57 = vpack.c.bf16 %v9781_v54, %v9780_v34  ;;  %v15694_v6 = vpop.f32.mrb[51].mxu1  ;;  %v22441_v5 = vpack.c.bf16 %v10361_v56, %v10360_v13  ;;  %v10365_v60 = vmax.f32 %v22429_v31, 0.0 }
 0x47a   :  { %v9783_v42 = vmax.f32 %v6405_v7, 0.0  ;;  %v15695_v46 = vadd.f32 %v15694_v6, %v15693_v49  ;;  %v15728_v54 = vpop.f32.mrb[52].mxu1  ;;  %v11130_v59 = vadd.f32 %v15692_v58, %v11045_v26  ;;  %v22446_v26 = vadd.f32 %v22435_v38, %v22265_v22 }
 0x47b   :  { %v9782_v14 = vmax.f32 %v6400_v40, 0.0  ;;  %v17518_v8 = vpop.f32.mrb[180].mxu0  ;;  %18835 = vmatprep.subr.bf16.mxu1 %v18834_v57  ;;  %v15729_v34 = vpop.f32.mrb[53].mxu1  ;;  %v10364_v56 = vmax.f32 %v9310_v48, 0.0  ;;  %v9320_v13 = vadd.f32 %v22435_v38, %v22267_v39 }
 0x47c   :  { %v6415_v12 = vadd.f32 %v22086_v27, %v17518_v8  ;;  %v6409_v0 = vpop.f32.mrb[181].mxu0  ;;  %17676 = vmatmul.mubr.msk.f32.gmra.mrb[30].mxu0 %vm1086_vm0, %v587_v33  ;;  %18837 = vmatpush3.bf16.msra.mxu1 %v22321_v4  ;;  %v589_v27 = vld [vmem:[#allocation2 + $0x1108] sm:$0xff]  ;;  %v11135_v11 = vadd.f32 %v15695_v46, %v11050_v61  ;;  %v15731_v7 = vpop.f32.mrb[54].mxu1  ;;  %v15730_v3 = vadd.f32 %v15729_v34, %v15728_v54  ;;  %v591_v8 = vld [vmem:[#allocation2 + $0x1118] sm:$0xff]  ;;  %v10367_v39 = vmax.f32 %v22446_v26, 0.0 }
 0x47d   :  { %v6410_v55 = vadd.f32 %v22435_v38, %v6409_v0  ;;  %17678 = vmatprep.mubr.msk.f32.mxu0 %vm1086_vm0, %v588_v53  ;;  %v18838_v19 = vpack.c.bf16 %v9783_v42, %v9782_v14  ;;  %v15732_v40 = vpop.f32.mrb[55].mxu1  ;;  %v22455_v54 = vpack.c.bf16 %v10363_v9, %v10362_v17  ;;  %v592_v0 = vld [vmem:[#allocation2 + $0x1120] sm:$0xff]  ;;  %v10366_v9 = vmax.f32 %v9320_v13, 0.0 }
 0x47e   :  { %v9785_v4 = vmax.f32 %v6415_v12, 0.0  ;;  %v15733_v49 = vadd.f32 %v15732_v40, %v15731_v7  ;;  %v15734_v42 = vpop.f32.mrb[56].mxu1  ;;  %v11205_v58 = vadd.f32 %v15730_v3, %v11120_v18  ;;  %v22460_v18 = vadd.f32 %v22435_v38, %v22271_v28  ;;  %v593_v40 = vld [vmem:[#allocation2 + $0x1128] sm:$0xff] }
 0x47f   :  { %v9784_v57 = vmax.f32 %v6410_v55, 0.0  ;;  %v17521_v33 = vpop.f32.mrb[182].mxu0  ;;  %18839 = vmatprep.subr.bf16.mxu1 %v18838_v19  ;;  %v15735_v6 = vpop.f32.mrb[57].mxu1  ;;  %v9330_v17 = vadd.f32 %v22435_v38, %v22278_v15  ;;  %v22469_v26 = vpack.c.bf16 %v10365_v60, %v10364_v56  ;;  %v9340_v56 = vadd.f32 %v22435_v38, %v22290_v44 }
 0x480   :  { %v6425_v61 = vadd.f32 %v22435_v38, %v17521_v33  ;;  %v6419_v53 = vpop.f32.mrb[183].mxu0  ;;  %17679 = vmatmul.mubr.msk.f32.gmra.mrb[32].mxu0 %vm1086_vm0, %v589_v27  ;;  %18841 = vmatpush3.bf16.msra.mxu1 %v22333_v21  ;;  %v11210_v31 = vadd.f32 %v15733_v49, %v11125_v24  ;;  %v15737_v46 = vpop.f32.mrb[58].mxu1  ;;  %v15736_v34 = vadd.f32 %v15735_v6, %v15734_v42  ;;  %v594_v42 = vld [vmem:[#allocation2 + $0x1130] sm:$0xff]  ;;  %v10369_v15 = vmax.f32 %v22460_v18, 0.0  ;;  %v596_v18 = vld [vmem:[#allocation2 + $0x1140] sm:$0xff] }
 0x481   :  { %v6420_v14 = vadd.f32 %v22435_v38, %v6419_v53  ;;  %17681 = vmatprep.mubr.msk.f32.mxu0 %vm1086_vm0, %v590_v32  ;;  %v18842_v22 = vpack.c.bf16 %v9785_v4, %v9784_v57  ;;  %v15738_v21 = vpop.f32.mrb[59].mxu1  ;;  %v10368_v60 = vmax.f32 %v9330_v17, 0.0 }
 0x482   :  { %v9787_v12 = vmax.f32 %v6425_v61, 0.0  ;;  %v15739_v19 = vadd.f32 %v15738_v21, %v15737_v46  ;;  %v15772_v27 = vpop.f32.mrb[60].mxu1  ;;  %v11215_v4 = vadd.f32 %v15736_v34, %v11130_v59  ;;  %v22474_v59 = vadd.f32 %v22435_v38, %v22288_v45 }
 0x483   :  { %v9786_v48 = vmax.f32 %v6420_v14, 0.0  ;;  %v17524_v55 = vpop.f32.mrb[184].mxu0  ;;  %18843 = vmatprep.subr.bf16.mxu1 %v18842_v22  ;;  %v15773_v32 = vpop.f32.mrb[61].mxu1 }
 0x484   :  { %v6435_v24 = vadd.f32 %v22435_v38, %v17524_v55  ;;  %v6429_v7 = vpop.f32.mrb[185].mxu0  ;;  %17682 = vmatmul.mubr.msk.f32.gmra.mrb[34].mxu0 %vm1086_vm0, %v591_v8  ;;  %18845 = vmatpush3.bf16.msra.mxu1 %v22346_v37  ;;  %v11220_v57 = vadd.f32 %v15739_v19, %v11135_v11  ;;  %v15775_v33 = vpop.f32.mrb[62].mxu1  ;;  %v15774_v61 = vadd.f32 %v15773_v32, %v15772_v27 }
 0x485   :  { %v6430_v3 = vadd.f32 %v22435_v38, %v6429_v7  ;;  %17684 = vmatprep.mubr.msk.f32.mxu0 %vm1086_vm0, %v592_v0  ;;  %v18846_v28 = vpack.c.bf16 %v9787_v12, %v9786_v48  ;;  %v15776_v37 = vpop.f32.mrb[63].mxu1  ;;  %v595_v0 = vld [vmem:[#allocation2 + $0x1138] sm:$0xff]  ;;  %v22483_v48 = vpack.c.bf16 %v10367_v39, %v10366_v9  ;;  %v10370_v39 = vmax.f32 %v9340_v56, 0.0 }
 0x486   :  { %v9789_v49 = vmax.f32 %v6435_v24, 0.0  ;;  %v15777_v6 = vadd.f32 %v15776_v37, %v15775_v33  ;;  %v15778_v14 = vpop.f32.mrb[64].mxu1  ;;  %v11290_v8 = vadd.f32 %v15774_v61, %v11205_v58  ;;  %v598_v37 = vld [vmem:[#allocation2 + $0x1150] sm:$0xff] }
 0x487   :  { %v9788_v53 = vmax.f32 %v6430_v3, 0.0  ;;  %v17527_v13 = vpop.f32.mrb[186].mxu0  ;;  %18847 = vmatprep.subr.bf16.mxu1 %v18846_v28  ;;  %v15779_v46 = vpop.f32.mrb[65].mxu1 }
 0x488   :  { %v6445_v11 = vadd.f32 %v22435_v38, %v17527_v13  ;;  %v6439_v22 = vpop.f32.mrb[187].mxu0  ;;  %17685 = vmatmul.mubr.msk.f32.gmra.mrb[36].mxu0 %vm1086_vm0, %v593_v40  ;;  %18849 = vmatpush3.bf16.msra.mxu1 %v22358_v1  ;;  %v11295_v34 = vadd.f32 %v15777_v6, %v11210_v31  ;;  %v15781_v21 = vpop.f32.mrb[66].mxu1  ;;  %v15780_v19 = vadd.f32 %v15779_v46, %v15778_v14  ;;  %v10371_v31 = vmax.f32 %v22474_v59, 0.0  ;;  %v597_v40 = vld [vmem:[#allocation2 + $0x1148] sm:$0xff] }
 0x489   :  { %v6440_v12 = vadd.f32 %v22435_v38, %v6439_v22  ;;  %17687 = vmatprep.mubr.msk.f32.mxu0 %vm1086_vm0, %v594_v42  ;;  %v18850_v45 = vpack.c.bf16 %v9789_v49, %v9788_v53  ;;  %v15782_v1 = vpop.f32.mrb[67].mxu1  ;;  %v22491_v42 = vpack.c.bf16 %v10369_v15, %v10368_v60  ;;  %v599_v60 = vld [vmem:[#allocation2 + $0x1158] sm:$0xff] }
 0x48a   :  { %v9791_v55 = vmax.f32 %v6445_v11, 0.0  ;;  %v15783_v44 = vadd.f32 %v15782_v1, %v15781_v21  ;;  %v15816_v58 = vpop.f32.mrb[68].mxu1  ;;  %v11300_v9 = vadd.f32 %v15780_v19, %v11215_v4 }
 0x48b   :  { %v9790_v27 = vmax.f32 %v6440_v12, 0.0  ;;  %v17530_v24 = vpop.f32.mrb[188].mxu0  ;;  %18851 = vmatprep.subr.bf16.mxu1 %v18850_v45  ;;  %v15817_v32 = vpop.f32.mrb[69].mxu1  ;;  %v22498_v12 = vpack.c.bf16 %v10371_v31, %v10370_v39 }
 0x48c   :  { %v6455_v7 = vadd.f32 %v22435_v38, %v17530_v24  ;;  %v6449_v17 = vpop.f32.mrb[189].mxu0  ;;  %17688 = vmatmul.mubr.msk.f32.gmra.mrb[38].mxu0 %vm1086_vm0, %v595_v0  ;;  %18853 = vmatpush3.bf16.msra.mxu1 %v22367_v43  ;;  %v11305_v33 = vadd.f32 %v15783_v44, %v11220_v57  ;;  %v15819_v49 = vpop.f32.mrb[70].mxu1  ;;  %v15818_v53 = vadd.f32 %v15817_v32, %v15816_v58  ;;  %v600_v0 = vld [vmem:[#allocation2 + $0x1160] sm:$0xff] }
 0x48d   :  { %v6450_v3 = vadd.f32 %v22435_v38, %v6449_v17  ;;  %17690 = vmatprep.mubr.msk.f32.mxu0 %vm1086_vm0, %v596_v18  ;;  %v18854_v28 = vpack.c.bf16 %v9791_v55, %v9790_v27  ;;  %v15820_v13 = vpop.f32.mrb[71].mxu1  ;;  %v601_v17 = vld [vmem:[#allocation2 + $0x1168] sm:$0xff] }
 0x48e   :  { %v9793_v61 = vmax.f32 %v6455_v7, 0.0  ;;  %v15822_v59 = vpop.f32.mrb[72].mxu1  ;;  %v11375_v11 = vadd.f32 %v15818_v53, %v11290_v8  ;;  %v15821_v56 = vadd.f32 %v15820_v13, %v15819_v49  ;;  %v10398_v53 = vld [vmem:[%s24048_s3 + $0xd0] sm:$0xff] }
 0x48f   :  { %v9792_v43 = vmax.f32 %v6450_v3, 0.0  ;;  %v17533_v6 = vpop.f32.mrb[190].mxu0  ;;  %18855 = vmatprep.subr.bf16.mxu1 %v18854_v28  ;;  %v15823_v57 = vpop.f32.mrb[73].mxu1 }
 0x490   :  { %v6465_v4 = vadd.f32 %v22435_v38, %v17533_v6  ;;  %v6459_v14 = vpop.f32.mrb[191].mxu0  ;;  %17691 = vmatmul.mubr.msk.f32.gmra.mrb[40].mxu0 %vm1086_vm0, %v597_v40  ;;  %18857 = vmatpush3.bf16.msra.mxu1 %v22375_v41  ;;  %v15825_v46 = vpop.f32.mrb[74].mxu1  ;;  %v15824_v21 = vadd.f32 %v15823_v57, %v15822_v59  ;;  %v11380_v41 = vadd.f32 %v15821_v56, %v11295_v34  ;;  %v602_v34 = vld [vmem:[#allocation2 + $0x1170] sm:$0xff] }
 0x491   :  { %v6460_v15 = vadd.f32 %v22435_v38, %v6459_v14  ;;  %17693 = vmatprep.mubr.msk.f32.mxu0 %vm1086_vm0, %v598_v37  ;;  %v18858_v22 = vpack.c.bf16 %v9793_v61, %v9792_v43  ;;  %v15826_v55 = vpop.f32.mrb[75].mxu1 }
 0x492   :  { %v9795_v45 = vmax.f32 %v6465_v4, 0.0  ;;  %v15860_v8 = vpop.f32.mrb[76].mxu1  ;;  %v11385_v24 = vadd.f32 %v15824_v21, %v11300_v9  ;;  %v15827_v31 = vadd.f32 %v15826_v55, %v15825_v46  ;;  %v10463_v4 = vld [vmem:[%s24048_s3 + $0x2d8] sm:$0xff]  ;;  %v10462_v21 = vld [vmem:[%s24048_s3 + $0x2d0] sm:$0xff] }
 0x493   :  { %v9794_v18 = vmax.f32 %v6460_v15, 0.0  ;;  %v17536_v19 = vpop.f32.mrb[192].mxu0  ;;  %18859 = vmatprep.subr.bf16.mxu1 %v18858_v22  ;;  %v15861_v44 = vpop.f32.mrb[77].mxu1  ;;  %v604_v15 = vld [vmem:[#allocation2 + $0x1180] sm:$0xff] }
 0x494   :  { %v6475_v1 = vadd.f32 %v22435_v38, %v17536_v19  ;;  %v6469_v27 = vpop.f32.mrb[193].mxu0  ;;  %17694 = vmatmul.mubr.msk.f32.gmra.mrb[42].mxu0 %vm1086_vm0, %v599_v60  ;;  %18861 = vmatpush3.bf16.msra.mxu1 %v22391_v10  ;;  %v15863_v39 = vpop.f32.mrb[78].mxu1  ;;  %v15862_v3 = vadd.f32 %v15861_v44, %v15860_v8  ;;  %v11390_v61 = vadd.f32 %v15827_v31, %v11305_v33  ;;  %v603_v33 = vld [vmem:[#allocation2 + $0x1178] sm:$0xff]  ;;  %v606_v44 = vld [vmem:[#allocation2 + $0x1190] sm:$0xff] }
 0x495   :  { %v6470_v58 = vadd.f32 %v22435_v38, %v6469_v27  ;;  %17696 = vmatprep.mubr.msk.f32.mxu0 %vm1086_vm0, %v600_v0  ;;  %v18862_v7 = vpack.c.bf16 %v9795_v45, %v9794_v18  ;;  %v15864_v28 = vpop.f32.mrb[79].mxu1  ;;  %v10527_v8 = vld [vmem:[%s24048_s3 + $0x4d8] sm:$0xff] }
 0x496   :  { %v9797_v32 = vmax.f32 %v6475_v1, 0.0  ;;  %v15866_v37 = vpop.f32.mrb[80].mxu1  ;;  %v22511_v13 = vadd.f32 %v15862_v3, %v11375_v11  ;;  %v15865_v14 = vadd.f32 %v15864_v28, %v15863_v39  ;;  %v10526_v39 = vld [vmem:[%s24048_s3 + $0x4d0] sm:$0xff]  ;;  %v607_v3 = vld [vmem:[#allocation2 + $0x1198] sm:$0xff] }
 0x497   :  { %v9796_v40 = vmax.f32 %v6470_v58, 0.0  ;;  %v17539_v49 = vpop.f32.mrb[194].mxu0  ;;  %18863 = vmatprep.subr.bf16.mxu1 %v18862_v7  ;;  %v15867_v43 = vpop.f32.mrb[81].mxu1  ;;  %v10591_v28 = vld [vmem:[%s24048_s3 + $0x6d8] sm:$0xff] }
 0x498   :  { %v6485_v10 = vadd.f32 %v22435_v38, %v17539_v49  ;;  %v6479_v9 = vpop.f32.mrb[195].mxu0  ;;  %17697 = vmatmul.mubr.msk.f32.gmra.mrb[44].mxu0 %vm1086_vm0, %v601_v17  ;;  %18865 = vmatpush3.bf16.msra.mxu1 %v22405_v50  ;;  %v15869_v50 = vpop.f32.mrb[82].mxu1  ;;  %v15868_v22 = vadd.f32 %v15867_v43, %v15866_v37  ;;  %v22520_v46 = vadd.f32 %v15865_v14, %v11380_v41  ;;  %v605_v41 = vld [vmem:[#allocation2 + $0x1188] sm:$0xff]  ;;  %v608_v49 = vld [vmem:[#allocation2 + $0x11a0] sm:$0xff] }
 0x499   :  { %v22513_v6 = vpack.c.bf16 %v9797_v32, %v9796_v40  ;;  %v6480_v59 = vadd.f32 %v22435_v38, %v6479_v9  ;;  %17699 = vmatprep.mubr.msk.f32.mxu0 %vm1086_vm0, %v602_v34  ;;  %v15870_v60 = vpop.f32.mrb[83].mxu1 }
 0x49a   :  { %v9799_v57 = vmax.f32 %v6485_v10, 0.0  ;;  %v22527_v55 = vadd.f32 %v15868_v22, %v11385_v24  ;;  %v15871_v1 = vadd.f32 %v15870_v60, %v15869_v50  ;;  %v610_v50 = vld [vmem:[#allocation2 + $0x11b0] sm:$0xff] }
 0x49b   :  { %v9798_v11 = vmax.f32 %v6480_v59, 0.0  ;;  %v17542_v56 = vpop.f32.mrb[196].mxu0  ;;  %11798 = vmatmul.mubr.f32.vlgmr.msra.gmra.mrb[108].mxu1 %v10398_v53  ;;  %v10590_v53 = vld [vmem:[%s24048_s3 + $0x6d0] sm:$0xff] }
 0x49c   :  { %v6495_v45 = vadd.f32 %v22435_v38, %v17542_v56  ;;  %v6489_v0 = vpop.f32.mrb[197].mxu0  ;;  %17700 = vmatmul.mubr.msk.f32.gmra.mrb[46].mxu0 %vm1086_vm0, %v603_v33  ;;  %11802 = vmatprep.mubr.f32.mxu1 %v10463_v4  ;;  %v22536_v17 = vadd.f32 %v15871_v1, %v11390_v61  ;;  %v609_v33 = vld [vmem:[#allocation2 + $0x11a8] sm:$0xff] }
 0x49d   :  { %v22529_v18 = vpack.c.bf16 %v9799_v57, %v9798_v11  ;;  %v6490_v19 = vadd.f32 %v22435_v38, %v6489_v0  ;;  %17702 = vmatprep.mubr.msk.f32.mxu0 %vm1086_vm0, %v604_v15  ;;  %v10401_v4 = vld [vmem:[%s24048_s3 + $0xe8] sm:$0xff] }
 0x49e   :  { %v9801_v27 = vmax.f32 %v6495_v45, 0.0  ;;  %v611_v45 = vld [vmem:[#allocation2 + $0x11b8] sm:$0xff] }
 0x49f   :  { %v9800_v58 = vmax.f32 %v6490_v19, 0.0  ;;  %v17545_v7 = vpop.f32.mrb[198].mxu0  ;;  %11803 = vmatmul.mubr.f32.gmra.mrb[110].mxu1 %v10462_v21  ;;  %v612_v21 = vld [vmem:[#allocation2 + $0x11c0] sm:$0xff] }
 0x4a0   :  { %v6505_v24 = vadd.f32 %v22435_v38, %v17545_v7  ;;  %v6499_v31 = vpop.f32.mrb[199].mxu0  ;;  %17703 = vmatmul.mubr.msk.f32.gmra.mrb[48].mxu0 %vm1086_vm0, %v605_v41  ;;  %11807 = vmatprep.mubr.f32.mxu1 %v10527_v8 }
 0x4a1   :  { %v22543_v32 = vpack.c.bf16 %v9801_v27, %v9800_v58  ;;  %v6500_v34 = vadd.f32 %v22435_v38, %v6499_v31  ;;  %17705 = vmatprep.mubr.msk.f32.mxu0 %vm1086_vm0, %v606_v44  ;;  %v613_v58 = vld [vmem:[#allocation2 + $0x11c8] sm:$0xff] }
 0x4a2   :  { %v9803_v40 = vmax.f32 %v6505_v24, 0.0  ;;  %v614_v24 = vld [vmem:[#allocation2 + $0x11d0] sm:$0xff] }
 0x4a3   :  { %v9802_v61 = vmax.f32 %v6500_v34, 0.0  ;;  %v17548_v37 = vpop.f32.mrb[200].mxu0  ;;  %11808 = vmatmul.mubr.f32.gmra.mrb[112].mxu1 %v10526_v39 }
 0x4a4   :  { %v6515_v10 = vadd.f32 %v22435_v38, %v17548_v37  ;;  %v6509_v9 = vpop.f32.mrb[201].mxu0  ;;  %17706 = vmatmul.mubr.msk.f32.gmra.mrb[50].mxu0 %vm1086_vm0, %v607_v3  ;;  %11812 = vmatprep.mubr.f32.mxu1 %v10591_v28 }
 0x4a5   :  { %v22555_v43 = vpack.c.bf16 %v9803_v40, %v9802_v61  ;;  %v6510_v59 = vadd.f32 %v22435_v38, %v6509_v9  ;;  %17708 = vmatprep.mubr.msk.f32.mxu0 %vm1086_vm0, %v608_v49 }
 0x4a6   :  { %v9805_v14 = vmax.f32 %v6515_v10, 0.0  ;;  %v615_v10 = vld [vmem:[#allocation2 + $0x11d8] sm:$0xff] }
 0x4a7   :  { %v9804_v57 = vmax.f32 %v6510_v59, 0.0  ;;  %v17551_v15 = vpop.f32.mrb[202].mxu0  ;;  %11813 = vmatmul.mubr.f32.gmra.mrb[114].mxu1 %v10590_v53  ;;  %v616_v53 = vld [vmem:[#allocation2 + $0x11e0] sm:$0xff] }
 0x4a8   :  { %v6525_v22 = vadd.f32 %v22435_v38, %v17551_v15  ;;  %v6519_v60 = vpop.f32.mrb[203].mxu0  ;;  %17709 = vmatmul.mubr.msk.f32.gmra.mrb[52].mxu0 %vm1086_vm0, %v609_v33  ;;  %11882 = vmatprep.mubr.f32.mxu1 %v10401_v4 }
 0x4a9   :  { %v22564_v11 = vpack.c.bf16 %v9805_v14, %v9804_v57  ;;  %v6520_v56 = vadd.f32 %v22435_v38, %v6519_v60  ;;  %17711 = vmatprep.mubr.msk.f32.mxu0 %vm1086_vm0, %v610_v50 }
 0x4aa   :  { %v9807_v0 = vmax.f32 %v6525_v22, 0.0 }
 0x4ab   :  { %v9806_v19 = vmax.f32 %v6520_v56, 0.0  ;;  %v17554_v41 = vpop.f32.mrb[204].mxu0 }
 0x4ac   :  { %v6535_v8 = vadd.f32 %v22435_v38, %v17554_v41  ;;  %v6529_v1 = vpop.f32.mrb[205].mxu0  ;;  %17712 = vmatmul.mubr.msk.f32.gmra.mrb[54].mxu0 %vm1086_vm0, %v611_v45  ;;  %v617_v45 = vld [vmem:[#allocation2 + $0x11e8] sm:$0xff] }
 0x4ad   :  { %v22570_v27 = vpack.c.bf16 %v9807_v0, %v9806_v19  ;;  %v6530_v44 = vadd.f32 %v22435_v38, %v6529_v1  ;;  %17714 = vmatprep.mubr.msk.f32.mxu0 %vm1086_vm0, %v612_v21 }
 0x4ae   :  { %v9809_v7 = vmax.f32 %v6535_v8, 0.0  ;;  %v15904_v31 = vpop.f32.mrb[84].mxu1 }
 0x4af   :  { %v9808_v39 = vmax.f32 %v6530_v44, 0.0  ;;  %v17557_v34 = vpop.f32.mrb[206].mxu0  ;;  %v15905_v3 = vpop.f32.mrb[85].mxu1 }
 0x4b0   :  { %v6545_v28 = vadd.f32 %v22435_v38, %v17557_v34  ;;  %v6539_v40 = vpop.f32.mrb[207].mxu0  ;;  %17715 = vmatmul.mubr.msk.f32.gmra.mrb[56].mxu0 %vm1086_vm0, %v613_v58  ;;  %v15906_v49 = vadd.f32 %v15905_v3, %v15904_v31  ;;  %v620_v3 = vld [vmem:[#allocation2 + $0x1200] sm:$0xff] }
 0x4b1   :  { %v22576_v61 = vpack.c.bf16 %v9809_v7, %v9808_v39  ;;  %v6540_v37 = vadd.f32 %v22435_v38, %v6539_v40  ;;  %17717 = vmatprep.mubr.msk.f32.mxu0 %vm1086_vm0, %v614_v24  ;;  %v619_v39 = vld [vmem:[#allocation2 + $0x11f8] sm:$0xff] }
 0x4b2   :  { %v9811_v9 = vmax.f32 %v6545_v28, 0.0  ;;  %v22581_v59 = vadd.f32 %v15906_v49, %v22511_v13  ;;  %v15907_v33 = vpop.f32.mrb[86].mxu1  ;;  %v618_v13 = vld [vmem:[#allocation2 + $0x11f0] sm:$0xff] }
 0x4b3   :  { %v9810_v4 = vmax.f32 %v6540_v37, 0.0  ;;  %v17560_v14 = vpop.f32.mrb[208].mxu0  ;;  %v15908_v50 = vpop.f32.mrb[87].mxu1 }
 0x4b4   :  { %v6555_v57 = vadd.f32 %v22435_v38, %v17560_v14  ;;  %v6549_v15 = vpop.f32.mrb[209].mxu0  ;;  %17718 = vmatmul.mubr.msk.f32.gmra.mrb[58].mxu0 %vm1086_vm0, %v615_v10  ;;  %v15909_v22 = vadd.f32 %v15908_v50, %v15907_v33  ;;  %v622_v50 = vld [vmem:[#allocation2 + $0x1210] sm:$0xff] }
 0x4b5   :  { %v22585_v60 = vpack.c.bf16 %v9811_v9, %v9810_v4  ;;  %v6550_v56 = vadd.f32 %v22435_v38, %v6549_v15  ;;  %17720 = vmatprep.mubr.msk.f32.mxu0 %vm1086_vm0, %v616_v53 }
 0x4b6   :  { %v9813_v0 = vmax.f32 %v6555_v57, 0.0  ;;  %v22590_v21 = vadd.f32 %v15909_v22, %v22520_v46  ;;  %v15910_v19 = vpop.f32.mrb[88].mxu1 }
 0x4b7   :  { %v9812_v41 = vmax.f32 %v6550_v56, 0.0  ;;  %v17563_v8 = vpop.f32.mrb[210].mxu0  ;;  %v15911_v1 = vpop.f32.mrb[89].mxu1 }
 0x4b8   :  { %v6565_v44 = vadd.f32 %v22435_v38, %v17563_v8  ;;  %v6559_v58 = vpop.f32.mrb[211].mxu0  ;;  %17721 = vmatmul.mubr.msk.f32.gmra.mrb[60].mxu0 %vm1086_vm0, %v617_v45  ;;  %v15912_v7 = vadd.f32 %v15911_v1, %v15910_v19 }
 0x4b9   :  { %v6560_v24 = vadd.f32 %v22435_v38, %v6559_v58  ;;  %17723 = vmatprep.mubr.msk.f32.mxu0 %vm1086_vm0, %v618_v13  ;;  %v18866_v31 = vpack.c.bf16 %v9813_v0, %v9812_v41  ;;  %v623_v13 = vld [vmem:[#allocation2 + $0x1218] sm:$0xff]  ;;  %v624_v41 = vld [vmem:[#allocation2 + $0x1220] sm:$0xff] }
 0x4ba   :  { %v9815_v34 = vmax.f32 %v6565_v44, 0.0  ;;  %v22597_v46 = vadd.f32 %v15912_v7, %v22527_v55  ;;  %v15913_v28 = vpop.f32.mrb[90].mxu1  ;;  %v621_v55 = vld [vmem:[#allocation2 + $0x1208] sm:$0xff] }
 0x4bb   :  { %v9814_v40 = vmax.f32 %v6560_v24, 0.0  ;;  %v17566_v49 = vpop.f32.mrb[212].mxu0  ;;  %18867 = vmatprep.subr.bf16.mxu1 %v18866_v31  ;;  %v15914_v37 = vpop.f32.mrb[91].mxu1  ;;  %v625_v7 = vld [vmem:[#allocation2 + $0x1228] sm:$0xff]  ;;  %v626_v31 = vld [vmem:[#allocation2 + $0x1230] sm:$0xff] }
 0x4bc   :  { %v6575_v10 = vadd.f32 %v22435_v38, %v17566_v49  ;;  %v6569_v9 = vpop.f32.mrb[213].mxu0  ;;  %17724 = vmatmul.mubr.msk.f32.gmra.mrb[62].mxu0 %vm1086_vm0, %v619_v39  ;;  %18869 = vmatpush3.bf16.msra.mxu1 %v22513_v6  ;;  %v15915_v53 = vadd.f32 %v15914_v37, %v15913_v28  ;;  %v627_v49 = vld [vmem:[#allocation2 + $0x1238] sm:$0xff] }
 0x4bd   :  { %v6570_v33 = vadd.f32 %v22435_v38, %v6569_v9  ;;  %17726 = vmatprep.mubr.msk.f32.mxu0 %vm1086_vm0, %v620_v3  ;;  %v18870_v4 = vpack.c.bf16 %v9815_v34, %v9814_v40 }
 0x4be   :  { %v9817_v14 = vmax.f32 %v6575_v10, 0.0  ;;  %v22605_v57 = vadd.f32 %v15915_v53, %v22536_v17  ;;  %v628_v10 = vld [vmem:[#allocation2 + $0x1240] sm:$0xff] }
 0x4bf   :  { %v9816_v15 = vmax.f32 %v6570_v33, 0.0  ;;  %v17569_v22 = vpop.f32.mrb[214].mxu0  ;;  %18871 = vmatprep.subr.bf16.mxu1 %v18870_v4 }
 0x4c0   :  { %v6585_v56 = vadd.f32 %v22435_v38, %v17569_v22  ;;  %v6579_v45 = vpop.f32.mrb[215].mxu0  ;;  %17727 = vmatmul.mubr.msk.f32.gmra.mrb[64].mxu0 %vm1086_vm0, %v621_v55  ;;  %18873 = vmatpush3.bf16.msra.mxu1 %v22529_v18 }
 0x4c1   :  { %v6580_v6 = vadd.f32 %v22435_v38, %v6579_v45  ;;  %17729 = vmatprep.mubr.msk.f32.mxu0 %vm1086_vm0, %v622_v50  ;;  %v18874_v0 = vpack.c.bf16 %v9817_v14, %v9816_v15  ;;  %v629_v14 = vld [vmem:[#allocation2 + $0x1248] sm:$0xff]  ;;  %v630_v15 = vld [vmem:[#allocation2 + $0x1250] sm:$0xff] }
 0x4c2   :  { %v9819_v19 = vmax.f32 %v6585_v56, 0.0 }
 0x4c3   :  { %v9818_v17 = vmax.f32 %v6580_v6, 0.0  ;;  %v17572_v8 = vpop.f32.mrb[216].mxu0  ;;  %18875 = vmatprep.subr.bf16.mxu1 %v18874_v0 }
 0x4c4   :  { %v6595_v1 = vadd.f32 %v22435_v38, %v17572_v8  ;;  %v6589_v44 = vpop.f32.mrb[217].mxu0  ;;  %17730 = vmatmul.mubr.msk.f32.gmra.mrb[66].mxu0 %vm1086_vm0, %v623_v13  ;;  %18877 = vmatpush3.bf16.msra.mxu1 %v22543_v32  ;;  %v631_v13 = vld [vmem:[#allocation2 + $0x1258] sm:$0xff] }
 0x4c5   :  { %v6590_v18 = vadd.f32 %v22435_v38, %v6589_v44  ;;  %17732 = vmatprep.mubr.msk.f32.mxu0 %vm1086_vm0, %v624_v41  ;;  %v18878_v58 = vpack.c.bf16 %v9819_v19, %v9818_v17  ;;  %v632_v41 = vld [vmem:[#allocation2 + $0x1260] sm:$0xff] }
 0x4c6   :  { %v9821_v24 = vmax.f32 %v6595_v1, 0.0 }
 0x4c7   :  { %v9820_v39 = vmax.f32 %v6590_v18, 0.0  ;;  %v17575_v34 = vpop.f32.mrb[218].mxu0  ;;  %18879 = vmatprep.subr.bf16.mxu1 %v18878_v58  ;;  %v633_v58 = vld [vmem:[#allocation2 + $0x1268] sm:$0xff] }
 0x4c8   :  { %v6605_v3 = vadd.f32 %v22435_v38, %v17575_v34  ;;  %v6599_v28 = vpop.f32.mrb[219].mxu0  ;;  %17733 = vmatmul.mubr.msk.f32.gmra.mrb[68].mxu0 %vm1086_vm0, %v625_v7  ;;  %18881 = vmatpush3.bf16.msra.mxu1 %v22555_v43 }
 0x4c9   :  { %v6600_v32 = vadd.f32 %v22435_v38, %v6599_v28  ;;  %17735 = vmatprep.mubr.msk.f32.mxu0 %vm1086_vm0, %v626_v31  ;;  %v18882_v40 = vpack.c.bf16 %v9821_v24, %v9820_v39  ;;  %v634_v24 = vld [vmem:[#allocation2 + $0x1270] sm:$0xff] }
 0x4ca   :  { %v9823_v37 = vmax.f32 %v6605_v3, 0.0 }
 0x4cb   :  { %v9822_v9 = vmax.f32 %v6600_v32, 0.0  ;;  %v17578_v53 = vpop.f32.mrb[220].mxu0  ;;  %18883 = vmatprep.subr.bf16.mxu1 %v18882_v40  ;;  %v635_v40 = vld [vmem:[#allocation2 + $0x1278] sm:$0xff] }
 0x4cc   :  { %v6615_v33 = vadd.f32 %v22435_v38, %v17578_v53  ;;  %v6609_v4 = vpop.f32.mrb[221].mxu0  ;;  %17736 = vmatmul.mubr.msk.f32.gmra.mrb[70].mxu0 %vm1086_vm0, %v627_v49  ;;  %18885 = vmatpush3.bf16.msra.mxu1 %v22564_v11  ;;  %v10465_v49 = vld [vmem:[%s24048_s3 + $0x2e8] sm:$0xff] }
 0x4cd   :  { %v6610_v43 = vadd.f32 %v22435_v38, %v6609_v4  ;;  %17738 = vmatprep.mubr.msk.f32.mxu0 %vm1086_vm0, %v628_v10  ;;  %v18886_v55 = vpack.c.bf16 %v9823_v37, %v9822_v9  ;;  %v636_v10 = vld [vmem:[#allocation2 + $0x1280] sm:$0xff] }
 0x4ce   :  { %v9825_v50 = vmax.f32 %v6615_v33, 0.0  ;;  %v10464_v4 = vld [vmem:[%s24048_s3 + $0x2e0] sm:$0xff] }
 0x4cf   :  { %v9824_v22 = vmax.f32 %v6610_v43, 0.0  ;;  %v17581_v56 = vpop.f32.mrb[222].mxu0  ;;  %18887 = vmatprep.subr.bf16.mxu1 %v18886_v55 }
 0x4d0   :  { %v6625_v45 = vadd.f32 %v22435_v38, %v17581_v56  ;;  %v6619_v6 = vpop.f32.mrb[223].mxu0  ;;  %17739 = vmatmul.mubr.msk.f32.gmra.mrb[72].mxu0 %vm1086_vm0, %v629_v14  ;;  %18889 = vmatpush3.bf16.msra.mxu1 %v22570_v27  ;;  %v637_v14 = vld [vmem:[#allocation2 + $0x1288] sm:$0xff] }
 0x4d1   :  { %v6620_v11 = vadd.f32 %v22435_v38, %v6619_v6  ;;  %17741 = vmatprep.mubr.msk.f32.mxu0 %vm1086_vm0, %v630_v15  ;;  %v18890_v0 = vpack.c.bf16 %v9825_v50, %v9824_v22  ;;  %v10529_v50 = vld [vmem:[%s24048_s3 + $0x4e8] sm:$0xff]  ;;  %v638_v22 = vld [vmem:[#allocation2 + $0x1290] sm:$0xff] }
 0x4d2   :  { %v9827_v19 = vmax.f32 %v6625_v45, 0.0 }
 0x4d3   :  { %v9826_v17 = vmax.f32 %v6620_v11, 0.0  ;;  %v17584_v8 = vpop.f32.mrb[224].mxu0  ;;  %18891 = vmatprep.subr.bf16.mxu1 %v18890_v0  ;;  %v10528_v0 = vld [vmem:[%s24048_s3 + $0x4e0] sm:$0xff] }
 0x4d4   :  { %v6635_v1 = vadd.f32 %v22435_v38, %v17584_v8  ;;  %v6629_v44 = vpop.f32.mrb[225].mxu0  ;;  %17742 = vmatmul.mubr.msk.f32.gmra.mrb[74].mxu0 %vm1086_vm0, %v631_v13  ;;  %18893 = vmatpush3.bf16.msra.mxu1 %v22576_v61  ;;  %v10400_v61 = vld [vmem:[%s24048_s3 + $0xe0] sm:$0xff] }
 0x4d5   :  { %v6630_v27 = vadd.f32 %v22435_v38, %v6629_v44  ;;  %17744 = vmatprep.mubr.msk.f32.mxu0 %vm1086_vm0, %v632_v41  ;;  %v18894_v18 = vpack.c.bf16 %v9827_v19, %v9826_v17  ;;  %v639_v41 = vld [vmem:[#allocation2 + $0x1298] sm:$0xff]  ;;  %v10593_v17 = vld [vmem:[%s24048_s3 + $0x6e8] sm:$0xff] }
 0x4d6   :  { %v9829_v7 = vmax.f32 %v6635_v1, 0.0  ;;  %v640_v1 = vld [vmem:[#allocation2 + $0x12a0] sm:$0xff] }
 0x4d7   :  { %v9828_v31 = vmax.f32 %v6630_v27, 0.0  ;;  %v17587_v39 = vpop.f32.mrb[226].mxu0  ;;  %18895 = vmatprep.subr.bf16.mxu1 %v18894_v18 }
 0x4d8   :  { %v6645_v34 = vadd.f32 %v22435_v38, %v17587_v39  ;;  %v6639_v3 = vpop.f32.mrb[227].mxu0  ;;  %17745 = vmatmul.mubr.msk.f32.gmra.mrb[76].mxu0 %vm1086_vm0, %v633_v58  ;;  %18897 = vmatpush3.bf16.msra.mxu1 %v22585_v60  ;;  %v641_v39 = vld [vmem:[#allocation2 + $0x12a8] sm:$0xff] }
 0x4d9   :  { %v22643_v28 = vpack.c.bf16 %v9829_v7, %v9828_v31  ;;  %v6640_v32 = vadd.f32 %v22435_v38, %v6639_v3  ;;  %17747 = vmatprep.mubr.msk.f32.mxu0 %vm1086_vm0, %v634_v24  ;;  %v10592_v7 = vld [vmem:[%s24048_s3 + $0x6e0] sm:$0xff] }
 0x4da   :  { %v9831_v37 = vmax.f32 %v6645_v34, 0.0  ;;  %v10403_v34 = vld [vmem:[%s24048_s3 + $0xf8] sm:$0xff] }
 0x4db   :  { %v9830_v9 = vmax.f32 %v6640_v32, 0.0  ;;  %v17590_v53 = vpop.f32.mrb[228].mxu0  ;;  %11883 = vmatmul.mubr.f32.vlgmr.msra.gmra.mrb[116].mxu1 %v10400_v61  ;;  %v642_v61 = vld [vmem:[#allocation2 + $0x12b0] sm:$0xff] }
 0x4dc   :  { %v6655_v60 = vadd.f32 %v22435_v38, %v17590_v53  ;;  %v6649_v33 = vpop.f32.mrb[229].mxu0  ;;  %17748 = vmatmul.mubr.msk.f32.gmra.mrb[78].mxu0 %vm1086_vm0, %v635_v40  ;;  %11887 = vmatprep.mubr.f32.mxu1 %v10465_v49  ;;  %v643_v53 = vld [vmem:[#allocation2 + $0x12b8] sm:$0xff] }
 0x4dd   :  { %v22655_v43 = vpack.c.bf16 %v9831_v37, %v9830_v9  ;;  %v6650_v55 = vadd.f32 %v22435_v38, %v6649_v33  ;;  %17750 = vmatprep.mubr.msk.f32.mxu0 %vm1086_vm0, %v636_v10  ;;  %v644_v33 = vld [vmem:[#allocation2 + $0x12c0] sm:$0xff] }
 0x4de   :  { %v9833_v15 = vmax.f32 %v6655_v60, 0.0 }
 0x4df   :  { %v9832_v56 = vmax.f32 %v6650_v55, 0.0  ;;  %v17593_v45 = vpop.f32.mrb[230].mxu0  ;;  %11888 = vmatmul.mubr.f32.gmra.mrb[118].mxu1 %v10464_v4 }
 0x4e0   :  { %v6665_v6 = vadd.f32 %v22435_v38, %v17593_v45  ;;  %v6659_v11 = vpop.f32.mrb[231].mxu0  ;;  %17751 = vmatmul.mubr.msk.f32.gmra.mrb[80].mxu0 %vm1086_vm0, %v637_v14  ;;  %11892 = vmatprep.mubr.f32.mxu1 %v10529_v50 }
 0x4e1   :  { %v22667_v13 = vpack.c.bf16 %v9833_v15, %v9832_v56  ;;  %v6660_v19 = vadd.f32 %v22435_v38, %v6659_v11  ;;  %17753 = vmatprep.mubr.msk.f32.mxu0 %vm1086_vm0, %v638_v22  ;;  %v645_v56 = vld [vmem:[#allocation2 + $0x12c8] sm:$0xff] }
 0x4e2   :  { %v9835_v8 = vmax.f32 %v6665_v6, 0.0  ;;  %v646_v6 = vld [vmem:[#allocation2 + $0x12d0] sm:$0xff] }
 0x4e3   :  { %v9834_v44 = vmax.f32 %v6660_v19, 0.0  ;;  %v17596_v27 = vpop.f32.mrb[232].mxu0  ;;  %11893 = vmatmul.mubr.f32.gmra.mrb[120].mxu1 %v10528_v0 }
 0x4e4   :  { %v6675_v18 = vadd.f32 %v22435_v38, %v17596_v27  ;;  %v6669_v58 = vpop.f32.mrb[233].mxu0  ;;  %17754 = vmatmul.mubr.msk.f32.gmra.mrb[82].mxu0 %vm1086_vm0, %v639_v41  ;;  %11897 = vmatprep.mubr.f32.mxu1 %v10593_v17 }
 0x4e5   :  { %v22679_v24 = vpack.c.bf16 %v9835_v8, %v9834_v44  ;;  %v6670_v31 = vadd.f32 %v22435_v38, %v6669_v58  ;;  %17756 = vmatprep.mubr.msk.f32.mxu0 %vm1086_vm0, %v640_v1 }
 0x4e6   :  { %v9837_v3 = vmax.f32 %v6675_v18, 0.0  ;;  %v647_v18 = vld [vmem:[#allocation2 + $0x12d8] sm:$0xff] }
 0x4e7   :  { %v9836_v32 = vmax.f32 %v6670_v31, 0.0  ;;  %v17599_v40 = vpop.f32.mrb[234].mxu0  ;;  %11898 = vmatmul.mubr.f32.gmra.mrb[122].mxu1 %v10592_v7  ;;  %v648_v7 = vld [vmem:[#allocation2 + $0x12e0] sm:$0xff] }
 0x4e8   :  { %v6685_v49 = vadd.f32 %v22435_v38, %v17599_v40  ;;  %v6679_v37 = vpop.f32.mrb[235].mxu0  ;;  %17757 = vmatmul.mubr.msk.f32.gmra.mrb[84].mxu0 %vm1086_vm0, %v641_v39  ;;  %11967 = vmatprep.mubr.f32.mxu1 %v10403_v34 }
 0x4e9   :  { %v22688_v10 = vpack.c.bf16 %v9837_v3, %v9836_v32  ;;  %v6680_v9 = vadd.f32 %v22435_v38, %v6679_v37  ;;  %17759 = vmatprep.mubr.msk.f32.mxu0 %vm1086_vm0, %v642_v61 }
 0x4ea   :  { %v9839_v60 = vmax.f32 %v6685_v49, 0.0 }
 0x4eb   :  { %v9838_v4 = vmax.f32 %v6680_v9, 0.0  ;;  %v17602_v55 = vpop.f32.mrb[236].mxu0 }
 0x4ec   :  { %v6695_v14 = vadd.f32 %v22435_v38, %v17602_v55  ;;  %v6689_v50 = vpop.f32.mrb[237].mxu0  ;;  %17760 = vmatmul.mubr.msk.f32.gmra.mrb[86].mxu0 %vm1086_vm0, %v643_v53  ;;  %v649_v53 = vld [vmem:[#allocation2 + $0x12e8] sm:$0xff] }
 0x4ed   :  { %v22694_v15 = vpack.c.bf16 %v9839_v60, %v9838_v4  ;;  %v6690_v22 = vadd.f32 %v22435_v38, %v6689_v50  ;;  %17762 = vmatprep.mubr.msk.f32.mxu0 %vm1086_vm0, %v644_v33 }
 0x4ee   :  { %v9841_v45 = vmax.f32 %v6695_v14, 0.0  ;;  %v15948_v11 = vpop.f32.mrb[92].mxu1 }
 0x4ef   :  { %v9840_v0 = vmax.f32 %v6690_v22, 0.0  ;;  %v17605_v19 = vpop.f32.mrb[238].mxu0  ;;  %v15949_v41 = vpop.f32.mrb[93].mxu1  ;;  %v22716_v22 = vld [vmem:[#allocation5] ss:$0 sm:$0xff] }
 0x4f0   :  { %v6705_v17 = vadd.f32 %v22435_v38, %v17605_v19  ;;  %v6699_v8 = vpop.f32.mrb[239].mxu0  ;;  %17763 = vmatmul.mubr.msk.f32.gmra.mrb[88].mxu0 %vm1086_vm0, %v645_v56  ;;  %v15950_v1 = vadd.f32 %v15949_v41, %v15948_v11  ;;  %v652_v19 = vld [vmem:[#allocation2 + $0x1300] sm:$0xff] }
 0x4f1   :  { %v22700_v44 = vpack.c.bf16 %v9841_v45, %v9840_v0  ;;  %v6700_v27 = vadd.f32 %v22435_v38, %v6699_v8  ;;  %17765 = vmatprep.mubr.msk.f32.mxu0 %vm1086_vm0, %v646_v6  ;;  %v651_v0 = vld [vmem:[#allocation2 + $0x12f8] sm:$0xff] }
 0x4f2   :  { %v9843_v58 = vmax.f32 %v6705_v17, 0.0  ;;  %v22705_v31 = vadd.f32 %v15950_v1, %v22581_v59  ;;  %v15951_v39 = vpop.f32.mrb[94].mxu1  ;;  %v650_v59 = vld [vmem:[#allocation2 + $0x12f0] sm:$0xff] }
 0x4f3   :  { %v9842_v34 = vmax.f32 %v6700_v27, 0.0  ;;  %v17608_v3 = vpop.f32.mrb[240].mxu0  ;;  %v15952_v61 = vpop.f32.mrb[95].mxu1 }
 0x4f4   :  { %v6715_v32 = vadd.f32 %v22435_v38, %v17608_v3  ;;  %v6709_v40 = vpop.f32.mrb[241].mxu0  ;;  %17766 = vmatmul.mubr.msk.f32.gmra.mrb[90].mxu0 %vm1086_vm0, %v647_v18  ;;  %v15953_v49 = vadd.f32 %v15952_v61, %v15951_v39  ;;  %v654_v61 = vld [vmem:[#allocation2 + $0x1310] sm:$0xff] }
 0x4f5   :  { %v22709_v37 = vpack.c.bf16 %v9843_v58, %v9842_v34  ;;  %v6710_v9 = vadd.f32 %v22435_v38, %v6709_v40  ;;  %17768 = vmatprep.mubr.msk.f32.mxu0 %vm1086_vm0, %v648_v7 }
 0x4f6   :  { %v9845_v60 = vmax.f32 %v6715_v32, 0.0  ;;  %v22714_v33 = vadd.f32 %v15953_v49, %v22590_v21  ;;  %v15954_v4 = vpop.f32.mrb[96].mxu1 }
 0x4f7   :  { %v9844_v55 = vmax.f32 %v6710_v9, 0.0  ;;  %v17611_v14 = vpop.f32.mrb[242].mxu0  ;;  %v15955_v50 = vpop.f32.mrb[97].mxu1 }
 0x4f8   :  { %v6725_v56 = vadd.f32 %v22716_v22, %v17611_v14  ;;  %v6719_v45 = vpop.f32.mrb[243].mxu0  ;;  %17769 = vmatmul.mubr.msk.f32.gmra.mrb[92].mxu0 %vm1086_vm0, %v649_v53  ;;  %v15956_v38 = vadd.f32 %v15955_v50, %v15954_v4 }
 0x4f9   :  { %v6720_v6 = vadd.f32 %v22716_v22, %v6719_v45  ;;  %17771 = vmatprep.mubr.msk.f32.mxu0 %vm1086_vm0, %v650_v59  ;;  %v18898_v11 = vpack.c.bf16 %v9845_v60, %v9844_v55  ;;  %v655_v59 = vld [vmem:[#allocation2 + $0x1318] sm:$0xff]  ;;  %v656_v55 = vld [vmem:[#allocation2 + $0x1320] sm:$0xff] }
 0x4fa   :  { %v9847_v21 = vmax.f32 %v6725_v56, 0.0  ;;  %v22723_v41 = vadd.f32 %v15956_v38, %v22597_v46  ;;  %v15957_v17 = vpop.f32.mrb[98].mxu1  ;;  %v653_v46 = vld [vmem:[#allocation2 + $0x1308] sm:$0xff] }
 0x4fb   :  { %v9846_v8 = vmax.f32 %v6720_v6, 0.0  ;;  %v17614_v1 = vpop.f32.mrb[244].mxu0  ;;  %18899 = vmatprep.subr.bf16.mxu1 %v18898_v11  ;;  %v15958_v27 = vpop.f32.mrb[99].mxu1  ;;  %v657_v38 = vld [vmem:[#allocation2 + $0x1328] sm:$0xff]  ;;  %v658_v11 = vld [vmem:[#allocation2 + $0x1330] sm:$0xff] }
 0x4fc   :  { %v6735_v18 = vadd.f32 %v22716_v22, %v17614_v1  ;;  %v6729_v58 = vpop.f32.mrb[245].mxu0  ;;  %17772 = vmatmul.mubr.msk.f32.gmra.mrb[94].mxu0 %vm1086_vm0, %v651_v0  ;;  %18901 = vmatpush3.bf16.msra.mxu1 %v22643_v28  ;;  %v15959_v7 = vadd.f32 %v15958_v27, %v15957_v17  ;;  %v659_v1 = vld [vmem:[#allocation2 + $0x1338] sm:$0xff] }
 0x4fd   :  { %v6730_v39 = vadd.f32 %v22716_v22, %v6729_v58  ;;  %17774 = vmatprep.mubr.msk.f32.mxu0 %vm1086_vm0, %v652_v19  ;;  %v18902_v34 = vpack.c.bf16 %v9847_v21, %v9846_v8 }
 0x4fe   :  { %v9849_v3 = vmax.f32 %v6735_v18, 0.0  ;;  %v22731_v32 = vadd.f32 %v15959_v7, %v22605_v57  ;;  %v660_v18 = vld [vmem:[#allocation2 + $0x1340] sm:$0xff] }
 0x4ff   :  { %v9848_v40 = vmax.f32 %v6730_v39, 0.0  ;;  %v17617_v49 = vpop.f32.mrb[246].mxu0  ;;  %18903 = vmatprep.subr.bf16.mxu1 %v18902_v34 }
 0x500   :  { %v6745_v9 = vadd.f32 %v22716_v22, %v17617_v49  ;;  %v6739_v53 = vpop.f32.mrb[247].mxu0  ;;  %17775 = vmatmul.mubr.msk.f32.gmra.mrb[96].mxu0 %vm1086_vm0, %v653_v46  ;;  %18905 = vmatpush3.bf16.msra.mxu1 %v22655_v43 }
 0x501   :  { %v6740_v28 = vadd.f32 %v22716_v22, %v6739_v53  ;;  %17777 = vmatprep.mubr.msk.f32.mxu0 %vm1086_vm0, %v654_v61  ;;  %v18906_v60 = vpack.c.bf16 %v9849_v3, %v9848_v40  ;;  %v661_v3 = vld [vmem:[#allocation2 + $0x1348] sm:$0xff]  ;;  %v662_v40 = vld [vmem:[#allocation2 + $0x1350] sm:$0xff] }
 0x502   :  { %v9851_v4 = vmax.f32 %v6745_v9, 0.0 }
 0x503   :  { %v9850_v57 = vmax.f32 %v6740_v28, 0.0  ;;  %v17620_v14 = vpop.f32.mrb[248].mxu0  ;;  %18907 = vmatprep.subr.bf16.mxu1 %v18906_v60 }
 0x504   :  { %v6755_v50 = vadd.f32 %v22716_v22, %v17620_v14  ;;  %v6749_v56 = vpop.f32.mrb[249].mxu0  ;;  %17778 = vmatmul.mubr.msk.f32.gmra.mrb[98].mxu0 %vm1086_vm0, %v655_v59  ;;  %18909 = vmatpush3.bf16.msra.mxu1 %v22667_v13  ;;  %v663_v59 = vld [vmem:[#allocation2 + $0x1358] sm:$0xff] }
 0x505   :  { %v6750_v43 = vadd.f32 %v22716_v22, %v6749_v56  ;;  %17780 = vmatprep.mubr.msk.f32.mxu0 %vm1086_vm0, %v656_v55  ;;  %v18910_v45 = vpack.c.bf16 %v9851_v4, %v9850_v57  ;;  %v664_v55 = vld [vmem:[#allocation2 + $0x1360] sm:$0xff] }
 0x506   :  { %v9853_v6 = vmax.f32 %v6755_v50, 0.0 }
 0x507   :  { %v9852_v0 = vmax.f32 %v6750_v43, 0.0  ;;  %v17623_v21 = vpop.f32.mrb[250].mxu0  ;;  %18911 = vmatprep.subr.bf16.mxu1 %v18910_v45  ;;  %v665_v45 = vld [vmem:[#allocation2 + $0x1368] sm:$0xff] }
 0x508   :  { %v6765_v19 = vadd.f32 %v22716_v22, %v17623_v21  ;;  %v6759_v17 = vpop.f32.mrb[251].mxu0  ;;  %17781 = vmatmul.mubr.msk.f32.gmra.mrb[100].mxu0 %vm1086_vm0, %v657_v38  ;;  %18913 = vmatpush3.bf16.msra.mxu1 %v22679_v24 }
 0x509   :  { %v6760_v13 = vadd.f32 %v22716_v22, %v6759_v17  ;;  %17783 = vmatprep.mubr.msk.f32.mxu0 %vm1086_vm0, %v658_v11  ;;  %v18914_v8 = vpack.c.bf16 %v9853_v6, %v9852_v0  ;;  %v666_v6 = vld [vmem:[#allocation2 + $0x1370] sm:$0xff] }
 0x50a   :  { %v9855_v27 = vmax.f32 %v6765_v19, 0.0 }
 0x50b   :  { %v9854_v58 = vmax.f32 %v6760_v13, 0.0  ;;  %v17626_v7 = vpop.f32.mrb[252].mxu0  ;;  %18915 = vmatprep.subr.bf16.mxu1 %v18914_v8  ;;  %v667_v8 = vld [vmem:[#allocation2 + $0x1378] sm:$0xff] }
 0x50c   :  { %v6775_v39 = vadd.f32 %v22716_v22, %v17626_v7  ;;  %v6769_v34 = vpop.f32.mrb[253].mxu0  ;;  %17784 = vmatmul.mubr.msk.f32.gmra.mrb[102].mxu0 %vm1086_vm0, %v659_v1  ;;  %18917 = vmatpush3.bf16.msra.mxu1 %v22688_v10  ;;  %v10467_v1 = vld [vmem:[%s24048_s3 + $0x2f8] sm:$0xff] }
 0x50d   :  { %v6770_v24 = vadd.f32 %v22716_v22, %v6769_v34  ;;  %17786 = vmatprep.mubr.msk.f32.mxu0 %vm1086_vm0, %v660_v18  ;;  %v18918_v46 = vpack.c.bf16 %v9855_v27, %v9854_v58  ;;  %v668_v18 = vld [vmem:[#allocation2 + $0x1380] sm:$0xff]  ;;  %v10466_v34 = vld [vmem:[%s24048_s3 + $0x2f0] sm:$0xff] }
 0x50e   :  { %v9857_v61 = vmax.f32 %v6775_v39, 0.0 }
 0x50f   :  { %v9856_v49 = vmax.f32 %v6770_v24, 0.0  ;;  %v17629_v9 = vpop.f32.mrb[254].mxu0  ;;  %18919 = vmatprep.subr.bf16.mxu1 %v18918_v46 }
 0x510   :  { %v6785_v53 = vadd.f32 %v22716_v22, %v17629_v9  ;;  %v6779_v28 = vpop.f32.mrb[255].mxu0  ;;  %17787 = vmatmul.mubr.msk.f32.gmra.mrb[104].mxu0 %vm1086_vm0, %v661_v3  ;;  %18921 = vmatpush3.bf16.msra.mxu1 %v22694_v15  ;;  %v669_v3 = vld [vmem:[#allocation2 + $0x1388] sm:$0xff] }
 0x511   :  { %v18922_v60 = vpack.c.bf16 %v9857_v61, %v9856_v49  ;;  %v6780_v10 = vadd.f32 %v22716_v22, %v6779_v28  ;;  %17789 = vmatprep.mubr.msk.f32.mxu0 %vm1086_vm0, %v662_v40  ;;  %v10531_v61 = vld [vmem:[%s24048_s3 + $0x4f8] sm:$0xff]  ;;  %v670_v49 = vld [vmem:[#allocation2 + $0x1390] sm:$0xff] }
 0x512   :  { %v9859_v4 = vmax.f32 %v6785_v53, 0.0 }
 0x513   :  { %v9858_v57 = vmax.f32 %v6780_v10, 0.0  ;;  %v17632_v14 = vpop.f32.mrb[0].mxu0  ;;  %18923 = vmatprep.subr.bf16.mxu1 %v18922_v60  ;;  %v10530_v10 = vld [vmem:[%s24048_s3 + $0x4f0] sm:$0xff] }
 0x514   :  { %v6795_v50 = vadd.f32 %v22716_v22, %v17632_v14  ;;  %v6789_v56 = vpop.f32.mrb[1].mxu0  ;;  %17790 = vmatmul.mubr.msk.f32.gmra.mrb[106].mxu0 %vm1086_vm0, %v663_v59  ;;  %18925 = vmatpush3.bf16.msra.mxu1 %v22700_v44  ;;  %v10402_v44 = vld [vmem:[%s24048_s3 + $0xf0] sm:$0xff] }
 0x515   :  { %v18926_v43 = vpack.c.bf16 %v9859_v4, %v9858_v57  ;;  %v6790_v15 = vadd.f32 %v22716_v22, %v6789_v56  ;;  %17792 = vmatprep.mubr.msk.f32.mxu0 %vm1086_vm0, %v664_v55  ;;  %v671_v55 = vld [vmem:[#allocation2 + $0x1398] sm:$0xff] }
 0x516   :  { %v9861_v38 = vmax.f32 %v6795_v50, 0.0  ;;  %v10595_v57 = vld [vmem:[%s24048_s3 + $0x6f8] sm:$0xff]  ;;  %v672_v50 = vld [vmem:[#allocation2 + $0x13a0] sm:$0xff] }
 0x517   :  { %v9860_v11 = vmax.f32 %v6790_v15, 0.0  ;;  %v17635_v0 = vpop.f32.mrb[2].mxu0  ;;  %18927 = vmatprep.subr.bf16.mxu1 %v18926_v43 }
 0x518   :  { %v6805_v21 = vadd.f32 %v22716_v22, %v17635_v0  ;;  %v6799_v19 = vpop.f32.mrb[3].mxu0  ;;  %17793 = vmatmul.mubr.msk.f32.gmra.mrb[108].mxu0 %vm1086_vm0, %v665_v45  ;;  %18929 = vmatpush3.bf16.msra.mxu1 %v22709_v37  ;;  %v673_v0 = vld [vmem:[#allocation2 + $0x13a8] sm:$0xff] }
 0x519   :  { %v22769_v17 = vpack.c.bf16 %v9861_v38, %v9860_v11  ;;  %v6800_v13 = vadd.f32 %v22716_v22, %v6799_v19  ;;  %17795 = vmatprep.mubr.msk.f32.mxu0 %vm1086_vm0, %v666_v6  ;;  %v10594_v38 = vld [vmem:[%s24048_s3 + $0x6f0] sm:$0xff] }
 0x51a   :  { %v9863_v27 = vmax.f32 %v6805_v21, 0.0  ;;  %v10405_v21 = vld [vmem:[%s24048_s3 + $0x108] sm:$0xff] }
 0x51b   :  { %v9862_v58 = vmax.f32 %v6800_v13, 0.0  ;;  %v17638_v7 = vpop.f32.mrb[4].mxu0  ;;  %11968 = vmatmul.mubr.f32.vlgmr.msra.gmra.mrb[124].mxu1 %v10402_v44  ;;  %v674_v44 = vld [vmem:[#allocation2 + $0x13b0] sm:$0xff] }
 0x51c   :  { %v6815_v37 = vadd.f32 %v22716_v22, %v17638_v7  ;;  %v6809_v39 = vpop.f32.mrb[5].mxu0  ;;  %17796 = vmatmul.mubr.msk.f32.gmra.mrb[110].mxu0 %vm1086_vm0, %v667_v8  ;;  %11972 = vmatprep.mubr.f32.mxu1 %v10467_v1  ;;  %v675_v7 = vld [vmem:[#allocation2 + $0x13b8] sm:$0xff] }
 0x51d   :  { %v22781_v24 = vpack.c.bf16 %v9863_v27, %v9862_v58  ;;  %v6810_v46 = vadd.f32 %v22716_v22, %v6809_v39  ;;  %17798 = vmatprep.mubr.msk.f32.mxu0 %vm1086_vm0, %v668_v18  ;;  %v676_v39 = vld [vmem:[#allocation2 + $0x13c0] sm:$0xff] }
 0x51e   :  { %v9865_v40 = vmax.f32 %v6815_v37, 0.0 }
 0x51f   :  { %v9864_v9 = vmax.f32 %v6810_v46, 0.0  ;;  %v17641_v53 = vpop.f32.mrb[6].mxu0  ;;  %11973 = vmatmul.mubr.f32.gmra.mrb[126].mxu1 %v10466_v34 }
 0x520   :  { %v6825_v28 = vadd.f32 %v22716_v22, %v17641_v53  ;;  %v6819_v60 = vpop.f32.mrb[7].mxu0  ;;  %17799 = vmatmul.mubr.msk.f32.gmra.mrb[112].mxu0 %vm1086_vm0, %v669_v3  ;;  %11977 = vmatprep.mubr.f32.mxu1 %v10531_v61 }
 0x521   :  { %v22793_v59 = vpack.c.bf16 %v9865_v40, %v9864_v9  ;;  %v6820_v4 = vadd.f32 %v22716_v22, %v6819_v60  ;;  %17801 = vmatprep.mubr.msk.f32.mxu0 %vm1086_vm0, %v670_v49  ;;  %v677_v9 = vld [vmem:[#allocation2 + $0x13c8] sm:$0xff]  ;;  %v678_v60 = vld [vmem:[#allocation2 + $0x13d0] sm:$0xff] }
 0x522   :  { %v9867_v14 = vmax.f32 %v6825_v28, 0.0 }
 0x523   :  { %v9866_v56 = vmax.f32 %v6820_v4, 0.0  ;;  %v17644_v43 = vpop.f32.mrb[8].mxu0  ;;  %11978 = vmatmul.mubr.f32.gmra.mrb[128].mxu1 %v10530_v10 }
 0x524   :  { %v6835_v15 = vadd.f32 %v22716_v22, %v17644_v43  ;;  %v6829_v45 = vpop.f32.mrb[9].mxu0  ;;  %17802 = vmatmul.mubr.msk.f32.gmra.mrb[114].mxu0 %vm1086_vm0, %v671_v55  ;;  %11982 = vmatprep.mubr.f32.mxu1 %v10595_v57 }
 0x525   :  { %v22805_v6 = vpack.c.bf16 %v9867_v14, %v9866_v56  ;;  %v6830_v11 = vadd.f32 %v22716_v22, %v6829_v45  ;;  %17804 = vmatprep.mubr.msk.f32.mxu0 %vm1086_vm0, %v672_v50 }
 0x526   :  { %v9869_v19 = vmax.f32 %v6835_v15, 0.0  ;;  %v679_v15 = vld [vmem:[#allocation2 + $0x13d8] sm:$0xff] }
 0x527   :  { %v9868_v13 = vmax.f32 %v6830_v11, 0.0  ;;  %v17647_v8 = vpop.f32.mrb[10].mxu0  ;;  %11983 = vmatmul.mubr.f32.gmra.mrb[130].mxu1 %v10594_v38  ;;  %v680_v11 = vld [vmem:[#allocation2 + $0x13e0] sm:$0xff] }
 0x528   :  { %v6845_v1 = vadd.f32 %v22716_v22, %v17647_v8  ;;  %v6839_v27 = vpop.f32.mrb[11].mxu0  ;;  %17805 = vmatmul.mubr.msk.f32.gmra.mrb[116].mxu0 %vm1086_vm0, %v673_v0  ;;  %12052 = vmatprep.mubr.f32.mxu1 %v10405_v21 }
 0x529   :  { %v22814_v18 = vpack.c.bf16 %v9869_v19, %v9868_v13  ;;  %v6840_v58 = vadd.f32 %v22716_v22, %v6839_v27  ;;  %17807 = vmatprep.mubr.msk.f32.mxu0 %vm1086_vm0, %v674_v44 }
 0x52a   :  { %v9871_v37 = vmax.f32 %v6845_v1, 0.0 }
 0x52b   :  { %v9870_v34 = vmax.f32 %v6840_v58, 0.0  ;;  %v17650_v46 = vpop.f32.mrb[12].mxu0 }
 0x52c   :  { %v6855_v3 = vadd.f32 %v22716_v22, %v17650_v46  ;;  %v6849_v61 = vpop.f32.mrb[13].mxu0  ;;  %17808 = vmatmul.mubr.msk.f32.gmra.mrb[118].mxu0 %vm1086_vm0, %v675_v7  ;;  %v681_v7 = vld [vmem:[#allocation2 + $0x13e8] sm:$0xff] }
 0x52d   :  { %v22820_v40 = vpack.c.bf16 %v9871_v37, %v9870_v34  ;;  %v6850_v49 = vadd.f32 %v22716_v22, %v6849_v61  ;;  %17810 = vmatprep.mubr.msk.f32.mxu0 %vm1086_vm0, %v676_v39  ;;  %v682_v39 = vld [vmem:[#allocation2 + $0x13f0] sm:$0xff] }
 0x52e   :  { %v9873_v53 = vmax.f32 %v6855_v3, 0.0  ;;  %v15992_v28 = vpop.f32.mrb[100].mxu1 }
 0x52f   :  { %v9872_v10 = vmax.f32 %v6850_v49, 0.0  ;;  %v17653_v4 = vpop.f32.mrb[14].mxu0  ;;  %v15993_v55 = vpop.f32.mrb[101].mxu1 }
 0x530   :  { %v6865_v57 = vadd.f32 %v22716_v22, %v17653_v4  ;;  %v15994_v14 = vadd.f32 %v15993_v55, %v15992_v28  ;;  %v6859_v50 = vpop.f32.mrb[15].mxu0  ;;  %17811 = vmatmul.mubr.msk.f32.gmra.mrb[120].mxu0 %vm1086_vm0, %v677_v9  ;;  %v684_v55 = vld [vmem:[#allocation2 + $0x1400] sm:$0xff] }
 0x531   :  { %v22826_v56 = vpack.c.bf16 %v9873_v53, %v9872_v10  ;;  %v6860_v43 = vadd.f32 %v22716_v22, %v6859_v50  ;;  %17813 = vmatprep.mubr.msk.f32.mxu0 %vm1086_vm0, %v678_v60  ;;  %v683_v10 = vld [vmem:[#allocation2 + $0x13f8] sm:$0xff] }
 0x532   :  { %v9875_v45 = vmax.f32 %v6865_v57, 0.0  ;;  %v22831_v38 = vadd.f32 %v15994_v14, %v22705_v31  ;;  %v15995_v0 = vpop.f32.mrb[102].mxu1 }
 0x533   :  { %v9874_v21 = vmax.f32 %v6860_v43, 0.0  ;;  %v17656_v19 = vpop.f32.mrb[16].mxu0  ;;  %v15996_v44 = vpop.f32.mrb[103].mxu1 }
 0x534   :  { %v6875_v13 = vadd.f32 %v22716_v22, %v17656_v19  ;;  %v6869_v8 = vpop.f32.mrb[17].mxu0  ;;  %17814 = vmatmul.mubr.msk.f32.gmra.mrb[122].mxu0 %vm1086_vm0, %v679_v15  ;;  %v15997_v1 = vadd.f32 %v15996_v44, %v15995_v0 }
 0x535   :  { %v22835_v27 = vpack.c.bf16 %v9875_v45, %v9874_v21  ;;  %v6870_v58 = vadd.f32 %v22716_v22, %v6869_v8  ;;  %17816 = vmatprep.mubr.msk.f32.mxu0 %vm1086_vm0, %v680_v11 }
 0x536   :  { %v9877_v31 = vmax.f32 %v6875_v13, 0.0  ;;  %v22840_v37 = vadd.f32 %v15997_v1, %v22714_v33  ;;  %v15998_v34 = vpop.f32.mrb[104].mxu1  ;;  %v686_v13 = vld [vmem:[#allocation2 + $0x1410] sm:$0xff] }
 0x537   :  { %v9876_v46 = vmax.f32 %v6870_v58, 0.0  ;;  %v17659_v3 = vpop.f32.mrb[18].mxu0  ;;  %v15999_v61 = vpop.f32.mrb[105].mxu1 }
 0x538   :  { %v6885_v49 = vadd.f32 %v22716_v22, %v17659_v3  ;;  %v6879_v9 = vpop.f32.mrb[19].mxu0  ;;  %17817 = vmatmul.mubr.msk.f32.gmra.mrb[124].mxu0 %vm1086_vm0, %v681_v7  ;;  %v16000_v53 = vadd.f32 %v15999_v61, %v15998_v34 }
 0x539   :  { %v18930_v28 = vpack.c.bf16 %v9877_v31, %v9876_v46  ;;  %v6880_v60 = vadd.f32 %v22716_v22, %v6879_v9  ;;  %17819 = vmatprep.mubr.msk.f32.mxu0 %vm1086_vm0, %v682_v39  ;;  %v687_v39 = vld [vmem:[#allocation2 + $0x1418] sm:$0xff] }
 0x53a   :  { %v9879_v4 = vmax.f32 %v6885_v49, 0.0  ;;  %v22847_v33 = vadd.f32 %v16000_v53, %v22723_v41  ;;  %v16001_v57 = vpop.f32.mrb[106].mxu1  ;;  %v685_v41 = vld [vmem:[#allocation2 + $0x1408] sm:$0xff] }
 0x53b   :  { %v9878_v14 = vmax.f32 %v6880_v60, 0.0  ;;  %v17662_v50 = vpop.f32.mrb[20].mxu0  ;;  %18931 = vmatprep.subr.bf16.mxu1 %v18930_v28  ;;  %v16002_v43 = vpop.f32.mrb[107].mxu1  ;;  %v689_v53 = vld [vmem:[#allocation2 + $0x1428] sm:$0xff]  ;;  %v690_v60 = vld [vmem:[#allocation2 + $0x1430] sm:$0xff] }
 0x53c   :  { %v6895_v15 = vadd.f32 %v22716_v22, %v17662_v50  ;;  %v6889_v45 = vpop.f32.mrb[21].mxu0  ;;  %17820 = vmatmul.mubr.msk.f32.gmra.mrb[126].mxu0 %vm1086_vm0, %v683_v10  ;;  %18933 = vmatpush3.bf16.msra.mxu1 %v22769_v17  ;;  %v16003_v11 = vadd.f32 %v16002_v43, %v16001_v57  ;;  %v691_v50 = vld [vmem:[#allocation2 + $0x1438] sm:$0xff] }
 0x53d   :  { %v18934_v0 = vpack.c.bf16 %v9879_v4, %v9878_v14  ;;  %v6890_v21 = vadd.f32 %v22716_v22, %v6889_v45  ;;  %17822 = vmatprep.mubr.msk.f32.mxu0 %vm1086_vm0, %v684_v55 }
 0x53e   :  { %v9881_v19 = vmax.f32 %v6895_v15, 0.0  ;;  %v22855_v44 = vadd.f32 %v16003_v11, %v22731_v32  ;;  %v688_v32 = vld [vmem:[#allocation2 + $0x1420] sm:$0xff] }
 0x53f   :  { %v9880_v8 = vmax.f32 %v6890_v21, 0.0  ;;  %v17665_v1 = vpop.f32.mrb[22].mxu0  ;;  %18935 = vmatprep.subr.bf16.mxu1 %v18934_v0  ;;  %v692_v15 = vld [vmem:[#allocation2 + $0x1440] sm:$0xff] }
 0x540   :  { %v6905_v58 = vadd.f32 %v22716_v22, %v17665_v1  ;;  %v6899_v7 = vpop.f32.mrb[23].mxu0  ;;  %17823 = vmatmul.mubr.msk.f32.gmra.mrb[128].mxu0 %vm1086_vm0, %v685_v41  ;;  %18937 = vmatpush3.bf16.msra.mxu1 %v22781_v24 }
 0x541   :  { %v18938_v17 = vpack.c.bf16 %v9881_v19, %v9880_v8  ;;  %v6900_v31 = vadd.f32 %v22716_v22, %v6899_v7  ;;  %17825 = vmatprep.mubr.msk.f32.mxu0 %vm1086_vm0, %v686_v13  ;;  %v693_v19 = vld [vmem:[#allocation2 + $0x1448] sm:$0xff]  ;;  %v694_v8 = vld [vmem:[#allocation2 + $0x1450] sm:$0xff] }
 0x542   :  { %v9883_v34 = vmax.f32 %v6905_v58, 0.0 }
 0x543   :  { %v9882_v46 = vmax.f32 %v6900_v31, 0.0  ;;  %v17668_v3 = vpop.f32.mrb[24].mxu0  ;;  %18939 = vmatprep.subr.bf16.mxu1 %v18938_v17 }
 0x544   :  { %v6915_v61 = vadd.f32 %v22716_v22, %v17668_v3  ;;  %v6909_v49 = vpop.f32.mrb[25].mxu0  ;;  %17826 = vmatmul.mubr.msk.f32.gmra.mrb[130].mxu0 %vm1086_vm0, %v687_v39  ;;  %18941 = vmatpush3.bf16.msra.mxu1 %v22793_v59  ;;  %v695_v39 = vld [vmem:[#allocation2 + $0x1458] sm:$0xff] }
 0x545   :  { %v18942_v9 = vpack.c.bf16 %v9883_v34, %v9882_v46  ;;  %v6910_v24 = vadd.f32 %v22716_v22, %v6909_v49  ;;  %17828 = vmatprep.mubr.msk.f32.mxu0 %vm1086_vm0, %v688_v32  ;;  %v696_v32 = vld [vmem:[#allocation2 + $0x1460] sm:$0xff] }
 0x546   :  { %v9885_v28 = vmax.f32 %v6915_v61, 0.0 }
 0x547   :  { %v9884_v10 = vmax.f32 %v6910_v24, 0.0  ;;  %v17671_v4 = vpop.f32.mrb[26].mxu0  ;;  %18943 = vmatprep.subr.bf16.mxu1 %v18942_v9  ;;  %v697_v24 = vld [vmem:[#allocation2 + $0x1468] sm:$0xff] }
 0x548   :  { %v6925_v55 = vadd.f32 %v22716_v22, %v17671_v4  ;;  %v6919_v57 = vpop.f32.mrb[27].mxu0  ;;  %17829 = vmatmul.mubr.msk.f32.gmra.mrb[132].mxu0 %vm1086_vm0, %v689_v53  ;;  %18945 = vmatpush3.bf16.msra.mxu1 %v22805_v6 }
 0x549   :  { %v18946_v14 = vpack.c.bf16 %v9885_v28, %v9884_v10  ;;  %v6920_v59 = vadd.f32 %v22716_v22, %v6919_v57  ;;  %17831 = vmatprep.mubr.msk.f32.mxu0 %vm1086_vm0, %v690_v60  ;;  %v698_v28 = vld [vmem:[#allocation2 + $0x1470] sm:$0xff] }
 0x54a   :  { %v9887_v43 = vmax.f32 %v6925_v55, 0.0 }
 0x54b   :  { %v9886_v45 = vmax.f32 %v6920_v59, 0.0  ;;  %v17674_v11 = vpop.f32.mrb[28].mxu0  ;;  %18947 = vmatprep.subr.bf16.mxu1 %v18946_v14  ;;  %v699_v59 = vld [vmem:[#allocation2 + $0x1478] sm:$0xff] }
 0x54c   :  { %v6935_v0 = vadd.f32 %v22716_v22, %v17674_v11  ;;  %v6929_v21 = vpop.f32.mrb[29].mxu0  ;;  %17832 = vmatmul.mubr.msk.f32.gmra.mrb[134].mxu0 %vm1086_vm0, %v691_v50  ;;  %18949 = vmatpush3.bf16.msra.mxu1 %v22814_v18  ;;  %v10469_v50 = vld [vmem:[%s24048_s3 + $0x308] sm:$0xff] }
 0x54d   :  { %v18950_v41 = vpack.c.bf16 %v9887_v43, %v9886_v45  ;;  %v6930_v6 = vadd.f32 %v22716_v22, %v6929_v21  ;;  %17834 = vmatprep.mubr.msk.f32.mxu0 %vm1086_vm0, %v692_v15  ;;  %v700_v15 = vld [vmem:[#allocation2 + $0x1480] sm:$0xff] }
 0x54e   :  { %v9889_v13 = vmax.f32 %v6935_v0, 0.0  ;;  %v10468_v21 = vld [vmem:[%s24048_s3 + $0x300] sm:$0xff] }
 0x54f   :  { %v9888_v1 = vmax.f32 %v6930_v6, 0.0  ;;  %v17677_v58 = vpop.f32.mrb[30].mxu0  ;;  %18951 = vmatprep.subr.bf16.mxu1 %v18950_v41 }
 0x550   :  { %v6945_v7 = vadd.f32 %v22716_v22, %v17677_v58  ;;  %v6939_v17 = vpop.f32.mrb[31].mxu0  ;;  %17835 = vmatmul.mubr.msk.f32.gmra.mrb[136].mxu0 %vm1086_vm0, %v693_v19  ;;  %18953 = vmatpush3.bf16.msra.mxu1 %v22820_v40  ;;  %v701_v19 = vld [vmem:[#allocation2 + $0x1488] sm:$0xff] }
 0x551   :  { %v18954_v31 = vpack.c.bf16 %v9889_v13, %v9888_v1  ;;  %v6940_v18 = vadd.f32 %v22716_v22, %v6939_v17  ;;  %17837 = vmatprep.mubr.msk.f32.mxu0 %vm1086_vm0, %v694_v8  ;;  %v10533_v13 = vld [vmem:[%s24048_s3 + $0x508] sm:$0xff]  ;;  %v702_v1 = vld [vmem:[#allocation2 + $0x1490] sm:$0xff] }
 0x552   :  { %v9891_v34 = vmax.f32 %v6945_v7, 0.0 }
 0x553   :  { %v9890_v46 = vmax.f32 %v6940_v18, 0.0  ;;  %v17680_v3 = vpop.f32.mrb[32].mxu0  ;;  %18955 = vmatprep.subr.bf16.mxu1 %v18954_v31  ;;  %v10532_v18 = vld [vmem:[%s24048_s3 + $0x500] sm:$0xff] }
 0x554   :  { %v6955_v61 = vadd.f32 %v22716_v22, %v17680_v3  ;;  %v6949_v49 = vpop.f32.mrb[33].mxu0  ;;  %17838 = vmatmul.mubr.msk.f32.gmra.mrb[138].mxu0 %vm1086_vm0, %v695_v39  ;;  %18957 = vmatpush3.bf16.msra.mxu1 %v22826_v56  ;;  %v10404_v56 = vld [vmem:[%s24048_s3 + $0x100] sm:$0xff] }
 0x555   :  { %v18958_v9 = vpack.c.bf16 %v9891_v34, %v9890_v46  ;;  %v6950_v40 = vadd.f32 %v22716_v22, %v6949_v49  ;;  %17840 = vmatprep.mubr.msk.f32.mxu0 %vm1086_vm0, %v696_v32  ;;  %v703_v32 = vld [vmem:[#allocation2 + $0x1498] sm:$0xff]  ;;  %v10597_v46 = vld [vmem:[%s24048_s3 + $0x708] sm:$0xff] }
 0x556   :  { %v9893_v53 = vmax.f32 %v6955_v61, 0.0  ;;  %v704_v61 = vld [vmem:[#allocation2 + $0x14a0] sm:$0xff] }
 0x557   :  { %v9892_v60 = vmax.f32 %v6950_v40, 0.0  ;;  %v17683_v10 = vpop.f32.mrb[34].mxu0  ;;  %18959 = vmatprep.subr.bf16.mxu1 %v18958_v9 }
 0x558   :  { %v6965_v4 = vadd.f32 %v22716_v22, %v17683_v10  ;;  %v6959_v55 = vpop.f32.mrb[35].mxu0  ;;  %17841 = vmatmul.mubr.msk.f32.gmra.mrb[140].mxu0 %vm1086_vm0, %v697_v24  ;;  %18961 = vmatpush3.bf16.msra.mxu1 %v22835_v27  ;;  %v705_v10 = vld [vmem:[#allocation2 + $0x14a8] sm:$0xff] }
 0x559   :  { %v22893_v57 = vpack.c.bf16 %v9893_v53, %v9892_v60  ;;  %v6960_v14 = vadd.f32 %v22716_v22, %v6959_v55  ;;  %17843 = vmatprep.mubr.msk.f32.mxu0 %vm1086_vm0, %v698_v28  ;;  %v10596_v53 = vld [vmem:[%s24048_s3 + $0x700] sm:$0xff] }
 0x55a   :  { %v9895_v43 = vmax.f32 %v6965_v4, 0.0  ;;  %v10407_v4 = vld [vmem:[%s24048_s3 + $0x118] sm:$0xff] }
 0x55b   :  { %v9894_v45 = vmax.f32 %v6960_v14, 0.0  ;;  %v17686_v11 = vpop.f32.mrb[36].mxu0  ;;  %12053 = vmatmul.mubr.f32.vlgmr.msra.gmra.mrb[132].mxu1 %v10404_v56  ;;  %v706_v56 = vld [vmem:[#allocation2 + $0x14b0] sm:$0xff] }
 0x55c   :  { %v6975_v27 = vadd.f32 %v22716_v22, %v17686_v11  ;;  %v6969_v0 = vpop.f32.mrb[37].mxu0  ;;  %17844 = vmatmul.mubr.msk.f32.gmra.mrb[142].mxu0 %vm1086_vm0, %v699_v59  ;;  %12057 = vmatprep.mubr.f32.mxu1 %v10469_v50  ;;  %v707_v11 = vld [vmem:[#allocation2 + $0x14b8] sm:$0xff] }
 0x55d   :  { %v22905_v41 = vpack.c.bf16 %v9895_v43, %v9894_v45  ;;  %v6970_v6 = vadd.f32 %v22716_v22, %v6969_v0  ;;  %17846 = vmatprep.mubr.msk.f32.mxu0 %vm1086_vm0, %v700_v15  ;;  %v708_v0 = vld [vmem:[#allocation2 + $0x14c0] sm:$0xff] }
 0x55e   :  { %v9897_v8 = vmax.f32 %v6975_v27, 0.0 }
 0x55f   :  { %v9896_v58 = vmax.f32 %v6970_v6, 0.0  ;;  %v17689_v7 = vpop.f32.mrb[38].mxu0  ;;  %12058 = vmatmul.mubr.f32.gmra.mrb[134].mxu1 %v10468_v21 }
 0x560   :  { %v6985_v17 = vadd.f32 %v22716_v22, %v17689_v7  ;;  %v6979_v31 = vpop.f32.mrb[39].mxu0  ;;  %17847 = vmatmul.mubr.msk.f32.gmra.mrb[144].mxu0 %vm1086_vm0, %v701_v19  ;;  %12062 = vmatprep.mubr.f32.mxu1 %v10533_v13 }
 0x561   :  { %v22917_v39 = vpack.c.bf16 %v9897_v8, %v9896_v58  ;;  %v6980_v34 = vadd.f32 %v22716_v22, %v6979_v31  ;;  %17849 = vmatprep.mubr.msk.f32.mxu0 %vm1086_vm0, %v702_v1  ;;  %v709_v58 = vld [vmem:[#allocation2 + $0x14c8] sm:$0xff]  ;;  %v710_v31 = vld [vmem:[#allocation2 + $0x14d0] sm:$0xff] }
 0x562   :  { %v9899_v3 = vmax.f32 %v6985_v17, 0.0 }
 0x563   :  { %v9898_v49 = vmax.f32 %v6980_v34, 0.0  ;;  %v17692_v9 = vpop.f32.mrb[40].mxu0  ;;  %12063 = vmatmul.mubr.f32.gmra.mrb[136].mxu1 %v10532_v18 }
 0x564   :  { %v6995_v40 = vadd.f32 %v22716_v22, %v17692_v9  ;;  %v6989_v24 = vpop.f32.mrb[41].mxu0  ;;  %17850 = vmatmul.mubr.msk.f32.gmra.mrb[146].mxu0 %vm1086_vm0, %v703_v32  ;;  %12067 = vmatprep.mubr.f32.mxu1 %v10597_v46 }
 0x565   :  { %v22929_v28 = vpack.c.bf16 %v9899_v3, %v9898_v49  ;;  %v6990_v60 = vadd.f32 %v22716_v22, %v6989_v24  ;;  %17852 = vmatprep.mubr.msk.f32.mxu0 %vm1086_vm0, %v704_v61 }
 0x566   :  { %v9901_v55 = vmax.f32 %v6995_v40, 0.0  ;;  %v711_v40 = vld [vmem:[#allocation2 + $0x14d8] sm:$0xff] }
 0x567   :  { %v9900_v14 = vmax.f32 %v6990_v60, 0.0  ;;  %v17695_v59 = vpop.f32.mrb[42].mxu0  ;;  %12068 = vmatmul.mubr.f32.gmra.mrb[138].mxu1 %v10596_v53 }
 0x568   :  { %v7005_v50 = vadd.f32 %v22716_v22, %v17695_v59  ;;  %v6999_v43 = vpop.f32.mrb[43].mxu0  ;;  %17853 = vmatmul.mubr.msk.f32.gmra.mrb[148].mxu0 %vm1086_vm0, %v705_v10  ;;  %12137 = vmatprep.mubr.f32.mxu1 %v10407_v4  ;;  %v712_v10 = vld [vmem:[#allocation2 + $0x14e0] sm:$0xff] }
 0x569   :  { %v22938_v15 = vpack.c.bf16 %v9901_v55, %v9900_v14  ;;  %v7000_v45 = vadd.f32 %v22716_v22, %v6999_v43  ;;  %17855 = vmatprep.mubr.msk.f32.mxu0 %vm1086_vm0, %v706_v56 }
 0x56a   :  { %v9903_v27 = vmax.f32 %v7005_v50, 0.0 }
 0x56b   :  { %v9902_v21 = vmax.f32 %v7000_v45, 0.0  ;;  %v17698_v6 = vpop.f32.mrb[44].mxu0 }
 0x56c   :  { %v7015_v19 = vadd.f32 %v22716_v22, %v17698_v6  ;;  %v7009_v13 = vpop.f32.mrb[45].mxu0  ;;  %17856 = vmatmul.mubr.msk.f32.gmra.mrb[150].mxu0 %vm1086_vm0, %v707_v11  ;;  %v713_v11 = vld [vmem:[#allocation2 + $0x14e8] sm:$0xff] }
 0x56d   :  { %v22944_v8 = vpack.c.bf16 %v9903_v27, %v9902_v21  ;;  %v7010_v1 = vadd.f32 %v22716_v22, %v7009_v13  ;;  %17858 = vmatprep.mubr.msk.f32.mxu0 %vm1086_vm0, %v708_v0  ;;  %v714_v21 = vld [vmem:[#allocation2 + $0x14f0] sm:$0xff] }
 0x56e   :  { %v9905_v7 = vmax.f32 %v7015_v19, 0.0  ;;  %v16036_v17 = vpop.f32.mrb[108].mxu1 }
 0x56f   :  { %v9904_v18 = vmax.f32 %v7010_v1, 0.0  ;;  %v17701_v34 = vpop.f32.mrb[46].mxu0  ;;  %v16037_v32 = vpop.f32.mrb[109].mxu1 }
 0x570   :  { %v7025_v46 = vadd.f32 %v22716_v22, %v17701_v34  ;;  %v16038_v3 = vadd.f32 %v16037_v32, %v16036_v17  ;;  %v7019_v61 = vpop.f32.mrb[47].mxu0  ;;  %17859 = vmatmul.mubr.msk.f32.gmra.mrb[152].mxu0 %vm1086_vm0, %v709_v58 }
 0x571   :  { %v22950_v49 = vpack.c.bf16 %v9905_v7, %v9904_v18  ;;  %v7020_v9 = vadd.f32 %v22716_v22, %v7019_v61  ;;  %17861 = vmatprep.mubr.msk.f32.mxu0 %vm1086_vm0, %v710_v31  ;;  %v715_v18 = vld [vmem:[#allocation2 + $0x14f8] sm:$0xff] }
 0x572   :  { %v9907_v24 = vmax.f32 %v7025_v46, 0.0  ;;  %v22955_v53 = vadd.f32 %v16038_v3, %v22831_v38  ;;  %v16039_v60 = vpop.f32.mrb[110].mxu1  ;;  %v716_v46 = vld [vmem:[#allocation2 + $0x1500] sm:$0xff] }
 0x573   :  { %v9906_v4 = vmax.f32 %v7020_v9, 0.0  ;;  %v17704_v55 = vpop.f32.mrb[48].mxu0  ;;  %v16040_v56 = vpop.f32.mrb[111].mxu1 }
 0x574   :  { %v7035_v14 = vadd.f32 %v22716_v22, %v17704_v55  ;;  %v16041_v59 = vadd.f32 %v16040_v56, %v16039_v60  ;;  %v7029_v50 = vpop.f32.mrb[49].mxu0  ;;  %17862 = vmatmul.mubr.msk.f32.gmra.mrb[154].mxu0 %vm1086_vm0, %v711_v40 }
 0x575   :  { %v22959_v43 = vpack.c.bf16 %v9907_v24, %v9906_v4  ;;  %v7030_v45 = vadd.f32 %v22716_v22, %v7029_v50  ;;  %17864 = vmatprep.mubr.msk.f32.mxu0 %vm1086_vm0, %v712_v10 }
 0x576   :  { %v9909_v38 = vmax.f32 %v7035_v14, 0.0  ;;  %v22964_v27 = vadd.f32 %v16041_v59, %v22840_v37  ;;  %v16042_v0 = vpop.f32.mrb[112].mxu1  ;;  %v718_v14 = vld [vmem:[#allocation2 + $0x1510] sm:$0xff] }
 0x577   :  { %v9908_v6 = vmax.f32 %v7030_v45, 0.0  ;;  %v17707_v19 = vpop.f32.mrb[50].mxu0  ;;  %v16043_v13 = vpop.f32.mrb[113].mxu1 }
 0x578   :  { %v7045_v1 = vadd.f32 %v22716_v22, %v17707_v19  ;;  %v16044_v58 = vadd.f32 %v16043_v13, %v16042_v0  ;;  %v7039_v7 = vpop.f32.mrb[51].mxu0  ;;  %17865 = vmatmul.mubr.msk.f32.gmra.mrb[156].mxu0 %vm1086_vm0, %v713_v11  ;;  %v719_v0 = vld [vmem:[#allocation2 + $0x1518] sm:$0xff] }
 0x579   :  { %v18962_v17 = vpack.c.bf16 %v9909_v38, %v9908_v6  ;;  %v7040_v31 = vadd.f32 %v22716_v22, %v7039_v7  ;;  %17867 = vmatprep.mubr.msk.f32.mxu0 %vm1086_vm0, %v714_v21  ;;  %v721_v7 = vld [vmem:[#allocation2 + $0x1528] sm:$0xff] }
 0x57a   :  { %v9911_v34 = vmax.f32 %v7045_v1, 0.0  ;;  %v22971_v37 = vadd.f32 %v16044_v58, %v22847_v33  ;;  %v16045_v32 = vpop.f32.mrb[114].mxu1  ;;  %v717_v33 = vld [vmem:[#allocation2 + $0x1508] sm:$0xff] }
 0x57b   :  { %v9910_v3 = vmax.f32 %v7040_v31, 0.0  ;;  %v17710_v61 = vpop.f32.mrb[52].mxu0  ;;  %v16046_v9 = vpop.f32.mrb[115].mxu1  ;;  %18963 = vmatprep.subr.bf16.mxu1 %v18962_v17  ;;  %v722_v31 = vld [vmem:[#allocation2 + $0x1530] sm:$0xff] }
 0x57c   :  { %v7055_v40 = vadd.f32 %v22716_v22, %v17710_v61  ;;  %v16047_v24 = vadd.f32 %v16046_v9, %v16045_v32  ;;  %v7049_v60 = vpop.f32.mrb[53].mxu0  ;;  %17868 = vmatmul.mubr.msk.f32.gmra.mrb[158].mxu0 %vm1086_vm0, %v715_v18  ;;  %18965 = vmatpush3.bf16.msra.mxu1 %v22893_v57  ;;  %v723_v61 = vld [vmem:[#allocation2 + $0x1538] sm:$0xff] }
 0x57d   :  { %v18966_v10 = vpack.c.bf16 %v9911_v34, %v9910_v3  ;;  %v7050_v4 = vadd.f32 %v22716_v22, %v7049_v60  ;;  %17870 = vmatprep.mubr.msk.f32.mxu0 %vm1086_vm0, %v716_v46 }
 0x57e   :  { %v9913_v55 = vmax.f32 %v7055_v40, 0.0  ;;  %v22979_v56 = vadd.f32 %v16047_v24, %v22855_v44  ;;  %v720_v44 = vld [vmem:[#allocation2 + $0x1520] sm:$0xff] }
 0x57f   :  { %v9912_v59 = vmax.f32 %v7050_v4, 0.0  ;;  %v17713_v50 = vpop.f32.mrb[54].mxu0  ;;  %18967 = vmatprep.subr.bf16.mxu1 %v18966_v10  ;;  %v724_v40 = vld [vmem:[#allocation2 + $0x1540] sm:$0xff] }
 0x580   :  { %v7065_v45 = vadd.f32 %v22716_v22, %v17713_v50  ;;  %v7059_v11 = vpop.f32.mrb[55].mxu0  ;;  %17871 = vmatmul.mubr.msk.f32.gmra.mrb[160].mxu0 %vm1086_vm0, %v717_v33  ;;  %18969 = vmatpush3.bf16.msra.mxu1 %v22905_v41  ;;  %v22996_v10 = vld [vmem:[#allocation5] ss:$0 sm:$0xff] }
 0x581   :  { %v18970_v57 = vpack.c.bf16 %v9913_v55, %v9912_v59  ;;  %v7060_v38 = vadd.f32 %v22716_v22, %v7059_v11  ;;  %17873 = vmatprep.mubr.msk.f32.mxu0 %vm1086_vm0, %v718_v14  ;;  %v725_v55 = vld [vmem:[#allocation2 + $0x1548] sm:$0xff]  ;;  %v726_v59 = vld [vmem:[#allocation2 + $0x1550] sm:$0xff] }
 0x582   :  { %v9915_v21 = vmax.f32 %v7065_v45, 0.0 }
 0x583   :  { %v9914_v6 = vmax.f32 %v7060_v38, 0.0  ;;  %v17716_v19 = vpop.f32.mrb[56].mxu0  ;;  %18971 = vmatprep.subr.bf16.mxu1 %v18970_v57 }
 0x584   :  { %v7075_v13 = vadd.f32 %v22716_v22, %v17716_v19  ;;  %v7069_v1 = vpop.f32.mrb[57].mxu0  ;;  %17874 = vmatmul.mubr.msk.f32.gmra.mrb[162].mxu0 %vm1086_vm0, %v719_v0  ;;  %18973 = vmatpush3.bf16.msra.mxu1 %v22917_v39  ;;  %v727_v0 = vld [vmem:[#allocation2 + $0x1558] sm:$0xff] }
 0x585   :  { %v18974_v58 = vpack.c.bf16 %v9915_v21, %v9914_v6  ;;  %v7070_v41 = vadd.f32 %v22716_v22, %v7069_v1  ;;  %17876 = vmatprep.mubr.msk.f32.mxu0 %vm1086_vm0, %v720_v44  ;;  %v728_v44 = vld [vmem:[#allocation2 + $0x1560] sm:$0xff] }
 0x586   :  { %v9917_v17 = vmax.f32 %v7075_v13, 0.0 }
 0x587   :  { %v9916_v18 = vmax.f32 %v7070_v41, 0.0  ;;  %v17719_v34 = vpop.f32.mrb[58].mxu0  ;;  %18975 = vmatprep.subr.bf16.mxu1 %v18974_v58  ;;  %v729_v41 = vld [vmem:[#allocation2 + $0x1568] sm:$0xff] }
 0x588   :  { %v7085_v32 = vadd.f32 %v22716_v22, %v17719_v34  ;;  %v7079_v46 = vpop.f32.mrb[59].mxu0  ;;  %17877 = vmatmul.mubr.msk.f32.gmra.mrb[164].mxu0 %vm1086_vm0, %v721_v7  ;;  %18977 = vmatpush3.bf16.msra.mxu1 %v22929_v28 }
 0x589   :  { %v18978_v3 = vpack.c.bf16 %v9917_v17, %v9916_v18  ;;  %v7080_v39 = vadd.f32 %v22716_v22, %v7079_v46  ;;  %17879 = vmatprep.mubr.msk.f32.mxu0 %vm1086_vm0, %v722_v31  ;;  %v730_v17 = vld [vmem:[#allocation2 + $0x1570] sm:$0xff] }
 0x58a   :  { %v9919_v9 = vmax.f32 %v7085_v32, 0.0 }
 0x58b   :  { %v9918_v24 = vmax.f32 %v7080_v39, 0.0  ;;  %v17722_v60 = vpop.f32.mrb[60].mxu0  ;;  %18979 = vmatprep.subr.bf16.mxu1 %v18978_v3  ;;  %v731_v39 = vld [vmem:[#allocation2 + $0x1578] sm:$0xff] }
 0x58c   :  { %v7095_v4 = vadd.f32 %v22996_v10, %v17722_v60  ;;  %v7089_v33 = vpop.f32.mrb[61].mxu0  ;;  %17880 = vmatmul.mubr.msk.f32.gmra.mrb[166].mxu0 %vm1086_vm0, %v723_v61  ;;  %18981 = vmatpush3.bf16.msra.mxu1 %v22938_v15  ;;  %v10471_v61 = vld [vmem:[%s24048_s3 + $0x318] sm:$0xff] }
 0x58d   :  { %v18982_v28 = vpack.c.bf16 %v9919_v9, %v9918_v24  ;;  %v7090_v22 = vadd.f32 %v22996_v10, %v7089_v33  ;;  %17882 = vmatprep.mubr.msk.f32.mxu0 %vm1086_vm0, %v724_v40  ;;  %v732_v40 = vld [vmem:[#allocation2 + $0x1580] sm:$0xff]  ;;  %v10470_v33 = vld [vmem:[%s24048_s3 + $0x310] sm:$0xff] }
 0x58e   :  { %v9921_v14 = vmax.f32 %v7095_v4, 0.0 }
 0x58f   :  { %v9920_v50 = vmax.f32 %v7090_v22, 0.0  ;;  %v17725_v45 = vpop.f32.mrb[62].mxu0  ;;  %18983 = vmatprep.subr.bf16.mxu1 %v18982_v28 }
 0x590   :  { %v7105_v11 = vadd.f32 %v22996_v10, %v17725_v45  ;;  %v7099_v57 = vpop.f32.mrb[63].mxu0  ;;  %17883 = vmatmul.mubr.msk.f32.gmra.mrb[168].mxu0 %vm1086_vm0, %v725_v55  ;;  %18985 = vmatpush3.bf16.msra.mxu1 %v22944_v8  ;;  %v733_v55 = vld [vmem:[#allocation2 + $0x1588] sm:$0xff] }
 0x591   :  { %v18986_v38 = vpack.c.bf16 %v9921_v14, %v9920_v50  ;;  %v7100_v15 = vadd.f32 %v22996_v10, %v7099_v57  ;;  %17885 = vmatprep.mubr.msk.f32.mxu0 %vm1086_vm0, %v726_v59  ;;  %v10535_v14 = vld [vmem:[%s24048_s3 + $0x518] sm:$0xff]  ;;  %v734_v50 = vld [vmem:[#allocation2 + $0x1590] sm:$0xff] }
 0x592   :  { %v9923_v21 = vmax.f32 %v7105_v11, 0.0 }
 0x593   :  { %v9922_v6 = vmax.f32 %v7100_v15, 0.0  ;;  %v17728_v19 = vpop.f32.mrb[64].mxu0  ;;  %18987 = vmatprep.subr.bf16.mxu1 %v18986_v38  ;;  %v10534_v15 = vld [vmem:[%s24048_s3 + $0x510] sm:$0xff] }
 0x594   :  { %v7115_v13 = vadd.f32 %v22996_v10, %v17728_v19  ;;  %v7109_v1 = vpop.f32.mrb[65].mxu0  ;;  %17886 = vmatmul.mubr.msk.f32.gmra.mrb[170].mxu0 %vm1086_vm0, %v727_v0  ;;  %18989 = vmatpush3.bf16.msra.mxu1 %v22950_v49  ;;  %v10406_v49 = vld [vmem:[%s24048_s3 + $0x110] sm:$0xff] }
 0x595   :  { %v18990_v58 = vpack.c.bf16 %v9923_v21, %v9922_v6  ;;  %v7110_v8 = vadd.f32 %v22996_v10, %v7109_v1  ;;  %17888 = vmatprep.mubr.msk.f32.mxu0 %vm1086_vm0, %v728_v44  ;;  %v735_v44 = vld [vmem:[#allocation2 + $0x1598] sm:$0xff] }
 0x596   :  { %v9925_v7 = vmax.f32 %v7115_v13, 0.0  ;;  %v10599_v6 = vld [vmem:[%s24048_s3 + $0x718] sm:$0xff]  ;;  %v736_v13 = vld [vmem:[#allocation2 + $0x15a0] sm:$0xff] }
 0x597   :  { %v9924_v31 = vmax.f32 %v7110_v8, 0.0  ;;  %v17731_v18 = vpop.f32.mrb[66].mxu0  ;;  %18991 = vmatprep.subr.bf16.mxu1 %v18990_v58 }
 0x598   :  { %v7125_v34 = vadd.f32 %v22996_v10, %v17731_v18  ;;  %v7119_v32 = vpop.f32.mrb[67].mxu0  ;;  %17889 = vmatmul.mubr.msk.f32.gmra.mrb[172].mxu0 %vm1086_vm0, %v729_v41  ;;  %18993 = vmatpush3.bf16.msra.mxu1 %v22959_v43  ;;  %v737_v18 = vld [vmem:[#allocation2 + $0x15a8] sm:$0xff] }
 0x599   :  { %v23019_v46 = vpack.c.bf16 %v9925_v7, %v9924_v31  ;;  %v7120_v3 = vadd.f32 %v22996_v10, %v7119_v32  ;;  %17891 = vmatprep.mubr.msk.f32.mxu0 %vm1086_vm0, %v730_v17  ;;  %v10598_v7 = vld [vmem:[%s24048_s3 + $0x710] sm:$0xff] }
 0x59a   :  { %v9927_v9 = vmax.f32 %v7125_v34, 0.0  ;;  %v10409_v34 = vld [vmem:[%s24048_s3 + $0x128] sm:$0xff] }
 0x59b   :  { %v9926_v24 = vmax.f32 %v7120_v3, 0.0  ;;  %v17734_v60 = vpop.f32.mrb[68].mxu0  ;;  %12138 = vmatmul.mubr.f32.vlgmr.msra.gmra.mrb[140].mxu1 %v10406_v49  ;;  %v738_v49 = vld [vmem:[#allocation2 + $0x15b0] sm:$0xff] }
 0x59c   :  { %v7135_v43 = vadd.f32 %v22996_v10, %v17734_v60  ;;  %v7129_v4 = vpop.f32.mrb[69].mxu0  ;;  %17892 = vmatmul.mubr.msk.f32.gmra.mrb[174].mxu0 %vm1086_vm0, %v731_v39  ;;  %12142 = vmatprep.mubr.f32.mxu1 %v10471_v61  ;;  %v739_v60 = vld [vmem:[#allocation2 + $0x15b8] sm:$0xff] }
 0x59d   :  { %v23031_v28 = vpack.c.bf16 %v9927_v9, %v9926_v24  ;;  %v7130_v22 = vadd.f32 %v22996_v10, %v7129_v4  ;;  %17894 = vmatprep.mubr.msk.f32.mxu0 %vm1086_vm0, %v732_v40  ;;  %v740_v4 = vld [vmem:[#allocation2 + $0x15c0] sm:$0xff] }
 0x59e   :  { %v9929_v59 = vmax.f32 %v7135_v43, 0.0 }
 0x59f   :  { %v9928_v45 = vmax.f32 %v7130_v22, 0.0  ;;  %v17737_v11 = vpop.f32.mrb[70].mxu0  ;;  %12143 = vmatmul.mubr.f32.gmra.mrb[142].mxu1 %v10470_v33 }
 0x5a0   :  { %v7145_v57 = vadd.f32 %v22996_v10, %v17737_v11  ;;  %v7139_v38 = vpop.f32.mrb[71].mxu0  ;;  %17895 = vmatmul.mubr.msk.f32.gmra.mrb[176].mxu0 %vm1086_vm0, %v733_v55  ;;  %12147 = vmatprep.mubr.f32.mxu1 %v10535_v14 }
 0x5a1   :  { %v23043_v0 = vpack.c.bf16 %v9929_v59, %v9928_v45  ;;  %v7140_v21 = vadd.f32 %v22996_v10, %v7139_v38  ;;  %17897 = vmatprep.mubr.msk.f32.mxu0 %vm1086_vm0, %v734_v50  ;;  %v741_v45 = vld [vmem:[#allocation2 + $0x15c8] sm:$0xff]  ;;  %v742_v38 = vld [vmem:[#allocation2 + $0x15d0] sm:$0xff] }
 0x5a2   :  { %v9931_v19 = vmax.f32 %v7145_v57, 0.0 }
 0x5a3   :  { %v9930_v1 = vmax.f32 %v7140_v21, 0.0  ;;  %v17740_v58 = vpop.f32.mrb[72].mxu0  ;;  %12148 = vmatmul.mubr.f32.gmra.mrb[144].mxu1 %v10534_v15 }
 0x5a4   :  { %v7155_v8 = vadd.f32 %v22996_v10, %v17740_v58  ;;  %v7149_v41 = vpop.f32.mrb[73].mxu0  ;;  %17898 = vmatmul.mubr.msk.f32.gmra.mrb[178].mxu0 %vm1086_vm0, %v735_v44  ;;  %12152 = vmatprep.mubr.f32.mxu1 %v10599_v6 }
 0x5a5   :  { %v23055_v17 = vpack.c.bf16 %v9931_v19, %v9930_v1  ;;  %v7150_v31 = vadd.f32 %v22996_v10, %v7149_v41  ;;  %17900 = vmatprep.mubr.msk.f32.mxu0 %vm1086_vm0, %v736_v13 }
 0x5a6   :  { %v9933_v32 = vmax.f32 %v7155_v8, 0.0  ;;  %v743_v8 = vld [vmem:[#allocation2 + $0x15d8] sm:$0xff] }
 0x5a7   :  { %v9932_v3 = vmax.f32 %v7150_v31, 0.0  ;;  %v17743_v39 = vpop.f32.mrb[74].mxu0  ;;  %12153 = vmatmul.mubr.f32.gmra.mrb[146].mxu1 %v10598_v7 }
 0x5a8   :  { %v7165_v61 = vadd.f32 %v22996_v10, %v17743_v39  ;;  %v7159_v9 = vpop.f32.mrb[75].mxu0  ;;  %17901 = vmatmul.mubr.msk.f32.gmra.mrb[180].mxu0 %vm1086_vm0, %v737_v18  ;;  %12222 = vmatprep.mubr.f32.mxu1 %v10409_v34  ;;  %v744_v18 = vld [vmem:[#allocation2 + $0x15e0] sm:$0xff] }
 0x5a9   :  { %v23064_v40 = vpack.c.bf16 %v9933_v32, %v9932_v3  ;;  %v7160_v24 = vadd.f32 %v22996_v10, %v7159_v9  ;;  %17903 = vmatprep.mubr.msk.f32.mxu0 %vm1086_vm0, %v738_v49 }
 0x5aa   :  { %v9935_v43 = vmax.f32 %v7165_v61, 0.0 }
 0x5ab   :  { %v9934_v33 = vmax.f32 %v7160_v24, 0.0  ;;  %v17746_v22 = vpop.f32.mrb[76].mxu0 }
 0x5ac   :  { %v7175_v55 = vadd.f32 %v22996_v10, %v17746_v22  ;;  %v7169_v14 = vpop.f32.mrb[77].mxu0  ;;  %17904 = vmatmul.mubr.msk.f32.gmra.mrb[182].mxu0 %vm1086_vm0, %v739_v60  ;;  %v745_v60 = vld [vmem:[#allocation2 + $0x15e8] sm:$0xff] }
 0x5ad   :  { %v23070_v59 = vpack.c.bf16 %v9935_v43, %v9934_v33  ;;  %v7170_v50 = vadd.f32 %v22996_v10, %v7169_v14  ;;  %17906 = vmatprep.mubr.msk.f32.mxu0 %vm1086_vm0, %v740_v4  ;;  %v746_v33 = vld [vmem:[#allocation2 + $0x15f0] sm:$0xff] }
 0x5ae   :  { %v9937_v11 = vmax.f32 %v7175_v55, 0.0  ;;  %v16080_v57 = vpop.f32.mrb[116].mxu1 }
 0x5af   :  { %v9936_v15 = vmax.f32 %v7170_v50, 0.0  ;;  %v17749_v21 = vpop.f32.mrb[78].mxu0  ;;  %v16081_v44 = vpop.f32.mrb[117].mxu1 }
 0x5b0   :  { %v7185_v6 = vadd.f32 %v22996_v10, %v17749_v21  ;;  %v16082_v19 = vadd.f32 %v16081_v44, %v16080_v57  ;;  %v7179_v13 = vpop.f32.mrb[79].mxu0  ;;  %17907 = vmatmul.mubr.msk.f32.gmra.mrb[184].mxu0 %vm1086_vm0, %v741_v45 }
 0x5b1   :  { %v23076_v1 = vpack.c.bf16 %v9937_v11, %v9936_v15  ;;  %v7180_v58 = vadd.f32 %v22996_v10, %v7179_v13  ;;  %17909 = vmatprep.mubr.msk.f32.mxu0 %vm1086_vm0, %v742_v38  ;;  %v747_v15 = vld [vmem:[#allocation2 + $0x15f8] sm:$0xff] }
 0x5b2   :  { %v9939_v41 = vmax.f32 %v7185_v6, 0.0  ;;  %v23081_v7 = vadd.f32 %v16082_v19, %v22955_v53  ;;  %v16083_v31 = vpop.f32.mrb[118].mxu1  ;;  %v748_v6 = vld [vmem:[#allocation2 + $0x1600] sm:$0xff] }
 0x5b3   :  { %v9938_v34 = vmax.f32 %v7180_v58, 0.0  ;;  %v17752_v32 = vpop.f32.mrb[80].mxu0  ;;  %v16084_v49 = vpop.f32.mrb[119].mxu1 }
 0x5b4   :  { %v7195_v3 = vadd.f32 %v22996_v10, %v17752_v32  ;;  %v16085_v39 = vadd.f32 %v16084_v49, %v16083_v31  ;;  %v7189_v61 = vpop.f32.mrb[81].mxu0  ;;  %17910 = vmatmul.mubr.msk.f32.gmra.mrb[186].mxu0 %vm1086_vm0, %v743_v8 }
 0x5b5   :  { %v23085_v9 = vpack.c.bf16 %v9939_v41, %v9938_v34  ;;  %v7190_v24 = vadd.f32 %v22996_v10, %v7189_v61  ;;  %17912 = vmatprep.mubr.msk.f32.mxu0 %vm1086_vm0, %v744_v18 }
 0x5b6   :  { %v9941_v53 = vmax.f32 %v7195_v3, 0.0  ;;  %v23090_v43 = vadd.f32 %v16085_v39, %v22964_v27  ;;  %v16086_v4 = vpop.f32.mrb[120].mxu1  ;;  %v750_v3 = vld [vmem:[#allocation2 + $0x1610] sm:$0xff] }
 0x5b7   :  { %v9940_v22 = vmax.f32 %v7190_v24, 0.0  ;;  %v17755_v55 = vpop.f32.mrb[82].mxu0  ;;  %v16087_v14 = vpop.f32.mrb[121].mxu1 }
 0x5b8   :  { %v7205_v50 = vadd.f32 %v22996_v10, %v17755_v55  ;;  %v16088_v45 = vadd.f32 %v16087_v14, %v16086_v4  ;;  %v7199_v11 = vpop.f32.mrb[83].mxu0  ;;  %17913 = vmatmul.mubr.msk.f32.gmra.mrb[188].mxu0 %vm1086_vm0, %v745_v60  ;;  %v751_v4 = vld [vmem:[#allocation2 + $0x1618] sm:$0xff] }
 0x5b9   :  { %v18994_v57 = vpack.c.bf16 %v9941_v53, %v9940_v22  ;;  %v7200_v38 = vadd.f32 %v22996_v10, %v7199_v11  ;;  %17915 = vmatprep.mubr.msk.f32.mxu0 %vm1086_vm0, %v746_v33  ;;  %v753_v11 = vld [vmem:[#allocation2 + $0x1628] sm:$0xff] }
 0x5ba   :  { %v9943_v21 = vmax.f32 %v7205_v50, 0.0  ;;  %v23097_v27 = vadd.f32 %v16088_v45, %v22971_v37  ;;  %v16089_v44 = vpop.f32.mrb[122].mxu1  ;;  %v749_v37 = vld [vmem:[#allocation2 + $0x1608] sm:$0xff] }
 0x5bb   :  { %v9942_v19 = vmax.f32 %v7200_v38, 0.0  ;;  %v17758_v13 = vpop.f32.mrb[84].mxu0  ;;  %v16090_v58 = vpop.f32.mrb[123].mxu1  ;;  %18995 = vmatprep.subr.bf16.mxu1 %v18994_v57  ;;  %v754_v38 = vld [vmem:[#allocation2 + $0x1630] sm:$0xff] }
 0x5bc   :  { %v7215_v8 = vadd.f32 %v22996_v10, %v17758_v13  ;;  %v16091_v41 = vadd.f32 %v16090_v58, %v16089_v44  ;;  %v7209_v31 = vpop.f32.mrb[85].mxu0  ;;  %17916 = vmatmul.mubr.msk.f32.gmra.mrb[190].mxu0 %vm1086_vm0, %v747_v15  ;;  %18997 = vmatpush3.bf16.msra.mxu1 %v23019_v46  ;;  %v755_v13 = vld [vmem:[#allocation2 + $0x1638] sm:$0xff] }
 0x5bd   :  { %v18998_v18 = vpack.c.bf16 %v9943_v21, %v9942_v19  ;;  %v7210_v34 = vadd.f32 %v22996_v10, %v7209_v31  ;;  %17918 = vmatprep.mubr.msk.f32.mxu0 %vm1086_vm0, %v748_v6 }
 0x5be   :  { %v9945_v32 = vmax.f32 %v7215_v8, 0.0  ;;  %v23105_v49 = vadd.f32 %v16091_v41, %v22979_v56  ;;  %v752_v56 = vld [vmem:[#allocation2 + $0x1620] sm:$0xff] }
 0x5bf   :  { %v9944_v39 = vmax.f32 %v7210_v34, 0.0  ;;  %v17761_v61 = vpop.f32.mrb[86].mxu0  ;;  %18999 = vmatprep.subr.bf16.mxu1 %v18998_v18  ;;  %v756_v8 = vld [vmem:[#allocation2 + $0x1640] sm:$0xff] }
 0x5c0   :  { %v7225_v24 = vadd.f32 %v22996_v10, %v17761_v61  ;;  %v7219_v60 = vpop.f32.mrb[87].mxu0  ;;  %17919 = vmatmul.mubr.msk.f32.gmra.mrb[192].mxu0 %vm1086_vm0, %v749_v37  ;;  %19001 = vmatpush3.bf16.msra.mxu1 %v23031_v28 }
 0x5c1   :  { %v19002_v46 = vpack.c.bf16 %v9945_v32, %v9944_v39  ;;  %v7220_v53 = vadd.f32 %v22996_v10, %v7219_v60  ;;  %17921 = vmatprep.mubr.msk.f32.mxu0 %vm1086_vm0, %v750_v3  ;;  %v757_v32 = vld [vmem:[#allocation2 + $0x1648] sm:$0xff]  ;;  %v758_v39 = vld [vmem:[#allocation2 + $0x1650] sm:$0xff] }
 0x5c2   :  { %v9947_v33 = vmax.f32 %v7225_v24, 0.0 }
 0x5c3   :  { %v9946_v22 = vmax.f32 %v7220_v53, 0.0  ;;  %v17764_v55 = vpop.f32.mrb[88].mxu0  ;;  %19003 = vmatprep.subr.bf16.mxu1 %v19002_v46 }
 0x5c4   :  { %v7235_v14 = vadd.f32 %v22996_v10, %v17764_v55  ;;  %v7229_v50 = vpop.f32.mrb[89].mxu0  ;;  %17922 = vmatmul.mubr.msk.f32.gmra.mrb[194].mxu0 %vm1086_vm0, %v751_v4  ;;  %19005 = vmatpush3.bf16.msra.mxu1 %v23043_v0  ;;  %v759_v4 = vld [vmem:[#allocation2 + $0x1658] sm:$0xff] }
 0x5c5   :  { %v19006_v45 = vpack.c.bf16 %v9947_v33, %v9946_v22  ;;  %v7230_v28 = vadd.f32 %v22996_v10, %v7229_v50  ;;  %17924 = vmatprep.mubr.msk.f32.mxu0 %vm1086_vm0, %v752_v56  ;;  %v760_v56 = vld [vmem:[#allocation2 + $0x1660] sm:$0xff] }
 0x5c6   :  { %v9949_v57 = vmax.f32 %v7235_v14, 0.0 }
 0x5c7   :  { %v9948_v15 = vmax.f32 %v7230_v28, 0.0  ;;  %v17767_v21 = vpop.f32.mrb[90].mxu0  ;;  %19007 = vmatprep.subr.bf16.mxu1 %v19006_v45  ;;  %v761_v28 = vld [vmem:[#allocation2 + $0x1668] sm:$0xff] }
 0x5c8   :  { %v7245_v44 = vadd.f32 %v22996_v10, %v17767_v21  ;;  %v7239_v6 = vpop.f32.mrb[91].mxu0  ;;  %17925 = vmatmul.mubr.msk.f32.gmra.mrb[196].mxu0 %vm1086_vm0, %v753_v11  ;;  %19009 = vmatpush3.bf16.msra.mxu1 %v23055_v17 }
 0x5c9   :  { %v19010_v19 = vpack.c.bf16 %v9949_v57, %v9948_v15  ;;  %v7240_v0 = vadd.f32 %v22996_v10, %v7239_v6  ;;  %17927 = vmatprep.mubr.msk.f32.mxu0 %vm1086_vm0, %v754_v38  ;;  %v762_v57 = vld [vmem:[#allocation2 + $0x1670] sm:$0xff] }
 0x5ca   :  { %v9951_v58 = vmax.f32 %v7245_v44, 0.0 }
 0x5cb   :  { %v9950_v41 = vmax.f32 %v7240_v0, 0.0  ;;  %v17770_v31 = vpop.f32.mrb[92].mxu0  ;;  %19011 = vmatprep.subr.bf16.mxu1 %v19010_v19  ;;  %v763_v0 = vld [vmem:[#allocation2 + $0x1678] sm:$0xff] }
 0x5cc   :  { %v7255_v18 = vadd.f32 %v22996_v10, %v17770_v31  ;;  %v7249_v34 = vpop.f32.mrb[93].mxu0  ;;  %17928 = vmatmul.mubr.msk.f32.gmra.mrb[198].mxu0 %vm1086_vm0, %v755_v13  ;;  %19013 = vmatpush3.bf16.msra.mxu1 %v23064_v40  ;;  %v10473_v13 = vld [vmem:[%s24048_s3 + $0x328] sm:$0xff] }
 0x5cd   :  { %v19014_v37 = vpack.c.bf16 %v9951_v58, %v9950_v41  ;;  %v7250_v17 = vadd.f32 %v22996_v10, %v7249_v34  ;;  %17930 = vmatprep.mubr.msk.f32.mxu0 %vm1086_vm0, %v756_v8  ;;  %v764_v8 = vld [vmem:[#allocation2 + $0x1680] sm:$0xff] }
 0x5ce   :  { %v9953_v3 = vmax.f32 %v7255_v18, 0.0  ;;  %v10472_v34 = vld [vmem:[%s24048_s3 + $0x320] sm:$0xff] }
 0x5cf   :  { %v9952_v61 = vmax.f32 %v7250_v17, 0.0  ;;  %v17773_v24 = vpop.f32.mrb[94].mxu0  ;;  %19015 = vmatprep.subr.bf16.mxu1 %v19014_v37 }
 0x5d0   :  { %v7265_v60 = vadd.f32 %v22996_v10, %v17773_v24  ;;  %v7259_v46 = vpop.f32.mrb[95].mxu0  ;;  %17931 = vmatmul.mubr.msk.f32.gmra.mrb[200].mxu0 %vm1086_vm0, %v757_v32  ;;  %19017 = vmatpush3.bf16.msra.mxu1 %v23070_v59  ;;  %v765_v32 = vld [vmem:[#allocation2 + $0x1688] sm:$0xff] }
 0x5d1   :  { %v19018_v53 = vpack.c.bf16 %v9953_v3, %v9952_v61  ;;  %v7260_v40 = vadd.f32 %v22996_v10, %v7259_v46  ;;  %17933 = vmatprep.mubr.msk.f32.mxu0 %vm1086_vm0, %v758_v39  ;;  %v10537_v3 = vld [vmem:[%s24048_s3 + $0x528] sm:$0xff]  ;;  %v766_v61 = vld [vmem:[#allocation2 + $0x1690] sm:$0xff] }
 0x5d2   :  { %v9955_v33 = vmax.f32 %v7265_v60, 0.0 }
 0x5d3   :  { %v9954_v22 = vmax.f32 %v7260_v40, 0.0  ;;  %v17776_v55 = vpop.f32.mrb[96].mxu0  ;;  %19019 = vmatprep.subr.bf16.mxu1 %v19018_v53  ;;  %v10536_v40 = vld [vmem:[%s24048_s3 + $0x520] sm:$0xff] }
 0x5d4   :  { %v7275_v14 = vadd.f32 %v22996_v10, %v17776_v55  ;;  %v7269_v50 = vpop.f32.mrb[97].mxu0  ;;  %17934 = vmatmul.mubr.msk.f32.gmra.mrb[202].mxu0 %vm1086_vm0, %v759_v4  ;;  %19021 = vmatpush3.bf16.msra.mxu1 %v23076_v1  ;;  %v10408_v1 = vld [vmem:[%s24048_s3 + $0x120] sm:$0xff] }
 0x5d5   :  { %v19022_v45 = vpack.c.bf16 %v9955_v33, %v9954_v22  ;;  %v7270_v59 = vadd.f32 %v22996_v10, %v7269_v50  ;;  %17936 = vmatprep.mubr.msk.f32.mxu0 %vm1086_vm0, %v760_v56  ;;  %v767_v56 = vld [vmem:[#allocation2 + $0x1698] sm:$0xff]  ;;  %v10601_v22 = vld [vmem:[%s24048_s3 + $0x728] sm:$0xff] }
 0x5d6   :  { %v9957_v11 = vmax.f32 %v7275_v14, 0.0  ;;  %v768_v14 = vld [vmem:[#allocation2 + $0x16a0] sm:$0xff] }
 0x5d7   :  { %v9956_v38 = vmax.f32 %v7270_v59, 0.0  ;;  %v17779_v15 = vpop.f32.mrb[98].mxu0  ;;  %19023 = vmatprep.subr.bf16.mxu1 %v19022_v45 }
 0x5d8   :  { %v7285_v21 = vadd.f32 %v22996_v10, %v17779_v15  ;;  %v7279_v44 = vpop.f32.mrb[99].mxu0  ;;  %17937 = vmatmul.mubr.msk.f32.gmra.mrb[204].mxu0 %vm1086_vm0, %v761_v28  ;;  %19025 = vmatpush3.bf16.msra.mxu1 %v23085_v9  ;;  %v769_v15 = vld [vmem:[#allocation2 + $0x16a8] sm:$0xff] }
 0x5d9   :  { %v23143_v6 = vpack.c.bf16 %v9957_v11, %v9956_v38  ;;  %v7280_v19 = vadd.f32 %v22996_v10, %v7279_v44  ;;  %17939 = vmatprep.mubr.msk.f32.mxu0 %vm1086_vm0, %v762_v57  ;;  %v10600_v11 = vld [vmem:[%s24048_s3 + $0x720] sm:$0xff] }
 0x5da   :  { %v9959_v58 = vmax.f32 %v7285_v21, 0.0  ;;  %v10411_v21 = vld [vmem:[%s24048_s3 + $0x138] sm:$0xff] }
 0x5db   :  { %v9958_v41 = vmax.f32 %v7280_v19, 0.0  ;;  %v17782_v31 = vpop.f32.mrb[100].mxu0  ;;  %12223 = vmatmul.mubr.f32.vlgmr.msra.gmra.mrb[148].mxu1 %v10408_v1  ;;  %v770_v1 = vld [vmem:[#allocation2 + $0x16b0] sm:$0xff] }
 0x5dc   :  { %v7295_v9 = vadd.f32 %v22996_v10, %v17782_v31  ;;  %v7289_v18 = vpop.f32.mrb[101].mxu0  ;;  %17940 = vmatmul.mubr.msk.f32.gmra.mrb[206].mxu0 %vm1086_vm0, %v763_v0  ;;  %12227 = vmatprep.mubr.f32.mxu1 %v10473_v13  ;;  %v771_v31 = vld [vmem:[#allocation2 + $0x16b8] sm:$0xff] }
 0x5dd   :  { %v23155_v37 = vpack.c.bf16 %v9959_v58, %v9958_v41  ;;  %v7290_v17 = vadd.f32 %v22996_v10, %v7289_v18  ;;  %17942 = vmatprep.mubr.msk.f32.mxu0 %vm1086_vm0, %v764_v8  ;;  %v772_v18 = vld [vmem:[#allocation2 + $0x16c0] sm:$0xff] }
 0x5de   :  { %v9961_v39 = vmax.f32 %v7295_v9, 0.0 }
 0x5df   :  { %v9960_v24 = vmax.f32 %v7290_v17, 0.0  ;;  %v17785_v60 = vpop.f32.mrb[102].mxu0  ;;  %12228 = vmatmul.mubr.f32.gmra.mrb[150].mxu1 %v10472_v34 }
 0x5e0   :  { %v7305_v46 = vadd.f32 %v22996_v10, %v17785_v60  ;;  %v7299_v53 = vpop.f32.mrb[103].mxu0  ;;  %17943 = vmatmul.mubr.msk.f32.gmra.mrb[208].mxu0 %vm1086_vm0, %v765_v32  ;;  %12232 = vmatprep.mubr.f32.mxu1 %v10537_v3 }
 0x5e1   :  { %v23167_v4 = vpack.c.bf16 %v9961_v39, %v9960_v24  ;;  %v7300_v33 = vadd.f32 %v22996_v10, %v7299_v53  ;;  %17945 = vmatprep.mubr.msk.f32.mxu0 %vm1086_vm0, %v766_v61  ;;  %v773_v24 = vld [vmem:[#allocation2 + $0x16c8] sm:$0xff]  ;;  %v774_v53 = vld [vmem:[#allocation2 + $0x16d0] sm:$0xff] }
 0x5e2   :  { %v9963_v55 = vmax.f32 %v7305_v46, 0.0 }
 0x5e3   :  { %v9962_v50 = vmax.f32 %v7300_v33, 0.0  ;;  %v17788_v45 = vpop.f32.mrb[104].mxu0  ;;  %12233 = vmatmul.mubr.f32.gmra.mrb[152].mxu1 %v10536_v40 }
 0x5e4   :  { %v7315_v59 = vadd.f32 %v22996_v10, %v17788_v45  ;;  %v7309_v28 = vpop.f32.mrb[105].mxu0  ;;  %17946 = vmatmul.mubr.msk.f32.gmra.mrb[210].mxu0 %vm1086_vm0, %v767_v56  ;;  %12237 = vmatprep.mubr.f32.mxu1 %v10601_v22 }
 0x5e5   :  { %v23179_v57 = vpack.c.bf16 %v9963_v55, %v9962_v50  ;;  %v7310_v38 = vadd.f32 %v22996_v10, %v7309_v28  ;;  %17948 = vmatprep.mubr.msk.f32.mxu0 %vm1086_vm0, %v768_v14 }
 0x5e6   :  { %v9965_v44 = vmax.f32 %v7315_v59, 0.0  ;;  %v775_v59 = vld [vmem:[#allocation2 + $0x16d8] sm:$0xff] }
 0x5e7   :  { %v9964_v19 = vmax.f32 %v7310_v38, 0.0  ;;  %v17791_v0 = vpop.f32.mrb[106].mxu0  ;;  %12238 = vmatmul.mubr.f32.gmra.mrb[154].mxu1 %v10600_v11 }
 0x5e8   :  { %v7325_v13 = vadd.f32 %v22996_v10, %v17791_v0  ;;  %v7319_v58 = vpop.f32.mrb[107].mxu0  ;;  %17949 = vmatmul.mubr.msk.f32.gmra.mrb[212].mxu0 %vm1086_vm0, %v769_v15  ;;  %12307 = vmatprep.mubr.f32.mxu1 %v10411_v21  ;;  %v776_v15 = vld [vmem:[#allocation2 + $0x16e0] sm:$0xff] }
 0x5e9   :  { %v23188_v8 = vpack.c.bf16 %v9965_v44, %v9964_v19  ;;  %v7320_v41 = vadd.f32 %v22996_v10, %v7319_v58  ;;  %17951 = vmatprep.mubr.msk.f32.mxu0 %vm1086_vm0, %v770_v1 }
 0x5ea   :  { %v9967_v9 = vmax.f32 %v7325_v13, 0.0 }
 0x5eb   :  { %v9966_v34 = vmax.f32 %v7320_v41, 0.0  ;;  %v17794_v17 = vpop.f32.mrb[108].mxu0 }
 0x5ec   :  { %v7335_v32 = vadd.f32 %v22996_v10, %v17794_v17  ;;  %v7329_v3 = vpop.f32.mrb[109].mxu0  ;;  %17952 = vmatmul.mubr.msk.f32.gmra.mrb[214].mxu0 %vm1086_vm0, %v771_v31  ;;  %v777_v31 = vld [vmem:[#allocation2 + $0x16e8] sm:$0xff] }
 0x5ed   :  { %v23194_v39 = vpack.c.bf16 %v9967_v9, %v9966_v34  ;;  %v7330_v61 = vadd.f32 %v22996_v10, %v7329_v3  ;;  %17954 = vmatprep.mubr.msk.f32.mxu0 %vm1086_vm0, %v772_v18  ;;  %v778_v34 = vld [vmem:[#allocation2 + $0x16f0] sm:$0xff] }
 0x5ee   :  { %v9969_v60 = vmax.f32 %v7335_v32, 0.0  ;;  %v16124_v46 = vpop.f32.mrb[124].mxu1 }
 0x5ef   :  { %v9968_v40 = vmax.f32 %v7330_v61, 0.0  ;;  %v17797_v33 = vpop.f32.mrb[110].mxu0  ;;  %v16125_v56 = vpop.f32.mrb[125].mxu1 }
 0x5f0   :  { %v7345_v22 = vadd.f32 %v22996_v10, %v17797_v33  ;;  %v16126_v55 = vadd.f32 %v16125_v56, %v16124_v46  ;;  %v7339_v14 = vpop.f32.mrb[111].mxu0  ;;  %17955 = vmatmul.mubr.msk.f32.gmra.mrb[216].mxu0 %vm1086_vm0, %v773_v24 }
 0x5f1   :  { %v23200_v50 = vpack.c.bf16 %v9969_v60, %v9968_v40  ;;  %v7340_v45 = vadd.f32 %v22996_v10, %v7339_v14  ;;  %17957 = vmatprep.mubr.msk.f32.mxu0 %vm1086_vm0, %v774_v53  ;;  %v779_v40 = vld [vmem:[#allocation2 + $0x16f8] sm:$0xff] }
 0x5f2   :  { %v9971_v28 = vmax.f32 %v7345_v22, 0.0  ;;  %v23205_v11 = vadd.f32 %v16126_v55, %v23081_v7  ;;  %v16127_v38 = vpop.f32.mrb[126].mxu1  ;;  %v780_v22 = vld [vmem:[#allocation2 + $0x1700] sm:$0xff] }
 0x5f3   :  { %v9970_v21 = vmax.f32 %v7340_v45, 0.0  ;;  %v17800_v44 = vpop.f32.mrb[112].mxu0  ;;  %v16128_v1 = vpop.f32.mrb[127].mxu1 }
 0x5f4   :  { %v7355_v19 = vadd.f32 %v22996_v10, %v17800_v44  ;;  %v16129_v0 = vadd.f32 %v16128_v1, %v16127_v38  ;;  %v7349_v13 = vpop.f32.mrb[113].mxu0  ;;  %17958 = vmatmul.mubr.msk.f32.gmra.mrb[218].mxu0 %vm1086_vm0, %v775_v59 }
 0x5f5   :  { %v23209_v58 = vpack.c.bf16 %v9971_v28, %v9970_v21  ;;  %v7350_v41 = vadd.f32 %v22996_v10, %v7349_v13  ;;  %17960 = vmatprep.mubr.msk.f32.mxu0 %vm1086_vm0, %v776_v15 }
 0x5f6   :  { %v9973_v7 = vmax.f32 %v7355_v19, 0.0  ;;  %v23214_v9 = vadd.f32 %v16129_v0, %v23090_v43  ;;  %v16130_v18 = vpop.f32.mrb[128].mxu1  ;;  %v782_v19 = vld [vmem:[#allocation2 + $0x1710] sm:$0xff] }
 0x5f7   :  { %v9972_v17 = vmax.f32 %v7350_v41, 0.0  ;;  %v17803_v32 = vpop.f32.mrb[114].mxu0  ;;  %v16131_v3 = vpop.f32.mrb[129].mxu1 }
 0x5f8   :  { %v7365_v61 = vadd.f32 %v22996_v10, %v17803_v32  ;;  %v16132_v24 = vadd.f32 %v16131_v3, %v16130_v18  ;;  %v7359_v60 = vpop.f32.mrb[115].mxu0  ;;  %17961 = vmatmul.mubr.msk.f32.gmra.mrb[220].mxu0 %vm1086_vm0, %v777_v31  ;;  %v783_v18 = vld [vmem:[#allocation2 + $0x1718] sm:$0xff] }
 0x5f9   :  { %v19026_v46 = vpack.c.bf16 %v9973_v7, %v9972_v17  ;;  %v7360_v53 = vadd.f32 %v22996_v10, %v7359_v60  ;;  %17963 = vmatprep.mubr.msk.f32.mxu0 %vm1086_vm0, %v778_v34  ;;  %v785_v60 = vld [vmem:[#allocation2 + $0x1728] sm:$0xff] }
 0x5fa   :  { %v9975_v33 = vmax.f32 %v7365_v61, 0.0  ;;  %v23221_v43 = vadd.f32 %v16132_v24, %v23097_v27  ;;  %v16133_v56 = vpop.f32.mrb[130].mxu1  ;;  %v781_v27 = vld [vmem:[#allocation2 + $0x1708] sm:$0xff] }
 0x5fb   :  { %v9974_v55 = vmax.f32 %v7360_v53, 0.0  ;;  %v17806_v14 = vpop.f32.mrb[116].mxu0  ;;  %v16134_v45 = vpop.f32.mrb[131].mxu1  ;;  %19027 = vmatprep.subr.bf16.mxu1 %v19026_v46  ;;  %v786_v53 = vld [vmem:[#allocation2 + $0x1730] sm:$0xff] }
 0x5fc   :  { %v7375_v59 = vadd.f32 %v22996_v10, %v17806_v14  ;;  %v16135_v28 = vadd.f32 %v16134_v45, %v16133_v56  ;;  %v7369_v38 = vpop.f32.mrb[117].mxu0  ;;  %17964 = vmatmul.mubr.msk.f32.gmra.mrb[222].mxu0 %vm1086_vm0, %v779_v40  ;;  %19029 = vmatpush3.bf16.msra.mxu1 %v23143_v6  ;;  %v787_v14 = vld [vmem:[#allocation2 + $0x1738] sm:$0xff] }
 0x5fd   :  { %v19030_v15 = vpack.c.bf16 %v9975_v33, %v9974_v55  ;;  %v7370_v21 = vadd.f32 %v22996_v10, %v7369_v38  ;;  %17966 = vmatprep.mubr.msk.f32.mxu0 %vm1086_vm0, %v780_v22 }
 0x5fe   :  { %v9977_v44 = vmax.f32 %v7375_v59, 0.0  ;;  %v23229_v1 = vadd.f32 %v16135_v28, %v23105_v49  ;;  %v784_v49 = vld [vmem:[#allocation2 + $0x1720] sm:$0xff] }
 0x5ff   :  { %v9976_v0 = vmax.f32 %v7370_v21, 0.0  ;;  %v17809_v13 = vpop.f32.mrb[118].mxu0  ;;  %19031 = vmatprep.subr.bf16.mxu1 %v19030_v15  ;;  %v788_v59 = vld [vmem:[#allocation2 + $0x1740] sm:$0xff] }
 0x600   :  { %v7385_v41 = vadd.f32 %v22996_v10, %v17809_v13  ;;  %v7379_v31 = vpop.f32.mrb[119].mxu0  ;;  %17967 = vmatmul.mubr.msk.f32.gmra.mrb[224].mxu0 %vm1086_vm0, %v781_v27  ;;  %19033 = vmatpush3.bf16.msra.mxu1 %v23155_v37 }
 0x601   :  { %v19034_v6 = vpack.c.bf16 %v9977_v44, %v9976_v0  ;;  %v7380_v7 = vadd.f32 %v22996_v10, %v7379_v31  ;;  %17969 = vmatprep.mubr.msk.f32.mxu0 %vm1086_vm0, %v782_v19  ;;  %v789_v44 = vld [vmem:[#allocation2 + $0x1748] sm:$0xff]  ;;  %v790_v0 = vld [vmem:[#allocation2 + $0x1750] sm:$0xff] }
 0x602   :  { %v9979_v34 = vmax.f32 %v7385_v41, 0.0 }
 0x603   :  { %v9978_v17 = vmax.f32 %v7380_v7, 0.0  ;;  %v17812_v32 = vpop.f32.mrb[120].mxu0  ;;  %19035 = vmatprep.subr.bf16.mxu1 %v19034_v6 }
 0x604   :  { %v7395_v3 = vadd.f32 %v22996_v10, %v17812_v32  ;;  %v7389_v61 = vpop.f32.mrb[121].mxu0  ;;  %17970 = vmatmul.mubr.msk.f32.gmra.mrb[226].mxu0 %vm1086_vm0, %v783_v18  ;;  %19037 = vmatpush3.bf16.msra.mxu1 %v23167_v4  ;;  %v791_v18 = vld [vmem:[#allocation2 + $0x1758] sm:$0xff] }
 0x605   :  { %v19038_v24 = vpack.c.bf16 %v9979_v34, %v9978_v17  ;;  %v7390_v37 = vadd.f32 %v22996_v10, %v7389_v61  ;;  %17972 = vmatprep.mubr.msk.f32.mxu0 %vm1086_vm0, %v784_v49  ;;  %v792_v49 = vld [vmem:[#allocation2 + $0x1760] sm:$0xff] }
 0x606   :  { %v9981_v46 = vmax.f32 %v7395_v3, 0.0 }
 0x607   :  { %v9980_v40 = vmax.f32 %v7390_v37, 0.0  ;;  %v17815_v33 = vpop.f32.mrb[122].mxu0  ;;  %19039 = vmatprep.subr.bf16.mxu1 %v19038_v24  ;;  %v793_v37 = vld [vmem:[#allocation2 + $0x1768] sm:$0xff] }
 0x608   :  { %v7405_v56 = vadd.f32 %v22996_v10, %v17815_v33  ;;  %v7399_v22 = vpop.f32.mrb[123].mxu0  ;;  %17973 = vmatmul.mubr.msk.f32.gmra.mrb[228].mxu0 %vm1086_vm0, %v785_v60  ;;  %19041 = vmatpush3.bf16.msra.mxu1 %v23179_v57 }
 0x609   :  { %v19042_v55 = vpack.c.bf16 %v9981_v46, %v9980_v40  ;;  %v7400_v4 = vadd.f32 %v22996_v10, %v7399_v22  ;;  %17975 = vmatprep.mubr.msk.f32.mxu0 %vm1086_vm0, %v786_v53  ;;  %v794_v46 = vld [vmem:[#allocation2 + $0x1770] sm:$0xff] }
 0x60a   :  { %v9983_v45 = vmax.f32 %v7405_v56, 0.0 }
 0x60b   :  { %v9982_v28 = vmax.f32 %v7400_v4, 0.0  ;;  %v17818_v38 = vpop.f32.mrb[124].mxu0  ;;  %19043 = vmatprep.subr.bf16.mxu1 %v19042_v55  ;;  %v795_v4 = vld [vmem:[#allocation2 + $0x1778] sm:$0xff] }
 0x60c   :  { %v7415_v15 = vadd.f32 %v22996_v10, %v17818_v38  ;;  %v7409_v21 = vpop.f32.mrb[125].mxu0  ;;  %17976 = vmatmul.mubr.msk.f32.gmra.mrb[230].mxu0 %vm1086_vm0, %v787_v14  ;;  %19045 = vmatpush3.bf16.msra.mxu1 %v23188_v8  ;;  %v10475_v14 = vld [vmem:[%s24048_s3 + $0x338] sm:$0xff] }
 0x60d   :  { %v19046_v27 = vpack.c.bf16 %v9983_v45, %v9982_v28  ;;  %v7410_v57 = vadd.f32 %v22996_v10, %v7409_v21  ;;  %17978 = vmatprep.mubr.msk.f32.mxu0 %vm1086_vm0, %v788_v59  ;;  %v796_v59 = vld [vmem:[#allocation2 + $0x1780] sm:$0xff]  ;;  %v10474_v21 = vld [vmem:[%s24048_s3 + $0x330] sm:$0xff] }
 0x60e   :  { %v9985_v19 = vmax.f32 %v7415_v15, 0.0 }
 0x60f   :  { %v9984_v13 = vmax.f32 %v7410_v57, 0.0  ;;  %v17821_v41 = vpop.f32.mrb[126].mxu0  ;;  %19047 = vmatprep.subr.bf16.mxu1 %v19046_v27 }
 0x610   :  { %v7425_v31 = vadd.f32 %v22996_v10, %v17821_v41  ;;  %v7419_v6 = vpop.f32.mrb[127].mxu0  ;;  %17979 = vmatmul.mubr.msk.f32.gmra.mrb[232].mxu0 %vm1086_vm0, %v789_v44  ;;  %19049 = vmatpush3.bf16.msra.mxu1 %v23194_v39  ;;  %v797_v44 = vld [vmem:[#allocation2 + $0x1788] sm:$0xff] }
 0x611   :  { %v19050_v7 = vpack.c.bf16 %v9985_v19, %v9984_v13  ;;  %v7420_v8 = vadd.f32 %v22996_v10, %v7419_v6  ;;  %17981 = vmatprep.mubr.msk.f32.mxu0 %vm1086_vm0, %v790_v0  ;;  %v10539_v19 = vld [vmem:[%s24048_s3 + $0x538] sm:$0xff]  ;;  %v798_v13 = vld [vmem:[#allocation2 + $0x1790] sm:$0xff]  ;;  %v23286_v6 = vld [vmem:[#allocation5] ss:$0 sm:$0xff] }
 0x612   :  { %v9987_v34 = vmax.f32 %v7425_v31, 0.0 }
 0x613   :  { %v9986_v17 = vmax.f32 %v7420_v8, 0.0  ;;  %v17824_v32 = vpop.f32.mrb[128].mxu0  ;;  %19051 = vmatprep.subr.bf16.mxu1 %v19050_v7 }
 0x614   :  { %v7435_v3 = vadd.f32 %v22996_v10, %v17824_v32  ;;  %v7429_v61 = vpop.f32.mrb[129].mxu0  ;;  %17982 = vmatmul.mubr.msk.f32.gmra.mrb[234].mxu0 %vm1086_vm0, %v791_v18  ;;  %19053 = vmatpush3.bf16.msra.mxu1 %v23200_v50  ;;  %v10410_v50 = vld [vmem:[%s24048_s3 + $0x130] sm:$0xff] }
 0x615   :  { %v19054_v24 = vpack.c.bf16 %v9987_v34, %v9986_v17  ;;  %v7430_v39 = vadd.f32 %v22996_v10, %v7429_v61  ;;  %17984 = vmatprep.mubr.msk.f32.mxu0 %vm1086_vm0, %v792_v49  ;;  %v799_v49 = vld [vmem:[#allocation2 + $0x1798] sm:$0xff] }
 0x616   :  { %v9989_v60 = vmax.f32 %v7435_v3, 0.0  ;;  %v10603_v17 = vld [vmem:[%s24048_s3 + $0x738] sm:$0xff]  ;;  %v800_v3 = vld [vmem:[#allocation2 + $0x17a0] sm:$0xff] }
 0x617   :  { %v9988_v53 = vmax.f32 %v7430_v39, 0.0  ;;  %v17827_v40 = vpop.f32.mrb[130].mxu0  ;;  %19055 = vmatprep.subr.bf16.mxu1 %v19054_v24 }
 0x618   :  { %v7445_v33 = vadd.f32 %v22996_v10, %v17827_v40  ;;  %v7439_v56 = vpop.f32.mrb[131].mxu0  ;;  %17985 = vmatmul.mubr.msk.f32.gmra.mrb[236].mxu0 %vm1086_vm0, %v793_v37  ;;  %19057 = vmatpush3.bf16.msra.mxu1 %v23209_v58  ;;  %v801_v40 = vld [vmem:[#allocation2 + $0x17a8] sm:$0xff] }
 0x619   :  { %v23267_v22 = vpack.c.bf16 %v9989_v60, %v9988_v53  ;;  %v7440_v55 = vadd.f32 %v22996_v10, %v7439_v56  ;;  %17987 = vmatprep.mubr.msk.f32.mxu0 %vm1086_vm0, %v794_v46  ;;  %v10602_v60 = vld [vmem:[%s24048_s3 + $0x730] sm:$0xff] }
 0x61a   :  { %v9991_v45 = vmax.f32 %v7445_v33, 0.0  ;;  %v10413_v33 = vld [vmem:[%s24048_s3 + $0x148] sm:$0xff] }
 0x61b   :  { %v9990_v28 = vmax.f32 %v7440_v55, 0.0  ;;  %v17830_v38 = vpop.f32.mrb[132].mxu0  ;;  %12308 = vmatmul.mubr.f32.vlgmr.msra.gmra.mrb[156].mxu1 %v10410_v50  ;;  %v802_v50 = vld [vmem:[#allocation2 + $0x17b0] sm:$0xff] }
 0x61c   :  { %v7455_v58 = vadd.f32 %v22996_v10, %v17830_v38  ;;  %v7449_v15 = vpop.f32.mrb[133].mxu0  ;;  %17988 = vmatmul.mubr.msk.f32.gmra.mrb[238].mxu0 %vm1086_vm0, %v795_v4  ;;  %12312 = vmatprep.mubr.f32.mxu1 %v10475_v14  ;;  %v803_v38 = vld [vmem:[#allocation2 + $0x17b8] sm:$0xff] }
 0x61d   :  { %v23279_v27 = vpack.c.bf16 %v9991_v45, %v9990_v28  ;;  %v7450_v57 = vadd.f32 %v22996_v10, %v7449_v15  ;;  %17990 = vmatprep.mubr.msk.f32.mxu0 %vm1086_vm0, %v796_v59  ;;  %v10538_v10 = vld [vmem:[%s24048_s3 + $0x530] sm:$0xff]  ;;  %v804_v15 = vld [vmem:[#allocation2 + $0x17c0] sm:$0xff] }
 0x61e   :  { %v9993_v0 = vmax.f32 %v7455_v58, 0.0 }
 0x61f   :  { %v9992_v41 = vmax.f32 %v7450_v57, 0.0  ;;  %v17833_v31 = vpop.f32.mrb[134].mxu0  ;;  %12313 = vmatmul.mubr.f32.gmra.mrb[158].mxu1 %v10474_v21 }
 0x620   :  { %v7465_v7 = vadd.f32 %v23286_v6, %v17833_v31  ;;  %v7459_v8 = vpop.f32.mrb[135].mxu0  ;;  %17991 = vmatmul.mubr.msk.f32.gmra.mrb[240].mxu0 %vm1086_vm0, %v797_v44  ;;  %12317 = vmatprep.mubr.f32.mxu1 %v10539_v19 }
 0x621   :  { %v23293_v18 = vpack.c.bf16 %v9993_v0, %v9992_v41  ;;  %v7460_v34 = vadd.f32 %v23286_v6, %v7459_v8  ;;  %17993 = vmatprep.mubr.msk.f32.mxu0 %vm1086_vm0, %v798_v13  ;;  %v805_v41 = vld [vmem:[#allocation2 + $0x17c8] sm:$0xff]  ;;  %v806_v8 = vld [vmem:[#allocation2 + $0x17d0] sm:$0xff] }
 0x622   :  { %v9995_v32 = vmax.f32 %v7465_v7, 0.0 }
 0x623   :  { %v9994_v61 = vmax.f32 %v7460_v34, 0.0  ;;  %v17836_v24 = vpop.f32.mrb[136].mxu0  ;;  %12318 = vmatmul.mubr.f32.gmra.mrb[160].mxu1 %v10538_v10 }
 0x624   :  { %v7475_v39 = vadd.f32 %v23286_v6, %v17836_v24  ;;  %v7469_v37 = vpop.f32.mrb[137].mxu0  ;;  %17994 = vmatmul.mubr.msk.f32.gmra.mrb[242].mxu0 %vm1086_vm0, %v799_v49  ;;  %12322 = vmatprep.mubr.f32.mxu1 %v10603_v17 }
 0x625   :  { %v23305_v46 = vpack.c.bf16 %v9995_v32, %v9994_v61  ;;  %v7470_v53 = vadd.f32 %v23286_v6, %v7469_v37  ;;  %17996 = vmatprep.mubr.msk.f32.mxu0 %vm1086_vm0, %v800_v3 }
 0x626   :  { %v9997_v56 = vmax.f32 %v7475_v39, 0.0  ;;  %v807_v39 = vld [vmem:[#allocation2 + $0x17d8] sm:$0xff] }
 0x627   :  { %v9996_v55 = vmax.f32 %v7470_v53, 0.0  ;;  %v17839_v4 = vpop.f32.mrb[138].mxu0  ;;  %12323 = vmatmul.mubr.f32.gmra.mrb[162].mxu1 %v10602_v60 }
 0x628   :  { %v7485_v14 = vadd.f32 %v23286_v6, %v17839_v4  ;;  %v7479_v45 = vpop.f32.mrb[139].mxu0  ;;  %17997 = vmatmul.mubr.msk.f32.gmra.mrb[244].mxu0 %vm1086_vm0, %v801_v40  ;;  %12392 = vmatprep.mubr.f32.mxu1 %v10413_v33 }
 0x629   :  { %v23314_v59 = vpack.c.bf16 %v9997_v56, %v9996_v55  ;;  %v7480_v28 = vadd.f32 %v23286_v6, %v7479_v45  ;;  %17999 = vmatprep.mubr.msk.f32.mxu0 %vm1086_vm0, %v802_v50 }
 0x62a   :  { %v9999_v58 = vmax.f32 %v7485_v14, 0.0 }
 0x62b   :  { %v9998_v21 = vmax.f32 %v7480_v28, 0.0  ;;  %v17842_v57 = vpop.f32.mrb[140].mxu0 }
 0x62c   :  { %v7495_v44 = vadd.f32 %v23286_v6, %v17842_v57  ;;  %v7489_v19 = vpop.f32.mrb[141].mxu0  ;;  %18000 = vmatmul.mubr.msk.f32.gmra.mrb[246].mxu0 %vm1086_vm0, %v803_v38 }
 0x62d   :  { %v23320_v0 = vpack.c.bf16 %v9999_v58, %v9998_v21  ;;  %v7490_v13 = vadd.f32 %v23286_v6, %v7489_v19  ;;  %18002 = vmatprep.mubr.msk.f32.mxu0 %vm1086_vm0, %v804_v15 }
 0x62e   :  { %v10001_v31 = vmax.f32 %v7495_v44, 0.0  ;;  %v16168_v7 = vpop.f32.mrb[132].mxu1 }
 0x62f   :  { %v10000_v10 = vmax.f32 %v7490_v13, 0.0  ;;  %v17845_v34 = vpop.f32.mrb[142].mxu0  ;;  %v16169_v49 = vpop.f32.mrb[133].mxu1 }
 0x630   :  { %v7505_v17 = vadd.f32 %v23286_v6, %v17845_v34  ;;  %v16170_v32 = vadd.f32 %v16169_v49, %v16168_v7  ;;  %v7499_v3 = vpop.f32.mrb[143].mxu0  ;;  %18003 = vmatmul.mubr.msk.f32.gmra.mrb[248].mxu0 %vm1086_vm0, %v805_v41 }
 0x631   :  { %v23326_v61 = vpack.c.bf16 %v10001_v31, %v10000_v10  ;;  %v7500_v24 = vadd.f32 %v23286_v6, %v7499_v3  ;;  %18005 = vmatprep.mubr.msk.f32.mxu0 %vm1086_vm0, %v806_v8 }
 0x632   :  { %v10003_v37 = vmax.f32 %v7505_v17, 0.0  ;;  %v23331_v60 = vadd.f32 %v16170_v32, %v23205_v11  ;;  %v16171_v53 = vpop.f32.mrb[134].mxu1 }
 0x633   :  { %v10002_v40 = vmax.f32 %v7500_v24, 0.0  ;;  %v17848_v33 = vpop.f32.mrb[144].mxu0  ;;  %v16172_v56 = vpop.f32.mrb[135].mxu1 }
 0x634   :  { %v7515_v50 = vadd.f32 %v23286_v6, %v17848_v33  ;;  %v16173_v55 = vadd.f32 %v16172_v56, %v16171_v53  ;;  %v7509_v4 = vpop.f32.mrb[145].mxu0  ;;  %18006 = vmatmul.mubr.msk.f32.gmra.mrb[250].mxu0 %vm1086_vm0, %v807_v39 }
 0x635   :  { %v23335_v14 = vpack.c.bf16 %v10003_v37, %v10002_v40  ;;  %v7510_v45 = vadd.f32 %v23286_v6, %v7509_v4 }
 0x636   :  { %v10005_v28 = vmax.f32 %v7515_v50, 0.0  ;;  %v23339_v38 = vadd.f32 %v16173_v55, %v23214_v9  ;;  %v16174_v11 = vpop.f32.mrb[136].mxu1 }
 0x637   :  { %v10004_v58 = vmax.f32 %v7510_v45, 0.0  ;;  %v17851_v15 = vpop.f32.mrb[146].mxu0  ;;  %v16175_v21 = vpop.f32.mrb[137].mxu1 }
 0x638   :  { %v7525_v57 = vadd.f32 %v23286_v6, %v17851_v15  ;;  %v16176_v44 = vadd.f32 %v16175_v21, %v16174_v11  ;;  %v7519_v19 = vpop.f32.mrb[147].mxu0 }
 0x639   :  { %v19058_v13 = vpack.c.bf16 %v10005_v28, %v10004_v58  ;;  %v7520_v41 = vadd.f32 %v23286_v6, %v7519_v19 }
 0x63a   :  { %v10007_v31 = vmax.f32 %v7525_v57, 0.0  ;;  %v23344_v7 = vadd.f32 %v16176_v44, %v23221_v43  ;;  %v16177_v8 = vpop.f32.mrb[138].mxu1 }
 0x63b   :  { %v10006_v10 = vmax.f32 %v7520_v41, 0.0  ;;  %v17854_v34 = vpop.f32.mrb[148].mxu0  ;;  %v16178_v9 = vpop.f32.mrb[139].mxu1  ;;  %19059 = vmatprep.subr.bf16.mxu1 %v19058_v13 }
 0x63c   :  { %v7535_v49 = vadd.f32 %v23286_v6, %v17854_v34  ;;  %v16179_v17 = vadd.f32 %v16178_v9, %v16177_v8  ;;  %v7529_v32 = vpop.f32.mrb[149].mxu0  ;;  %19061 = vmatpush3.bf16.msra.mxu1 %v23267_v22 }
 0x63d   :  { %v19062_v3 = vpack.c.bf16 %v10007_v31, %v10006_v10  ;;  %v7530_v24 = vadd.f32 %v23286_v6, %v7529_v32 }
 0x63e   :  { %v10009_v39 = vmax.f32 %v7535_v49, 0.0  ;;  %v23350_v37 = vadd.f32 %v16179_v17, %v23229_v1 }
 0x63f   :  { %v10008_v43 = vmax.f32 %v7530_v24, 0.0  ;;  %v17857_v53 = vpop.f32.mrb[150].mxu0  ;;  %19063 = vmatprep.subr.bf16.mxu1 %v19062_v3 }
 0x640   :  { %v7545_v40 = vadd.f32 %v23286_v6, %v17857_v53  ;;  %v7539_v33 = vpop.f32.mrb[151].mxu0  ;;  %19065 = vmatpush3.bf16.msra.mxu1 %v23279_v27 }
 0x641   :  { %v19066_v56 = vpack.c.bf16 %v10009_v39, %v10008_v43  ;;  %v7540_v50 = vadd.f32 %v23286_v6, %v7539_v33 }
 0x642   :  { %v10011_v55 = vmax.f32 %v7545_v40, 0.0 }
 0x643   :  { %v10010_v22 = vmax.f32 %v7540_v50, 0.0  ;;  %v17860_v4 = vpop.f32.mrb[152].mxu0  ;;  %19067 = vmatprep.subr.bf16.mxu1 %v19066_v56 }
 0x644   :  { %v7555_v45 = vadd.f32 %v23286_v6, %v17860_v4  ;;  %v7549_v28 = vpop.f32.mrb[153].mxu0  ;;  %19069 = vmatpush3.bf16.msra.mxu1 %v23293_v18 }
 0x645   :  { %v19070_v1 = vpack.c.bf16 %v10011_v55, %v10010_v22  ;;  %v7550_v11 = vadd.f32 %v23286_v6, %v7549_v28 }
 0x646   :  { %v10013_v58 = vmax.f32 %v7555_v45, 0.0  ;;  %v10412_v45 = vld [vmem:[%s24048_s3 + $0x140] sm:$0xff] }
 0x647   :  { %v10012_v15 = vmax.f32 %v7550_v11, 0.0  ;;  %v17863_v21 = vpop.f32.mrb[154].mxu0  ;;  %19071 = vmatprep.subr.bf16.mxu1 %v19070_v1  ;;  %v10477_v1 = vld [vmem:[%s24048_s3 + $0x348] sm:$0xff] }
 0x648   :  { %v7565_v27 = vadd.f32 %v23286_v6, %v17863_v21  ;;  %v7559_v57 = vpop.f32.mrb[155].mxu0  ;;  %19073 = vmatpush3.bf16.msra.mxu1 %v23305_v46 }
 0x649   :  { %v19074_v44 = vpack.c.bf16 %v10013_v58, %v10012_v15  ;;  %v7560_v19 = vadd.f32 %v23286_v6, %v7559_v57 }
 0x64a   :  { %v10015_v13 = vmax.f32 %v7565_v27, 0.0 }
 0x64b   :  { %v10014_v41 = vmax.f32 %v7560_v19, 0.0  ;;  %v17866_v31 = vpop.f32.mrb[156].mxu0  ;;  %19075 = vmatprep.subr.bf16.mxu1 %v19074_v44  ;;  %v10541_v19 = vld [vmem:[%s24048_s3 + $0x548] sm:$0xff] }
 0x64c   :  { %v7575_v18 = vadd.f32 %v23286_v6, %v17866_v31  ;;  %v7569_v8 = vpop.f32.mrb[157].mxu0  ;;  %19077 = vmatpush3.bf16.msra.mxu1 %v23314_v59 }
 0x64d   :  { %v19078_v10 = vpack.c.bf16 %v10015_v13, %v10014_v41  ;;  %v7570_v34 = vadd.f32 %v23286_v6, %v7569_v8 }
 0x64e   :  { %v10017_v9 = vmax.f32 %v7575_v18, 0.0 }
 0x64f   :  { %v10016_v49 = vmax.f32 %v7570_v34, 0.0  ;;  %v17869_v17 = vpop.f32.mrb[158].mxu0  ;;  %19079 = vmatprep.subr.bf16.mxu1 %v19078_v10  ;;  %v10540_v10 = vld [vmem:[%s24048_s3 + $0x540] sm:$0xff] }
 0x650   :  { %v7585_v46 = vadd.f32 %v23286_v6, %v17869_v17  ;;  %v7579_v32 = vpop.f32.mrb[159].mxu0  ;;  %19081 = vmatpush3.bf16.msra.mxu1 %v23320_v0 }
 0x651   :  { %v19082_v3 = vpack.c.bf16 %v10017_v9, %v10016_v49  ;;  %v7580_v24 = vadd.f32 %v23286_v6, %v7579_v32  ;;  %v10605_v49 = vld [vmem:[%s24048_s3 + $0x748] sm:$0xff] }
 0x652   :  { %v10019_v39 = vmax.f32 %v7585_v46, 0.0 }
 0x653   :  { %v10018_v43 = vmax.f32 %v7580_v24, 0.0  ;;  %v17872_v53 = vpop.f32.mrb[160].mxu0  ;;  %19083 = vmatprep.subr.bf16.mxu1 %v19082_v3 }
 0x654   :  { %v7595_v59 = vadd.f32 %v23286_v6, %v17872_v53  ;;  %v7589_v40 = vpop.f32.mrb[161].mxu0  ;;  %19085 = vmatpush3.bf16.msra.mxu1 %v23326_v61 }
 0x655   :  { %v19086_v33 = vpack.c.bf16 %v10019_v39, %v10018_v43  ;;  %v7590_v56 = vadd.f32 %v23286_v6, %v7589_v40  ;;  %v10604_v39 = vld [vmem:[%s24048_s3 + $0x740] sm:$0xff] }
 0x656   :  { %v10021_v50 = vmax.f32 %v7595_v59, 0.0  ;;  %v10415_v59 = vld [vmem:[%s24048_s3 + $0x158] sm:$0xff] }
 0x657   :  { %v10020_v55 = vmax.f32 %v7590_v56, 0.0  ;;  %v17875_v22 = vpop.f32.mrb[162].mxu0  ;;  %19087 = vmatprep.subr.bf16.mxu1 %v19086_v33 }
 0x658   :  { %v7605_v0 = vadd.f32 %v23286_v6, %v17875_v22  ;;  %v7599_v4 = vpop.f32.mrb[163].mxu0  ;;  %19089 = vmatpush3.bf16.msra.mxu1 %v23335_v14  ;;  %v10476_v14 = vld [vmem:[%s24048_s3 + $0x340] sm:$0xff] }
 0x659   :  { %v23375_v28 = vpack.c.bf16 %v10021_v50, %v10020_v55  ;;  %v7600_v61 = vadd.f32 %v23286_v6, %v7599_v4 }
 0x65a   :  { %v10023_v11 = vmax.f32 %v7605_v0, 0.0 }
 0x65b   :  { %v10022_v58 = vmax.f32 %v7600_v61, 0.0  ;;  %v17878_v15 = vpop.f32.mrb[164].mxu0  ;;  %12393 = vmatmul.mubr.f32.vlgmr.msra.gmra.mrb[164].mxu1 %v10412_v45 }
 0x65c   :  { %v7615_v21 = vadd.f32 %v23286_v6, %v17878_v15  ;;  %v7609_v27 = vpop.f32.mrb[165].mxu0  ;;  %12397 = vmatprep.mubr.f32.mxu1 %v10477_v1 }
 0x65d   :  { %v23385_v57 = vpack.c.bf16 %v10023_v11, %v10022_v58  ;;  %v7610_v44 = vadd.f32 %v23286_v6, %v7609_v27 }
 0x65e   :  { %v10025_v13 = vmax.f32 %v7615_v21, 0.0 }
 0x65f   :  { %v10024_v41 = vmax.f32 %v7610_v44, 0.0  ;;  %v17881_v31 = vpop.f32.mrb[166].mxu0  ;;  %12398 = vmatmul.mubr.f32.gmra.mrb[166].mxu1 %v10476_v14 }
 0x660   :  { %v7625_v18 = vadd.f32 %v23286_v6, %v17881_v31  ;;  %v7619_v8 = vpop.f32.mrb[167].mxu0  ;;  %12402 = vmatprep.mubr.f32.mxu1 %v10541_v19 }
 0x661   :  { %v23395_v34 = vpack.c.bf16 %v10025_v13, %v10024_v41  ;;  %v7620_v9 = vadd.f32 %v23286_v6, %v7619_v8 }
 0x662   :  { %v10027_v17 = vmax.f32 %v7625_v18, 0.0 }
 0x663   :  { %v10026_v46 = vmax.f32 %v7620_v9, 0.0  ;;  %v17884_v32 = vpop.f32.mrb[168].mxu0  ;;  %12403 = vmatmul.mubr.f32.gmra.mrb[168].mxu1 %v10540_v10 }
 0x664   :  { %v7635_v3 = vadd.f32 %v23286_v6, %v17884_v32  ;;  %v7629_v24 = vpop.f32.mrb[169].mxu0  ;;  %12407 = vmatprep.mubr.f32.mxu1 %v10605_v49 }
 0x665   :  { %v23405_v43 = vpack.c.bf16 %v10027_v17, %v10026_v46  ;;  %v7630_v53 = vadd.f32 %v23286_v6, %v7629_v24 }
 0x666   :  { %v10029_v40 = vmax.f32 %v7635_v3, 0.0 }
 0x667   :  { %v10028_v33 = vmax.f32 %v7630_v53, 0.0  ;;  %v17887_v56 = vpop.f32.mrb[170].mxu0  ;;  %12408 = vmatmul.mubr.f32.gmra.mrb[170].mxu1 %v10604_v39 }
 0x668   :  { %v7645_v50 = vadd.f32 %v23286_v6, %v17887_v56  ;;  %v7639_v55 = vpop.f32.mrb[171].mxu0  ;;  %12477 = vmatprep.mubr.f32.mxu1 %v10415_v59 }
 0x669   :  { %v23412_v22 = vpack.c.bf16 %v10029_v40, %v10028_v33  ;;  %v7640_v0 = vadd.f32 %v23286_v6, %v7639_v55 }
 0x66a   :  { %v10031_v4 = vmax.f32 %v7645_v50, 0.0 }
 0x66b   :  { %v10030_v45 = vmax.f32 %v7640_v0, 0.0  ;;  %v17890_v61 = vpop.f32.mrb[172].mxu0 }
 0x66c   :  { %v7655_v1 = vadd.f32 %v23286_v6, %v17890_v61  ;;  %v7649_v11 = vpop.f32.mrb[173].mxu0 }
 0x66d   :  { %v23416_v58 = vpack.c.bf16 %v10031_v4, %v10030_v45  ;;  %v7650_v15 = vadd.f32 %v23286_v6, %v7649_v11 }
 0x66e   :  { %v10033_v21 = vmax.f32 %v7655_v1, 0.0  ;;  %v16212_v27 = vpop.f32.mrb[140].mxu1 }
 0x66f   :  { %v10032_v14 = vmax.f32 %v7650_v15, 0.0  ;;  %v17893_v44 = vpop.f32.mrb[174].mxu0  ;;  %v16213_v19 = vpop.f32.mrb[141].mxu1 }
 0x670   :  { %v7665_v13 = vadd.f32 %v23286_v6, %v17893_v44  ;;  %v16214_v41 = vadd.f32 %v16213_v19, %v16212_v27  ;;  %v7659_v31 = vpop.f32.mrb[175].mxu0 }
 0x671   :  { %v23420_v18 = vpack.c.bf16 %v10033_v21, %v10032_v14  ;;  %v7660_v8 = vadd.f32 %v23286_v6, %v7659_v31 }
 0x672   :  { %v10035_v10 = vmax.f32 %v7665_v13, 0.0  ;;  %v23424_v9 = vadd.f32 %v16214_v41, %v23331_v60  ;;  %v16215_v49 = vpop.f32.mrb[142].mxu1 }
 0x673   :  { %v10034_v17 = vmax.f32 %v7660_v8, 0.0  ;;  %v17896_v46 = vpop.f32.mrb[176].mxu0  ;;  %v16216_v32 = vpop.f32.mrb[143].mxu1 }
 0x674   :  { %v7675_v3 = vadd.f32 %v23286_v6, %v17896_v46  ;;  %v16217_v24 = vadd.f32 %v16216_v32, %v16215_v49  ;;  %v7669_v39 = vpop.f32.mrb[177].mxu0 }
 0x675   :  { %v23427_v53 = vpack.c.bf16 %v10035_v10, %v10034_v17  ;;  %v7670_v59 = vadd.f32 %v23286_v6, %v7669_v39 }
 0x676   :  { %v10037_v40 = vmax.f32 %v7675_v3, 0.0  ;;  %v23431_v33 = vadd.f32 %v16217_v24, %v23339_v38  ;;  %v16218_v56 = vpop.f32.mrb[144].mxu1 }
 0x677   :  { %v10036_v50 = vmax.f32 %v7670_v59, 0.0  ;;  %v17899_v60 = vpop.f32.mrb[178].mxu0  ;;  %v16219_v55 = vpop.f32.mrb[145].mxu1 }
 0x678   :  { %v7685_v0 = vadd.f32 %v23286_v6, %v17899_v60  ;;  %v16220_v4 = vadd.f32 %v16219_v55, %v16218_v56  ;;  %v7679_v45 = vpop.f32.mrb[179].mxu0 }
 0x679   :  { %v19090_v61 = vpack.c.bf16 %v10037_v40, %v10036_v50  ;;  %v7680_v1 = vadd.f32 %v23286_v6, %v7679_v45 }
 0x67a   :  { %v10039_v11 = vmax.f32 %v7685_v0, 0.0  ;;  %v23436_v15 = vadd.f32 %v16220_v4, %v23344_v7  ;;  %v16221_v21 = vpop.f32.mrb[146].mxu1 }
 0x67b   :  { %v10038_v27 = vmax.f32 %v7680_v1, 0.0  ;;  %v17902_v14 = vpop.f32.mrb[180].mxu0  ;;  %v16222_v38 = vpop.f32.mrb[147].mxu1  ;;  %19091 = vmatprep.subr.bf16.mxu1 %v19090_v61 }
 0x67c   :  { %v7695_v44 = vadd.f32 %v23286_v6, %v17902_v14  ;;  %v16223_v19 = vadd.f32 %v16222_v38, %v16221_v21  ;;  %v7689_v13 = vpop.f32.mrb[181].mxu0  ;;  %19093 = vmatpush3.bf16.msra.mxu1 %v23375_v28 }
 0x67d   :  { %v19094_v41 = vpack.c.bf16 %v10039_v11, %v10038_v27  ;;  %v7690_v31 = vadd.f32 %v23286_v6, %v7689_v13 }
 0x67e   :  { %v10041_v8 = vmax.f32 %v7695_v44, 0.0  ;;  %v23442_v10 = vadd.f32 %v16223_v19, %v23350_v37 }
 0x67f   :  { %v10040_v7 = vmax.f32 %v7690_v31, 0.0  ;;  %v17905_v49 = vpop.f32.mrb[182].mxu0  ;;  %19095 = vmatprep.subr.bf16.mxu1 %v19094_v41 }
 0x680   :  { %v7705_v17 = vadd.f32 %v23286_v6, %v17905_v49  ;;  %v7699_v46 = vpop.f32.mrb[183].mxu0  ;;  %19097 = vmatpush3.bf16.msra.mxu1 %v23385_v57 }
 0x681   :  { %v19098_v32 = vpack.c.bf16 %v10041_v8, %v10040_v7  ;;  %v7700_v3 = vadd.f32 %v23286_v6, %v7699_v46 }
 0x682   :  { %v10043_v24 = vmax.f32 %v7705_v17, 0.0 }
 0x683   :  { %v10042_v28 = vmax.f32 %v7700_v3, 0.0  ;;  %v17908_v39 = vpop.f32.mrb[184].mxu0  ;;  %19099 = vmatprep.subr.bf16.mxu1 %v19098_v32 }
 0x684   :  { %v7715_v59 = vadd.f32 %v23286_v6, %v17908_v39  ;;  %v7709_v40 = vpop.f32.mrb[185].mxu0  ;;  %19101 = vmatpush3.bf16.msra.mxu1 %v23395_v34 }
 0x685   :  { %v19102_v37 = vpack.c.bf16 %v10043_v24, %v10042_v28  ;;  %v7710_v56 = vadd.f32 %v23286_v6, %v7709_v40 }
 0x686   :  { %v10045_v50 = vmax.f32 %v7715_v59, 0.0  ;;  %v10414_v59 = vld [vmem:[%s24048_s3 + $0x150] sm:$0xff] }
 0x687   :  { %v10044_v60 = vmax.f32 %v7710_v56, 0.0  ;;  %v17911_v55 = vpop.f32.mrb[186].mxu0  ;;  %19103 = vmatprep.subr.bf16.mxu1 %v19102_v37  ;;  %v10479_v37 = vld [vmem:[%s24048_s3 + $0x358] sm:$0xff] }
 0x688   :  { %v7725_v57 = vadd.f32 %v23286_v6, %v17911_v55  ;;  %v7719_v0 = vpop.f32.mrb[187].mxu0  ;;  %19105 = vmatpush3.bf16.msra.mxu1 %v23405_v43 }
 0x689   :  { %v19106_v4 = vpack.c.bf16 %v10045_v50, %v10044_v60  ;;  %v7720_v45 = vadd.f32 %v23286_v6, %v7719_v0 }
 0x68a   :  { %v10047_v61 = vmax.f32 %v7725_v57, 0.0 }
 0x68b   :  { %v10046_v1 = vmax.f32 %v7720_v45, 0.0  ;;  %v17914_v11 = vpop.f32.mrb[188].mxu0  ;;  %19107 = vmatprep.subr.bf16.mxu1 %v19106_v4  ;;  %v10543_v45 = vld [vmem:[%s24048_s3 + $0x558] sm:$0xff] }
 0x68c   :  { %v7735_v34 = vadd.f32 %v23286_v6, %v17914_v11  ;;  %v7729_v21 = vpop.f32.mrb[189].mxu0  ;;  %19109 = vmatpush3.bf16.msra.mxu1 %v23412_v22 }
 0x68d   :  { %v19110_v27 = vpack.c.bf16 %v10047_v61, %v10046_v1  ;;  %v7730_v14 = vadd.f32 %v23286_v6, %v7729_v21 }
 0x68e   :  { %v10049_v38 = vmax.f32 %v7735_v34, 0.0 }
 0x68f   :  { %v10048_v44 = vmax.f32 %v7730_v14, 0.0  ;;  %v17917_v19 = vpop.f32.mrb[190].mxu0  ;;  %19111 = vmatprep.subr.bf16.mxu1 %v19110_v27  ;;  %v10542_v27 = vld [vmem:[%s24048_s3 + $0x550] sm:$0xff] }
 0x690   :  { %v7745_v43 = vadd.f32 %v23286_v6, %v17917_v19  ;;  %v7739_v13 = vpop.f32.mrb[191].mxu0  ;;  %19113 = vmatpush3.bf16.msra.mxu1 %v23416_v58 }
 0x691   :  { %v19114_v41 = vpack.c.bf16 %v10049_v38, %v10048_v44  ;;  %v7740_v31 = vadd.f32 %v23286_v6, %v7739_v13  ;;  %v10607_v44 = vld [vmem:[%s24048_s3 + $0x758] sm:$0xff] }
 0x692   :  { %v10051_v8 = vmax.f32 %v7745_v43, 0.0 }
 0x693   :  { %v10050_v7 = vmax.f32 %v7740_v31, 0.0  ;;  %v17920_v49 = vpop.f32.mrb[192].mxu0  ;;  %19115 = vmatprep.subr.bf16.mxu1 %v19114_v41 }
 0x694   :  { %v7755_v22 = vadd.f32 %v23286_v6, %v17920_v49  ;;  %v7749_v17 = vpop.f32.mrb[193].mxu0  ;;  %19117 = vmatpush3.bf16.msra.mxu1 %v23420_v18 }
 0x695   :  { %v19118_v46 = vpack.c.bf16 %v10051_v8, %v10050_v7  ;;  %v7750_v32 = vadd.f32 %v23286_v6, %v7749_v17  ;;  %v10606_v8 = vld [vmem:[%s24048_s3 + $0x750] sm:$0xff] }
 0x696   :  { %v10053_v3 = vmax.f32 %v7755_v22, 0.0  ;;  %v10417_v22 = vld [vmem:[%s24048_s3 + $0x168] sm:$0xff] }
 0x697   :  { %v10052_v24 = vmax.f32 %v7750_v32, 0.0  ;;  %v17923_v28 = vpop.f32.mrb[194].mxu0  ;;  %19119 = vmatprep.subr.bf16.mxu1 %v19118_v46 }
 0x698   :  { %v7765_v58 = vadd.f32 %v23286_v6, %v17923_v28  ;;  %v7759_v39 = vpop.f32.mrb[195].mxu0  ;;  %19121 = vmatpush3.bf16.msra.mxu1 %v23427_v53  ;;  %v10478_v53 = vld [vmem:[%s24048_s3 + $0x350] sm:$0xff] }
 0x699   :  { %v23467_v40 = vpack.c.bf16 %v10053_v3, %v10052_v24  ;;  %v7760_v18 = vadd.f32 %v23286_v6, %v7759_v39 }
 0x69a   :  { %v10055_v56 = vmax.f32 %v7765_v58, 0.0 }
 0x69b   :  { %v10054_v50 = vmax.f32 %v7760_v18, 0.0  ;;  %v17926_v60 = vpop.f32.mrb[196].mxu0  ;;  %12478 = vmatmul.mubr.f32.vlgmr.msra.gmra.mrb[172].mxu1 %v10414_v59 }
 0x69c   :  { %v7775_v55 = vadd.f32 %v23286_v6, %v17926_v60  ;;  %v7769_v57 = vpop.f32.mrb[197].mxu0  ;;  %12482 = vmatprep.mubr.f32.mxu1 %v10479_v37 }
 0x69d   :  { %v23477_v0 = vpack.c.bf16 %v10055_v56, %v10054_v50  ;;  %v7770_v4 = vadd.f32 %v23286_v6, %v7769_v57 }
 0x69e   :  { %v10057_v61 = vmax.f32 %v7775_v55, 0.0 }
 0x69f   :  { %v10056_v1 = vmax.f32 %v7770_v4, 0.0  ;;  %v17929_v11 = vpop.f32.mrb[198].mxu0  ;;  %12483 = vmatmul.mubr.f32.gmra.mrb[174].mxu1 %v10478_v53 }
 0x6a0   :  { %v7785_v34 = vadd.f32 %v23286_v6, %v17929_v11  ;;  %v7779_v21 = vpop.f32.mrb[199].mxu0  ;;  %12487 = vmatprep.mubr.f32.mxu1 %v10543_v45 }
 0x6a1   :  { %v23487_v14 = vpack.c.bf16 %v10057_v61, %v10056_v1  ;;  %v7780_v38 = vadd.f32 %v23286_v6, %v7779_v21 }
 0x6a2   :  { %v10059_v19 = vmax.f32 %v7785_v34, 0.0 }
 0x6a3   :  { %v10058_v43 = vmax.f32 %v7780_v38, 0.0  ;;  %v17932_v13 = vpop.f32.mrb[200].mxu0  ;;  %12488 = vmatmul.mubr.f32.gmra.mrb[176].mxu1 %v10542_v27 }
 0x6a4   :  { %v7795_v41 = vadd.f32 %v23286_v6, %v17932_v13  ;;  %v7789_v31 = vpop.f32.mrb[201].mxu0  ;;  %12492 = vmatprep.mubr.f32.mxu1 %v10607_v44 }
 0x6a5   :  { %v23497_v7 = vpack.c.bf16 %v10059_v19, %v10058_v43  ;;  %v7790_v49 = vadd.f32 %v23286_v6, %v7789_v31 }
 0x6a6   :  { %v10061_v17 = vmax.f32 %v7795_v41, 0.0 }
 0x6a7   :  { %v10060_v46 = vmax.f32 %v7790_v49, 0.0  ;;  %v17935_v32 = vpop.f32.mrb[202].mxu0  ;;  %12493 = vmatmul.mubr.f32.gmra.mrb[178].mxu1 %v10606_v8 }
 0x6a8   :  { %v7805_v3 = vadd.f32 %v23286_v6, %v17935_v32  ;;  %v7799_v24 = vpop.f32.mrb[203].mxu0  ;;  %12562 = vmatprep.mubr.f32.mxu1 %v10417_v22 }
 0x6a9   :  { %v23504_v28 = vpack.c.bf16 %v10061_v17, %v10060_v46  ;;  %v7800_v58 = vadd.f32 %v23286_v6, %v7799_v24 }
 0x6aa   :  { %v10063_v39 = vmax.f32 %v7805_v3, 0.0 }
 0x6ab   :  { %v10062_v59 = vmax.f32 %v7800_v58, 0.0  ;;  %v17938_v18 = vpop.f32.mrb[204].mxu0 }
 0x6ac   :  { %v7815_v37 = vadd.f32 %v23286_v6, %v17938_v18  ;;  %v7809_v56 = vpop.f32.mrb[205].mxu0 }
 0x6ad   :  { %v23508_v50 = vpack.c.bf16 %v10063_v39, %v10062_v59  ;;  %v7810_v60 = vadd.f32 %v23286_v6, %v7809_v56 }
 0x6ae   :  { %v10065_v55 = vmax.f32 %v7815_v37, 0.0  ;;  %v16256_v57 = vpop.f32.mrb[148].mxu1 }
 0x6af   :  { %v10064_v53 = vmax.f32 %v7810_v60, 0.0  ;;  %v17941_v4 = vpop.f32.mrb[206].mxu0  ;;  %v16257_v45 = vpop.f32.mrb[149].mxu1 }
 0x6b0   :  { %v7825_v61 = vadd.f32 %v23286_v6, %v17941_v4  ;;  %v16258_v1 = vadd.f32 %v16257_v45, %v16256_v57  ;;  %v7819_v11 = vpop.f32.mrb[207].mxu0 }
 0x6b1   :  { %v23512_v34 = vpack.c.bf16 %v10065_v55, %v10064_v53  ;;  %v7820_v21 = vadd.f32 %v23286_v6, %v7819_v11 }
 0x6b2   :  { %v10067_v27 = vmax.f32 %v7825_v61, 0.0  ;;  %v23516_v38 = vadd.f32 %v16258_v1, %v23424_v9  ;;  %v16259_v44 = vpop.f32.mrb[150].mxu1 }
 0x6b3   :  { %v10066_v19 = vmax.f32 %v7820_v21, 0.0  ;;  %v17944_v43 = vpop.f32.mrb[208].mxu0  ;;  %v16260_v13 = vpop.f32.mrb[151].mxu1 }
 0x6b4   :  { %v7835_v41 = vadd.f32 %v23286_v6, %v17944_v43  ;;  %v16261_v31 = vadd.f32 %v16260_v13, %v16259_v44  ;;  %v7829_v8 = vpop.f32.mrb[209].mxu0 }
 0x6b5   :  { %v23519_v49 = vpack.c.bf16 %v10067_v27, %v10066_v19  ;;  %v7830_v22 = vadd.f32 %v23286_v6, %v7829_v8 }
 0x6b6   :  { %v10069_v17 = vmax.f32 %v7835_v41, 0.0  ;;  %v23523_v46 = vadd.f32 %v16261_v31, %v23431_v33  ;;  %v16262_v32 = vpop.f32.mrb[152].mxu1 }
 0x6b7   :  { %v10068_v3 = vmax.f32 %v7830_v22, 0.0  ;;  %v17947_v9 = vpop.f32.mrb[210].mxu0  ;;  %v16263_v24 = vpop.f32.mrb[153].mxu1 }
 0x6b8   :  { %v7845_v58 = vadd.f32 %v23286_v6, %v17947_v9  ;;  %v16264_v39 = vadd.f32 %v16263_v24, %v16262_v32  ;;  %v7839_v59 = vpop.f32.mrb[211].mxu0 }
 0x6b9   :  { %v19122_v18 = vpack.c.bf16 %v10069_v17, %v10068_v3  ;;  %v7840_v37 = vadd.f32 %v23286_v6, %v7839_v59 }
 0x6ba   :  { %v10071_v56 = vmax.f32 %v7845_v58, 0.0  ;;  %v23528_v60 = vadd.f32 %v16264_v39, %v23436_v15  ;;  %v16265_v55 = vpop.f32.mrb[154].mxu1 }
 0x6bb   :  { %v10070_v57 = vmax.f32 %v7840_v37, 0.0  ;;  %v17950_v53 = vpop.f32.mrb[212].mxu0  ;;  %v16266_v33 = vpop.f32.mrb[155].mxu1  ;;  %19123 = vmatprep.subr.bf16.mxu1 %v19122_v18 }
 0x6bc   :  { %v7855_v4 = vadd.f32 %v23286_v6, %v17950_v53  ;;  %v16267_v45 = vadd.f32 %v16266_v33, %v16265_v55  ;;  %v7849_v61 = vpop.f32.mrb[213].mxu0  ;;  %19125 = vmatpush3.bf16.msra.mxu1 %v23467_v40 }
 0x6bd   :  { %v19126_v1 = vpack.c.bf16 %v10071_v56, %v10070_v57  ;;  %v7850_v11 = vadd.f32 %v23286_v6, %v7849_v61 }
 0x6be   :  { %v10073_v21 = vmax.f32 %v7855_v4, 0.0  ;;  %v23534_v27 = vadd.f32 %v16267_v45, %v23442_v10 }
 0x6bf   :  { %v10072_v15 = vmax.f32 %v7850_v11, 0.0  ;;  %v17953_v44 = vpop.f32.mrb[214].mxu0  ;;  %19127 = vmatprep.subr.bf16.mxu1 %v19126_v1 }
 0x6c0   :  { %v7865_v19 = vadd.f32 %v23286_v6, %v17953_v44  ;;  %v7859_v43 = vpop.f32.mrb[215].mxu0  ;;  %19129 = vmatpush3.bf16.msra.mxu1 %v23477_v0 }
 0x6c1   :  { %v19130_v13 = vpack.c.bf16 %v10073_v21, %v10072_v15  ;;  %v7860_v41 = vadd.f32 %v23286_v6, %v7859_v43 }
 0x6c2   :  { %v10075_v31 = vmax.f32 %v7865_v19, 0.0 }
 0x6c3   :  { %v10074_v40 = vmax.f32 %v7860_v41, 0.0  ;;  %v17956_v8 = vpop.f32.mrb[216].mxu0  ;;  %19131 = vmatprep.subr.bf16.mxu1 %v19130_v13 }
 0x6c4   :  { %v7875_v22 = vadd.f32 %v23286_v6, %v17956_v8  ;;  %v7869_v17 = vpop.f32.mrb[217].mxu0  ;;  %19133 = vmatpush3.bf16.msra.mxu1 %v23487_v14 }
 0x6c5   :  { %v19134_v10 = vpack.c.bf16 %v10075_v31, %v10074_v40  ;;  %v7870_v32 = vadd.f32 %v23286_v6, %v7869_v17 }
 0x6c6   :  { %v10077_v3 = vmax.f32 %v7875_v22, 0.0  ;;  %v10416_v22 = vld [vmem:[%s24048_s3 + $0x160] sm:$0xff] }
 0x6c7   :  { %v10076_v9 = vmax.f32 %v7870_v32, 0.0  ;;  %v17959_v24 = vpop.f32.mrb[218].mxu0  ;;  %19135 = vmatprep.subr.bf16.mxu1 %v19134_v10  ;;  %v10481_v10 = vld [vmem:[%s24048_s3 + $0x368] sm:$0xff] }
 0x6c8   :  { %v7885_v0 = vadd.f32 %v23286_v6, %v17959_v24  ;;  %v7879_v58 = vpop.f32.mrb[219].mxu0  ;;  %19137 = vmatpush3.bf16.msra.mxu1 %v23497_v7 }
 0x6c9   :  { %v19138_v39 = vpack.c.bf16 %v10077_v3, %v10076_v9  ;;  %v7880_v59 = vadd.f32 %v23286_v6, %v7879_v58 }
 0x6ca   :  { %v10079_v18 = vmax.f32 %v7885_v0, 0.0 }
 0x6cb   :  { %v10078_v37 = vmax.f32 %v7880_v59, 0.0  ;;  %v17962_v56 = vpop.f32.mrb[220].mxu0  ;;  %19139 = vmatprep.subr.bf16.mxu1 %v19138_v39  ;;  %v10545_v59 = vld [vmem:[%s24048_s3 + $0x568] sm:$0xff] }
 0x6cc   :  { %v7895_v14 = vadd.f32 %v23286_v6, %v17962_v56  ;;  %v7889_v55 = vpop.f32.mrb[221].mxu0  ;;  %19141 = vmatpush3.bf16.msra.mxu1 %v23504_v28 }
 0x6cd   :  { %v19142_v57 = vpack.c.bf16 %v10079_v18, %v10078_v37  ;;  %v7890_v53 = vadd.f32 %v23286_v6, %v7889_v55 }
 0x6ce   :  { %v10081_v33 = vmax.f32 %v7895_v14, 0.0 }
 0x6cf   :  { %v10080_v4 = vmax.f32 %v7890_v53, 0.0  ;;  %v17965_v45 = vpop.f32.mrb[222].mxu0  ;;  %19143 = vmatprep.subr.bf16.mxu1 %v19142_v57  ;;  %v10544_v57 = vld [vmem:[%s24048_s3 + $0x560] sm:$0xff] }
 0x6d0   :  { %v7905_v7 = vadd.f32 %v23286_v6, %v17965_v45  ;;  %v7899_v61 = vpop.f32.mrb[223].mxu0  ;;  %19145 = vmatpush3.bf16.msra.mxu1 %v23508_v50 }
 0x6d1   :  { %v19146_v1 = vpack.c.bf16 %v10081_v33, %v10080_v4  ;;  %v7900_v11 = vadd.f32 %v23286_v6, %v7899_v61  ;;  %v10609_v4 = vld [vmem:[%s24048_s3 + $0x768] sm:$0xff] }
 0x6d2   :  { %v10083_v21 = vmax.f32 %v7905_v7, 0.0 }
 0x6d3   :  { %v10082_v15 = vmax.f32 %v7900_v11, 0.0  ;;  %v17968_v44 = vpop.f32.mrb[224].mxu0  ;;  %19147 = vmatprep.subr.bf16.mxu1 %v19146_v1 }
 0x6d4   :  { %v7915_v28 = vadd.f32 %v23286_v6, %v17968_v44  ;;  %v7909_v19 = vpop.f32.mrb[225].mxu0  ;;  %19149 = vmatpush3.bf16.msra.mxu1 %v23512_v34  ;;  %v23591_v44 = vld [vmem:[#allocation5] ss:$0 sm:$0xff] }
 0x6d5   :  { %v19150_v43 = vpack.c.bf16 %v10083_v21, %v10082_v15  ;;  %v7910_v13 = vadd.f32 %v23286_v6, %v7909_v19  ;;  %v10608_v21 = vld [vmem:[%s24048_s3 + $0x760] sm:$0xff]  ;;  %v10419_v19 = vld [vmem:[%s24048_s3 + $0x178] sm:$0xff] }
 0x6d6   :  { %v10085_v41 = vmax.f32 %v7915_v28, 0.0 }
 0x6d7   :  { %v10084_v31 = vmax.f32 %v7910_v13, 0.0  ;;  %v17971_v40 = vpop.f32.mrb[226].mxu0  ;;  %19151 = vmatprep.subr.bf16.mxu1 %v19150_v43 }
 0x6d8   :  { %v7925_v50 = vadd.f32 %v23286_v6, %v17971_v40  ;;  %v7919_v8 = vpop.f32.mrb[227].mxu0  ;;  %19153 = vmatpush3.bf16.msra.mxu1 %v23519_v49  ;;  %v10480_v49 = vld [vmem:[%s24048_s3 + $0x360] sm:$0xff] }
 0x6d9   :  { %v23559_v17 = vpack.c.bf16 %v10085_v41, %v10084_v31  ;;  %v7920_v34 = vadd.f32 %v23286_v6, %v7919_v8 }
 0x6da   :  { %v10087_v32 = vmax.f32 %v7925_v50, 0.0 }
 0x6db   :  { %v10086_v3 = vmax.f32 %v7920_v34, 0.0  ;;  %v17974_v9 = vpop.f32.mrb[228].mxu0  ;;  %12563 = vmatmul.mubr.f32.vlgmr.msra.gmra.mrb[180].mxu1 %v10416_v22 }
 0x6dc   :  { %v7935_v24 = vadd.f32 %v23286_v6, %v17974_v9  ;;  %v7929_v0 = vpop.f32.mrb[229].mxu0  ;;  %12567 = vmatprep.mubr.f32.mxu1 %v10481_v10 }
 0x6dd   :  { %v23569_v58 = vpack.c.bf16 %v10087_v32, %v10086_v3  ;;  %v7930_v39 = vadd.f32 %v23286_v6, %v7929_v0 }
 0x6de   :  { %v10089_v18 = vmax.f32 %v7935_v24, 0.0 }
 0x6df   :  { %v10088_v37 = vmax.f32 %v7930_v39, 0.0  ;;  %v17977_v56 = vpop.f32.mrb[230].mxu0  ;;  %12568 = vmatmul.mubr.f32.gmra.mrb[182].mxu1 %v10480_v49 }
 0x6e0   :  { %v7945_v14 = vadd.f32 %v23286_v6, %v17977_v56  ;;  %v7939_v55 = vpop.f32.mrb[231].mxu0  ;;  %12572 = vmatprep.mubr.f32.mxu1 %v10545_v59 }
 0x6e1   :  { %v23579_v53 = vpack.c.bf16 %v10089_v18, %v10088_v37  ;;  %v7940_v33 = vadd.f32 %v23286_v6, %v7939_v55 }
 0x6e2   :  { %v10091_v45 = vmax.f32 %v7945_v14, 0.0 }
 0x6e3   :  { %v10090_v7 = vmax.f32 %v7940_v33, 0.0  ;;  %v17980_v61 = vpop.f32.mrb[232].mxu0  ;;  %12573 = vmatmul.mubr.f32.gmra.mrb[184].mxu1 %v10544_v57 }
 0x6e4   :  { %v7955_v1 = vadd.f32 %v23286_v6, %v17980_v61  ;;  %v7949_v11 = vpop.f32.mrb[233].mxu0  ;;  %12577 = vmatprep.mubr.f32.mxu1 %v10609_v4 }
 0x6e5   :  { %v23589_v15 = vpack.c.bf16 %v10091_v45, %v10090_v7  ;;  %v7950_v28 = vadd.f32 %v23591_v44, %v7949_v11 }
 0x6e6   :  { %v10093_v43 = vmax.f32 %v7955_v1, 0.0 }
 0x6e7   :  { %v10092_v13 = vmax.f32 %v7950_v28, 0.0  ;;  %v17983_v41 = vpop.f32.mrb[234].mxu0  ;;  %12578 = vmatmul.mubr.f32.gmra.mrb[186].mxu1 %v10608_v21 }
 0x6e8   :  { %v7965_v6 = vadd.f32 %v23591_v44, %v17983_v41  ;;  %v7959_v31 = vpop.f32.mrb[235].mxu0  ;;  %12647 = vmatprep.mubr.f32.mxu1 %v10419_v19 }
 0x6e9   :  { %v23598_v40 = vpack.c.bf16 %v10093_v43, %v10092_v13  ;;  %v7960_v50 = vadd.f32 %v23591_v44, %v7959_v31 }
 0x6ea   :  { %v10095_v8 = vmax.f32 %v7965_v6, 0.0 }
 0x6eb   :  { %v10094_v22 = vmax.f32 %v7960_v50, 0.0  ;;  %v17986_v34 = vpop.f32.mrb[236].mxu0 }
 0x6ec   :  { %v7975_v10 = vadd.f32 %v23591_v44, %v17986_v34  ;;  %v7969_v32 = vpop.f32.mrb[237].mxu0 }
 0x6ed   :  { %v23602_v3 = vpack.c.bf16 %v10095_v8, %v10094_v22  ;;  %v7970_v9 = vadd.f32 %v23591_v44, %v7969_v32 }
 0x6ee   :  { %v10097_v24 = vmax.f32 %v7975_v10, 0.0  ;;  %v16300_v0 = vpop.f32.mrb[156].mxu1 }
 0x6ef   :  { %v10096_v49 = vmax.f32 %v7970_v9, 0.0  ;;  %v17989_v39 = vpop.f32.mrb[238].mxu0  ;;  %v16301_v59 = vpop.f32.mrb[157].mxu1 }
 0x6f0   :  { %v7985_v18 = vadd.f32 %v23591_v44, %v17989_v39  ;;  %v16302_v37 = vadd.f32 %v16301_v59, %v16300_v0  ;;  %v7979_v56 = vpop.f32.mrb[239].mxu0 }
 0x6f1   :  { %v23606_v14 = vpack.c.bf16 %v10097_v24, %v10096_v49  ;;  %v7980_v55 = vadd.f32 %v23591_v44, %v7979_v56 }
 0x6f2   :  { %v10099_v57 = vmax.f32 %v7985_v18, 0.0  ;;  %v23610_v33 = vadd.f32 %v16302_v37, %v23516_v38  ;;  %v16303_v4 = vpop.f32.mrb[158].mxu1 }
 0x6f3   :  { %v10098_v45 = vmax.f32 %v7980_v55, 0.0  ;;  %v17992_v7 = vpop.f32.mrb[240].mxu0  ;;  %v16304_v61 = vpop.f32.mrb[159].mxu1 }
 0x6f4   :  { %v7995_v1 = vadd.f32 %v23591_v44, %v17992_v7  ;;  %v16305_v11 = vadd.f32 %v16304_v61, %v16303_v4  ;;  %v7989_v21 = vpop.f32.mrb[241].mxu0 }
 0x6f5   :  { %v23613_v28 = vpack.c.bf16 %v10099_v57, %v10098_v45  ;;  %v7990_v19 = vadd.f32 %v23591_v44, %v7989_v21 }
 0x6f6   :  { %v10101_v43 = vmax.f32 %v7995_v1, 0.0  ;;  %v23617_v13 = vadd.f32 %v16305_v11, %v23523_v46  ;;  %v16306_v41 = vpop.f32.mrb[160].mxu1 }
 0x6f7   :  { %v10100_v6 = vmax.f32 %v7990_v19, 0.0  ;;  %v17995_v38 = vpop.f32.mrb[242].mxu0  ;;  %v16307_v31 = vpop.f32.mrb[161].mxu1 }
 0x6f8   :  { %v8005_v50 = vadd.f32 %v23591_v44, %v17995_v38  ;;  %v16308_v8 = vadd.f32 %v16307_v31, %v16306_v41  ;;  %v7999_v22 = vpop.f32.mrb[243].mxu0 }
 0x6f9   :  { %v19154_v34 = vpack.c.bf16 %v10101_v43, %v10100_v6  ;;  %v8000_v10 = vadd.f32 %v23591_v44, %v7999_v22 }
 0x6fa   :  { %v10103_v32 = vmax.f32 %v8005_v50, 0.0  ;;  %v23622_v9 = vadd.f32 %v16308_v8, %v23528_v60  ;;  %v16309_v24 = vpop.f32.mrb[162].mxu1 }
 0x6fb   :  { %v10102_v0 = vmax.f32 %v8000_v10, 0.0  ;;  %v17998_v49 = vpop.f32.mrb[244].mxu0  ;;  %v16310_v46 = vpop.f32.mrb[163].mxu1  ;;  %19155 = vmatprep.subr.bf16.mxu1 %v19154_v34 }
 0x6fc   :  { %v8015_v39 = vadd.f32 %v23591_v44, %v17998_v49  ;;  %v16311_v59 = vadd.f32 %v16310_v46, %v16309_v24  ;;  %v8009_v18 = vpop.f32.mrb[245].mxu0  ;;  %19157 = vmatpush3.bf16.msra.mxu1 %v23559_v17  ;;  %v24233_v24 = vld [vmem:[#allocation16_spill] sm:$0xff]  ;;  %v24234_v49 = vld [vmem:[#allocation15_spill] sm:$0xff] }
 0x6fd   :  { %v19158_v37 = vpack.c.bf16 %v10103_v32, %v10102_v0  ;;  %v8010_v56 = vadd.f32 %v23591_v44, %v8009_v18  ;;  %v10546_v32 = vld [vmem:[%s24048_s3 + $0x570] sm:$0xff]  ;;  %v10611_v0 = vld [vmem:[%s24048_s3 + $0x778] sm:$0xff]  ;;  %v24236_v18 = vld [vmem:[#allocation19_spill] sm:$0xff] }
 0x6fe   :  { %v10105_v55 = vmax.f32 %v8015_v39, 0.0  ;;  %v23628_v57 = vadd.f32 %v16311_v59, %v23534_v27  ;;  %v10610_v46 = vld [vmem:[%s24048_s3 + $0x770] sm:$0xff]  ;;  %v10421_v39 = vld [vmem:[%s24048_s3 + $0x188] sm:$0xff] }
 0x6ff   :  { %v10104_v60 = vmax.f32 %v8010_v56, 0.0  ;;  %v18001_v4 = vpop.f32.mrb[246].mxu0  ;;  %19159 = vmatprep.subr.bf16.mxu1 %v19158_v37  ;;  %v24235_v59 = vld [vmem:[#allocation17_spill] sm:$0xff] }
 0x700   :  { %v8025_v45 = vadd.f32 %v23591_v44, %v18001_v4  ;;  %v8019_v7 = vpop.f32.mrb[247].mxu0  ;;  %19161 = vmatpush3.bf16.msra.mxu1 %v23569_v58 }
 0x701   :  { %v19162_v61 = vpack.c.bf16 %v10105_v55, %v10104_v60  ;;  %v8020_v1 = vadd.f32 %v23591_v44, %v8019_v7  ;;  %v24237_v60 = vld [vmem:[#allocation21_spill] sm:$0xff] }
 0x702   :  { %v10107_v11 = vmax.f32 %v8025_v45, 0.0 }
 0x703   :  { %v10106_v17 = vmax.f32 %v8020_v1, 0.0  ;;  %v18004_v21 = vpop.f32.mrb[248].mxu0  ;;  %19163 = vmatprep.subr.bf16.mxu1 %v19162_v61  ;;  %v24238_v61 = vld [vmem:[#allocation22_spill] sm:$0xff] }
 0x704   :  { %v8035_v19 = vadd.f32 %v23591_v44, %v18004_v21  ;;  %v8029_v43 = vpop.f32.mrb[249].mxu0  ;;  %19165 = vmatpush3.bf16.msra.mxu1 %v23579_v53 }
 0x705   :  { %v19166_v27 = vpack.c.bf16 %v10107_v11, %v10106_v17  ;;  %v8030_v41 = vadd.f32 %v23591_v44, %v8029_v43  ;;  %v24239_v17 = vld [vmem:[#allocation25_spill] sm:$0xff]  ;;  %v24240_v43 = vld [vmem:[#allocation52_spill] sm:$0xff] }
 0x706   :  { %v10109_v6 = vmax.f32 %v8035_v19, 0.0 }
 0x707   :  { %v10108_v38 = vmax.f32 %v8030_v41, 0.0  ;;  %v18007_v31 = vpop.f32.mrb[250].mxu0  ;;  %19167 = vmatprep.subr.bf16.mxu1 %v19166_v27  ;;  %v10484_v27 = vld [vmem:[%s24048_s3 + $0x380] sm:$0xff]  ;;  %v24241_v41 = vld [vmem:[#allocation53_spill] sm:$0xff] }
 0x708   :  { %v8045_v58 = vadd.f32 %v23591_v44, %v18007_v31  ;;  %v8039_v50 = vpop.f32.mrb[251].mxu0  ;;  %19169 = vmatpush3.bf16.msra.mxu1 %v23589_v15  ;;  %v10418_v15 = vld [vmem:[%s24048_s3 + $0x170] sm:$0xff]  ;;  %v10423_v31 = vld [vmem:[%s24048_s3 + $0x198] sm:$0xff] }
 0x709   :  { %v19170_v8 = vpack.c.bf16 %v10109_v6, %v10108_v38  ;;  %v8040_v22 = vadd.f32 %v23591_v44, %v8039_v50  ;;  %v24229_v44 = vld [vmem:[#allocation12_spill] sm:$0xff]  ;;  %v10548_v6 = vld [vmem:[%s24048_s3 + $0x580] sm:$0xff] }
 0x70a   :  { %v10111_v34 = vmax.f32 %v8045_v58, 0.0  ;;  %v24242_v38 = vld [vmem:[#allocation54_spill] sm:$0xff]  ;;  %v24245_v50 = vld [vmem:[#allocation56_spill] sm:$0xff] }
 0x70b   :  { %v10110_v10 = vmax.f32 %v8040_v22, 0.0  ;;  %19171 = vmatprep.subr.bf16.mxu1 %v19170_v8  ;;  %v24244_v58 = vld [vmem:[#allocation26_spill] sm:$0xff]  ;;  %v24246_v8 = vld [vmem:[#allocation20_spill] sm:$0xff]  ;;  %v24247_v22 = vld [vmem:[#allocation57_spill] sm:$0xff] }
 0x70c   :  { %19173 = vmatpush3.bf16.msra.mxu1 %v23598_v40  ;;  %v10483_v40 = vld [vmem:[%s24048_s3 + $0x378] sm:$0xff] }
 0x70d   :  { %v19174_v53 = vpack.c.bf16 %v10111_v34, %v10110_v10  ;;  %v24248_v34 = vld [vmem:[#allocation43_spill] sm:$0xff]  ;;  %v24249_v10 = vld [vmem:[#allocation58_spill] sm:$0xff] }
 0x70f   :  { %19175 = vmatprep.subr.bf16.mxu1 %v19174_v53  ;;  %v24251_v53 = vld [vmem:[#allocation59_spill] sm:$0xff] }
 0x710   :  { %19177 = vmatpush3.bf16.msra.mxu1 %v23602_v3  ;;  %v24230_v3 = vld [vmem:[#allocation11_spill] sm:$0xff] }
 0x711   :  { %19179 = vmatprep.subr.bf16.mxu1 %v20789_v29  ;;  %v10482_v29 = vld [vmem:[%s24048_s3 + $0x370] sm:$0xff] }
 0x714   :  { %19181 = vmatpush3.bf16.msra.mxu1 %v23606_v14  ;;  %v10547_v14 = vld [vmem:[%s24048_s3 + $0x578] sm:$0xff] }
 0x715   :  { %19183 = vmatprep.subr.bf16.mxu1 %v20805_v30  ;;  %v24231_v30 = vld [vmem:[#allocation14_spill] sm:$0xff] }
 0x718   :  { %19185 = vmatpush3.bf16.msra.mxu1 %v23613_v28  ;;  %v24232_v28 = vld [vmem:[#allocation13_spill] sm:$0xff] }
 0x719   :  { %19187 = vmatprep.subr.bf16.mxu1 %v24229_v44  ;;  %v24252_v44 = vld [vmem:[#allocation50_spill] sm:$0xff] }
 0x71b   :  { %12648 = vmatmul.mubr.f32.vlgmr.msra.gmra.mrb[188].mxu1 %v10418_v15  ;;  %v10422_v15 = vld [vmem:[%s24048_s3 + $0x190] sm:$0xff] }
 0x71c   :  { %19189 = vmatpush3.bf16.msra.mxu1 %v24230_v3  ;;  %12652 = vmatprep.mubr.f32.mxu1 %v10483_v40  ;;  %v10487_v40 = vld [vmem:[%s24048_s3 + $0x398] sm:$0xff] }
 0x71d   :  { %19191 = vmatprep.subr.bf16.mxu1 %v24231_v30  ;;  %v24253_v3 = vld [vmem:[#allocation18_spill] sm:$0xff]  ;;  %v24254_v30 = vld [vmem:[#allocation31_spill] sm:$0xff] }
 0x71f   :  { %12653 = vmatmul.mubr.f32.gmra.mrb[190].mxu1 %v10482_v29  ;;  %v10486_v29 = vld [vmem:[%s24048_s3 + $0x390] sm:$0xff] }
 0x720   :  { %19193 = vmatpush3.bf16.msra.mxu1 %v24232_v28  ;;  %12657 = vmatprep.mubr.f32.mxu1 %v10547_v14  ;;  %v10551_v14 = vld [vmem:[%s24048_s3 + $0x598] sm:$0xff] }
 0x721   :  { %19195 = vmatprep.subr.bf16.mxu1 %v24233_v24  ;;  %v24255_v28 = vld [vmem:[#allocation29_spill] sm:$0xff] }
 0x722   :  { %v24256_v24 = vld [vmem:[#allocation33_spill] sm:$0xff] }
 0x723   :  { %12658 = vmatmul.mubr.f32.gmra.mrb[192].mxu1 %v10546_v32  ;;  %v10550_v32 = vld [vmem:[%s24048_s3 + $0x590] sm:$0xff] }
 0x724   :  { %19197 = vmatpush3.bf16.msra.mxu1 %v24234_v49  ;;  %12662 = vmatprep.mubr.f32.mxu1 %v10611_v0  ;;  %v10615_v0 = vld [vmem:[%s24048_s3 + $0x798] sm:$0xff]  ;;  %v24257_v49 = vld [vmem:[#allocation23_spill] sm:$0xff] }
 0x725   :  { %19199 = vmatprep.subr.bf16.mxu1 %v20976_v51 }
 0x727   :  { %12663 = vmatmul.mubr.f32.gmra.mrb[194].mxu1 %v10610_v46  ;;  %v10614_v46 = vld [vmem:[%s24048_s3 + $0x790] sm:$0xff] }
 0x728   :  { %19201 = vmatpush3.bf16.msra.mxu1 %v24235_v59  ;;  %12732 = vmatprep.mubr.f32.mxu1 %v10421_v39  ;;  %v24258_v39 = vld [vmem:[#allocation35_spill] sm:$0xff] }
 0x729   :  { %19203 = vmatprep.subr.bf16.mxu1 %v20993_v62  ;;  %v10425_v59 = vld [vmem:[%s24048_s3 + $0x1a8] sm:$0xff] }
 0x72c   :  { %19205 = vmatpush3.bf16.msra.mxu1 %v24236_v18  ;;  %v24259_v18 = vld [vmem:[#allocation24_spill] sm:$0xff] }
 0x72d   :  { %19207 = vmatprep.subr.bf16.mxu1 %v21013_v2 }
 0x72e   :  { %v16344_v37 = vpop.f32.mrb[164].mxu1 }
 0x72f   :  { %v16345_v56 = vpop.f32.mrb[165].mxu1 }
 0x730   :  { %v16346_v55 = vadd.f32 %v16345_v56, %v16344_v37  ;;  %19209 = vmatpush3.bf16.msra.mxu1 %v24237_v60  ;;  %v24260_v37 = vld [vmem:[#allocation34_spill] sm:$0xff]  ;;  %v24261_v56 = vld [vmem:[#allocation47_spill] sm:$0xff] }
 0x731   :  { %19211 = vmatprep.subr.bf16.mxu1 %v21029_v20  ;;  %v10420_v20 = vld [vmem:[%s24048_s3 + $0x180] sm:$0xff] }
 0x732   :  { %v23683_v51 = vadd.f32 %v16346_v55, %v23610_v33  ;;  %v16347_v4 = vpop.f32.mrb[166].mxu1  ;;  %v10485_v33 = vld [vmem:[%s24048_s3 + $0x388] sm:$0xff] }
 0x733   :  { %v16348_v45 = vpop.f32.mrb[167].mxu1  ;;  %v24262_v55 = vld [vmem:[#allocation36_spill] sm:$0xff] }
 0x734   :  { %v16349_v7 = vadd.f32 %v16348_v45, %v16347_v4  ;;  %19213 = vmatpush3.bf16.msra.mxu1 %v24238_v61  ;;  %v24264_v61 = vld [vmem:[#allocation38_spill] sm:$0xff] }
 0x735   :  { %19215 = vmatprep.subr.bf16.mxu1 %v21045_v35 }
 0x736   :  { %v23688_v62 = vadd.f32 %v16349_v7, %v23617_v13  ;;  %v16350_v2 = vpop.f32.mrb[168].mxu1  ;;  %v24263_v7 = vld [vmem:[#allocation28_spill] sm:$0xff] }
 0x737   :  { %v16351_v1 = vpop.f32.mrb[169].mxu1 }
 0x738   :  { %v16352_v11 = vadd.f32 %v16351_v1, %v16350_v2  ;;  %19217 = vmatpush3.bf16.msra.mxu1 %v24239_v17 }
 0x739   :  { %19219 = vmatprep.subr.bf16.mxu1 %v21167_v23  ;;  %v10549_v23 = vld [vmem:[%s24048_s3 + $0x588] sm:$0xff] }
 0x73a   :  { %v23699_v35 = vadd.f32 %v16352_v11, %v23622_v9  ;;  %v16353_v13 = vpop.f32.mrb[170].mxu1 }
 0x73b   :  { %v16354_v21 = vpop.f32.mrb[171].mxu1  ;;  %12733 = vmatmul.mubr.f32.vlgmr.msra.gmra.mrb[196].mxu1 %v10420_v20  ;;  %v24265_v20 = vld [vmem:[#allocation30_spill] sm:$0xff] }
 0x73c   :  { %v16355_v19 = vadd.f32 %v16354_v21, %v16353_v13  ;;  %19221 = vmatpush3.bf16.msra.mxu1 %v24240_v43  ;;  %12737 = vmatprep.mubr.f32.mxu1 %v10485_v33  ;;  %v24266_v33 = vld [vmem:[#allocation37_spill] sm:$0xff] }
 0x73d   :  { %19223 = vmatprep.subr.bf16.mxu1 %v21186_v52  ;;  %v10613_v52 = vld [vmem:[%s24048_s3 + $0x788] sm:$0xff] }
 0x73e   :  { %v23710_v9 = vadd.f32 %v16355_v19, %v23628_v57  ;;  %v10612_v57 = vld [vmem:[%s24048_s3 + $0x780] sm:$0xff] }
 0x73f   :  { %12738 = vmatmul.mubr.f32.gmra.mrb[198].mxu1 %v10484_v27  ;;  %v24267_v27 = vld [vmem:[#allocation32_spill] sm:$0xff] }
 0x740   :  { %19225 = vmatpush3.bf16.msra.mxu1 %v24241_v41  ;;  %12742 = vmatprep.mubr.f32.mxu1 %v10549_v23  ;;  %v24268_v23 = vld [vmem:[#allocation49_spill] sm:$0xff]  ;;  %v10489_v41 = vld [vmem:[%s24048_s3 + $0x3a8] sm:$0xff] }
 0x741   :  { %19227 = vmatprep.subr.bf16.mxu1 %v21200_v63  ;;  %v24243_v63 = vld [vmem:[#allocation55_spill] sm:$0xff] }
 0x743   :  { %12743 = vmatmul.mubr.f32.gmra.mrb[200].mxu1 %v10548_v6 }
 0x744   :  { %19229 = vmatpush3.bf16.msra.mxu1 %v24242_v38  ;;  %12747 = vmatprep.mubr.f32.mxu1 %v10613_v52 }
 0x745   :  { %19231 = vmatprep.subr.bf16.mxu1 %v21216_v36  ;;  %v24250_v36 = vld [vmem:[#allocation27_spill] sm:$0xff] }
 0x747   :  { %12748 = vmatmul.mubr.f32.gmra.mrb[202].mxu1 %v10612_v57  ;;  %v24269_v57 = vld [vmem:[#allocation39_spill] sm:$0xff] }
 0x748   :  { %19233 = vmatpush3.bf16.msra.mxu1 %v24243_v63  ;;  %12817 = vmatprep.mubr.f32.mxu1 %v10423_v31  ;;  %v10488_v31 = vld [vmem:[%s24048_s3 + $0x3a0] sm:$0xff] }
 0x749   :  { %19235 = vmatprep.subr.bf16.mxu1 %v24244_v58  ;;  %v24270_v63 = vld [vmem:[#allocation51_spill] sm:$0xff] }
 0x74a   :  { %v10553_v58 = vld [vmem:[%s24048_s3 + $0x5a8] sm:$0xff] }
 0x74c   :  { %19237 = vmatpush3.bf16.msra.mxu1 %v24245_v50  ;;  %v24271_v50 = vld [vmem:[#allocation40_spill] sm:$0xff] }
 0x74d   :  { %19239 = vmatprep.subr.bf16.mxu1 %v24246_v8  ;;  %v10552_v8 = vld [vmem:[%s24048_s3 + $0x5a0] sm:$0xff] }
 0x750   :  { %19241 = vmatpush3.bf16.msra.mxu1 %v24247_v22  ;;  %v24272_v22 = vld [vmem:[#allocation60_spill] sm:$0xff] }
 0x751   :  { %19243 = vmatprep.subr.bf16.mxu1 %v24248_v34  ;;  %v10617_v34 = vld [vmem:[%s24048_s3 + $0x7a8] sm:$0xff] }
 0x754   :  { %19245 = vmatpush3.bf16.msra.mxu1 %v24249_v10  ;;  %v24273_v10 = vld [vmem:[#allocation44_spill] sm:$0xff] }
 0x755   :  { %19247 = vmatprep.subr.bf16.mxu1 %v24250_v36  ;;  %v24274_v36 = vld [vmem:[#allocation61_spill] sm:$0xff] }
 0x758   :  { %19249 = vmatpush3.bf16.msra.mxu1 %v24251_v53  ;;  %v10427_v53 = vld [vmem:[%s24048_s3 + $0x1b8] sm:$0xff] }
 0x759   :  { %19251 = vmatprep.subr.bf16.mxu1 %v24252_v44  ;;  %v24276_v44 = vld [vmem:[#allocation62_spill] sm:$0xff] }
 0x75b   :  { %12818 = vmatmul.mubr.f32.vlgmr.msra.gmra.mrb[204].mxu1 %v10422_v15  ;;  %v24275_v15 = vld [vmem:[#allocation45_spill] sm:$0xff] }
 0x75c   :  { %19253 = vmatpush3.bf16.msra.mxu1 %v24253_v3  ;;  %12822 = vmatprep.mubr.f32.mxu1 %v10487_v40  ;;  %v24277_v40 = vld [vmem:[#allocation41_spill] sm:$0xff]  ;;  %v24278_v3 = vld [vmem:[#allocation63_spill] sm:$0xff] }
 0x75d   :  { %19255 = vmatprep.subr.bf16.mxu1 %v24254_v30  ;;  %v24280_v30 = vld [vmem:[#allocation64_spill] sm:$0xff] }
 0x75f   :  { %12823 = vmatmul.mubr.f32.gmra.mrb[206].mxu1 %v10486_v29  ;;  %v24279_v29 = vld [vmem:[#allocation46_spill] sm:$0xff] }
 0x760   :  { %19257 = vmatpush3.bf16.msra.mxu1 %v24255_v28  ;;  %12827 = vmatprep.mubr.f32.mxu1 %v10551_v14  ;;  %v24281_v14 = vld [vmem:[#allocation48_spill] sm:$0xff]  ;;  %v24282_v28 = vld [vmem:[#allocation65_spill] sm:$0xff] }
 0x761   :  { %19259 = vmatprep.subr.bf16.mxu1 %v24256_v24  ;;  %v10426_v24 = vld [vmem:[%s24048_s3 + $0x1b0] sm:$0xff] }
 0x763   :  { %12828 = vmatmul.mubr.f32.gmra.mrb[208].mxu1 %v10550_v32  ;;  %v24283_v32 = vld [vmem:[#allocation42_spill] sm:$0xff] }
 0x764   :  { %19261 = vmatpush3.bf16.msra.mxu1 %v24257_v49  ;;  %12832 = vmatprep.mubr.f32.mxu1 %v10615_v0  ;;  %v24284_v0 = vld [vmem:[#allocation74_spill] sm:$0xff] }
 0x765   :  { %19263 = vmatprep.subr.bf16.mxu1 %v24258_v39  ;;  %v10491_v49 = vld [vmem:[%s24048_s3 + $0x3b8] sm:$0xff]  ;;  %v10490_v39 = vld [vmem:[%s24048_s3 + $0x3b0] sm:$0xff] }
 0x767   :  { %12833 = vmatmul.mubr.f32.gmra.mrb[210].mxu1 %v10614_v46  ;;  %v24285_v46 = vld [vmem:[#allocation66_spill] sm:$0xff] }
 0x768   :  { %19265 = vmatpush3.bf16.msra.mxu1 %v24259_v18  ;;  %12902 = vmatprep.mubr.f32.mxu1 %v10425_v59  ;;  %v24286_v59 = vld [vmem:[#allocation75_spill] sm:$0xff]  ;;  %v10555_v18 = vld [vmem:[%s24048_s3 + $0x5b8] sm:$0xff] }
 0x769   :  { %19267 = vmatprep.subr.bf16.mxu1 %v24260_v37  ;;  %v24287_v37 = vld [vmem:[#allocation67_spill] sm:$0xff] }
 0x76c   :  { %19269 = vmatpush3.bf16.msra.mxu1 %v24261_v56  ;;  %v10554_v56 = vld [vmem:[%s24048_s3 + $0x5b0] sm:$0xff] }
 0x76d   :  { %19271 = vmatprep.subr.bf16.mxu1 %v24262_v55  ;;  %v24288_v55 = vld [vmem:[#allocation76_spill] sm:$0xff] }
 0x76e   :  { %v16388_v60 = vpop.f32.mrb[172].mxu1 }
 0x76f   :  { %v16389_v4 = vpop.f32.mrb[173].mxu1 }
 0x770   :  { %v16390_v45 = vadd.f32 %v16389_v4, %v16388_v60  ;;  %19273 = vmatpush3.bf16.msra.mxu1 %v24263_v7  ;;  %v10619_v60 = vld [vmem:[%s24048_s3 + $0x7b8] sm:$0xff]  ;;  %v24289_v4 = vld [vmem:[#allocation68_spill] sm:$0xff] }
 0x771   :  { %19275 = vmatprep.subr.bf16.mxu1 %v24264_v61  ;;  %v24290_v7 = vld [vmem:[#allocation77_spill] sm:$0xff]  ;;  %v10429_v61 = vld [vmem:[%s24048_s3 + $0x1c8] sm:$0xff] }
 0x772   :  { %v23775_v2 = vadd.f32 %v16390_v45, %v23683_v51  ;;  %v16391_v1 = vpop.f32.mrb[174].mxu1  ;;  %v10424_v51 = vld [vmem:[%s24048_s3 + $0x1a0] sm:$0xff]  ;;  %v10618_v45 = vld [vmem:[%s24048_s3 + $0x7b0] sm:$0xff] }
 0x773   :  { %v16392_v11 = vpop.f32.mrb[175].mxu1 }
 0x774   :  { %v16393_v17 = vadd.f32 %v16392_v11, %v16391_v1  ;;  %19277 = vmatpush3.bf16.msra.mxu1 %v24265_v20  ;;  %v24291_v1 = vld [vmem:[#allocation69_spill] sm:$0xff]  ;;  %v24292_v11 = vld [vmem:[#allocation78_spill] sm:$0xff]  ;;  %v24294_v20 = vld [vmem:[#allocation79_spill] sm:$0xff] }
 0x775   :  { %19279 = vmatprep.subr.bf16.mxu1 %v24266_v33 }
 0x776   :  { %v23780_v13 = vadd.f32 %v16393_v17, %v23688_v62  ;;  %v16394_v21 = vpop.f32.mrb[176].mxu1  ;;  %v24293_v17 = vld [vmem:[#allocation70_spill] sm:$0xff] }
 0x777   :  { %v16395_v19 = vpop.f32.mrb[177].mxu1 }
 0x778   :  { %v16396_v43 = vadd.f32 %v16395_v19, %v16394_v21  ;;  %19281 = vmatpush3.bf16.msra.mxu1 %v24267_v27  ;;  %v24296_v27 = vld [vmem:[#allocation80_spill] sm:$0xff] }
 0x779   :  { %19283 = vmatprep.subr.bf16.mxu1 %v24268_v23 }
 0x77a   :  { %v23791_v6 = vadd.f32 %v16396_v43, %v23699_v35  ;;  %v16397_v62 = vpop.f32.mrb[178].mxu1  ;;  %v24295_v43 = vld [vmem:[#allocation71_spill] sm:$0xff] }
 0x77b   :  { %v16398_v52 = vpop.f32.mrb[179].mxu1  ;;  %12903 = vmatmul.mubr.f32.vlgmr.msra.gmra.mrb[212].mxu1 %v10424_v51 }
 0x77c   :  { %v16399_v38 = vadd.f32 %v16398_v52, %v16397_v62  ;;  %19285 = vmatpush3.bf16.msra.mxu1 %v24269_v57  ;;  %12907 = vmatprep.mubr.f32.mxu1 %v10489_v41  ;;  %v24297_v52 = vld [vmem:[#allocation72_spill] sm:$0xff] }
 0x77d   :  { %19287 = vmatprep.subr.bf16.mxu1 %v24270_v63 }
 0x77e   :  { %v23802_v35 = vadd.f32 %v16399_v38, %v23710_v9  ;;  %v10616_v9 = vld [vmem:[%s24048_s3 + $0x7a0] sm:$0xff]  ;;  %v24298_v38 = vld [vmem:[#allocation81_spill] sm:$0xff] }
 0x77f   :  { %12908 = vmatmul.mubr.f32.gmra.mrb[214].mxu1 %v10488_v31 }
 0x780   :  { %19289 = vmatpush3.bf16.msra.mxu1 %v24271_v50  ;;  %12912 = vmatprep.mubr.f32.mxu1 %v10553_v58  ;;  %v24299_v50 = vld [vmem:[#allocation73_spill] sm:$0xff] }
 0x781   :  { %19291 = vmatprep.subr.bf16.mxu1 %v24272_v22  ;;  %v10493_v22 = vld [vmem:[%s24048_s3 + $0x3c8] sm:$0xff] }
 0x783   :  { %12913 = vmatmul.mubr.f32.gmra.mrb[216].mxu1 %v10552_v8  ;;  %v24300_v8 = vld [vmem:[#allocation90_spill] sm:$0xff] }
 0x784   :  { %19293 = vmatpush3.bf16.msra.mxu1 %v24273_v10  ;;  %12917 = vmatprep.mubr.f32.mxu1 %v10617_v34 }
 0x785   :  { %19295 = vmatprep.subr.bf16.mxu1 %v24274_v36  ;;  %v24301_v36 = vld [vmem:[#allocation82_spill] sm:$0xff] }
 0x787   :  { %12918 = vmatmul.mubr.f32.gmra.mrb[218].mxu1 %v10616_v9 }
 0x788   :  { %19297 = vmatpush3.bf16.msra.mxu1 %v24275_v15  ;;  %12987 = vmatprep.mubr.f32.mxu1 %v10427_v53  ;;  %v10492_v53 = vld [vmem:[%s24048_s3 + $0x3c0] sm:$0xff] }
 0x789   :  { %19299 = vmatprep.subr.bf16.mxu1 %v24276_v44  ;;  %v24302_v15 = vld [vmem:[#allocation91_spill] sm:$0xff] }
 0x78a   :  { %v10557_v44 = vld [vmem:[%s24048_s3 + $0x5c8] sm:$0xff] }
 0x78c   :  { %19301 = vmatpush3.bf16.msra.mxu1 %v24277_v40  ;;  %v24303_v40 = vld [vmem:[#allocation83_spill] sm:$0xff] }
 0x78d   :  { %19303 = vmatprep.subr.bf16.mxu1 %v24278_v3  ;;  %v10556_v3 = vld [vmem:[%s24048_s3 + $0x5c0] sm:$0xff] }
 0x790   :  { %19305 = vmatpush3.bf16.msra.mxu1 %v24279_v29  ;;  %v24304_v29 = vld [vmem:[#allocation92_spill] sm:$0xff] }
 0x791   :  { %19307 = vmatprep.subr.bf16.mxu1 %v24280_v30  ;;  %v10621_v30 = vld [vmem:[%s24048_s3 + $0x7c8] sm:$0xff] }
 0x794   :  { %19309 = vmatpush3.bf16.msra.mxu1 %v24281_v14  ;;  %v24305_v14 = vld [vmem:[#allocation84_spill] sm:$0xff] }
 0x795   :  { %19311 = vmatprep.subr.bf16.mxu1 %v24282_v28  ;;  %v24306_v28 = vld [vmem:[#allocation93_spill] sm:$0xff] }
 0x798   :  { %19313 = vmatpush3.bf16.msra.mxu1 %v24283_v32  ;;  %v10431_v32 = vld [vmem:[%s24048_s3 + $0x1d8] sm:$0xff] }
 0x799   :  { %19315 = vmatprep.subr.bf16.mxu1 %v24284_v0  ;;  %v24308_v0 = vld [vmem:[#allocation94_spill] sm:$0xff] }
 0x79b   :  { %12988 = vmatmul.mubr.f32.vlgmr.msra.gmra.mrb[220].mxu1 %v10426_v24  ;;  %v24307_v24 = vld [vmem:[#allocation85_spill] sm:$0xff] }
 0x79c   :  { %19317 = vmatpush3.bf16.msra.mxu1 %v24285_v46  ;;  %12992 = vmatprep.mubr.f32.mxu1 %v10491_v49  ;;  %v24309_v49 = vld [vmem:[#allocation86_spill] sm:$0xff]  ;;  %v24310_v46 = vld [vmem:[#allocation95_spill] sm:$0xff] }
 0x79d   :  { %19319 = vmatprep.subr.bf16.mxu1 %v24286_v59  ;;  %v24312_v59 = vld [vmem:[#allocation96_spill] sm:$0xff] }
 0x79f   :  { %12993 = vmatmul.mubr.f32.gmra.mrb[222].mxu1 %v10490_v39  ;;  %v24311_v39 = vld [vmem:[#allocation87_spill] sm:$0xff] }
 0x7a0   :  { %19321 = vmatpush3.bf16.msra.mxu1 %v24287_v37  ;;  %12997 = vmatprep.mubr.f32.mxu1 %v10555_v18  ;;  %v24313_v18 = vld [vmem:[#allocation88_spill] sm:$0xff]  ;;  %v24314_v37 = vld [vmem:[#allocation99_spill] sm:$0xff] }
 0x7a1   :  { %19323 = vmatprep.subr.bf16.mxu1 %v24288_v55  ;;  %v10430_v55 = vld [vmem:[%s24048_s3 + $0x1d0] sm:$0xff] }
 0x7a3   :  { %12998 = vmatmul.mubr.f32.gmra.mrb[224].mxu1 %v10554_v56  ;;  %v24315_v56 = vld [vmem:[#allocation89_spill] sm:$0xff] }
 0x7a4   :  { %19325 = vmatpush3.bf16.msra.mxu1 %v24289_v4  ;;  %13002 = vmatprep.mubr.f32.mxu1 %v10619_v60  ;;  %v10495_v60 = vld [vmem:[%s24048_s3 + $0x3d8] sm:$0xff] }
 0x7a5   :  { %19327 = vmatprep.subr.bf16.mxu1 %v24290_v7  ;;  %v24316_v4 = vld [vmem:[#allocation97_spill] sm:$0xff]  ;;  %v24317_v7 = vld [vmem:[#allocation114_spill] sm:$0xff] }
 0x7a7   :  { %13003 = vmatmul.mubr.f32.gmra.mrb[226].mxu1 %v10618_v45  ;;  %v10494_v45 = vld [vmem:[%s24048_s3 + $0x3d0] sm:$0xff] }
 0x7a8   :  { %19329 = vmatpush3.bf16.msra.mxu1 %v24291_v1  ;;  %13072 = vmatprep.mubr.f32.mxu1 %v10429_v61  ;;  %v10559_v61 = vld [vmem:[%s24048_s3 + $0x5d8] sm:$0xff]  ;;  %v10558_v1 = vld [vmem:[%s24048_s3 + $0x5d0] sm:$0xff] }
 0x7a9   :  { %19331 = vmatprep.subr.bf16.mxu1 %v24292_v11  ;;  %v24319_v11 = vld [vmem:[#allocation115_spill] sm:$0xff] }
 0x7ac   :  { %19333 = vmatpush3.bf16.msra.mxu1 %v24293_v17  ;;  %v10623_v17 = vld [vmem:[%s24048_s3 + $0x7d8] sm:$0xff] }
 0x7ad   :  { %19335 = vmatprep.subr.bf16.mxu1 %v24294_v20  ;;  %v24320_v20 = vld [vmem:[#allocation100_spill] sm:$0xff] }
 0x7ae   :  { %v16432_v33 = vpop.f32.mrb[180].mxu1 }
 0x7af   :  { %v16433_v21 = vpop.f32.mrb[181].mxu1 }
 0x7b0   :  { %v16434_v19 = vadd.f32 %v16433_v21, %v16432_v33  ;;  %19337 = vmatpush3.bf16.msra.mxu1 %v24295_v43  ;;  %v10622_v33 = vld [vmem:[%s24048_s3 + $0x7d0] sm:$0xff] }
 0x7b1   :  { %19339 = vmatprep.subr.bf16.mxu1 %v24296_v27  ;;  %v24321_v21 = vld [vmem:[#allocation116_spill] sm:$0xff]  ;;  %v24322_v43 = vld [vmem:[#allocation101_spill] sm:$0xff] }
 0x7b2   :  { %v23867_v51 = vadd.f32 %v16434_v19, %v23775_v2  ;;  %v16435_v23 = vpop.f32.mrb[182].mxu1  ;;  %v10428_v2 = vld [vmem:[%s24048_s3 + $0x1c0] sm:$0xff]  ;;  %v10433_v19 = vld [vmem:[%s24048_s3 + $0x1e8] sm:$0xff]  ;;  %v24323_v27 = vld [vmem:[#allocation117_spill] sm:$0xff] }
 0x7b3   :  { %v16436_v41 = vpop.f32.mrb[183].mxu1 }
 0x7b4   :  { %v16437_v62 = vadd.f32 %v16436_v41, %v16435_v23  ;;  %19341 = vmatpush3.bf16.msra.mxu1 %v24297_v52  ;;  %v24324_v23 = vld [vmem:[#allocation102_spill] sm:$0xff] }
 0x7b5   :  { %19343 = vmatprep.subr.bf16.mxu1 %v24298_v38  ;;  %v24325_v41 = vld [vmem:[#allocation118_spill] sm:$0xff] }
 0x7b6   :  { %v23872_v57 = vadd.f32 %v16437_v62, %v23780_v13  ;;  %v16438_v31 = vpop.f32.mrb[184].mxu1 }
 0x7b7   :  { %v16439_v63 = vpop.f32.mrb[185].mxu1 }
 0x7b8   :  { %v16440_v58 = vadd.f32 %v16439_v63, %v16438_v31  ;;  %19345 = vmatpush3.bf16.msra.mxu1 %v24299_v50  ;;  %v24326_v31 = vld [vmem:[#allocation103_spill] sm:$0xff] }
 0x7b9   :  { %19347 = vmatprep.subr.bf16.mxu1 %v24300_v8  ;;  %v24327_v63 = vld [vmem:[#allocation119_spill] sm:$0xff] }
 0x7ba   :  { %v23883_v34 = vadd.f32 %v16440_v58, %v23791_v6  ;;  %v16441_v13 = vpop.f32.mrb[186].mxu1 }
 0x7bb   :  { %v16442_v10 = vpop.f32.mrb[187].mxu1  ;;  %13073 = vmatmul.mubr.f32.vlgmr.msra.gmra.mrb[228].mxu1 %v10428_v2 }
 0x7bc   :  { %v16443_v9 = vadd.f32 %v16442_v10, %v16441_v13  ;;  %19349 = vmatpush3.bf16.msra.mxu1 %v24301_v36  ;;  %13077 = vmatprep.mubr.f32.mxu1 %v10493_v22  ;;  %v24328_v22 = vld [vmem:[#allocation104_spill] sm:$0xff] }
 0x7bd   :  { %19351 = vmatprep.subr.bf16.mxu1 %v24302_v15  ;;  %v24329_v13 = vld [vmem:[#allocation120_spill] sm:$0xff]  ;;  %v24330_v15 = vld [vmem:[#allocation105_spill] sm:$0xff] }
 0x7be   :  { %v23894_v6 = vadd.f32 %v16443_v9, %v23802_v35  ;;  %v10620_v35 = vld [vmem:[%s24048_s3 + $0x7c0] sm:$0xff] }
 0x7bf   :  { %13078 = vmatmul.mubr.f32.gmra.mrb[230].mxu1 %v10492_v53 }
 0x7c0   :  { %19353 = vmatpush3.bf16.msra.mxu1 %v24303_v40  ;;  %13082 = vmatprep.mubr.f32.mxu1 %v10557_v44  ;;  %v10432_v44 = vld [vmem:[%s24048_s3 + $0x1e0] sm:$0xff] }
 0x7c1   :  { %19355 = vmatprep.subr.bf16.mxu1 %v24304_v29 }
 0x7c3   :  { %13083 = vmatmul.mubr.f32.gmra.mrb[232].mxu1 %v10556_v3 }
 0x7c4   :  { %19357 = vmatpush3.bf16.msra.mxu1 %v24305_v14  ;;  %13087 = vmatprep.mubr.f32.mxu1 %v10621_v30  ;;  %v24331_v30 = vld [vmem:[#allocation106_spill] sm:$0xff] }
 0x7c5   :  { %19359 = vmatprep.subr.bf16.mxu1 %v24306_v28  ;;  %v10496_v14 = vld [vmem:[%s24048_s3 + $0x3e0] sm:$0xff] }
 0x7c6   :  { %v10560_v28 = vld [vmem:[%s24048_s3 + $0x5e0] sm:$0xff] }
 0x7c7   :  { %13088 = vmatmul.mubr.f32.gmra.mrb[234].mxu1 %v10620_v35 }
 0x7c8   :  { %19361 = vmatpush3.bf16.msra.mxu1 %v24307_v24  ;;  %13157 = vmatprep.mubr.f32.mxu1 %v10431_v32  ;;  %v24333_v32 = vld [vmem:[#allocation108_spill] sm:$0xff]  ;;  %v10435_v24 = vld [vmem:[%s24048_s3 + $0x1f8] sm:$0xff] }
 0x7c9   :  { %19363 = vmatprep.subr.bf16.mxu1 %v24308_v0  ;;  %v24335_v0 = vld [vmem:[#allocation110_spill] sm:$0xff] }
 0x7cc   :  { %19365 = vmatpush3.bf16.msra.mxu1 %v24309_v49 }
 0x7cd   :  { %19367 = vmatprep.subr.bf16.mxu1 %v24310_v46 }
 0x7d0   :  { %19369 = vmatpush3.bf16.msra.mxu1 %v24311_v39 }
 0x7d1   :  { %19371 = vmatprep.subr.bf16.mxu1 %v24312_v59  ;;  %v24336_v59 = vld [vmem:[#allocation111_spill] sm:$0xff] }
 0x7d4   :  { %19373 = vmatpush3.bf16.msra.mxu1 %v24313_v18 }
 0x7d5   :  { %19375 = vmatprep.subr.bf16.mxu1 %v24314_v37 }
 0x7d8   :  { %19377 = vmatpush3.bf16.msra.mxu1 %v24315_v56 }
 0x7d9   :  { %19379 = vmatprep.subr.bf16.mxu1 %v22246_v47  ;;  %v24318_v47 = vld [vmem:[#allocation98_spill] sm:$0xff] }
 0x7db   :  { %13158 = vmatmul.mubr.f32.vlgmr.msra.gmra.mrb[236].mxu1 %v10430_v55  ;;  %v24337_v55 = vld [vmem:[#allocation112_spill] sm:$0xff] }
 0x7dc   :  { %19381 = vmatpush3.bf16.msra.mxu1 %v24316_v4  ;;  %13162 = vmatprep.mubr.f32.mxu1 %v10495_v60 }
 0x7dd   :  { %19383 = vmatprep.subr.bf16.mxu1 %v24317_v7  ;;  %v10434_v7 = vld [vmem:[%s24048_s3 + $0x1f0] sm:$0xff] }
 0x7df   :  { %13163 = vmatmul.mubr.f32.gmra.mrb[238].mxu1 %v10494_v45 }
 0x7e0   :  { %19385 = vmatpush3.bf16.msra.mxu1 %v24318_v47  ;;  %13167 = vmatprep.mubr.f32.mxu1 %v10559_v61 }
 0x7e1   :  { %19387 = vmatprep.subr.bf16.mxu1 %v24319_v11 }
 0x7e3   :  { %13168 = vmatmul.mubr.f32.gmra.mrb[240].mxu1 %v10558_v1 }
 0x7e4   :  { %19389 = vmatpush3.bf16.msra.mxu1 %v24320_v20  ;;  %13172 = vmatprep.mubr.f32.mxu1 %v10623_v17  ;;  %v10563_v17 = vld [vmem:[%s24048_s3 + $0x5f8] sm:$0xff] }
 0x7e5   :  { %19391 = vmatprep.subr.bf16.mxu1 %v24321_v21  ;;  %v10627_v21 = vld [vmem:[%s24048_s3 + $0x7f8] sm:$0xff] }
 0x7e7   :  { %13173 = vmatmul.mubr.f32.gmra.mrb[242].mxu1 %v10622_v33  ;;  %v10562_v33 = vld [vmem:[%s24048_s3 + $0x5f0] sm:$0xff] }
 0x7e8   :  { %19393 = vmatpush3.bf16.msra.mxu1 %v24322_v43  ;;  %13242 = vmatprep.mubr.f32.mxu1 %v10433_v19  ;;  %v10626_v19 = vld [vmem:[%s24048_s3 + $0x7f0] sm:$0xff] }
 0x7e9   :  { %19395 = vmatprep.subr.bf16.mxu1 %v24323_v27 }
 0x7ec   :  { %19397 = vmatpush3.bf16.msra.mxu1 %v24324_v23 }
 0x7ed   :  { %19399 = vmatprep.subr.bf16.mxu1 %v24325_v41 }
 0x7ee   :  { %v16476_v62 = vpop.f32.mrb[188].mxu1 }
 0x7ef   :  { %v16477_v52 = vpop.f32.mrb[189].mxu1 }
 0x7f0   :  { %v16478_v38 = vadd.f32 %v16477_v52, %v16476_v62  ;;  %19401 = vmatpush3.bf16.msra.mxu1 %v24326_v31 }
 0x7f1   :  { %19403 = vmatprep.subr.bf16.mxu1 %v24327_v63 }
 0x7f2   :  { %v12650_v58 = vadd.f32 %v16478_v38, %v23867_v51  ;;  %v16479_v50 = vpop.f32.mrb[190].mxu1  ;;  %v10497_v51 = vld [vmem:[%s24048_s3 + $0x3e8] sm:$0xff] }
 0x7f3   :  { %v16480_v2 = vpop.f32.mrb[191].mxu1 }
 0x7f4   :  { %v16481_v8 = vadd.f32 %v16480_v2, %v16479_v50  ;;  %19405 = vmatpush3.bf16.msra.mxu1 %v24328_v22 }
 0x7f5   :  { %19407 = vmatprep.subr.bf16.mxu1 %v24329_v13 }
 0x7f6   :  { %v12655_v10 = vadd.f32 %v16481_v8, %v23872_v57  ;;  %v16482_v9 = vpop.f32.mrb[192].mxu1 }
 0x7f7   :  { %v16483_v36 = vpop.f32.mrb[193].mxu1 }
 0x7f8   :  { %v16484_v53 = vadd.f32 %v16483_v36, %v16482_v9  ;;  %19409 = vmatpush3.bf16.msra.mxu1 %v24330_v15 }
 0x7f9   :  { %19411 = vmatprep.subr.bf16.mxu1 %v22409_v16  ;;  %v10561_v16 = vld [vmem:[%s24048_s3 + $0x5e8] sm:$0xff] }
 0x7fa   :  { %v12660_v40 = vadd.f32 %v16484_v53, %v23883_v34  ;;  %v16485_v3 = vpop.f32.mrb[194].mxu1  ;;  %v24332_v34 = vld [vmem:[#allocation107_spill] sm:$0xff] }
 0x7fb   :  { %v16486_v29 = vpop.f32.mrb[195].mxu1  ;;  %13243 = vmatmul.mubr.f32.vlgmr.msra.gmra.mrb[244].mxu1 %v10432_v44 }
 0x7fc   :  { %v16487_v57 = vadd.f32 %v16486_v29, %v16485_v3  ;;  %19413 = vmatpush3.bf16.msra.mxu1 %v24331_v30  ;;  %13247 = vmatprep.mubr.f32.mxu1 %v10497_v51 }
 0x7fd   :  { %19415 = vmatprep.subr.bf16.mxu1 %v22424_v25  ;;  %v10625_v25 = vld [vmem:[%s24048_s3 + $0x7e8] sm:$0xff] }
 0x7fe   :  { %v12665_v35 = vadd.f32 %v16487_v57, %v23894_v6  ;;  %v10624_v6 = vld [vmem:[%s24048_s3 + $0x7e0] sm:$0xff] }
 0x7ff   :  { %13248 = vmatmul.mubr.f32.gmra.mrb[246].mxu1 %v10496_v14 }
 0x800   :  { %19417 = vmatpush3.bf16.msra.mxu1 %v24332_v34  ;;  %13252 = vmatprep.mubr.f32.mxu1 %v10561_v16 }
 0x801   :  { %19419 = vmatprep.subr.bf16.mxu1 %v22441_v5  ;;  %v24334_v5 = vld [vmem:[#allocation109_spill] sm:$0xff] }
 0x803   :  { %13253 = vmatmul.mubr.f32.gmra.mrb[248].mxu1 %v10560_v28 }
 0x804   :  { %19421 = vmatpush3.bf16.msra.mxu1 %v24333_v32  ;;  %13257 = vmatprep.mubr.f32.mxu1 %v10625_v25 }
 0x805   :  { %19423 = vmatprep.subr.bf16.mxu1 %v22455_v54 }
 0x807   :  { %13258 = vmatmul.mubr.f32.gmra.mrb[250].mxu1 %v10624_v6 }
 0x808   :  { %19425 = vmatpush3.bf16.msra.mxu1 %v24334_v5  ;;  %13327 = vmatprep.mubr.f32.mxu1 %v10435_v24 }
 0x809   :  { %19427 = vmatprep.subr.bf16.mxu1 %v22469_v26 }
 0x80c   :  { %19429 = vmatpush3.bf16.msra.mxu1 %v24335_v0 }
 0x80d   :  { %19431 = vmatprep.subr.bf16.mxu1 %v22483_v48  ;;  %v24338_v48 = vld [vmem:[#allocation113_spill] sm:$0xff] }
 0x80e   :  { %v16520_v49 = vpop.f32.mrb[196].mxu1 }
 0x80f   :  { %v16521_v46 = vpop.f32.mrb[197].mxu1 }
 0x810   :  { %v16522_v39 = vadd.f32 %v16521_v46, %v16520_v49  ;;  %19433 = vmatpush3.bf16.msra.mxu1 %v24336_v59 }
 0x811   :  { %19435 = vmatprep.subr.bf16.mxu1 %v22491_v42  ;;  %v10499_v42 = vld [vmem:[%s24048_s3 + $0x3f8] sm:$0xff] }
 0x812   :  { %v12735_v54 = vadd.f32 %v16522_v39, %v12650_v58  ;;  %v16523_v18 = vpop.f32.mrb[198].mxu1 }
 0x813   :  { %v16524_v37 = vpop.f32.mrb[199].mxu1 }
 0x814   :  { %v16525_v56 = vadd.f32 %v16524_v37, %v16523_v18  ;;  %19437 = vmatpush3.bf16.msra.mxu1 %v24337_v55 }
 0x815   :  { %19439 = vmatprep.subr.bf16.mxu1 %v22498_v12  ;;  %v10498_v12 = vld [vmem:[%s24048_s3 + $0x3f0] sm:$0xff]  ;;  %s19547_s3 = smov [#allocation7]  }
 0x816   :  { %v12740_v26 = vadd.f32 %v16525_v56, %v12655_v10  ;;  %v16526_v60 = vpop.f32.mrb[200].mxu1  ;;  %s13358_s11 = sshll.u32 %s19547_s3, 4  ;;  %s13359_s11 = int_to_ptr.vmem [resolvable:$true] %s13358_s11 }
 0x817   :  { %v16527_v4 = vpop.f32.mrb[201].mxu1  ;;  %s19515_s1 = scalar_lea.vmem %s13359_s11, 512  ;;  %p19520_p3 = scmp.lt.s32.totalorder %s13359_s11, %s13359_s11 }
 0x818   :  { %v16528_v45 = vadd.f32 %v16527_v4, %v16526_v60  ;;  %19441 = vmatpush3.bf16.msra.mxu1 %v24338_v48  ;;  %p19516_p2 = scmp.ne.s32.totalorder %s13359_s11, %s19515_s1  ;;  %p19521_p4 = scmp.lt.s32.totalorder %s19515_s1, %s19515_s1 }
 0x81a   :  { %v12745_v61 = vadd.f32 %v16528_v45, %v12660_v40  ;;  %v16529_v47 = vpop.f32.mrb[202].mxu1  ;;  %p19522_p5 = por %p19521_p4, %p19520_p3 }
 0x81b   :  { %v16530_v1 = vpop.f32.mrb[203].mxu1  ;;  %13328 = vmatmul.mubr.f32.vlgmr.msra.gmra.mrb[252].mxu1 %v10434_v7 }
 0x81c   :  { %v16531_v11 = vadd.f32 %v16530_v1, %v16529_v47  ;;  %13332 = vmatprep.mubr.f32.mxu1 %v10499_v42  ;;  %p19523_p6 = pnand %p19522_p5, %p19516_p2 }
 0x81e   :  { %v12750_v20 = vadd.f32 %v16531_v11, %v12665_v35 }
 0x81f   :  { %13333 = vmatmul.mubr.f32.gmra.mrb[254].mxu1 %v10498_v12 }
 0x820   :  { %13337 = vmatprep.mubr.f32.mxu1 %v10563_v17 }
 0x823   :  { %13338 = vmatmul.mubr.f32.gmra.mrb[0].mxu1 %v10562_v33 }
 0x824   :  { %13342 = vmatprep.mubr.f32.mxu1 %v10627_v21 }
 0x827   :  { %13343 = vmatmul.mubr.f32.gmra.mrb[2].mxu1 %v10626_v19 }
 0x82e   :  { %v16564_v43 = vpop.f32.mrb[204].mxu1 }
 0x82f   :  { %v16565_v27 = vpop.f32.mrb[205].mxu1 }
 0x830   :  { %v16566_v23 = vadd.f32 %v16565_v27, %v16564_v43 }
 0x832   :  { %v12820_v41 = vadd.f32 %v16566_v23, %v12735_v54  ;;  %v16567_v62 = vpop.f32.mrb[206].mxu1 }
 0x833   :  { %v16568_v52 = vpop.f32.mrb[207].mxu1 }
 0x834   :  { %v16569_v38 = vadd.f32 %v16568_v52, %v16567_v62 }
 0x836   :  { %v12825_v31 = vadd.f32 %v16569_v38, %v12740_v26  ;;  %v16570_v63 = vpop.f32.mrb[208].mxu1 }
 0x837   :  { %v16571_v58 = vpop.f32.mrb[209].mxu1 }
 0x838   :  { %v16572_v50 = vadd.f32 %v16571_v58, %v16570_v63 }
 0x83a   :  { %v12830_v2 = vadd.f32 %v16572_v50, %v12745_v61  ;;  %v16573_v8 = vpop.f32.mrb[210].mxu1 }
 0x83b   :  { %v16574_v22 = vpop.f32.mrb[211].mxu1 }
 0x83c   :  { %v16575_v13 = vadd.f32 %v16574_v22, %v16573_v8 }
 0x83e   :  { %v12835_v10 = vadd.f32 %v16575_v13, %v12750_v20 }
 0x84e   :  { %v16608_v9 = vpop.f32.mrb[212].mxu1 }
 0x84f   :  { %v16609_v36 = vpop.f32.mrb[213].mxu1 }
 0x850   :  { %v16610_v53 = vadd.f32 %v16609_v36, %v16608_v9 }
 0x852   :  { %v12905_v15 = vadd.f32 %v16610_v53, %v12820_v41  ;;  %v16611_v44 = vpop.f32.mrb[214].mxu1 }
 0x853   :  { %v16612_v51 = vpop.f32.mrb[215].mxu1 }
 0x854   :  { %v16613_v40 = vadd.f32 %v16612_v51, %v16611_v44 }
 0x856   :  { %v12910_v3 = vadd.f32 %v16613_v40, %v12825_v31  ;;  %v16614_v29 = vpop.f32.mrb[216].mxu1 }
 0x857   :  { %v16615_v57 = vpop.f32.mrb[217].mxu1 }
 0x858   :  { %v16616_v30 = vadd.f32 %v16615_v57, %v16614_v29 }
 0x85a   :  { %v12915_v14 = vadd.f32 %v16616_v30, %v12830_v2  ;;  %v16617_v16 = vpop.f32.mrb[218].mxu1 }
 0x85b   :  { %v16618_v35 = vpop.f32.mrb[219].mxu1 }
 0x85c   :  { %v16619_v34 = vadd.f32 %v16618_v35, %v16617_v16 }
 0x85e   :  { %v12920_v28 = vadd.f32 %v16619_v34, %v12835_v10 }
 0x86e   :  { %v16652_v25 = vpop.f32.mrb[220].mxu1 }
 0x86f   :  { %v16653_v32 = vpop.f32.mrb[221].mxu1 }
 0x870   :  { %v16654_v6 = vadd.f32 %v16653_v32, %v16652_v25 }
 0x872   :  { %v12990_v24 = vadd.f32 %v16654_v6, %v12905_v15  ;;  %v16655_v5 = vpop.f32.mrb[222].mxu1 }
 0x873   :  { %v16656_v0 = vpop.f32.mrb[223].mxu1 }
 0x874   :  { %v16657_v49 = vadd.f32 %v16656_v0, %v16655_v5 }
 0x876   :  { %v12995_v46 = vadd.f32 %v16657_v49, %v12910_v3  ;;  %v16658_v39 = vpop.f32.mrb[224].mxu1 }
 0x877   :  { %v16659_v59 = vpop.f32.mrb[225].mxu1 }
 0x878   :  { %v16660_v54 = vadd.f32 %v16659_v59, %v16658_v39 }
 0x87a   :  { %v13000_v18 = vadd.f32 %v16660_v54, %v12915_v14  ;;  %v16661_v37 = vpop.f32.mrb[226].mxu1 }
 0x87b   :  { %v16662_v56 = vpop.f32.mrb[227].mxu1 }
 0x87c   :  { %v16663_v55 = vadd.f32 %v16662_v56, %v16661_v37 }
 0x87e   :  { %v13005_v26 = vadd.f32 %v16663_v55, %v12920_v28 }
 0x88e   :  { %v16696_v60 = vpop.f32.mrb[228].mxu1 }
 0x88f   :  { %v16697_v4 = vpop.f32.mrb[229].mxu1 }
 0x890   :  { %v16698_v45 = vadd.f32 %v16697_v4, %v16696_v60 }
 0x892   :  { %v13075_v48 = vadd.f32 %v16698_v45, %v12990_v24  ;;  %v16699_v7 = vpop.f32.mrb[230].mxu1 }
 0x893   :  { %v16700_v42 = vpop.f32.mrb[231].mxu1 }
 0x894   :  { %v16701_v61 = vadd.f32 %v16700_v42, %v16699_v7 }
 0x896   :  { %v13080_v47 = vadd.f32 %v16701_v61, %v12995_v46  ;;  %v16702_v1 = vpop.f32.mrb[232].mxu1 }
 0x897   :  { %v16703_v11 = vpop.f32.mrb[233].mxu1 }
 0x898   :  { %v16704_v12 = vadd.f32 %v16703_v11, %v16702_v1 }
 0x89a   :  { %v13085_v17 = vadd.f32 %v16704_v12, %v13000_v18  ;;  %v16705_v20 = vpop.f32.mrb[234].mxu1 }
 0x89b   :  { %v16706_v33 = vpop.f32.mrb[235].mxu1 }
 0x89c   :  { %v16707_v21 = vadd.f32 %v16706_v33, %v16705_v20 }
 0x89e   :  { %v13090_v19 = vadd.f32 %v16707_v21, %v13005_v26 }
 0x8ae   :  { %v16740_v43 = vpop.f32.mrb[236].mxu1 }
 0x8af   :  { %v16741_v27 = vpop.f32.mrb[237].mxu1 }
 0x8b0   :  { %v16742_v23 = vadd.f32 %v16741_v27, %v16740_v43 }
 0x8b2   :  { %v13160_v41 = vadd.f32 %v16742_v23, %v13075_v48  ;;  %v16743_v62 = vpop.f32.mrb[238].mxu1 }
 0x8b3   :  { %v16744_v52 = vpop.f32.mrb[239].mxu1 }
 0x8b4   :  { %v16745_v38 = vadd.f32 %v16744_v52, %v16743_v62 }
 0x8b6   :  { %v13165_v31 = vadd.f32 %v16745_v38, %v13080_v47  ;;  %v16746_v63 = vpop.f32.mrb[240].mxu1 }
 0x8b7   :  { %v16747_v58 = vpop.f32.mrb[241].mxu1 }
 0x8b8   :  { %v16748_v50 = vadd.f32 %v16747_v58, %v16746_v63 }
 0x8ba   :  { %v13170_v2 = vadd.f32 %v16748_v50, %v13085_v17  ;;  %v16749_v8 = vpop.f32.mrb[242].mxu1 }
 0x8bb   :  { %v16750_v22 = vpop.f32.mrb[243].mxu1 }
 0x8bc   :  { %v16751_v13 = vadd.f32 %v16750_v22, %v16749_v8 }
 0x8be   :  { %v13175_v10 = vadd.f32 %v16751_v13, %v13090_v19 }
 0x8ce   :  { %v16784_v9 = vpop.f32.mrb[244].mxu1 }
 0x8cf   :  { %v16785_v36 = vpop.f32.mrb[245].mxu1 }
 0x8d0   :  { %v16786_v53 = vadd.f32 %v16785_v36, %v16784_v9 }
 0x8d2   :  { %v13245_v15 = vadd.f32 %v16786_v53, %v13160_v41  ;;  %v16787_v44 = vpop.f32.mrb[246].mxu1 }
 0x8d3   :  { %v16788_v51 = vpop.f32.mrb[247].mxu1 }
 0x8d4   :  { %v16789_v40 = vadd.f32 %v16788_v51, %v16787_v44 }
 0x8d6   :  { %v13250_v3 = vadd.f32 %v16789_v40, %v13165_v31  ;;  %v16790_v29 = vpop.f32.mrb[248].mxu1 }
 0x8d7   :  { %v16791_v57 = vpop.f32.mrb[249].mxu1 }
 0x8d8   :  { %v16792_v30 = vadd.f32 %v16791_v57, %v16790_v29 }
 0x8da   :  { %v13255_v14 = vadd.f32 %v16792_v30, %v13170_v2  ;;  %v16793_v16 = vpop.f32.mrb[250].mxu1 }
 0x8db   :  { %v16794_v35 = vpop.f32.mrb[251].mxu1 }
 0x8dc   :  { %v16795_v34 = vadd.f32 %v16794_v35, %v16793_v16 }
 0x8de   :  { %v13260_v28 = vadd.f32 %v16795_v34, %v13175_v10 }
 0x8ee   :  { %v16828_v25 = vpop.f32.mrb[252].mxu1 }
 0x8ef   :  { %v16829_v32 = vpop.f32.mrb[253].mxu1 }
 0x8f0   :  { %v16830_v6 = vadd.f32 %v16829_v32, %v16828_v25 }
 0x8f2   :  { %v13330_v24 = vadd.f32 %v16830_v6, %v13245_v15  ;;  %v16831_v5 = vpop.f32.mrb[254].mxu1 }
 0x8f3   :  { %v16832_v0 = vpop.f32.mrb[255].mxu1 }
 0x8f4   :  { %13349 = vst.msk [vmem:[#allocation7] sm:$0xff] %vm13348_vm2, %v13330_v24  ;;  %v16833_v49 = vadd.f32 %v16832_v0, %v16831_v5 }
 0x8f6   :  { %v13335_v46 = vadd.f32 %v16833_v49, %v13250_v3  ;;  %v16834_v39 = vpop.f32.mrb[0].mxu1 }
 0x8f7   :  { %v16835_v59 = vpop.f32.mrb[1].mxu1 }
 0x8f8   :  { %13350 = vst.msk [vmem:[#allocation7 + $0x8] sm:$0xff] %vm13348_vm2, %v13335_v46  ;;  %v16836_v54 = vadd.f32 %v16835_v59, %v16834_v39 }
 0x8fa   :  { %v13340_v18 = vadd.f32 %v16836_v54, %v13255_v14  ;;  %v16837_v37 = vpop.f32.mrb[2].mxu1 }
 0x8fb   :  { %v16838_v56 = vpop.f32.mrb[3].mxu1 }
 0x8fc   :  { %13351 = vst.msk [vmem:[#allocation7 + $0x10] sm:$0xff] %vm13348_vm2, %v13340_v18  ;;  %v16839_v55 = vadd.f32 %v16838_v56, %v16837_v37 }
 0x8fe   :  { %v13345_v26 = vadd.f32 %v16839_v55, %v13260_v28 }
 0x900   :  { %13352 = vst.msk [vmem:[#allocation7 + $0x18] sm:$0xff] %vm13348_vm2, %v13345_v26 }
 0x901   :  { %19526 = shalt.err (!%p19523_p6)
}
 0x902   :  { %s19527_s13 = scalar_lea.hbm %s24049_s4, 512 }
 0x903   :  { %p19528_p7 = scmp.ne.s32.totalorder %s24049_s4, %s19527_s13  ;;  %p19531_p8 = scmp.lt.u32.totalorder %s19527_s13, %s24049_s4 }
 0x905   :  { %p19533_p9 = pnand %p19531_p8, %p19528_p7 }
 0x907   :  { %19536 = shalt.err (!%p19533_p9)
}
 0x908   :  { %13364 = dma.vmem_to_hbm [thread:$0]  %s13359_s11, 512, %s24049_s4, [#allocation4], %s19544_s25, %s19544_s25, %s19545_s26  }
 0x909   :  { %19541 = dma.done.wait [#allocation4], 512  }
 0x90a   :  { %19542 = vsyncadd [#allocation4], 4294966784 }
 0x90b   :  { %13368 = vsyncpa [#allocation3], 1 }
 0x90c   :  { %13369 = vsyncpa [#allocation6], 1 }
 0x90d   :  { %13370 = vsyncpa [#allocation4], 1 }

</bundles_post_ra>
